<compile_context>
chip_gen: v7x
topology: tpu7x:2x2x1
jax: 0.10.0
libtpu: 0.0.40
codegen_flags: <defaults>
</compile_context>

<pallas_src>
import jax
import jax.numpy as jnp
from jax import lax
from jax.experimental import pallas as pl
from jax.experimental.pallas import tpu as pltpu


def _round_up(x, m):
    return ((x + m - 1) // m) * m


def _usblock_kernel(x1_ref, x2_ref, w_ref, b_ref, o_ref, pad_ref):
    """One batch element per grid step.

    x1_ref : (1, H,  W,  C1)      low-res feature map (2x nearest-upsampled here), bf16
    x2_ref : (1, 2H, 2W, C1)      skip connection, bf16
    w_ref  : (9*2*C1, Cout)       conv weight in im2col layout, bf16
    b_ref  : (1, Cout)            conv bias, f32
    o_ref  : (1, 2H, 2W, Cout)    output, f32
    pad_ref: (2H+2, 2W+2, 2*C1)   VMEM scratch: zero-padded concatenated input, bf16
    (C1 / Cout here are the lane-padded sizes.)
    """
    _, H, W, C1 = x1_ref.shape
    Ho, Wo = 2 * H, 2 * W
    Cin = 2 * C1
    Cout = o_ref.shape[-1]
    M = Ho * Wo
    bf16 = jnp.bfloat16

    # ---- zero only the 1-pixel halo border of the padded scratch ----------
    # (done every grid step so it stays correct when the 'parallel' batch
    #  axis is split across TensorCores; the interior is overwritten below)
    pad_ref[0:1, :, :] = jnp.zeros((1, Wo + 2, Cin), bf16)
    pad_ref[Ho + 1:Ho + 2, :, :] = jnp.zeros((1, Wo + 2, Cin), bf16)
    pad_ref[1:Ho + 1, 0:1, :] = jnp.zeros((Ho, 1, Cin), bf16)
    pad_ref[1:Ho + 1, Wo + 1:Wo + 2, :] = jnp.zeros((Ho, 1, Cin), bf16)

    # ---- nearest-neighbour 2x upsample of x1 (vectorized, no loops) --------
    x1 = x1_ref[0]                                                # (H, W, C1) bf16
    # duplicate along W: (H, W, 2, C1) -> (H, 2W, C1)  (lane dim unchanged)
    x1 = jnp.broadcast_to(x1[:, :, None, :], (H, W, 2, C1)).reshape(H, Wo, C1)
    # duplicate along H (leading dims only): (H, 2, 2W, C1) -> (2H, 2W, C1)
    x1 = jnp.broadcast_to(x1[:, None, :, :], (H, 2, Wo, C1)).reshape(Ho, Wo, C1)

    # ---- channel "concat": two separate lane-group stores (no concat temp) -
    pad_ref[1:Ho + 1, 1:Wo + 1, 0:C1] = x1
    pad_ref[1:Ho + 1, 1:Wo + 1, C1:Cin] = x2_ref[0]

    # ---- Conv2d(2*C1, Cout, 3, padding=1): 9 accumulating MXU matmuls ------
    # im2col row index = (dy*3 + dx)*Cin + c  ==  row index of w_ref
    acc = jnp.broadcast_to(b_ref[...], (M, Cout)).astype(jnp.float32)
    for dy in range(3):
        for dx in range(3):
            k0 = (dy * 3 + dx) * Cin
            tap = pad_ref[dy:dy + Ho, dx:dx + Wo, :].reshape(M, Cin)
            acc = acc + jnp.dot(tap, w_ref[k0:k0 + Cin, :],
                                preferred_element_type=jnp.float32)

    o_ref[0] = acc.reshape(Ho, Wo, Cout).astype(o_ref.dtype)


def usblock_forward(x1_nchw, x2_nchw, params):
    """USBlock forward. Inputs are NCHW, weight is PyTorch OIHW (Cout, 2*C1, 3, 3)."""
    w_oihw = params["w"]
    bias = params["b"]
    Cout = w_oihw.shape[0]
    C1 = x1_nchw.shape[1]
    assert w_oihw.shape[1] == 2 * C1, "conv expects 2*in_c input channels"

    # NHWC, bf16 at the wrapper (halves DMA bytes; MXU operands are bf16 anyway)
    x1 = jnp.transpose(x1_nchw, (0, 2, 3, 1)).astype(jnp.bfloat16)
    x2 = jnp.transpose(x2_nchw, (0, 2, 3, 1)).astype(jnp.bfloat16)
    N, H, W, _ = x1.shape
    Ho, Wo = 2 * H, 2 * W

    # pad channels to lane multiples (128) -> lane-dense stores / full MXU N
    C1p = _round_up(C1, 128)
    Coutp = _round_up(Cout, 128)
    Cinp = 2 * C1p
    if C1p != C1:
        x1 = jnp.pad(x1, ((0, 0), (0, 0), (0, 0), (0, C1p - C1)))
        x2 = jnp.pad(x2, ((0, 0), (0, 0), (0, 0), (0, C1p - C1)))

    # weight: OIHW -> HWIO, split the two channel groups into the padded
    # layout ([x1: 0..C1) | zeros | x2: C1p..C1p+C1) | zeros]), flatten im2col
    w_hwio = jnp.transpose(w_oihw, (2, 3, 1, 0)).astype(jnp.float32)  # (3,3,2*C1,Cout)
    w_p = jnp.zeros((3, 3, Cinp, Coutp), jnp.float32)
    w_p = w_p.at[:, :, :C1, :Cout].set(w_hwio[:, :, :C1, :])
    w_p = w_p.at[:, :, C1p:C1p + C1, :Cout].set(w_hwio[:, :, C1:, :])
    w_col = w_p.reshape(9 * Cinp, Coutp).astype(jnp.bfloat16)
    b_p = jnp.zeros((1, Coutp), jnp.float32).at[0, :Cout].set(
        bias.astype(jnp.float32))

    out = pl.pallas_call(
        _usblock_kernel,
        out_shape=jax.ShapeDtypeStruct((N, Ho, Wo, Coutp), jnp.float32),
        grid=(N,),
        in_specs=[
            pl.BlockSpec((1, H, W, C1p), lambda n: (n, 0, 0, 0)),
            pl.BlockSpec((1, Ho, Wo, C1p), lambda n: (n, 0, 0, 0)),
            pl.BlockSpec((9 * Cinp, Coutp), lambda n: (0, 0)),
            pl.BlockSpec((1, Coutp), lambda n: (0, 0)),
        ],
        out_specs=pl.BlockSpec((1, Ho, Wo, Coutp), lambda n: (n, 0, 0, 0)),
        scratch_shapes=[pltpu.VMEM((Ho + 2, Wo + 2, Cinp), jnp.bfloat16)],
        compiler_params=pltpu.CompilerParams(
            dimension_semantics=("parallel",),
            vmem_limit_bytes=32 * 1024 * 1024),
    )(x1, x2, w_col, b_p)

    out = out[..., :Cout]                           # drop lane padding
    return jnp.transpose(out, (0, 3, 1, 2))         # back to NCHW


def init_params(key, in_c, out_c):
    """Deterministic synthetic parameters, PyTorch OIHW layout."""
    k1, k2 = jax.random.split(key)
    cin = 2 * in_c
    s = 1.0 / (cin * 9) ** 0.5
    return dict(
        w=jax.random.uniform(k1, (out_c, cin, 3, 3), jnp.float32, -s, s),
        b=jax.random.uniform(k2, (out_c,), jnp.float32, -s, s),
    )


def ref_forward(x1_nchw, x2_nchw, params):
    """Pure-JAX/XLA reference; mirrors the kernel's mixed precision
    (bf16 operands feeding the MXU, f32 accumulation)."""
    w_hwio = jnp.transpose(params["w"], (2, 3, 1, 0))            # OIHW -> HWIO
    x1 = jnp.transpose(x1_nchw, (0, 2, 3, 1)).astype(jnp.bfloat16)
    x2 = jnp.transpose(x2_nchw, (0, 2, 3, 1)).astype(jnp.bfloat16)
    x1u = jnp.repeat(jnp.repeat(x1, 2, axis=1), 2, axis=2)       # nearest 2x
    xcat = jnp.concatenate([x1u, x2], axis=-1)
    y = lax.conv_general_dilated(
        xcat, w_hwio.astype(jnp.bfloat16),
        window_strides=(1, 1), padding="SAME",
        dimension_numbers=("NHWC", "HWIO", "NHWC"),
        preferred_element_type=jnp.float32)
    y = y + params["b"].reshape(1, 1, 1, -1).astype(jnp.float32)
    return jnp.transpose(y, (0, 3, 1, 2))


if __name__ == "__main__":
    key = jax.random.PRNGKey(0)
    k1, k2, kp = jax.random.split(key, 3)
    in_c, out_c = 4, 8
    x1 = jax.random.normal(k1, (2, in_c, 8, 8), jnp.float32)     # NCHW low-res
    x2 = jax.random.normal(k2, (2, in_c, 16, 16), jnp.float32)   # NCHW skip
    params = init_params(kp, in_c, out_c)

    out = jax.block_until_ready(usblock_forward(x1, x2, params))
    assert out.shape == (2, out_c, 16, 16)

    ref = jax.block_until_ready(ref_forward(x1, x2, params))
    if not jnp.allclose(out, ref, atol=2e-2, rtol=2e-2):
        err = float(jnp.max(jnp.abs(out - ref)))
        raise AssertionError(f"Pallas USBlock mismatch, max abs err = {err}")

    print("KERNEL_OK")
</pallas_src>

<mosaic_0001>
module attributes {stable_mosaic.version = 11 : i64} {
  func.func @_usblock_kernel(%arg0: i32, %arg1: memref<1x8x8x128xbf16, #tpu.memory_space<vmem>>, %arg2: memref<1x16x16x128xbf16, #tpu.memory_space<vmem>>, %arg3: memref<2304x128xbf16, #tpu.memory_space<vmem>>, %arg4: memref<1x128xf32, #tpu.memory_space<vmem>>, %arg5: memref<1x16x16x128xf32, #tpu.memory_space<vmem>>, %arg6: memref<18x18x256xbf16, #tpu.memory_space<vmem>>) attributes {dimension_semantics = [#tpu.dimension_semantics<parallel>], iteration_bounds = array<i64: 2>, scalar_prefetch = 0 : i64, scratch_operands = 1 : i64, tpu.core_type = #tpu.core_type<tc>, window_params = [{transform_indices = @transform_0, window_bounds = array<i64: 1, 8, 8, 128>}, {transform_indices = @transform_1, window_bounds = array<i64: 1, 16, 16, 128>}, {pipeline_mode = #tpu.pipeline_mode<synchronous>, transform_indices = @transform_2, window_bounds = array<i64: 2304, 128>}, {pipeline_mode = #tpu.pipeline_mode<synchronous>, transform_indices = @transform_3, window_bounds = array<i64: 1, 128>}, {transform_indices = @transform_4, window_bounds = array<i64: 1, 16, 16, 128>}]} {
    %cst = arith.constant 0.000000e+00 : bf16
    %0 = vector.broadcast %cst : bf16 to vector<1x18x256xbf16>
    %c0 = arith.constant 0 : index
    %c0_0 = arith.constant 0 : index
    %c0_1 = arith.constant 0 : index
    %1 = vector.load %arg6[%c0, %c0_0, %c0_1] : memref<18x18x256xbf16, #tpu.memory_space<vmem>>, vector<1x18x256xbf16>
    tpu.vector_store %arg6[%c0, %c0_0, %c0_1], %0 {strides = array<i32>} : memref<18x18x256xbf16, #tpu.memory_space<vmem>>, vector<1x18x256xbf16>,
    %cst_2 = arith.constant 0.000000e+00 : bf16
    %2 = vector.broadcast %cst_2 : bf16 to vector<1x18x256xbf16>
    %c17 = arith.constant 17 : index
    %c0_3 = arith.constant 0 : index
    %c0_4 = arith.constant 0 : index
    %3 = vector.load %arg6[%c17, %c0_3, %c0_4] : memref<18x18x256xbf16, #tpu.memory_space<vmem>>, vector<1x18x256xbf16>
    tpu.vector_store %arg6[%c17, %c0_3, %c0_4], %2 {strides = array<i32>} : memref<18x18x256xbf16, #tpu.memory_space<vmem>>, vector<1x18x256xbf16>,
    %cst_5 = arith.constant 0.000000e+00 : bf16
    %4 = vector.broadcast %cst_5 : bf16 to vector<16x1x256xbf16>
    %c1 = arith.constant 1 : index
    %c0_6 = arith.constant 0 : index
    %c0_7 = arith.constant 0 : index
    %5 = vector.load %arg6[%c1, %c0_6, %c0_7] : memref<18x18x256xbf16, #tpu.memory_space<vmem>>, vector<16x1x256xbf16>
    tpu.vector_store %arg6[%c1, %c0_6, %c0_7], %4 {strides = array<i32>} : memref<18x18x256xbf16, #tpu.memory_space<vmem>>, vector<16x1x256xbf16>,
    %cst_8 = arith.constant 0.000000e+00 : bf16
    %6 = vector.broadcast %cst_8 : bf16 to vector<16x1x256xbf16>
    %c1_9 = arith.constant 1 : index
    %c17_10 = arith.constant 17 : index
    %c0_11 = arith.constant 0 : index
    %7 = vector.load %arg6[%c1_9, %c17_10, %c0_11] : memref<18x18x256xbf16, #tpu.memory_space<vmem>>, vector<16x1x256xbf16>
    tpu.vector_store %arg6[%c1_9, %c17_10, %c0_11], %6 {strides = array<i32>} : memref<18x18x256xbf16, #tpu.memory_space<vmem>>, vector<16x1x256xbf16>,
    %c0_12 = arith.constant 0 : index
    %c0_13 = arith.constant 0 : index
    %c0_14 = arith.constant 0 : index
    %c0_15 = arith.constant 0 : index
    %8 = vector.load %arg1[%c0_12, %c0_13, %c0_14, %c0_15] : memref<1x8x8x128xbf16, #tpu.memory_space<vmem>>, vector<1x8x8x128xbf16>
    %9 = vector.shape_cast %8 : vector<1x8x8x128xbf16> to vector<8x8x128xbf16>
    %10 = vector.shape_cast %9 : vector<8x8x128xbf16> to vector<8x8x1x128xbf16>
    %11 = vector.shape_cast %10 : vector<8x8x1x128xbf16> to vector<8x8x1x128xbf16>
    %12 = vector.broadcast %11 : vector<8x8x1x128xbf16> to vector<8x8x2x128xbf16>
    %13 = vector.shape_cast %12 : vector<8x8x2x128xbf16> to vector<8x16x128xbf16>
    %14 = vector.shape_cast %13 : vector<8x16x128xbf16> to vector<8x1x16x128xbf16>
    %15 = vector.shape_cast %14 : vector<8x1x16x128xbf16> to vector<8x1x16x128xbf16>
    %16 = vector.broadcast %15 : vector<8x1x16x128xbf16> to vector<8x2x16x128xbf16>
    %17 = vector.shape_cast %16 : vector<8x2x16x128xbf16> to vector<16x16x128xbf16>
    %c1_16 = arith.constant 1 : index
    %c1_17 = arith.constant 1 : index
    %c0_18 = arith.constant 0 : index
    %18 = vector.load %arg6[%c1_16, %c1_17, %c0_18] : memref<18x18x256xbf16, #tpu.memory_space<vmem>>, vector<16x16x128xbf16>
    tpu.vector_store %arg6[%c1_16, %c1_17, %c0_18], %17 {strides = array<i32>} : memref<18x18x256xbf16, #tpu.memory_space<vmem>>, vector<16x16x128xbf16>,
    %c0_19 = arith.constant 0 : index
    %c0_20 = arith.constant 0 : index
    %c0_21 = arith.constant 0 : index
    %c0_22 = arith.constant 0 : index
    %19 = vector.load %arg2[%c0_19, %c0_20, %c0_21, %c0_22] : memref<1x16x16x128xbf16, #tpu.memory_space<vmem>>, vector<1x16x16x128xbf16>
    %20 = vector.shape_cast %19 : vector<1x16x16x128xbf16> to vector<16x16x128xbf16>
    %c1_23 = arith.constant 1 : index
    %c1_24 = arith.constant 1 : index
    %c128 = arith.constant 128 : index
    %21 = vector.load %arg6[%c1_23, %c1_24, %c128] : memref<18x18x256xbf16, #tpu.memory_space<vmem>>, vector<16x16x128xbf16>
    tpu.vector_store %arg6[%c1_23, %c1_24, %c128], %20 {strides = array<i32>} : memref<18x18x256xbf16, #tpu.memory_space<vmem>>, vector<16x16x128xbf16>,
    %c0_25 = arith.constant 0 : index
    %c0_26 = arith.constant 0 : index
    %22 = vector.load %arg4[%c0_25, %c0_26] : memref<1x128xf32, #tpu.memory_space<vmem>>, vector<1x128xf32>
    %23 = vector.shape_cast %22 : vector<1x128xf32> to vector<1x128xf32>
    %24 = vector.broadcast %23 : vector<1x128xf32> to vector<256x128xf32>
    %c0_27 = arith.constant 0 : index
    %c0_28 = arith.constant 0 : index
    %c0_29 = arith.constant 0 : index
    %25 = vector.load %arg6[%c0_27, %c0_28, %c0_29] : memref<18x18x256xbf16, #tpu.memory_space<vmem>>, vector<16x16x256xbf16>
    %26 = vector.shape_cast %25 : vector<16x16x256xbf16> to vector<256x256xbf16>
    %c0_30 = arith.constant 0 : index
    %c0_31 = arith.constant 0 : index
    %27 = vector.load %arg3[%c0_30, %c0_31] : memref<2304x128xbf16, #tpu.memory_space<vmem>>, vector<256x128xbf16>
    %cst_32 = arith.constant dense<0.000000e+00> : vector<256x128xf32>
    %28 = tpu.matmul %26, %27, %cst_32 {dimension_numbers = #tpu.dot_dimension_numbers<[1], [0], [0], [1], [0, 0, 1, 1], [], []>} : vector<256x256xbf16>, vector<256x128xbf16>, vector<256x128xf32> -> vector<256x128xf32>
    %29 = arith.addf %24, %28 : vector<256x128xf32>
    %c0_33 = arith.constant 0 : index
    %c1_34 = arith.constant 1 : index
    %c0_35 = arith.constant 0 : index
    %30 = vector.load %arg6[%c0_33, %c1_34, %c0_35] : memref<18x18x256xbf16, #tpu.memory_space<vmem>>, vector<16x16x256xbf16>
    %31 = vector.shape_cast %30 : vector<16x16x256xbf16> to vector<256x256xbf16>
    %c256 = arith.constant 256 : index
    %c0_36 = arith.constant 0 : index
    %32 = vector.load %arg3[%c256, %c0_36] : memref<2304x128xbf16, #tpu.memory_space<vmem>>, vector<256x128xbf16>
    %cst_37 = arith.constant dense<0.000000e+00> : vector<256x128xf32>
    %33 = tpu.matmul %31, %32, %cst_37 {dimension_numbers = #tpu.dot_dimension_numbers<[1], [0], [0], [1], [0, 0, 1, 1], [], []>} : vector<256x256xbf16>, vector<256x128xbf16>, vector<256x128xf32> -> vector<256x128xf32>
    %34 = arith.addf %29, %33 : vector<256x128xf32>
    %c0_38 = arith.constant 0 : index
    %c2 = arith.constant 2 : index
    %c0_39 = arith.constant 0 : index
    %35 = vector.load %arg6[%c0_38, %c2, %c0_39] : memref<18x18x256xbf16, #tpu.memory_space<vmem>>, vector<16x16x256xbf16>
    %36 = vector.shape_cast %35 : vector<16x16x256xbf16> to vector<256x256xbf16>
    %c512 = arith.constant 512 : index
    %c0_40 = arith.constant 0 : index
    %37 = vector.load %arg3[%c512, %c0_40] : memref<2304x128xbf16, #tpu.memory_space<vmem>>, vector<256x128xbf16>
    %cst_41 = arith.constant dense<0.000000e+00> : vector<256x128xf32>
    %38 = tpu.matmul %36, %37, %cst_41 {dimension_numbers = #tpu.dot_dimension_numbers<[1], [0], [0], [1], [0, 0, 1, 1], [], []>} : vector<256x256xbf16>, vector<256x128xbf16>, vector<256x128xf32> -> vector<256x128xf32>
    %39 = arith.addf %34, %38 : vector<256x128xf32>
    %c1_42 = arith.constant 1 : index
    %c0_43 = arith.constant 0 : index
    %c0_44 = arith.constant 0 : index
    %40 = vector.load %arg6[%c1_42, %c0_43, %c0_44] : memref<18x18x256xbf16, #tpu.memory_space<vmem>>, vector<16x16x256xbf16>
    %41 = vector.shape_cast %40 : vector<16x16x256xbf16> to vector<256x256xbf16>
    %c768 = arith.constant 768 : index
    %c0_45 = arith.constant 0 : index
    %42 = vector.load %arg3[%c768, %c0_45] : memref<2304x128xbf16, #tpu.memory_space<vmem>>, vector<256x128xbf16>
    %cst_46 = arith.constant dense<0.000000e+00> : vector<256x128xf32>
    %43 = tpu.matmul %41, %42, %cst_46 {dimension_numbers = #tpu.dot_dimension_numbers<[1], [0], [0], [1], [0, 0, 1, 1], [], []>} : vector<256x256xbf16>, vector<256x128xbf16>, vector<256x128xf32> -> vector<256x128xf32>
    %44 = arith.addf %39, %43 : vector<256x128xf32>
    %c1_47 = arith.constant 1 : index
    %c1_48 = arith.constant 1 : index
    %c0_49 = arith.constant 0 : index
    %45 = vector.load %arg6[%c1_47, %c1_48, %c0_49] : memref<18x18x256xbf16, #tpu.memory_space<vmem>>, vector<16x16x256xbf16>
    %46 = vector.shape_cast %45 : vector<16x16x256xbf16> to vector<256x256xbf16>
    %c1024 = arith.constant 1024 : index
    %c0_50 = arith.constant 0 : index
    %47 = vector.load %arg3[%c1024, %c0_50] : memref<2304x128xbf16, #tpu.memory_space<vmem>>, vector<256x128xbf16>
    %cst_51 = arith.constant dense<0.000000e+00> : vector<256x128xf32>
    %48 = tpu.matmul %46, %47, %cst_51 {dimension_numbers = #tpu.dot_dimension_numbers<[1], [0], [0], [1], [0, 0, 1, 1], [], []>} : vector<256x256xbf16>, vector<256x128xbf16>, vector<256x128xf32> -> vector<256x128xf32>
    %49 = arith.addf %44, %48 : vector<256x128xf32>
    %c1_52 = arith.constant 1 : index
    %c2_53 = arith.constant 2 : index
    %c0_54 = arith.constant 0 : index
    %50 = vector.load %arg6[%c1_52, %c2_53, %c0_54] : memref<18x18x256xbf16, #tpu.memory_space<vmem>>, vector<16x16x256xbf16>
    %51 = vector.shape_cast %50 : vector<16x16x256xbf16> to vector<256x256xbf16>
    %c1280 = arith.constant 1280 : index
    %c0_55 = arith.constant 0 : index
    %52 = vector.load %arg3[%c1280, %c0_55] : memref<2304x128xbf16, #tpu.memory_space<vmem>>, vector<256x128xbf16>
    %cst_56 = arith.constant dense<0.000000e+00> : vector<256x128xf32>
    %53 = tpu.matmul %51, %52, %cst_56 {dimension_numbers = #tpu.dot_dimension_numbers<[1], [0], [0], [1], [0, 0, 1, 1], [], []>} : vector<256x256xbf16>, vector<256x128xbf16>, vector<256x128xf32> -> vector<256x128xf32>
    %54 = arith.addf %49, %53 : vector<256x128xf32>
    %c2_57 = arith.constant 2 : index
    %c0_58 = arith.constant 0 : index
    %c0_59 = arith.constant 0 : index
    %55 = vector.load %arg6[%c2_57, %c0_58, %c0_59] : memref<18x18x256xbf16, #tpu.memory_space<vmem>>, vector<16x16x256xbf16>
    %56 = vector.shape_cast %55 : vector<16x16x256xbf16> to vector<256x256xbf16>
    %c1536 = arith.constant 1536 : index
    %c0_60 = arith.constant 0 : index
    %57 = vector.load %arg3[%c1536, %c0_60] : memref<2304x128xbf16, #tpu.memory_space<vmem>>, vector<256x128xbf16>
    %cst_61 = arith.constant dense<0.000000e+00> : vector<256x128xf32>
    %58 = tpu.matmul %56, %57, %cst_61 {dimension_numbers = #tpu.dot_dimension_numbers<[1], [0], [0], [1], [0, 0, 1, 1], [], []>} : vector<256x256xbf16>, vector<256x128xbf16>, vector<256x128xf32> -> vector<256x128xf32>
    %59 = arith.addf %54, %58 : vector<256x128xf32>
    %c2_62 = arith.constant 2 : index
    %c1_63 = arith.constant 1 : index
    %c0_64 = arith.constant 0 : index
    %60 = vector.load %arg6[%c2_62, %c1_63, %c0_64] : memref<18x18x256xbf16, #tpu.memory_space<vmem>>, vector<16x16x256xbf16>
    %61 = vector.shape_cast %60 : vector<16x16x256xbf16> to vector<256x256xbf16>
    %c1792 = arith.constant 1792 : index
    %c0_65 = arith.constant 0 : index
    %62 = vector.load %arg3[%c1792, %c0_65] : memref<2304x128xbf16, #tpu.memory_space<vmem>>, vector<256x128xbf16>
    %cst_66 = arith.constant dense<0.000000e+00> : vector<256x128xf32>
    %63 = tpu.matmul %61, %62, %cst_66 {dimension_numbers = #tpu.dot_dimension_numbers<[1], [0], [0], [1], [0, 0, 1, 1], [], []>} : vector<256x256xbf16>, vector<256x128xbf16>, vector<256x128xf32> -> vector<256x128xf32>
    %64 = arith.addf %59, %63 : vector<256x128xf32>
    %c2_67 = arith.constant 2 : index
    %c2_68 = arith.constant 2 : index
    %c0_69 = arith.constant 0 : index
    %65 = vector.load %arg6[%c2_67, %c2_68, %c0_69] : memref<18x18x256xbf16, #tpu.memory_space<vmem>>, vector<16x16x256xbf16>
    %66 = vector.shape_cast %65 : vector<16x16x256xbf16> to vector<256x256xbf16>
    %c2048 = arith.constant 2048 : index
    %c0_70 = arith.constant 0 : index
    %67 = vector.load %arg3[%c2048, %c0_70] : memref<2304x128xbf16, #tpu.memory_space<vmem>>, vector<256x128xbf16>
    %cst_71 = arith.constant dense<0.000000e+00> : vector<256x128xf32>
    %68 = tpu.matmul %66, %67, %cst_71 {dimension_numbers = #tpu.dot_dimension_numbers<[1], [0], [0], [1], [0, 0, 1, 1], [], []>} : vector<256x256xbf16>, vector<256x128xbf16>, vector<256x128xf32> -> vector<256x128xf32>
    %69 = arith.addf %64, %68 : vector<256x128xf32>
    %70 = vector.shape_cast %69 : vector<256x128xf32> to vector<16x16x128xf32>
    %c0_72 = arith.constant 0 : index
    %c0_73 = arith.constant 0 : index
    %c0_74 = arith.constant 0 : index
    %c0_75 = arith.constant 0 : index
    %71 = vector.load %arg5[%c0_72, %c0_73, %c0_74, %c0_75] : memref<1x16x16x128xf32, #tpu.memory_space<vmem>>, vector<1x16x16x128xf32>
    %72 = vector.shape_cast %71 : vector<1x16x16x128xf32> to vector<16x16x128xf32>
    %73 = vector.shape_cast %70 : vector<16x16x128xf32> to vector<1x16x16x128xf32>
    tpu.vector_store %arg5[%c0_72, %c0_73, %c0_74, %c0_75], %73 {strides = array<i32>} : memref<1x16x16x128xf32, #tpu.memory_space<vmem>>, vector<1x16x16x128xf32>,
    return
  }
  func.func @transform_0(%arg0: i32) -> (i32, i32, i32, i32) {
    %c0_i32 = arith.constant 0 : i32
    %c0_i32_0 = arith.constant 0 : i32
    %c0_i32_1 = arith.constant 0 : i32
    %c0_i32_2 = arith.constant 0 : i32
    return %arg0, %c0_i32, %c0_i32_0, %c0_i32_1 : i32, i32, i32, i32
  }
  func.func @transform_1(%arg0: i32) -> (i32, i32, i32, i32) {
    %c0_i32 = arith.constant 0 : i32
    %c0_i32_0 = arith.constant 0 : i32
    %c0_i32_1 = arith.constant 0 : i32
    %c0_i32_2 = arith.constant 0 : i32
    return %arg0, %c0_i32, %c0_i32_0, %c0_i32_1 : i32, i32, i32, i32
  }
  func.func @transform_2(%arg0: i32) -> (i32, i32) {
    %c0_i32 = arith.constant 0 : i32
    %c0_i32_0 = arith.constant 0 : i32
    %c0_i32_1 = arith.constant 0 : i32
    return %c0_i32, %c0_i32_0 : i32, i32
  }
  func.func @transform_3(%arg0: i32) -> (i32, i32) {
    %c0_i32 = arith.constant 0 : i32
    %c0_i32_0 = arith.constant 0 : i32
    %c0_i32_1 = arith.constant 0 : i32
    return %c0_i32, %c0_i32_0 : i32, i32
  }
  func.func @transform_4(%arg0: i32) -> (i32, i32, i32, i32) {
    %c0_i32 = arith.constant 0 : i32
    %c0_i32_0 = arith.constant 0 : i32
    %c0_i32_1 = arith.constant 0 : i32
    %c0_i32_2 = arith.constant 0 : i32
    return %arg0, %c0_i32, %c0_i32_0, %c0_i32_1 : i32, i32, i32, i32
  }
}

</mosaic_0001>

<bundles_post_ra>
// kernel: tpu_custom_call.1
= control target key start
LH: loop header
LB: loop body
LE: loop exit
PB: predicated region body
PF: predicated region fallthrough
CT: control target
= control target key end

     0   :  { %s14262_s0 = inlined_call_operand.hbm [shape: bf16[2,8,8,128], index: 0, kind: input, shape index: {}]   ;;  %s14263_s1 = inlined_call_operand.hbm [shape: bf16[2,16,16,128], index: 1, kind: input, shape index: {}]   ;;  %s14264_s2 = inlined_call_operand.hbm [shape: bf16[2304,128], index: 2, kind: input, shape index: {}]   ;;  %s14265_s3 = inlined_call_operand.vmem [shape: f32[1,128], index: 3, kind: input, shape index: {}]   ;;  %s14266_s4 = inlined_call_operand.hbm [shape: f32[2,16,16,128], index: 4, kind: output, shape index: {}]  }
   0x1   :  { %14273 = sst [smem:[#allocation33_spill]] %s14262_s0 }
   0x2   :  { %14274 = sst [smem:[#allocation34_spill]] %s14264_s2 }
   0x3   :  { %9 = vsyncpa [#allocation4], 0 }
   0x4   :  { %11 = vsyncpa [#allocation4 + $0x1], 0 }
   0x5   :  { %12 = vsyncpa [#allocation7], 0 }
   0x6   :  { %14 = vsyncpa [#allocation7 + $0x1], 0 }
   0x7   :  { %15 = vsyncpa [#allocation5], 0 }
   0x8   :  { %17 = vsyncpa [#allocation5 + $0x1], 0  ;;  %s10971_s15 = smov 0   ;;  %s10973_s16 = smov 0  }
   0x9   :  { %s10975_s17 = smov 0   ;;  %s10977_s18 = smov 0  }
   0xa LB: > { %s10992_s19 = sadd.s32 4294967295, %s10933_s18   ;;  %s8837_s20 = sadd.s32 4294967294, %s10933_s18   ;;  %s10933_s18 = sphi %s10977_s18, %s14428_s18   ;;  %s10929_s17 = sphi %s10975_s17, %s14427_s17   ;;  %s10925_s16 = sphi %s10973_s16, %s14426_s16   ;;  %s10921_s15 = sphi %s10971_s15, %s14425_s15  }
   0xb   : > { %p43_p0 = scmp.ne.s32.totalorder %s10925_s16, %s10921_s15  ;;  %p14267_p1 = scmp.eq.s32.totalorder %s10992_s19, 0 }
   0xc   : > { %p141_p3 = scmp.eq.s32.totalorder %s8837_s20, 1  ;;  %p8838_p5 = scmp.ge.s32.totalorder %s10933_s18, 1 }
   0xd   : > { %p11001_p4 = por %p14267_p1, %p43_p0  ;;  %p148_p7 = scmp.lt.s32.totalorder %s10933_s18, 3 }
   0xe   : > { %p11006_p6 = por %p141_p3, %p43_p0  ;;  %s10935_s24 = smov [#allocation8]  }
   0xf   : > { %s14275_s21 = scalar_select %p11001_p4, 1, 0 }
  0x10   : > { %s14276_s22 = scalar_select %p11006_p6, 1, 0 }
  0x11   : > { %p11011_p8 = pnand %p8838_p5, %p148_p7  ;;  %s160_s25 = sshll.u32 %s10935_s24, 4  ;;  %s11015_s25 = int_to_ptr.vmem [resolvable:$true] %s160_s25 }
  0x12   : > { %s11027_s27 = sadd.s32 1, %s10933_s18   ;;  %s30_s28 = sadd.s32 1, %s10929_s17 }
  0x13   : > { %s14277_s23 = scalar_select %p11011_p8, 1, 0 }
  0x14   : > { %p10415_p9 = pneg %p11011_p8  ;;  %s27_s29 = ssub.s32 %s10933_s18, %s11027_s27 }
  0x15   : > { %s14279_s2 = sld [smem:[#allocation34_spill]] }
  0x16   : > { %p11022_p11 = pnand %p10415_p9, %p14267_p1 }
  0x18   : > { %p10773_p13 = pneg %p11022_p11 }
  0x1b   : > { %s10771_s6 = scalar_lea.hbm %s14279_s2, 18432 }
  0x1c   : > { %p10772_p12 = scmp.ne.s32.totalorder %s14279_s2, %s10771_s6  ;;  %p10778_p5 = scmp.lt.u32.totalorder %s10771_s6, %s14279_s2 }
  0x1e   : > { %p10774_p0 = pnand %p10773_p13, %p10772_p12 }
  0x20   : > { %p10775_p3 = pneg %p10774_p0 }
  0x22   : > { %p10780_p7 = pnand %p10778_p5, %p10775_p3 }
  0x24   : > { %10783 = shalt.err (!%p10780_p7)
}
  0x25   : > { %s10784_s11 = scalar_lea.vmem %s11015_s25, 18432  ;;  %p10792_p2 = scmp.lt.s32.totalorder %s11015_s25, %s11015_s25 }
  0x26   : > { %p10785_p9 = scmp.ne.s32.totalorder %s11015_s25, %s10784_s11  ;;  %p10793_p6 = scmp.lt.s32.totalorder %s10784_s11, %s10784_s11 }
  0x28   : > { %p10787_p10 = pnand %p10785_p9, %p10773_p13  ;;  %p10794_p4 = por %p10793_p6, %p10792_p2 }
  0x2a   : > { %p10788_p1 = pneg %p10787_p10 }
  0x2c   : > { %p10795_p8 = pnand %p10794_p4, %p10788_p1 }
  0x2e   : > { %10798 = shalt.err (!%p10795_p8)
}
  0x2f   : > { %s10936_s12 = smov 64   ;;  %s10937_s13 = smov 4  }
  0x30   : > { %10418 = dma.hbm_to_vmem [thread:$0]  (!%p11022_p11), %s14279_s2, 18432, %s11015_s25, [#allocation7], %s10936_s12, %s10936_s12, %s10937_s13  }
  0x31   : > { %p28_p1 = scmp.eq.s32.totalorder %s27_s29, 0  ;;  %p37_p2 = scmp.ne.s32.totalorder %s10929_s17, %s10925_s16 }
  0x32   : > { %p38_p4 = scmp.eq.s32.totalorder %s10933_s18, 0  ;;  %p10431_p6 = scmp.lt.s32.totalorder %s10933_s18, 2 }
  0x33   : > { %s11061_s24 = scalar_select %p28_p1, %s10929_s17, %s30_s28  }
  0x34   : > { %p39_p8 = por %p38_p4, %p37_p2  ;;  %p14280_p10 = scmp.eq.s32.totalorder %s10992_s19, 1 }
  0x35   : > { %s11070_s26 = sand.u32 1, %s10929_s17   ;;  %s9378_s5 = sshll.u32 %s10933_s18, 9 }
  0x36   : > { %p11065_p12 = por %p14280_p10, %p37_p2  ;;  %s8841_s6 = sshll.u32 %s11070_s26, 5 }
  0x37   : > { %s14282_s0 = sld [smem:[#allocation33_spill]]  ;;  %s181_s28 = scalar_lea.vmem [#allocation3], %s8841_s6 }
  0x38   : > { %s188_s8 = sshll.u32 %s181_s28, 4  ;;  %p11079_p11 = pnand %p10431_p6, %p39_p8  ;;  %s11083_s8 = int_to_ptr.vmem [resolvable:$true] %s188_s8 }
  0x39   : > { %s198_s10 = sand.u32 1, %s10933_s18   ;;  %s178_s11 = scalar_lea.sflag [#allocation4], %s11070_s26 }
  0x3a   : > { %p10801_p0 = pneg %p11079_p11 }
  0x3d   : > { %s11077_s29 = scalar_lea.hbm %s14282_s0, %s9378_s5  ;;  %s10804_s6 = scalar_lea.hbm %s14282_s0, 1024 }
  0x3e   : > { %s10799_s14 = scalar_lea.hbm %s11077_s29, 512  ;;  %p10805_p7 = scmp.lt.u32.totalorder %s11077_s29, %s14282_s0 }
  0x3f   : > { %p10800_p13 = scmp.ne.s32.totalorder %s11077_s29, %s10799_s14  ;;  %p10806_p9 = scmp.lt.u32.totalorder %s10804_s6, %s10799_s14 }
  0x40   : > { %p10808_p2 = scmp.lt.u32.totalorder %s10799_s14, %s11077_s29 }
  0x41   : > { %p10802_p3 = pnand %p10801_p0, %p10800_p13  ;;  %p10807_p1 = por %p10806_p9, %p10805_p7 }
  0x43   : > { %p10803_p5 = pneg %p10802_p3  ;;  %p10809_p4 = por %p10808_p2, %p10807_p1 }
  0x45   : > { %p10810_p6 = pnand %p10809_p4, %p10803_p5 }
  0x47   : > { %10813 = shalt.err (!%p10810_p6)
}
  0x48   : > { %s10814_s28 = scalar_lea.vmem %s11083_s8, 512  ;;  %s10938_s20 = smov [#allocation3]  }
  0x49   : > { %p10815_p8 = scmp.ne.s32.totalorder %s11083_s8, %s10814_s28  ;;  %s10819_s5 = sshll.u32 %s10938_s20, 4  ;;  %s10820_s5 = int_to_ptr.vmem [resolvable:$false] %s10819_s5 }
  0x4a   : > { %s10821_s25 = scalar_lea.vmem %s10820_s5, 1024  ;;  %p10822_p3 = scmp.lt.s32.totalorder %s11083_s8, %s10820_s5 }
  0x4b   : > { %p10817_p10 = pnand %p10815_p8, %p10801_p0  ;;  %p10823_p7 = scmp.lt.s32.totalorder %s10821_s25, %s10814_s28 }
  0x4d   : > { %p10818_p13 = pneg %p10817_p10  ;;  %p10824_p9 = por %p10823_p7, %p10822_p3 }
  0x4f   : > { %p10825_p1 = pnand %p10824_p9, %p10818_p13 }
  0x51   : > { %10828 = shalt.err (!%p10825_p1)
}
  0x52   : > { %10422 = dma.hbm_to_vmem [thread:$0]  (!%p11079_p11), %s11077_s29, 512, %s11083_s8, %s178_s11, %s10936_s12, %s10936_s12, %s10937_s13  }
  0x53   : > { %s8844_s14 = sshll.u32 %s11070_s26, 7  ;;  %s9379_s6 = sshll.u32 %s10933_s18, 11 }
  0x54   : > { %s11122_s20 = scalar_lea.hbm %s14263_s1, %s9379_s6  ;;  %s202_s5 = scalar_lea.vmem [#allocation6], %s8844_s14 }
  0x55   : > { %s209_s25 = sshll.u32 %s202_s5, 4  ;;  %s11128_s0 = scalar_lea.sflag [#allocation7], %s198_s10  ;;  %s11124_s25 = int_to_ptr.vmem [resolvable:$true] %s209_s25 }
  0x56   : > { %s10829_s2 = scalar_lea.hbm %s11122_s20, 2048  ;;  %s10834_s8 = scalar_lea.hbm %s14263_s1, 4096 }
  0x57   : > { %p10830_p5 = scmp.ne.s32.totalorder %s11122_s20, %s10829_s2  ;;  %p10835_p6 = scmp.lt.u32.totalorder %s11122_s20, %s14263_s1 }
  0x58   : > { %p10836_p8 = scmp.lt.u32.totalorder %s10834_s8, %s10829_s2  ;;  %p10838_p13 = scmp.lt.u32.totalorder %s10829_s2, %s11122_s20 }
  0x59   : > { %p10832_p2 = pnand %p10830_p5, %p10801_p0 }
  0x5a   : > { %p10837_p10 = por %p10836_p8, %p10835_p6 }
  0x5b   : > { %p10833_p4 = pneg %p10832_p2 }
  0x5c   : > { %p10839_p3 = por %p10838_p13, %p10837_p10 }
  0x5e   : > { %p10840_p7 = pnand %p10839_p3, %p10833_p4 }
  0x60   : > { %10843 = shalt.err (!%p10840_p7)
}
  0x61   : > { %s10844_s10 = scalar_lea.vmem %s11124_s25, 2048  ;;  %s10939_s14 = smov [#allocation6]  }
  0x62   : > { %p10845_p9 = scmp.ne.s32.totalorder %s11124_s25, %s10844_s10  ;;  %s10849_s7 = sshll.u32 %s10939_s14, 4  ;;  %s10850_s7 = int_to_ptr.vmem [resolvable:$false] %s10849_s7 }
  0x63   : > { %s10851_s28 = scalar_lea.vmem %s10850_s7, 4096  ;;  %p10852_p2 = scmp.lt.s32.totalorder %s11124_s25, %s10850_s7 }
  0x64   : > { %p10847_p1 = pnand %p10845_p9, %p10801_p0  ;;  %p10853_p6 = scmp.lt.s32.totalorder %s10851_s28, %s10844_s10 }
  0x66   : > { %p10848_p5 = pneg %p10847_p1  ;;  %p10854_p8 = por %p10853_p6, %p10852_p2 }
  0x68   : > { %p10855_p10 = pnand %p10854_p8, %p10848_p5 }
  0x6a   : > { %10858 = shalt.err (!%p10855_p10)
}
  0x6b   : > { %10425 = dma.hbm_to_vmem [thread:$0]  (!%p11079_p11), %s11122_s20, 2048, %s11124_s25, %s11128_s0, %s10936_s12, %s10936_s12, %s10937_s13  }
  0x6c   : > { %p14284_p0 = scmp.ne.s32.totalorder %s14277_s23, 0 }
  0x6e   : > { %221 = sbr.rel (%p14284_p0) target bundleno = 1084 (0x43c), region = 36 }
  0x75   : > { %s11160_s2 = sand.u32 1, %s10925_s16   ;;  %p14285_p4 = scmp.ne.s32.totalorder %s14275_s21, 0 }
  0x76   : > { %s8848_s5 = sshll.u32 %s11160_s2, 5  ;;  %s224_s26 = scalar_lea.sflag [#allocation4], %s11160_s2 }
  0x77   : > { %s11164_s29 = scalar_lea.vmem [#allocation3], %s8848_s5 }
  0x78   : > { %10904 = dma.done.wait (%p14285_p4), %s224_s26, 512  }
  0x79   : > { %10906 = vsyncadd (%p14285_p4), %s224_s26, 4294966784  ;;  %s232_s0 = sand.u32 1, %s10992_s19   ;;  %s8849_s23 = sshll.u32 %s11160_s2, 7 }
  0x7a   : > { %s233_s12 = scalar_lea.sflag [#allocation7], %s232_s0  ;;  %s11172_s13 = scalar_lea.vmem [#allocation6], %s8849_s23 }
  0x7b   : > { %10908 = dma.done.wait (%p14285_p4), %s233_s12, 2048  }
  0x7c   : > { %10910 = vsyncadd (%p14285_p4), %s233_s12, 4294965248  ;;  %p14286_p11 = scmp.eq.s32.totalorder %s10992_s19, 0 }
  0x7e   : > { %10912 = dma.done.wait (%p14286_p11), [#allocation7], 18432   ;;  %p14287_p13 = pmov %p14286_p11 }
  0x7f   : > { %v10940_v0 = vmov 0   ;;  %vm279_vm0 = vcmask 1040384   ;;  %vm280_vm1 = vsmask.f32 256  ;;  %vm282_vm2 = vcmask 1044484   ;;  %v10474_v3 = vld [vmem:[#allocation8 + $0x40] sm:$0xff]  }
  0x80   : > { %10914 = vsyncadd (%p14287_p13), [#allocation7], 4294948864  ;;  %271 = vst [vmem:[#allocation2] sm:$0xff] %v10940_v0  ;;  %v8894_v1 = vcombine.high %v10940_v0, %v10940_v0  ;;  %vm283_vm3 = vsmask.f32 4352  ;;  %v10475_v4 = vld [vmem:[#allocation8] sm:$0xff]   ;;  %9381 = vmatprep.subr.bf16.mxu0 %v10474_v3  ;;  %10389 = vmatprep.subr.bf16.mxu1 %v10474_v3  ;;  %v414_v12 = vlaneseq  ;;  %v11229_v40 = vcombine.low %v10940_v0, %v10940_v0 }
  0x81   : > { %273 = vst [vmem:[#allocation2 + $0x10] sm:$0x11] %v10940_v0  ;;  %275 = vst [vmem:[#allocation2 + $0x198] sm:$0xff] %v10940_v0  ;;  %v10476_v5 = vld [vmem:[#allocation8 + $0x48] sm:$0xff]   ;;  %9382 = vmatpush3.bf16.msra.mxu0 %v10475_v4  ;;  %10397 = vmatpush3.bf16.msra.mxu1 %v10475_v4  ;;  %v10478_v7 = vld [vmem:[#allocation8 + $0x50] sm:$0xff]   ;;  %vm2037_vm13 = vcmask 1043456  }
  0x82   : > { %277 = vst [vmem:[#allocation2 + $0x1a8] sm:$0x11] %v10940_v0  ;;  %2974 = vmatprep.mubr.bf16.mxu0 %v8894_v1  ;;  %vm11190_vm4 = vmand %vm279_vm0, %vm280_vm1  ;;  %v10477_v6 = vld [vmem:[#allocation8 + $0x8] sm:$0xff]   ;;  %9383 = vmatprep.subr.bf16.mxu0 %v10476_v5  ;;  %vm334_vm6 = vsmask.f32 7938  ;;  %v10479_v9 = vld [vmem:[#allocation8 + $0x10] sm:$0xff]  }
  0x83   : > { %vm284_vm5 = vmand %vm282_vm2, %vm283_vm3  ;;  %10390 = vmatprep.subr.bf16.mxu1 %v10476_v5  ;;  %vm336_vm8 = vsmask.f32 7954  ;;  %v10941_v10 = vmov 1966171168   ;;  %v10480_v13 = vld [vmem:[#allocation8 + $0x58] sm:$0xff]   ;;  %v415_v16 = vshrl.u32 %v414_v12, 7 }
  0x84   : > { %vm11197_vm7 = vmor %vm284_vm5, %vm11190_vm4  ;;  %v412_v11 = vunpack.c.l.s4 %v10941_v10  ;;  %v10481_v14 = vld [vmem:[#allocation8 + $0x18] sm:$0xff]   ;;  %v10482_v17 = vld [vmem:[#allocation8 + $0x60] sm:$0xff]   ;;  %v10942_v18 = vmov 1935823168   ;;  %vm1875_vm12 = vsmask.f32 4368 }
  0x85   : > { %9384 = vmatpush3.bf16.msra.mxu0 %v10477_v6  ;;  %10398 = vmatpush3.bf16.msra.mxu1 %v10477_v6  ;;  %vm335_vm9 = vmand %vm279_vm0, %vm334_vm6  ;;  %v1494_v19 = vunpack.c.l.s4 %v10942_v18  ;;  %v10483_v21 = vld [vmem:[#allocation8 + $0x20] sm:$0xff]   ;;  %v10484_v22 = vld [vmem:[#allocation8 + $0x68] sm:$0xff]   ;;  %v11216_v31 = vsub.s32 0, %v415_v16  ;;  %vm4083_vm0 = vcmask 1042432   ;;  %vm3183_vm3 = vsmask.f32 3328 }
  0x86   : > { %9385 = vmatprep.subr.bf16.mxu0 %v10478_v7  ;;  %10391 = vmatprep.subr.bf16.mxu1 %v10478_v7  ;;  %vm337_vm10 = vmand %vm282_vm2, %vm336_vm8  ;;  %v413_v15 = vunpack.c.0.s8 %v412_v11  ;;  %v307_v24 = vld [vmem:[#allocation2 + $0xc0] sm:$0x11]  ;;  %v357_v25 = vld [vmem:[#allocation2 + $0xb8] sm:$0x11]  ;;  %vm3184_vm5 = vsmask.f32 7440 }
  0x87   : > { %vm11204_vm11 = vmor %vm337_vm10, %vm335_vm9  ;;  %v360_v26 = vld [vmem:[#allocation2 + $0xd0] sm:$0x11]  ;;  %v1495_v27 = vunpack.c.0.s8 %v1494_v19  ;;  %v308_v28 = vsel %vm11197_vm7, 0, %v307_v24  ;;  %v11219_v32 = vld [vmem:[%s11172_s13 + $0x38] sm:$0xf]  ;;  %s8851_s20 = sshll.u32 %s11160_s2, 8 }
  0x88   : > { %v11208_v23 = vsub.s32 %v413_v15, %v415_v16  ;;  %v358_v29 = vsel %vm11204_vm11, 0, %v357_v25  ;;  %v361_v30 = vsel %vm11204_vm11, 0, %v360_v26  ;;  %309 = vst [vmem:[#allocation2 + $0xc0] sm:$0x11] %v308_v28  ;;  %v11223_v34 = vld [vmem:[%s11172_s13 + $0x3c] sm:$0xf]  ;;  %vm11248_vm14 = vmor %vm280_vm1, %vm1875_vm12 }
  0x89   : > { %9386 = vmatpush3.bf16.msra.mxu0 %v10479_v9  ;;  %10399 = vmatpush3.bf16.msra.mxu1 %v10479_v9  ;;  %359 = vst [vmem:[#allocation2 + $0xb8] sm:$0x11] %v358_v29  ;;  %362 = vst [vmem:[#allocation2 + $0xd0] sm:$0x11] %v361_v30  ;;  %v10485_v35 = vld [vmem:[#allocation8 + $0x28] sm:$0xff]   ;;  %v2303_v38 = vshrl.u32 %v11219_v32, 16  ;;  %v11231_v41 = vsub.s32 %v1495_v27, %v415_v16 }
  0x8a   : > { %9387 = vmatprep.subr.bf16.mxu0 %v10480_v13  ;;  %10392 = vmatprep.subr.bf16.mxu1 %v10480_v13  ;;  %v8855_v33 = vld.sshfl [vmem:[%s11164_s29 + $0xc] sm:$0x33 pattern:$0x75316420]  ;;  %v10486_v39 = vld [vmem:[#allocation8 + $0x70] sm:$0xff]   ;;  %v2311_v42 = vshrl.u32 %v11223_v34, 16  ;;  %vm11256_vm15 = vmand %vm2037_vm13, %vm334_vm6 }
  0x8b   : > { %v482_v36 = vcombine.high %v8855_v33, %v8855_v33  ;;  %v489_v37 = vrot.slane %v8855_v33, %v11208_v23  ;;  %v11235_v47 = vrot.slane %v2303_v38, 7  ;;  %v2306_v48 = vshll.u32 %v11219_v32, 16  ;;  %v10487_v51 = vld [vmem:[#allocation8 + $0x30] sm:$0xff]   ;;  %v10488_v56 = vld [vmem:[#allocation8 + $0x78] sm:$0xff]   ;;  %v286_v1 = vld [vmem:[#allocation2 + $0x18] sm:$0x11] }
  0x8c   : > { %v11238_v49 = vrot.slane %v2311_v42, 7  ;;  %v2314_v50 = vshll.u32 %v11223_v34, 16  ;;  %v10489_v9 = vld [vmem:[#allocation8 + $0x38] sm:$0xff]   ;;  %v10493_v15 = vld [vmem:[#allocation8 + $0xc0] sm:$0xff]   ;;  %vm4084_vm1 = vcmask 1046532   ;;  %vm11798_vm6 = vmor %vm3183_vm3, %vm3184_vm5  ;;  %s14147_s25 = scalar_lea.vmem [#allocation9], %s8851_s20 }
  0x8d   : > { %9388 = vmatpush3.bf16.msra.mxu0 %v10481_v14  ;;  %10400 = vmatpush3.bf16.msra.mxu1 %v10481_v14  ;;  %v496_v43 = vrot.slane %v482_v36, %v11208_v23  ;;  %v497_v44 = vcombine.high %v489_v37, %v489_v37  ;;  %v620_v45 = vunpack.i.h.s16 %v489_v37  ;;  %v8872_v46 = vpack.i.b16 %v489_v37, %v489_v37  ;;  %v11266_v24 = vld [vmem:[%s11172_s13] sm:$0xf]  ;;  %vm11760_vm2 = vmor %vm4083_vm0, %vm4084_vm1  ;;  %s9380_s8 = sshll.u32 %s10992_s19, 12  ;;  %s8732_s11 = sshll.u32 %s14147_s25, 4  ;;  %s14216_s11 = int_to_ptr.vmem [resolvable:$true] %s8732_s11 }
  0x8e   : > { %9389 = vmatprep.subr.bf16.mxu0 %v10482_v17  ;;  %10393 = vmatprep.subr.bf16.mxu1 %v10482_v17  ;;  %v2309_v60 = vrot.slane %v11235_v47, 4  ;;  %v2318_v14 = vrot.slane %v11238_v49, 4  ;;  %v8852_v30 = vld.sshfl [vmem:[%s11164_s29] sm:$0x33 pattern:$0x75316420]  ;;  %v2308_v36 = vor.u32 %v2306_v48, %v11235_v47  ;;  %v2316_v47 = vor.u32 %v2314_v50, %v11238_v49  ;;  %s14214_s14 = scalar_lea.hbm %s14266_s4, %s9380_s8 }
  0x8f   : > { %v498_v52 = vcombine.high %v496_v43, %v496_v43  ;;  %v622_v53 = vunpack.i.h.s16 %v496_v43  ;;  %v624_v54 = vunpack.i.h.s16 %v497_v44  ;;  %v684_v55 = vpack.i.b16 %v620_v45, %v620_v45  ;;  %v2552_v19 = vld [vmem:[#allocation2 + $0xc4] sm:$0xf]  ;;  %v10496_v42 = vld [vmem:[#allocation8 + $0x100] sm:$0xff]   ;;  %v10505_v48 = vld [vmem:[#allocation8 + $0x148] sm:$0xff]   ;;  %s8719_s7 = scalar_lea.sflag [#allocation5], %s11160_s2  ;;  %s10859_s28 = scalar_lea.vmem %s14216_s11, 4096 }
  0x90   : > { %v8873_v57 = vpack.i.b16 %v496_v43, %v496_v43  ;;  %v8874_v58 = vpack.i.b16 %v497_v44, %v497_v44  ;;  %v822_v59 = vrot.slane %v8872_v46, %v11216_v31  ;;  %v2556_v29 = vld [vmem:[#allocation2 + $0xd4] sm:$0x1]  ;;  %v2184_v43 = vshrl.u32 %v11266_v24, 16  ;;  %p10860_p3 = scmp.ne.s32.totalorder %s14216_s11, %s10859_s28  ;;  %s10943_s19 = smov [#allocation9]  }
  0x91   : > { %9390 = vmatpush3.bf16.msra.mxu0 %v10483_v21  ;;  %10401 = vmatpush3.bf16.msra.mxu1 %v10483_v21  ;;  %v626_v61 = vunpack.i.h.s16 %v498_v52  ;;  %v686_v62 = vpack.i.b16 %v622_v53, %v622_v53  ;;  %v688_v63 = vpack.i.b16 %v624_v54, %v624_v54  ;;  %v8875_v0 = vpack.i.b16 %v498_v52, %v498_v52  ;;  %v10495_v21 = vld [vmem:[#allocation8 + $0x140] sm:$0xff]   ;;  %s10863_s5 = sshll.u32 %s10943_s19, 4  ;;  %s10864_s5 = int_to_ptr.vmem [resolvable:$false] %s10863_s5 }
  0x92   : > { %9391 = vmatprep.subr.bf16.mxu0 %v10484_v22  ;;  %10394 = vmatprep.subr.bf16.mxu1 %v10484_v22  ;;  %v826_v3 = vrot.slane %v684_v55, %v11216_v31  ;;  %v830_v4 = vrot.slane %v8873_v57, %v11216_v31  ;;  %v838_v5 = vrot.slane %v8874_v58, %v11216_v31  ;;  %v287_v22 = vsel %vm11197_vm7, 0, %v286_v1  ;;  %p10861_p7 = pnand %p10860_p3, %p11065_p12  ;;  %s10865_s26 = scalar_lea.vmem %s10864_s5, 8192 }
  0x93   : > { %v1148_v6 = vpack.i.b16 %v822_v59, %v822_v59  ;;  %v690_v10 = vpack.i.b16 %v626_v61, %v626_v61  ;;  %v834_v11 = vrot.slane %v686_v62, %v11216_v31  ;;  %v842_v12 = vrot.slane %v688_v63, %v11216_v31  ;;  %288 = vst [vmem:[#allocation2 + $0x18] sm:$0x11] %v287_v22  ;;  %p10866_p1 = scmp.lt.s32.totalorder %s14216_s11, %s10864_s5  ;;  %p10867_p5 = scmp.lt.s32.totalorder %s10865_s26, %s10859_s28 }
  0x94   : > { %v846_v16 = vrot.slane %v8875_v0, %v11216_v31  ;;  %v1155_v18 = vpack.i.b16 %v826_v3, %v826_v3  ;;  %v1162_v26 = vpack.i.b16 %v830_v4, %v830_v4  ;;  %v1176_v28 = vpack.i.b16 %v838_v5, %v838_v5  ;;  %v10515_v5 = vld [vmem:[#allocation8 + $0x150] sm:$0xff]   ;;  %p10862_p9 = pneg %p10861_p7 }
  0x95   : > { %9392 = vmatpush3.bf16.msra.mxu0 %v10485_v35  ;;  %10402 = vmatpush3.bf16.msra.mxu1 %v10485_v35  ;;  %v1153_v17 = vrot.slane %v1148_v6, %v11216_v31  ;;  %v850_v25 = vrot.slane %v690_v10, %v11216_v31  ;;  %v1169_v27 = vpack.i.b16 %v834_v11, %v834_v11  ;;  %v11292_v59 = vrot.slane %v2184_v43, 7  ;;  %p10868_p2 = por %p10867_p5, %p10866_p1 }
  0x96   : > { %9393 = vmatprep.subr.bf16.mxu0 %v10486_v39  ;;  %10395 = vmatprep.subr.bf16.mxu1 %v10486_v39  ;;  %v1160_v32 = vrot.slane %v1155_v18, %v11216_v31  ;;  %v1183_v33 = vpack.i.b16 %v842_v12, %v842_v12  ;;  %v1190_v35 = vpack.i.b16 %v846_v16, %v846_v16 }
  0x97   : > { %v1167_v37 = vrot.slane %v1162_v26, %v11216_v31  ;;  %v1174_v38 = vrot.slane %v1169_v27, %v11216_v31  ;;  %v1181_v39 = vrot.slane %v1176_v28, %v11216_v31  ;;  %v1197_v46 = vpack.i.b16 %v850_v25, %v850_v25  ;;  %p10869_p6 = pnand %p10868_p2, %p10862_p9 }
  0x98   : > { %v1188_v44 = vrot.slane %v1183_v33, %v11216_v31  ;;  %v1195_v45 = vrot.slane %v1190_v35, %v11216_v31  ;;  %v2553_v53 = vsel %vm11256_vm15, %v2308_v36, %v2552_v19  ;;  %v2557_v54 = vsel %vm11190_vm4, %v2318_v14, %v2556_v29 }
  0x99   : > { %9394 = vmatpush3.bf16.msra.mxu0 %v10487_v51  ;;  %10403 = vmatpush3.bf16.msra.mxu1 %v10487_v51  ;;  %v1635_v51 = vcombine.low %v1153_v17, %v1167_v37  ;;  %v1636_v52 = vcombine.low %v1160_v32, %v1174_v38  ;;  %v1202_v55 = vrot.slane %v1197_v46, %v11216_v31  ;;  %v10516_v17 = vld [vmem:[#allocation8 + $0x110] sm:$0xff]   ;;  %v10525_v46 = vld [vmem:[#allocation8 + $0x158] sm:$0xff]  }
  0x9a   : > { %9395 = vmatprep.subr.bf16.mxu0 %v10488_v56  ;;  %10396 = vmatprep.subr.bf16.mxu1 %v10488_v56  ;;  %v1659_v56 = vcombine.low %v1181_v39, %v1195_v45  ;;  %v2317_v34 = vsel %vm11248_vm14, %v2309_v60, %v2316_v47  ;;  %2554 = vst [vmem:[#allocation2 + $0xc4] sm:$0xf] %v2553_v53  ;;  %2558 = vst [vmem:[#allocation2 + $0xd4] sm:$0x1] %v2557_v54  ;;  %v2187_v60 = vshll.u32 %v11266_v24, 16  ;;  %v10526_v53 = vld [vmem:[#allocation8 + $0x118] sm:$0xff]  }
  0x9b   : > { %v410_v49 = vcombine.high %v8852_v30, %v8852_v30  ;;  %v1643_v50 = vrot.slane %v1635_v51, %v11231_v41  ;;  %v1650_v57 = vrot.slane %v1636_v52, %v11231_v41  ;;  %2555 = vst [vmem:[#allocation2 + $0xcc] sm:$0xf] %v2317_v34  ;;  %v417_v58 = vrot.slane %v8852_v30, %v11208_v23  ;;  %v2088_v30 = vld [vmem:[#allocation2 + $0xc0] sm:$0xf] }
  0x9c   : > { %v1660_v61 = vcombine.low %v1188_v44, %v1202_v55  ;;  %v1667_v62 = vrot.slane %v1659_v56, %v11231_v41 }
  0x9d   : > { %9396 = vmatpush3.bf16.msra.mxu0 %v10489_v9  ;;  %10404 = vmatpush3.bf16.msra.mxu1 %v10489_v9  ;;  %v424_v63 = vrot.slane %v410_v49, %v11208_v23  ;;  %v1651_v0 = vcombine.low %v1643_v50, %v1650_v57  ;;  %v425_v1 = vcombine.high %v417_v58, %v417_v58  ;;  %v596_v3 = vunpack.i.h.s16 %v417_v58  ;;  %v2085_v49 = vld [vmem:[#allocation2 + $0xb8] sm:$0x1]  ;;  %v2092_v57 = vld [vmem:[#allocation2 + $0xd0] sm:$0x1] }
  0x9e   : > { %9493 = vmatprep.subr.bf16.mxu1 %v10493_v15  ;;  %9605 = vmatprep.subr.bf16.mxu0 %v10495_v21  ;;  %v8860_v4 = vpack.i.b16 %v417_v58, %v417_v58  ;;  %v1674_v6 = vrot.slane %v1660_v61, %v11231_v41 }
  0x9f   : > { %v426_v9 = vcombine.high %v424_v63, %v424_v63  ;;  %v598_v10 = vunpack.i.h.s16 %v424_v63  ;;  %v8861_v11 = vpack.i.b16 %v424_v63, %v424_v63  ;;  %v1658_v12 = vrot.slane %v1651_v0, %v11231_v41 }
  0xa0   : > { %2975 = vmatmul.mubr.bf16.vlgmr.msra.gmra.mrb[0].mxu0 %v11229_v40  ;;  %v10506_v40 = vld [vmem:[#allocation8 + $0x108] sm:$0xff]   ;;  %v600_v14 = vunpack.i.h.s16 %v425_v1  ;;  %v660_v15 = vpack.i.b16 %v596_v3, %v596_v3  ;;  %v8862_v16 = vpack.i.b16 %v425_v1, %v425_v1  ;;  %v1675_v18 = vcombine.low %v1667_v62, %v1674_v6  ;;  %v2152_v3 = vld [vmem:[%s11172_s13 + $0x4] sm:$0xf] }
  0xa1   : > { %9606 = vmatpush3.bf16.msra.mxu0 %v10496_v42  ;;  %v602_v19 = vunpack.i.h.s16 %v426_v9  ;;  %v662_v21 = vpack.i.b16 %v598_v10, %v598_v10  ;;  %v8863_v22 = vpack.i.b16 %v426_v9, %v426_v9  ;;  %v1929_v25 = vshrl.u32 %v1658_v12, 16  ;;  %v2503_v10 = vld [vmem:[#allocation2 + $0x1c] sm:$0xf] }
  0xa2   : > { %9607 = vmatprep.subr.bf16.mxu0 %v10505_v48  ;;  %v1932_v26 = vshll.u32 %v1658_v12, 16  ;;  %v664_v27 = vpack.i.b16 %v600_v14, %v600_v14  ;;  %v726_v28 = vrot.slane %v8860_v4, %v11216_v31  ;;  %v1682_v29 = vrot.slane %v1675_v18, %v11231_v41  ;;  %v8856_v12 = vld.sshfl [vmem:[%s11164_s29 + $0x10] sm:$0x33 pattern:$0x75316420] }
  0xa3   : > { %v666_v32 = vpack.i.b16 %v602_v19, %v602_v19  ;;  %v730_v33 = vrot.slane %v660_v15, %v11216_v31  ;;  %v734_v35 = vrot.slane %v8861_v11, %v11216_v31  ;;  %v1931_v36 = vrot.slane %v1929_v25, 7  ;;  %v310_v11 = vld [vmem:[#allocation2 + $0xd8] sm:$0x11]  ;;  %v10535_v25 = vld [vmem:[#allocation8 + $0x160] sm:$0xff]  }
  0xa4   : > { %v738_v37 = vrot.slane %v662_v21, %v11216_v31  ;;  %v742_v38 = vrot.slane %v8862_v16, %v11216_v31  ;;  %v746_v39 = vrot.slane %v664_v27, %v11216_v31  ;;  %v1937_v42 = vshrl.u32 %v1682_v29, 16 }
  0xa5   : > { %9608 = vmatpush3.bf16.msra.mxu0 %v10506_v40  ;;  %v1940_v43 = vshll.u32 %v1682_v29, 16  ;;  %v750_v44 = vrot.slane %v8863_v22, %v11216_v31  ;;  %v754_v45 = vrot.slane %v666_v32, %v11216_v31  ;;  %v11308_v47 = vor.u32 %v1932_v26, %v1931_v36 }
  0xa6   : > { %9609 = vmatprep.subr.bf16.mxu0 %v10515_v5  ;;  %v1935_v48 = vrot.slane %v1931_v36, 4  ;;  %v980_v51 = vpack.i.b16 %v726_v28, %v726_v28  ;;  %v987_v52 = vpack.i.b16 %v730_v33, %v730_v33  ;;  %v1939_v54 = vrot.slane %v1937_v42, 7 }
  0xa7   : > { %v994_v55 = vpack.i.b16 %v734_v35, %v734_v35  ;;  %v1001_v56 = vpack.i.b16 %v738_v37, %v738_v37  ;;  %v1008_v34 = vpack.i.b16 %v742_v38, %v742_v38  ;;  %v2089_v50 = vsel %vm11256_vm15, %v11308_v47, %v2088_v30  ;;  %v10536_v30 = vld [vmem:[#allocation8 + $0x120] sm:$0xff]  }
  0xa8   : > { %v985_v58 = vrot.slane %v980_v51, %v11216_v31  ;;  %v992_v40 = vrot.slane %v987_v52, %v11216_v31  ;;  %v1015_v61 = vpack.i.b16 %v746_v39, %v746_v39  ;;  %v1942_v62 = vor.u32 %v1940_v43, %v1939_v54  ;;  %2090 = vst [vmem:[#allocation2 + $0xc0] sm:$0xf] %v2089_v50  ;;  %v10494_v43 = vld [vmem:[#allocation8 + $0x80] sm:$0xff]  }
  0xa9   : > { %9610 = vmatpush3.bf16.msra.mxu0 %v10516_v17  ;;  %v1944_v63 = vrot.slane %v1939_v54, 4  ;;  %v999_v0 = vrot.slane %v994_v55, %v11216_v31  ;;  %v1006_v1 = vrot.slane %v1001_v56, %v11216_v31  ;;  %v1013_v4 = vrot.slane %v1008_v34, %v11216_v31  ;;  %v10502_v54 = vld [vmem:[#allocation8 + $0xc8] sm:$0xff]   ;;  %v10492_v56 = vld [vmem:[#allocation2 + $0xc4] ss:$8 sps:$4 sm:$0xff]  }
  0xaa   : > { %9611 = vmatprep.subr.bf16.mxu0 %v10525_v46  ;;  %v1020_v5 = vrot.slane %v1015_v61, %v11216_v31  ;;  %v1022_v6 = vpack.i.b16 %v750_v44, %v750_v44  ;;  %v1029_v9 = vpack.i.b16 %v754_v45, %v754_v45  ;;  %v1943_v14 = vsel %vm11248_vm14, %v1935_v48, %v1942_v62 }
  0xab   : > { %v2086_v15 = vsel %vm11190_vm4, %v1944_v63, %v2085_v49  ;;  %v2093_v16 = vsel %vm11190_vm4, %v1944_v63, %v2092_v57  ;;  %v1491_v17 = vcombine.low %v985_v58, %v999_v0  ;;  %2084 = vst [vmem:[#allocation2 + $0xb0] sm:$0xf] %v1943_v14  ;;  %2091 = vst [vmem:[#allocation2 + $0xc8] sm:$0xf] %v1943_v14  ;;  %v2190_v27 = vrot.slane %v11292_v59, 4 }
  0xac   : > { %2087 = vst [vmem:[#allocation2 + $0xb8] sm:$0x1] %v2086_v15  ;;  %2094 = vst [vmem:[#allocation2 + $0xd0] sm:$0x1] %v2093_v16  ;;  %v1027_v18 = vrot.slane %v1022_v6, %v11216_v31  ;;  %v1034_v19 = vrot.slane %v1029_v9, %v11216_v31  ;;  %v1492_v21 = vcombine.low %v992_v40, %v1006_v1  ;;  %v2192_v28 = vshrl.u32 %v2152_v3, 16 }
  0xad   : > { %9612 = vmatpush3.bf16.msra.mxu0 %v10526_v53  ;;  %v2189_v22 = vor.u32 %v2187_v60, %v11292_v59  ;;  %v1499_v26 = vrot.slane %v1491_v17, %v11231_v41  ;;  %v2195_v29 = vshll.u32 %v2152_v3, 16  ;;  %v311_v24 = vsel %vm11197_vm7, 0, %v310_v11  ;;  %3038 = vmatprep.mubr.bf16.mxu1 %v10492_v56  ;;  %v11353_v16 = vld [vmem:[%s11172_s13 + $0x40] sm:$0xf]  ;;  %v10504_v17 = vld [vmem:[#allocation8 + $0x88] sm:$0xff]  }
  0xae   : > { %v1506_v32 = vrot.slane %v1492_v21, %v11231_v41  ;;  %v1515_v33 = vcombine.low %v1013_v4, %v1027_v18  ;;  %v1516_v35 = vcombine.low %v1020_v5, %v1034_v19  ;;  %9613 = vmatprep.subr.bf16.mxu0 %v10535_v25  ;;  %v11337_v37 = vrot.slane %v2192_v28, 7  ;;  %312 = vst [vmem:[#allocation2 + $0xd8] sm:$0x11] %v311_v24  ;;  %v10512_v25 = vld [vmem:[#allocation8 + $0xd0] sm:$0xff]  }
  0xaf   : > { %v2504_v36 = vsel %vm11256_vm15, %v2189_v22, %v2503_v10  ;;  %v506_v60 = vcombine.high %v8856_v12, %v8856_v12  ;;  %v513_v59 = vrot.slane %v8856_v12, %v11208_v23  ;;  %v2039_v10 = vld [vmem:[#allocation2 + $0x18] sm:$0xf]  ;;  %v2320_v24 = vshrl.u32 %v11353_v16, 16 }
  0xb0   : > { %2505 = vst [vmem:[#allocation2 + $0x1c] sm:$0xf] %v2504_v36  ;;  %v1507_v38 = vcombine.low %v1499_v26, %v1506_v32  ;;  %v1523_v39 = vrot.slane %v1515_v33, %v11231_v41  ;;  %v1530_v42 = vrot.slane %v1516_v35, %v11231_v41  ;;  %v2197_v44 = vor.u32 %v2195_v29, %v11337_v37  ;;  %v10545_v26 = vld [vmem:[#allocation8 + $0x168] sm:$0xff]  }
  0xb1   : > { %9614 = vmatpush3.bf16.msra.mxu0 %v10536_v30  ;;  %v520_v45 = vrot.slane %v506_v60, %v11208_v23  ;;  %v521_v46 = vcombine.high %v513_v59, %v513_v59  ;;  %v628_v52 = vunpack.i.h.s16 %v513_v59  ;;  %v8876_v53 = vpack.i.b16 %v513_v59, %v513_v59  ;;  %v10546_v32 = vld [vmem:[#allocation8 + $0x128] sm:$0xff]   ;;  %v10514_v60 = vld [vmem:[#allocation8 + $0x90] sm:$0xff]   ;;  %v10522_v59 = vld [vmem:[#allocation8 + $0xd8] sm:$0xff]  }
  0xb2   : > { %v1514_v48 = vrot.slane %v1507_v38, %v11231_v41  ;;  %v1531_v51 = vcombine.low %v1523_v39, %v1530_v42  ;;  %v10490_v55 = vld [vmem:[#allocation2 + $0xc0] ss:$8 sps:$4 sm:$0xff]   ;;  %v2198_v34 = vsel %vm11248_vm14, %v2190_v27, %v2197_v44  ;;  %9615 = vmatprep.subr.bf16.mxu0 %v10545_v26 }
  0xb3   : > { %v522_v49 = vcombine.high %v520_v45, %v520_v45  ;;  %v630_v50 = vunpack.i.h.s16 %v520_v45  ;;  %v632_v57 = vunpack.i.h.s16 %v521_v46  ;;  %2506 = vst [vmem:[#allocation2 + $0x24] sm:$0xf] %v2198_v34  ;;  %v692_v62 = vpack.i.b16 %v628_v52, %v628_v52  ;;  %3039 = vmatmul.mubr.bf16.vlgmr.msra.gmra.mrb[0].mxu1 %v10490_v55  ;;  %v2168_v55 = vld [vmem:[%s11172_s13 + $0x44] sm:$0xf] }
  0xb4   : > { %v1538_v58 = vrot.slane %v1531_v51, %v11231_v41  ;;  %v1878_v40 = vshrl.u32 %v1514_v48, 16  ;;  %v1881_v61 = vshll.u32 %v1514_v48, 16  ;;  %v8877_v0 = vpack.i.b16 %v520_v45, %v520_v45  ;;  %9494 = vmatpush3.bf16.msra.mxu1 %v10494_v43 }
  0xb5   : > { %v634_v63 = vunpack.i.h.s16 %v522_v49  ;;  %v694_v1 = vpack.i.b16 %v630_v50, %v630_v50  ;;  %v8878_v3 = vpack.i.b16 %v521_v46, %v521_v46  ;;  %v696_v9 = vpack.i.b16 %v632_v57, %v632_v57  ;;  %9495 = vmatprep.subr.bf16.mxu1 %v10502_v54  ;;  %9616 = vmatpush3.bf16.msra.mxu0 %v10546_v32  ;;  %v289_v57 = vld [vmem:[#allocation2 + $0x30] sm:$0x11] }
  0xb6   : > { %v1880_v4 = vrot.slane %v1878_v40, 7  ;;  %v1886_v5 = vshrl.u32 %v1538_v58, 16  ;;  %v1889_v6 = vshll.u32 %v1538_v58, 16  ;;  %v8879_v11 = vpack.i.b16 %v522_v49, %v522_v49  ;;  %v2153_v58 = vld [vmem:[%s11172_s13 + $0x8] sm:$0xf]  ;;  %v10524_v40 = vld [vmem:[#allocation8 + $0x98] sm:$0xff]  }
  0xb7   : > { %v698_v12 = vpack.i.b16 %v634_v63, %v634_v63  ;;  %v854_v14 = vrot.slane %v8876_v53, %v11216_v31  ;;  %v858_v15 = vrot.slane %v692_v62, %v11216_v31  ;;  %v862_v22 = vrot.slane %v8877_v0, %v11216_v31 }
  0xb8   : > { %v11355_v18 = vor.u32 %v1881_v61, %v1880_v4  ;;  %v1884_v19 = vrot.slane %v1880_v4, 4  ;;  %v11357_v21 = vrot.slane %v1886_v5, 7  ;;  %v866_v27 = vrot.slane %v694_v1, %v11216_v31  ;;  %9496 = vmatpush3.bf16.msra.mxu1 %v10504_v17  ;;  %v10532_v1 = vld [vmem:[#allocation8 + $0xe0] sm:$0xff]   ;;  %v10555_v4 = vld [vmem:[#allocation8 + $0x130] sm:$0xff]  }
  0xb9   : > { %v870_v28 = vrot.slane %v8878_v3, %v11216_v31  ;;  %v874_v29 = vrot.slane %v696_v9, %v11216_v31  ;;  %v878_v30 = vrot.slane %v8879_v11, %v11216_v31  ;;  %v882_v36 = vrot.slane %v698_v12, %v11216_v31  ;;  %9497 = vmatprep.subr.bf16.mxu1 %v10512_v25  ;;  %v10554_v3 = vld [vmem:[#allocation8 + $0x170] sm:$0xff]   ;;  %v2559_v11 = vld [vmem:[#allocation2 + $0xdc] sm:$0xf] }
  0xba   : > { %v1891_v33 = vor.u32 %v1889_v6, %v11357_v21  ;;  %v2040_v35 = vsel %vm11256_vm15, %v11355_v18, %v2039_v10  ;;  %v1204_v38 = vpack.i.b16 %v854_v14, %v854_v14  ;;  %v1211_v39 = vpack.i.b16 %v858_v15, %v858_v15  ;;  %9617 = vmatprep.subr.bf16.mxu0 %v10554_v3 }
  0xbb   : > { %2041 = vst [vmem:[#allocation2 + $0x18] sm:$0xf] %v2040_v35  ;;  %v1218_v42 = vpack.i.b16 %v862_v22, %v862_v22  ;;  %v1225_v43 = vpack.i.b16 %v866_v27, %v866_v27  ;;  %v1232_v45 = vpack.i.b16 %v870_v28, %v870_v28  ;;  %v1239_v46 = vpack.i.b16 %v874_v29, %v874_v29  ;;  %v10534_v35 = vld [vmem:[#allocation8 + $0xa0] sm:$0xff]  }
  0xbc   : > { %v1892_v44 = vsel %vm11248_vm14, %v1884_v19, %v1891_v33  ;;  %v1246_v48 = vpack.i.b16 %v878_v30, %v878_v30  ;;  %v1209_v51 = vrot.slane %v1204_v38, %v11216_v31  ;;  %v1216_v52 = vrot.slane %v1211_v39, %v11216_v31  ;;  %9498 = vmatpush3.bf16.msra.mxu1 %v10514_v60  ;;  %v2154_v19 = vld [vmem:[%s11172_s13 + $0xc] sm:$0xf]  ;;  %v2169_v33 = vld [vmem:[%s11172_s13 + $0x48] sm:$0xf] }
  0xbd   : > { %2042 = vst [vmem:[#allocation2 + $0x20] sm:$0xf] %v1892_v44  ;;  %2049 = vst [vmem:[#allocation2 + $0x38] sm:$0xf] %v1892_v44  ;;  %v1223_v53 = vrot.slane %v1218_v42, %v11216_v31  ;;  %v1230_v54 = vrot.slane %v1225_v43, %v11216_v31  ;;  %v1237_v56 = vrot.slane %v1232_v45, %v11216_v31  ;;  %v2322_v63 = vrot.slane %v2320_v24, 7 }
  0xbe   : > { %v1244_v34 = vrot.slane %v1239_v46, %v11216_v31  ;;  %v1251_v49 = vrot.slane %v1246_v48, %v11216_v31  ;;  %v1253_v50 = vpack.i.b16 %v882_v36, %v882_v36  ;;  %v2323_v0 = vshll.u32 %v11353_v16, 16  ;;  %9499 = vmatprep.subr.bf16.mxu1 %v10522_v59  ;;  %v313_v16 = vld [vmem:[#allocation2 + $0xf0] sm:$0x11]  ;;  %9618 = vmatpush3.bf16.msra.mxu0 %v10555_v4  ;;  %v10542_v36 = vld [vmem:[#allocation8 + $0xe8] sm:$0xff]   ;;  %v292_v42 = vld [vmem:[#allocation2 + $0x48] sm:$0x11] }
  0xbf   : > { %v1683_v61 = vcombine.low %v1209_v51, %v1223_v53  ;;  %v1684_v62 = vcombine.low %v1216_v52, %v1230_v54  ;;  %v2328_v9 = vshrl.u32 %v2168_v55, 16  ;;  %v2331_v10 = vshll.u32 %v2168_v55, 16  ;;  %v10497_v24 = vld [vmem:[#allocation2 + $0x1c] ss:$8 sps:$4 sm:$0xff]  }
  0xc0   : > { %v1258_v5 = vrot.slane %v1253_v50, %v11216_v31  ;;  %v1707_v6 = vcombine.low %v1237_v56, %v1251_v49  ;;  %v2325_v15 = vor.u32 %v2323_v0, %v2322_v63  ;;  %v2326_v17 = vrot.slane %v2322_v63, 4  ;;  %9500 = vmatpush3.bf16.msra.mxu1 %v10524_v40  ;;  %v11397_v39 = vld [vmem:[%s11172_s13 + $0x4c] sm:$0xf]  ;;  %2982 = vmatprep.mubr.bf16.mxu0 %v10497_v24  ;;  %v10551_v63 = vld [vmem:[#allocation8 + $0xf0] sm:$0xff]  }
  0xc1   : > { %v1691_v12 = vrot.slane %v1683_v61, %v11231_v41  ;;  %v1698_v14 = vrot.slane %v1684_v62, %v11231_v41  ;;  %v11387_v26 = vrot.slane %v2328_v9, 7  ;;  %v290_v27 = vsel %vm11197_vm7, 0, %v289_v57  ;;  %v8853_v43 = vld.sshfl [vmem:[%s11164_s29 + $0x4] sm:$0x33 pattern:$0x75316420]  ;;  %9501 = vmatprep.subr.bf16.mxu1 %v10532_v1 }
  0xc2   : > { %v1708_v22 = vcombine.low %v1244_v34, %v1258_v5  ;;  %v1715_v25 = vrot.slane %v1707_v6, %v11231_v41  ;;  %v2560_v29 = vsel %vm11256_vm15, %v2325_v15, %v2559_v11  ;;  %291 = vst [vmem:[#allocation2 + $0x30] sm:$0x11] %v290_v27  ;;  %v2201_v30 = vshrl.u32 %v2153_v58, 16  ;;  %v10544_v50 = vld [vmem:[#allocation8 + $0xa8] sm:$0xff]   ;;  %v11412_v5 = vld [vmem:[%s11172_s13 + $0x10] sm:$0xf] }
  0xc3   : > { %v1699_v28 = vcombine.low %v1691_v12, %v1698_v14  ;;  %v2204_v32 = vshll.u32 %v2153_v58, 16  ;;  %v2333_v38 = vor.u32 %v2331_v10, %v11387_v26  ;;  %2561 = vst [vmem:[#allocation2 + $0xdc] sm:$0xf] %v2560_v29  ;;  %v2209_v46 = vshrl.u32 %v2154_v19, 16  ;;  %v2095_v58 = vld [vmem:[#allocation2 + $0xd8] sm:$0xf] }
  0xc4   : > { %v10499_v60 = vld [vmem:[#allocation2 + $0x18] ss:$8 sps:$4 sm:$0xff]   ;;  %v1722_v59 = vrot.slane %v1708_v22, %v11231_v41  ;;  %v2203_v45 = vrot.slane %v2201_v30, 7  ;;  %v2212_v48 = vshll.u32 %v2154_v19, 16  ;;  %v314_v53 = vsel %vm11197_vm7, 0, %v313_v16  ;;  %9502 = vmatpush3.bf16.msra.mxu1 %v10534_v35 }
  0xc5   : > { %v1706_v44 = vrot.slane %v1699_v28, %v11231_v41  ;;  %v2334_v52 = vsel %vm11248_vm14, %v2326_v17, %v2333_v38  ;;  %v2337_v54 = vshrl.u32 %v2169_v33, 16  ;;  %2983 = vmatmul.mubr.bf16.gmra.mrb[4].mxu0 %v10499_v60  ;;  %315 = vst [vmem:[#allocation2 + $0xf0] sm:$0x11] %v314_v53  ;;  %v11406_v40 = vrot.slane %v2209_v46, 7  ;;  %9503 = vmatprep.subr.bf16.mxu1 %v10542_v36 }
  0xc6   : > { %v1723_v51 = vcombine.low %v1715_v25, %v1722_v59  ;;  %2562 = vst [vmem:[#allocation2 + $0xe4] sm:$0xf] %v2334_v52  ;;  %v2206_v34 = vor.u32 %v2204_v32, %v2203_v45  ;;  %v2207_v49 = vrot.slane %v2203_v45, 4  ;;  %v2340_v62 = vshll.u32 %v2169_v33, 16  ;;  %v10553_v25 = vld [vmem:[#allocation8 + $0xb0] sm:$0xff]  }
  0xc7   : > { %v1946_v55 = vshrl.u32 %v1706_v44, 16  ;;  %v1949_v56 = vshll.u32 %v1706_v44, 16  ;;  %v2339_v61 = vrot.slane %v2337_v54, 7  ;;  %v2345_v1 = vshrl.u32 %v11397_v39, 16 }
  0xc8   : > { %v1730_v57 = vrot.slane %v1723_v51, %v11231_v41  ;;  %v293_v3 = vsel %vm11197_vm7, 0, %v292_v42  ;;  %v434_v4 = vcombine.high %v8853_v43, %v8853_v43  ;;  %v2214_v11 = vor.u32 %v2212_v48, %v11406_v40  ;;  %v11417_v14 = vld.sshfl [vmem:[%s11164_s29 + $0x14] sm:$0x33 pattern:$0x75316420]  ;;  %9504 = vmatpush3.bf16.msra.mxu1 %v10544_v50 }
  0xc9   : > { %v1948_v0 = vrot.slane %v1946_v55, 7  ;;  %v2046_v10 = vld [vmem:[#allocation2 + $0x30] sm:$0xf]  ;;  %v2348_v12 = vshll.u32 %v11397_v39, 16  ;;  %294 = vst [vmem:[#allocation2 + $0x48] sm:$0x11] %v293_v3  ;;  %v2342_v22 = vor.u32 %v2340_v62, %v2339_v61  ;;  %9505 = vmatprep.subr.bf16.mxu1 %v10551_v63  ;;  %v441_v33 = vrot.slane %v8853_v43, %v11208_v23 }
  0xca   : > { %v1954_v6 = vshrl.u32 %v1730_v57, 16  ;;  %v1957_v9 = vshll.u32 %v1730_v57, 16  ;;  %v2047_v19 = vsel %vm11256_vm15, %v11355_v18, %v2046_v10  ;;  %v2510_v16 = vld [vmem:[#allocation2 + $0x34] sm:$0xf]  ;;  %v2215_v28 = vsel %vm11248_vm14, %v2207_v49, %v2214_v11 }
  0xcb   : > { %v1951_v15 = vor.u32 %v1949_v56, %v1948_v0  ;;  %v1952_v17 = vrot.slane %v1948_v0, 4  ;;  %2048 = vst [vmem:[#allocation2 + $0x30] sm:$0xf] %v2047_v19  ;;  %v2511_v29 = vsel %vm11256_vm15, %v2206_v34, %v2510_v16  ;;  %v2343_v30 = vrot.slane %v2339_v61, 4  ;;  %2513 = vst [vmem:[#allocation2 + $0x3c] sm:$0xf] %v2215_v28 }
  0xcc   : > { %v11422_v27 = vrot.slane %v1954_v6, 7  ;;  %2512 = vst [vmem:[#allocation2 + $0x34] sm:$0xf] %v2511_v29  ;;  %v11430_v18 = vrot.slane %v2345_v1, 7  ;;  %v448_v35 = vrot.slane %v434_v4, %v11208_v23  ;;  %v2102_v24 = vld [vmem:[#allocation2 + $0xf0] sm:$0xf]  ;;  %v530_v43 = vcombine.high %v11417_v14, %v11417_v14  ;;  %9506 = vmatpush3.bf16.msra.mxu1 %v10553_v25 }
  0xcd   : > { %v2096_v32 = vsel %vm11256_vm15, %v1951_v15, %v2095_v58  ;;  %v2566_v60 = vld [vmem:[#allocation2 + $0xf4] sm:$0xf]  ;;  %v2218_v59 = vshrl.u32 %v11412_v5, 16  ;;  %v2103_v38 = vsel %vm11256_vm15, %v1951_v15, %v2102_v24  ;;  %v449_v45 = vcombine.high %v441_v33, %v441_v33  ;;  %v10563_v25 = vld [vmem:[#allocation8 + $0x178] sm:$0xff]  }
  0xce   : > { %v1959_v36 = vor.u32 %v1957_v9, %v11422_v27  ;;  %2097 = vst [vmem:[#allocation2 + $0xd8] sm:$0xf] %v2096_v32  ;;  %v2350_v39 = vor.u32 %v2348_v12, %v11430_v18  ;;  %v2567_v42 = vsel %vm11256_vm15, %v2342_v22, %v2566_v60  ;;  %2104 = vst [vmem:[#allocation2 + $0xf0] sm:$0xf] %v2103_v38  ;;  %v604_v48 = vunpack.i.h.s16 %v441_v33  ;;  %v10560_v12 = vld [vmem:[#allocation8 + $0xf8] sm:$0xff]  }
  0xcf   : > { %2568 = vst [vmem:[#allocation2 + $0xf4] sm:$0xf] %v2567_v42  ;;  %v450_v46 = vcombine.high %v448_v35, %v448_v35  ;;  %v606_v52 = vunpack.i.h.s16 %v448_v35  ;;  %v8864_v53 = vpack.i.b16 %v441_v33, %v441_v33  ;;  %v8865_v54 = vpack.i.b16 %v448_v35, %v448_v35  ;;  %v10562_v22 = vld [vmem:[#allocation8 + $0xb8] sm:$0xff]   ;;  %v2156_v35 = vld [vmem:[%s11172_s13 + $0x14] sm:$0xf]  ;;  %9507 = vmatprep.subr.bf16.mxu1 %v10560_v12  ;;  %v10567_v12 = vld [vmem:[#allocation8 + $0x240] sm:$0xff]  }
  0xd0   : > { %v1960_v44 = vsel %vm11248_vm14, %v1952_v17, %v1959_v36  ;;  %v2351_v51 = vsel %vm11248_vm14, %v2343_v30, %v2350_v39  ;;  %v608_v55 = vunpack.i.h.s16 %v449_v45  ;;  %v668_v34 = vpack.i.b16 %v604_v48, %v604_v48  ;;  %v10564_v28 = vld [vmem:[#allocation8 + $0x138] sm:$0xff]   ;;  %v10500_v36 = vld [vmem:[#allocation2 + $0xdc] ss:$8 sps:$4 sm:$0xff]   ;;  %9508 = vmatpush3.bf16.msra.mxu1 %v10562_v22  ;;  %9619 = vmatprep.subr.bf16.mxu0 %v10563_v25 }
  0xd1   : > { %2098 = vst [vmem:[#allocation2 + $0xe0] sm:$0xf] %v1960_v44  ;;  %2105 = vst [vmem:[#allocation2 + $0xf8] sm:$0xf] %v1960_v44  ;;  %v610_v56 = vunpack.i.h.s16 %v450_v46  ;;  %v8866_v49 = vpack.i.b16 %v449_v45, %v449_v45  ;;  %v670_v50 = vpack.i.b16 %v606_v52, %v606_v52  ;;  %v8867_v57 = vpack.i.b16 %v450_v46, %v450_v46 }
  0xd2   : > { %2569 = vst [vmem:[#allocation2 + $0xfc] sm:$0xf] %v2351_v51  ;;  %v758_v58 = vrot.slane %v8864_v53, %v11216_v31  ;;  %v766_v61 = vrot.slane %v8865_v54, %v11216_v31  ;;  %v672_v63 = vpack.i.b16 %v608_v55, %v608_v55  ;;  %v762_v1 = vrot.slane %v668_v34, %v11216_v31  ;;  %v10509_v4 = vld [vmem:[#allocation2 + $0x30] ss:$8 sps:$4 sm:$0xff]  }
  0xd3   : > { %v10507_v62 = vld [vmem:[#allocation2 + $0x34] ss:$8 sps:$4 sm:$0xff]   ;;  %v674_v0 = vpack.i.b16 %v610_v56, %v610_v56  ;;  %v774_v3 = vrot.slane %v8866_v49, %v11216_v31  ;;  %v770_v6 = vrot.slane %v670_v50, %v11216_v31  ;;  %v782_v9 = vrot.slane %v8867_v57, %v11216_v31  ;;  %3046 = vmatprep.mubr.bf16.mxu1 %v10500_v36  ;;  %v316_v56 = vld [vmem:[#allocation2 + $0x108] sm:$0x11] }
  0xd4   : > { %v1036_v10 = vpack.i.b16 %v758_v58, %v758_v58  ;;  %v1050_v11 = vpack.i.b16 %v766_v61, %v766_v61  ;;  %2990 = vmatprep.mubr.bf16.mxu0 %v10507_v62  ;;  %v778_v15 = vrot.slane %v672_v63, %v11216_v31  ;;  %v1043_v19 = vpack.i.b16 %v762_v1, %v762_v1  ;;  %v10565_v34 = vld [vmem:[#allocation8 + $0x1c0] sm:$0xff]  }
  0xd5   : > { %v786_v17 = vrot.slane %v674_v0, %v11216_v31  ;;  %v1064_v16 = vpack.i.b16 %v774_v3, %v774_v3  ;;  %2991 = vmatmul.mubr.bf16.gmra.mrb[8].mxu0 %v10509_v4  ;;  %v1057_v32 = vpack.i.b16 %v770_v6, %v770_v6  ;;  %v1078_v33 = vpack.i.b16 %v782_v9, %v782_v9 }
  0xd6   : > { %v1041_v29 = vrot.slane %v1036_v10, %v11216_v31  ;;  %v1055_v30 = vrot.slane %v1050_v11, %v11216_v31  ;;  %v1048_v60 = vrot.slane %v1043_v19, %v11216_v31  ;;  %v1071_v39 = vpack.i.b16 %v778_v15, %v778_v15  ;;  %9620 = vmatpush3.bf16.msra.mxu0 %v10564_v28 }
  0xd7   : > { %v1069_v38 = vrot.slane %v1064_v16, %v11216_v31  ;;  %v1085_v42 = vpack.i.b16 %v786_v17, %v786_v17  ;;  %v1062_v45 = vrot.slane %v1057_v32, %v11216_v31  ;;  %v1083_v46 = vrot.slane %v1078_v33, %v11216_v31  ;;  %9717 = vmatprep.subr.bf16.mxu1 %v10565_v34 }
  0xd8   : > { %v10503_v24 = vld [vmem:[#allocation2 + $0xd8] ss:$8 sps:$4 sm:$0xff]   ;;  %v1539_v48 = vcombine.low %v1041_v29, %v1055_v30  ;;  %v2220_v51 = vrot.slane %v2218_v59, 7  ;;  %v1076_v52 = vrot.slane %v1071_v39, %v11216_v31  ;;  %v2221_v54 = vshll.u32 %v11412_v5, 16  ;;  %v2517_v59 = vld [vmem:[#allocation2 + $0x4c] sm:$0xf]  ;;  %9829 = vmatprep.subr.bf16.mxu0 %v10567_v12 }
  0xd9   : > { %v10510_v44 = vld [vmem:[#allocation2 + $0xf4] ss:$8 sps:$4 sm:$0xff]   ;;  %v1090_v53 = vrot.slane %v1085_v42, %v11216_v31  ;;  %v2226_v55 = vshrl.u32 %v2156_v35, 16  ;;  %3047 = vmatmul.mubr.bf16.gmra.mrb[4].mxu1 %v10503_v24  ;;  %v1540_v49 = vcombine.low %v1048_v60, %v1062_v45  ;;  %v1563_v57 = vcombine.low %v1069_v38, %v1083_v46  ;;  %v10513_v6 = vld [vmem:[#allocation2 + $0xf0] ss:$8 sps:$4 sm:$0xff]  }
  0xda   : > { %v1547_v50 = vrot.slane %v1539_v48, %v11231_v41  ;;  %v2224_v58 = vrot.slane %v2220_v51, 4  ;;  %3054 = vmatprep.mubr.bf16.mxu1 %v10510_v44  ;;  %v2223_v62 = vor.u32 %v2221_v54, %v2220_v51  ;;  %v2229_v0 = vshll.u32 %v2156_v35, 16  ;;  %v2171_v54 = vld [vmem:[%s11172_s13 + $0x50] sm:$0xf] }
  0xdb   : > { %v1564_v61 = vcombine.low %v1076_v52, %v1090_v53  ;;  %v11468_v63 = vrot.slane %v2226_v55, 7  ;;  %v1554_v5 = vrot.slane %v1540_v49, %v11231_v41  ;;  %v1571_v1 = vrot.slane %v1563_v57, %v11231_v41 }
  0xdc   : > { %v317_v3 = vsel %vm11197_vm7, 0, %v316_v56  ;;  %v537_v4 = vrot.slane %v11417_v14, %v11208_v23  ;;  %v2518_v11 = vsel %vm11256_vm15, %v2223_v62, %v2517_v59  ;;  %v544_v17 = vrot.slane %v530_v43, %v11208_v23  ;;  %v2053_v56 = vld [vmem:[#allocation2 + $0x48] sm:$0xf] }
  0xdd   : > { %v1578_v9 = vrot.slane %v1564_v61, %v11231_v41  ;;  %v2231_v10 = vor.u32 %v2229_v0, %v11468_v63  ;;  %318 = vst [vmem:[#allocation2 + $0x108] sm:$0x11] %v317_v3  ;;  %v1555_v15 = vcombine.low %v1547_v50, %v1554_v5  ;;  %2519 = vst [vmem:[#allocation2 + $0x4c] sm:$0xf] %v2518_v11 }
  0xde   : > { %v545_v19 = vcombine.high %v537_v4, %v537_v4  ;;  %v636_v16 = vunpack.i.h.s16 %v537_v4  ;;  %v8880_v28 = vpack.i.b16 %v537_v4, %v537_v4  ;;  %v546_v30 = vcombine.high %v544_v17, %v544_v17 }
  0xdf   : > { %v1579_v22 = vcombine.low %v1571_v1, %v1578_v9  ;;  %v2232_v25 = vsel %vm11248_vm14, %v2224_v58, %v2231_v10  ;;  %v1562_v29 = vrot.slane %v1555_v15, %v11231_v41  ;;  %v638_v32 = vunpack.i.h.s16 %v544_v17 }
  0xe0   : > { %2520 = vst [vmem:[#allocation2 + $0x54] sm:$0xf] %v2232_v25  ;;  %v640_v33 = vunpack.i.h.s16 %v545_v19  ;;  %v700_v36 = vpack.i.b16 %v636_v16, %v636_v16  ;;  %v8881_v14 = vpack.i.b16 %v544_v17, %v544_v17  ;;  %v8882_v43 = vpack.i.b16 %v545_v19, %v545_v19  ;;  %v2172_v17 = vld [vmem:[%s11172_s13 + $0x54] sm:$0xf] }
  0xe1   : > { %v1586_v35 = vrot.slane %v1579_v22, %v11231_v41  ;;  %3055 = vmatmul.mubr.bf16.gmra.mrb[8].mxu1 %v10513_v6  ;;  %v1895_v24 = vshrl.u32 %v1562_v29, 16  ;;  %v1898_v60 = vshll.u32 %v1562_v29, 16  ;;  %v642_v38 = vunpack.i.h.s16 %v546_v30 }
  0xe2   : > { %v702_v39 = vpack.i.b16 %v638_v32, %v638_v32  ;;  %v704_v45 = vpack.i.b16 %v640_v33, %v640_v33  ;;  %v8883_v46 = vpack.i.b16 %v546_v30, %v546_v30  ;;  %v886_v52 = vrot.slane %v8880_v28, %v11216_v31  ;;  %v295_v28 = vld [vmem:[#allocation2 + $0x60] sm:$0x11] }
  0xe3   : > { %v1903_v42 = vshrl.u32 %v1586_v35, 16  ;;  %v1906_v44 = vshll.u32 %v1586_v35, 16  ;;  %v1897_v48 = vrot.slane %v1895_v24, 7  ;;  %v706_v51 = vpack.i.b16 %v642_v38, %v642_v38 }
  0xe4   : > { %v890_v53 = vrot.slane %v700_v36, %v11216_v31  ;;  %v894_v34 = vrot.slane %v8881_v14, %v11216_v31  ;;  %v898_v49 = vrot.slane %v702_v39, %v11216_v31  ;;  %v902_v50 = vrot.slane %v8882_v43, %v11216_v31  ;;  %v2573_v24 = vld [vmem:[#allocation2 + $0x10c] sm:$0xf] }
  0xe5   : > { %v11491_v55 = vrot.slane %v1903_v42, 7  ;;  %v11496_v57 = vor.u32 %v1898_v60, %v1897_v48  ;;  %v1901_v58 = vrot.slane %v1897_v48, 4  ;;  %v906_v59 = vrot.slane %v704_v45, %v11216_v31  ;;  %v2157_v60 = vld [vmem:[%s11172_s13 + $0x18] sm:$0xf]  ;;  %v2158_v45 = vld [vmem:[%s11172_s13 + $0x1c] sm:$0xf] }
  0xe6   : > { %v910_v61 = vrot.slane %v8883_v46, %v11216_v31  ;;  %v914_v0 = vrot.slane %v706_v51, %v11216_v31  ;;  %v1260_v5 = vpack.i.b16 %v886_v52, %v886_v52  ;;  %v2354_v1 = vshrl.u32 %v2171_v54, 16 }
  0xe7   : > { %v1908_v62 = vor.u32 %v1906_v44, %v11491_v55  ;;  %v2054_v3 = vsel %vm11256_vm15, %v11496_v57, %v2053_v56  ;;  %v1267_v4 = vpack.i.b16 %v890_v53, %v890_v53  ;;  %v1274_v6 = vpack.i.b16 %v894_v34, %v894_v34 }
  0xe8   : > { %v1281_v9 = vpack.i.b16 %v898_v49, %v898_v49  ;;  %2055 = vst [vmem:[#allocation2 + $0x48] sm:$0xf] %v2054_v3  ;;  %v1265_v11 = vrot.slane %v1260_v5, %v11216_v31  ;;  %v1288_v12 = vpack.i.b16 %v902_v50, %v902_v50  ;;  %v1295_v15 = vpack.i.b16 %v906_v59, %v906_v59 }
  0xe9   : > { %v1909_v10 = vsel %vm11248_vm14, %v1901_v58, %v1908_v62  ;;  %v1272_v19 = vrot.slane %v1267_v4, %v11216_v31  ;;  %v1279_v16 = vrot.slane %v1274_v6, %v11216_v31  ;;  %v1302_v25 = vpack.i.b16 %v910_v61, %v910_v61  ;;  %v319_v61 = vld [vmem:[#allocation2 + $0x120] sm:$0x11]  ;;  %v2173_v62 = vld [vmem:[%s11172_s13 + $0x58] sm:$0xf]  ;;  %v2174_v4 = vld [vmem:[%s11172_s13 + $0x5c] sm:$0xf] }
  0xea   : > { %2056 = vst [vmem:[#allocation2 + $0x50] sm:$0xf] %v1909_v10  ;;  %2063 = vst [vmem:[#allocation2 + $0x68] sm:$0xf] %v1909_v10  ;;  %v1286_v22 = vrot.slane %v1281_v9, %v11216_v31  ;;  %v1293_v29 = vrot.slane %v1288_v12, %v11216_v31  ;;  %v1300_v30 = vrot.slane %v1295_v15, %v11216_v31  ;;  %v2356_v33 = vrot.slane %v2354_v1, 7 }
  0xeb   : > { %v1309_v32 = vpack.i.b16 %v914_v0, %v914_v0  ;;  %v1307_v35 = vrot.slane %v1302_v25, %v11216_v31  ;;  %v1731_v36 = vcombine.low %v1265_v11, %v1279_v16  ;;  %v2357_v43 = vshll.u32 %v2171_v54, 16  ;;  %v10517_v0 = vld [vmem:[#allocation2 + $0x4c] ss:$8 sps:$4 sm:$0xff]   ;;  %v298_v15 = vld [vmem:[#allocation2 + $0x78] sm:$0x11] }
  0xec   : > { %v1732_v14 = vcombine.low %v1272_v19, %v1286_v22  ;;  %v2360_v39 = vrot.slane %v2356_v33, 4  ;;  %v2362_v42 = vshrl.u32 %v2172_v17, 16  ;;  %v2365_v44 = vshll.u32 %v2172_v17, 16  ;;  %2998 = vmatprep.mubr.bf16.mxu0 %v10517_v0 }
  0xed   : > { %v1314_v38 = vrot.slane %v1309_v32, %v11216_v31  ;;  %v1739_v46 = vrot.slane %v1731_v36, %v11231_v41  ;;  %v1755_v51 = vcombine.low %v1293_v29, %v1307_v35  ;;  %v2359_v52 = vor.u32 %v2357_v43, %v2356_v33  ;;  %v8854_v6 = vld.sshfl [vmem:[%s11164_s29 + $0x8] sm:$0x33 pattern:$0x75316420]  ;;  %v2109_v33 = vld [vmem:[#allocation2 + $0x108] sm:$0xf] }
  0xee   : > { %v1746_v48 = vrot.slane %v1732_v14, %v11231_v41  ;;  %v11520_v56 = vrot.slane %v2362_v42, 7  ;;  %v296_v54 = vsel %vm11197_vm7, 0, %v295_v28  ;;  %v2235_v34 = vshrl.u32 %v2157_v60, 16 }
  0xef   : > { %v1756_v53 = vcombine.low %v1300_v30, %v1314_v38  ;;  %v1763_v50 = vrot.slane %v1755_v51, %v11231_v41  ;;  %v2574_v58 = vsel %vm11256_vm15, %v2359_v52, %v2573_v24  ;;  %297 = vst [vmem:[#allocation2 + $0x60] sm:$0x11] %v296_v54  ;;  %v2238_v59 = vshll.u32 %v2157_v60, 16 }
  0xf0   : > { %v1747_v49 = vcombine.low %v1739_v46, %v1746_v48  ;;  %v2367_v3 = vor.u32 %v2365_v44, %v11520_v56  ;;  %2575 = vst [vmem:[#allocation2 + $0x10c] sm:$0xf] %v2574_v58  ;;  %v2237_v10 = vrot.slane %v2235_v34, 7  ;;  %v2243_v11 = vshrl.u32 %v2158_v45, 16 }
  0xf1   : > { %v10519_v5 = vld [vmem:[#allocation2 + $0x48] ss:$8 sps:$4 sm:$0xff]   ;;  %v1770_v1 = vrot.slane %v1756_v53, %v11231_v41  ;;  %v2246_v12 = vshll.u32 %v2158_v45, 16  ;;  %v320_v16 = vsel %vm11197_vm7, 0, %v319_v61  ;;  %v2371_v22 = vshrl.u32 %v2173_v62, 16 }
  0xf2   : > { %v1754_v9 = vrot.slane %v1747_v49, %v11231_v41  ;;  %v2368_v19 = vsel %vm11248_vm14, %v2360_v39, %v2367_v3  ;;  %2999 = vmatmul.mubr.bf16.gmra.mrb[12].mxu0 %v10519_v5  ;;  %v2240_v29 = vor.u32 %v2238_v59, %v2237_v10  ;;  %v2241_v30 = vrot.slane %v2237_v10, 4  ;;  %321 = vst [vmem:[#allocation2 + $0x120] sm:$0x11] %v320_v16  ;;  %v11543_v39 = vld [vmem:[%s11172_s13 + $0x20] sm:$0xf] }
  0xf3   : > { %v1771_v17 = vcombine.low %v1763_v50, %v1770_v1  ;;  %2576 = vst [vmem:[#allocation2 + $0x114] sm:$0xf] %v2368_v19  ;;  %v11538_v35 = vrot.slane %v2243_v11, 7  ;;  %v2373_v36 = vrot.slane %v2371_v22, 7  ;;  %v2374_v14 = vshll.u32 %v2173_v62, 16 }
  0xf4   : > { %v1963_v25 = vshrl.u32 %v1754_v9, 16  ;;  %v1966_v28 = vshll.u32 %v1754_v9, 16  ;;  %v2379_v24 = vshrl.u32 %v2174_v4, 16  ;;  %v299_v60 = vsel %vm11197_vm7, 0, %v298_v15 }
  0xf5   : > { %v1778_v32 = vrot.slane %v1771_v17, %v11231_v41  ;;  %v458_v38 = vcombine.high %v8854_v6, %v8854_v6  ;;  %v2248_v46 = vor.u32 %v2246_v12, %v11538_v35  ;;  %v2382_v48 = vshll.u32 %v2174_v4, 16  ;;  %300 = vst [vmem:[#allocation2 + $0x78] sm:$0x11] %v299_v60 }
  0xf6   : > { %v1965_v43 = vrot.slane %v1963_v25, 7  ;;  %v2060_v45 = vld [vmem:[#allocation2 + $0x60] sm:$0xf]  ;;  %v2524_v34 = vld [vmem:[#allocation2 + $0x64] sm:$0xf]  ;;  %v2376_v49 = vor.u32 %v2374_v14, %v2373_v36  ;;  %v2377_v61 = vrot.slane %v2373_v36, 4 }
  0xf7   : > { %v1971_v42 = vshrl.u32 %v1778_v32, 16  ;;  %v1974_v44 = vshll.u32 %v1778_v32, 16  ;;  %v11547_v51 = vld.sshfl [vmem:[%s11164_s29 + $0x18] sm:$0x33 pattern:$0x75316420]  ;;  %v2061_v54 = vsel %vm11256_vm15, %v11496_v57, %v2060_v45  ;;  %v2249_v58 = vsel %vm11248_vm14, %v2241_v30, %v2248_v46 }
  0xf8   : > { %v1968_v52 = vor.u32 %v1966_v28, %v1965_v43  ;;  %v1969_v53 = vrot.slane %v1965_v43, 4  ;;  %2062 = vst [vmem:[#allocation2 + $0x60] sm:$0xf] %v2061_v54  ;;  %v2525_v59 = vsel %vm11256_vm15, %v2240_v29, %v2524_v34  ;;  %2527 = vst [vmem:[#allocation2 + $0x6c] sm:$0xf] %v2249_v58  ;;  %v11560_v0 = vrot.slane %v2379_v24, 7 }
  0xf9   : > { %v11552_v50 = vrot.slane %v1971_v42, 7  ;;  %2526 = vst [vmem:[#allocation2 + $0x64] sm:$0xf] %v2525_v59  ;;  %v465_v57 = vrot.slane %v8854_v6, %v11208_v23  ;;  %v472_v5 = vrot.slane %v458_v38, %v11208_v23  ;;  %v2116_v3 = vld [vmem:[#allocation2 + $0x120] sm:$0xf]  ;;  %v2252_v9 = vshrl.u32 %v11543_v39, 16 }
  0xfa   : > { %v2110_v62 = vsel %vm11256_vm15, %v1968_v52, %v2109_v33  ;;  %v2580_v4 = vld [vmem:[#allocation2 + $0x124] sm:$0xf]  ;;  %v2117_v10 = vsel %vm11256_vm15, %v1968_v52, %v2116_v3  ;;  %v2384_v11 = vor.u32 %v2382_v48, %v11560_v0  ;;  %v554_v6 = vcombine.high %v11547_v51, %v11547_v51 }
  0xfb   : > { %v1976_v1 = vor.u32 %v1974_v44, %v11552_v50  ;;  %2111 = vst [vmem:[#allocation2 + $0x108] sm:$0xf] %v2110_v62  ;;  %v2581_v12 = vsel %vm11256_vm15, %v2376_v49, %v2580_v4  ;;  %2118 = vst [vmem:[#allocation2 + $0x120] sm:$0xf] %v2117_v10  ;;  %v473_v17 = vcombine.high %v465_v57, %v465_v57  ;;  %v612_v16 = vunpack.i.h.s16 %v465_v57  ;;  %v2160_v62 = vld [vmem:[%s11172_s13 + $0x24] sm:$0xf] }
  0xfc   : > { %2582 = vst [vmem:[#allocation2 + $0x124] sm:$0xf] %v2581_v12  ;;  %v474_v19 = vcombine.high %v472_v5, %v472_v5  ;;  %v2385_v22 = vsel %vm11248_vm14, %v2377_v61, %v2384_v11  ;;  %v614_v25 = vunpack.i.h.s16 %v472_v5  ;;  %v8868_v28 = vpack.i.b16 %v465_v57, %v465_v57  ;;  %v10520_v4 = vld [vmem:[#allocation2 + $0x10c] ss:$8 sps:$4 sm:$0xff]  }
  0xfd   : > { %v1977_v15 = vsel %vm11248_vm14, %v1969_v53, %v1976_v1  ;;  %v8869_v29 = vpack.i.b16 %v472_v5, %v472_v5  ;;  %2583 = vst [vmem:[#allocation2 + $0x12c] sm:$0xf] %v2385_v22  ;;  %v616_v30 = vunpack.i.h.s16 %v473_v17  ;;  %v676_v33 = vpack.i.b16 %v612_v16, %v612_v16  ;;  %3062 = vmatprep.mubr.bf16.mxu1 %v10520_v4 }
  0xfe   : > { %2112 = vst [vmem:[#allocation2 + $0x110] sm:$0xf] %v1977_v15  ;;  %2119 = vst [vmem:[#allocation2 + $0x128] sm:$0xf] %v1977_v15  ;;  %v618_v32 = vunpack.i.h.s16 %v474_v19  ;;  %v8870_v36 = vpack.i.b16 %v473_v17, %v473_v17  ;;  %v678_v14 = vpack.i.b16 %v614_v25, %v614_v25  ;;  %v8871_v43 = vpack.i.b16 %v474_v19, %v474_v19  ;;  %v322_v19 = vld [vmem:[#allocation2 + $0x138] sm:$0x11] }
  0xff   : > { %v790_v24 = vrot.slane %v8868_v28, %v11216_v31  ;;  %v798_v60 = vrot.slane %v8869_v29, %v11216_v31  ;;  %v680_v42 = vpack.i.b16 %v616_v30, %v616_v30  ;;  %v794_v45 = vrot.slane %v676_v33, %v11216_v31  ;;  %v10529_v48 = vld [vmem:[#allocation2 + $0x60] ss:$8 sps:$4 sm:$0xff]   ;;  %v2531_v30 = vld [vmem:[#allocation2 + $0x7c] sm:$0xf] }
 0x100   : > { %v10527_v38 = vld [vmem:[#allocation2 + $0x64] ss:$8 sps:$4 sm:$0xff]   ;;  %v682_v44 = vpack.i.b16 %v618_v32, %v618_v32  ;;  %v806_v46 = vrot.slane %v8870_v36, %v11216_v31  ;;  %v802_v52 = vrot.slane %v678_v14, %v11216_v31  ;;  %v814_v53 = vrot.slane %v8871_v43, %v11216_v31 }
 0x101   : > { %v1092_v54 = vpack.i.b16 %v790_v24, %v790_v24  ;;  %v1106_v34 = vpack.i.b16 %v798_v60, %v798_v60  ;;  %3006 = vmatprep.mubr.bf16.mxu0 %v10527_v38  ;;  %v810_v49 = vrot.slane %v680_v42, %v11216_v31  ;;  %v1099_v59 = vpack.i.b16 %v794_v45, %v794_v45 }
 0x102   : > { %v818_v58 = vrot.slane %v682_v44, %v11216_v31  ;;  %v1120_v61 = vpack.i.b16 %v806_v46, %v806_v46  ;;  %3007 = vmatmul.mubr.bf16.gmra.mrb[16].mxu0 %v10529_v48  ;;  %v1113_v1 = vpack.i.b16 %v802_v52, %v802_v52  ;;  %v1134_v3 = vpack.i.b16 %v814_v53, %v814_v53 }
 0x103   : > { %v1097_v57 = vrot.slane %v1092_v54, %v11216_v31  ;;  %v1111_v5 = vrot.slane %v1106_v34, %v11216_v31  ;;  %v1104_v11 = vrot.slane %v1099_v59, %v11216_v31  ;;  %v1127_v15 = vpack.i.b16 %v810_v49, %v810_v49 }
 0x104   : > { %v1125_v12 = vrot.slane %v1120_v61, %v11216_v31  ;;  %v1141_v17 = vpack.i.b16 %v818_v58, %v818_v58  ;;  %v10530_v16 = vld [vmem:[#allocation2 + $0x124] ss:$8 sps:$4 sm:$0xff]   ;;  %v1118_v22 = vrot.slane %v1113_v1, %v11216_v31  ;;  %v1139_v25 = vrot.slane %v1134_v3, %v11216_v31 }
 0x105   : > { %v10523_v10 = vld [vmem:[#allocation2 + $0x108] ss:$8 sps:$4 sm:$0xff]   ;;  %v1587_v28 = vcombine.low %v1097_v57, %v1111_v5  ;;  %v2254_v29 = vrot.slane %v2252_v9, 7  ;;  %v1132_v32 = vrot.slane %v1127_v15, %v11216_v31  ;;  %v2255_v36 = vshll.u32 %v11543_v39, 16 }
 0x106   : > { %v1146_v33 = vrot.slane %v1141_v17, %v11216_v31  ;;  %v2260_v14 = vshrl.u32 %v2160_v62, 16  ;;  %3063 = vmatmul.mubr.bf16.gmra.mrb[12].mxu1 %v10523_v10  ;;  %v1588_v43 = vcombine.low %v1104_v11, %v1118_v22  ;;  %v1611_v60 = vcombine.low %v1125_v12, %v1139_v25  ;;  %v10533_v58 = vld [vmem:[#allocation2 + $0x120] ss:$8 sps:$4 sm:$0xff]  }
 0x107   : > { %v1595_v24 = vrot.slane %v1587_v28, %v11231_v41  ;;  %v2258_v38 = vrot.slane %v2254_v29, 4  ;;  %3070 = vmatprep.mubr.bf16.mxu1 %v10530_v16  ;;  %v2257_v44 = vor.u32 %v2255_v36, %v2254_v29  ;;  %v2263_v9 = vshll.u32 %v2160_v62, 16 }
 0x108   : > { %v1612_v42 = vcombine.low %v1132_v32, %v1146_v33  ;;  %v11596_v45 = vrot.slane %v2260_v14, 7  ;;  %v1602_v46 = vrot.slane %v1588_v43, %v11231_v41  ;;  %v1619_v48 = vrot.slane %v1611_v60, %v11231_v41  ;;  %v2175_v60 = vld [vmem:[%s11172_s13 + $0x60] sm:$0xf] }
 0x109   : > { %v323_v39 = vsel %vm11197_vm7, 0, %v322_v19  ;;  %v561_v52 = vrot.slane %v11547_v51, %v11208_v23  ;;  %v2199_v53 = vrot.slane %v11337_v37, 4  ;;  %v2532_v49 = vsel %vm11256_vm15, %v2257_v44, %v2531_v30 }
 0x10a   : > { %v1626_v54 = vrot.slane %v1612_v42, %v11231_v41  ;;  %v2265_v34 = vor.u32 %v2263_v9, %v11596_v45  ;;  %324 = vst [vmem:[#allocation2 + $0x138] sm:$0x11] %v323_v39  ;;  %v1603_v59 = vcombine.low %v1595_v24, %v1602_v46  ;;  %2533 = vst [vmem:[#allocation2 + $0x7c] sm:$0xf] %v2532_v49  ;;  %v1893_v5 = vrot.slane %v11357_v21, 4 }
 0x10b   : > { %v568_v61 = vrot.slane %v554_v6, %v11208_v23  ;;  %v569_v62 = vcombine.high %v561_v52, %v561_v52  ;;  %v644_v57 = vunpack.i.h.s16 %v561_v52  ;;  %v8884_v4 = vpack.i.b16 %v561_v52, %v561_v52  ;;  %v2067_v42 = vld [vmem:[#allocation2 + $0x78] sm:$0xf] }
 0x10c   : > { %v1627_v1 = vcombine.low %v1619_v48, %v1626_v54  ;;  %v2266_v3 = vsel %vm11248_vm14, %v2258_v38, %v2265_v34  ;;  %v1610_v10 = vrot.slane %v1603_v59, %v11231_v41  ;;  %v2388_v59 = vshrl.u32 %v2175_v60, 16 }
 0x10d   : > { %2534 = vst [vmem:[#allocation2 + $0x84] sm:$0xf] %v2266_v3  ;;  %v570_v11 = vcombine.high %v568_v61, %v568_v61  ;;  %v646_v12 = vunpack.i.h.s16 %v568_v61  ;;  %v648_v15 = vunpack.i.h.s16 %v569_v62  ;;  %v708_v19 = vpack.i.b16 %v644_v57, %v644_v57 }
 0x10e   : > { %v1634_v17 = vrot.slane %v1627_v1, %v11231_v41  ;;  %v8885_v51 = vpack.i.b16 %v568_v61, %v568_v61  ;;  %v8886_v6 = vpack.i.b16 %v569_v62, %v569_v62  ;;  %3071 = vmatmul.mubr.bf16.gmra.mrb[16].mxu1 %v10533_v58  ;;  %v1912_v16 = vshrl.u32 %v1610_v10, 16 }
 0x10f   : > { %v1915_v22 = vshll.u32 %v1610_v10, 16  ;;  %v650_v25 = vunpack.i.h.s16 %v570_v11  ;;  %v710_v28 = vpack.i.b16 %v646_v12, %v646_v12  ;;  %v712_v32 = vpack.i.b16 %v648_v15, %v648_v15  ;;  %v2176_v12 = vld [vmem:[%s11172_s13 + $0x64] sm:$0xf] }
 0x110   : > { %v1920_v29 = vshrl.u32 %v1634_v17, 16  ;;  %v1923_v30 = vshll.u32 %v1634_v17, 16  ;;  %v8887_v33 = vpack.i.b16 %v570_v11, %v570_v11  ;;  %v1914_v36 = vrot.slane %v1912_v16, 7  ;;  %v2161_v16 = vld [vmem:[%s11172_s13 + $0x28] sm:$0xf] }
 0x111   : > { %v714_v14 = vpack.i.b16 %v650_v25, %v650_v25  ;;  %v918_v43 = vrot.slane %v8884_v4, %v11216_v31  ;;  %v922_v24 = vrot.slane %v708_v19, %v11216_v31  ;;  %v926_v44 = vrot.slane %v8885_v51, %v11216_v31 }
 0x112   : > { %v11621_v38 = vrot.slane %v1920_v29, 7  ;;  %v930_v9 = vrot.slane %v710_v28, %v11216_v31  ;;  %v934_v46 = vrot.slane %v8886_v6, %v11216_v31  ;;  %v11626_v48 = vor.u32 %v1915_v22, %v1914_v36  ;;  %v301_v6 = vld [vmem:[#allocation2 + $0x90] sm:$0x11] }
 0x113   : > { %v1918_v39 = vrot.slane %v1914_v36, 4  ;;  %v938_v52 = vrot.slane %v712_v32, %v11216_v31  ;;  %v942_v54 = vrot.slane %v8887_v33, %v11216_v31  ;;  %v946_v49 = vrot.slane %v714_v14, %v11216_v31 }
 0x114   : > { %v1925_v34 = vor.u32 %v1923_v30, %v11621_v38  ;;  %v1316_v58 = vpack.i.b16 %v918_v43, %v918_v43  ;;  %v2068_v61 = vsel %vm11256_vm15, %v11626_v48, %v2067_v42  ;;  %v1323_v62 = vpack.i.b16 %v922_v24, %v922_v24  ;;  %v2587_v30 = vld [vmem:[#allocation2 + $0x13c] sm:$0xf] }
 0x115   : > { %v1330_v57 = vpack.i.b16 %v926_v44, %v926_v44  ;;  %v1337_v1 = vpack.i.b16 %v930_v9, %v930_v9  ;;  %2069 = vst [vmem:[#allocation2 + $0x78] sm:$0xf] %v2068_v61  ;;  %v1344_v10 = vpack.i.b16 %v934_v46, %v934_v46  ;;  %v1351_v11 = vpack.i.b16 %v938_v52, %v938_v52 }
 0x116   : > { %v1926_v3 = vsel %vm11248_vm14, %v1918_v39, %v1925_v34  ;;  %v1321_v4 = vrot.slane %v1316_v58, %v11216_v31  ;;  %v1328_v15 = vrot.slane %v1323_v62, %v11216_v31  ;;  %v1358_v51 = vpack.i.b16 %v942_v54, %v942_v54  ;;  %v2162_v58 = vld [vmem:[%s11172_s13 + $0x2c] sm:$0xf] }
 0x117   : > { %2070 = vst [vmem:[#allocation2 + $0x80] sm:$0xf] %v1926_v3  ;;  %2077 = vst [vmem:[#allocation2 + $0x98] sm:$0xf] %v1926_v3  ;;  %v1335_v17 = vrot.slane %v1330_v57, %v11216_v31  ;;  %v1342_v19 = vrot.slane %v1337_v1, %v11216_v31  ;;  %v1349_v22 = vrot.slane %v1344_v10, %v11216_v31  ;;  %v2390_v29 = vrot.slane %v2388_v59, 7 }
 0x118   : > { %v1356_v25 = vrot.slane %v1351_v11, %v11216_v31  ;;  %v1365_v28 = vpack.i.b16 %v946_v49, %v946_v49  ;;  %v1363_v32 = vrot.slane %v1358_v51, %v11216_v31  ;;  %v2391_v14 = vshll.u32 %v2175_v60, 16  ;;  %v325_v1 = vld [vmem:[#allocation2 + $0x150] sm:$0x11]  ;;  %v2177_v3 = vld [vmem:[%s11172_s13 + $0x68] sm:$0xf] }
 0x119   : > { %v1779_v33 = vcombine.low %v1321_v4, %v1335_v17  ;;  %v1780_v36 = vcombine.low %v1328_v15, %v1342_v19  ;;  %v2394_v24 = vrot.slane %v2390_v29, 4  ;;  %v2396_v42 = vshrl.u32 %v2176_v12, 16  ;;  %v10537_v10 = vld [vmem:[#allocation2 + $0x7c] ss:$8 sps:$4 sm:$0xff]  }
 0x11a   : > { %v1370_v43 = vrot.slane %v1365_v28, %v11216_v31  ;;  %v2399_v44 = vshll.u32 %v2176_v12, 16  ;;  %v1803_v39 = vcombine.low %v1349_v22, %v1363_v32  ;;  %v2393_v52 = vor.u32 %v2391_v14, %v2390_v29  ;;  %v2178_v22 = vld [vmem:[%s11172_s13 + $0x6c] sm:$0xf]  ;;  %3014 = vmatprep.mubr.bf16.mxu0 %v10537_v10  ;;  %v304_v32 = vld [vmem:[#allocation2 + $0xa8] sm:$0x11] }
 0x11b   : > { %v1787_v9 = vrot.slane %v1779_v33, %v11231_v41  ;;  %v1794_v46 = vrot.slane %v1780_v36, %v11231_v41  ;;  %v11649_v34 = vrot.slane %v2396_v42, 7  ;;  %v302_v49 = vsel %vm11197_vm7, 0, %v301_v6 }
 0x11c   : > { %v1804_v54 = vcombine.low %v1356_v25, %v1370_v43  ;;  %v2269_v60 = vshrl.u32 %v2161_v16, 16  ;;  %v1811_v61 = vrot.slane %v1803_v39, %v11231_v41  ;;  %v2588_v62 = vsel %vm11256_vm15, %v2393_v52, %v2587_v30  ;;  %303 = vst [vmem:[#allocation2 + $0x90] sm:$0x11] %v302_v49 }
 0x11d   : > { %v1795_v59 = vcombine.low %v1787_v9, %v1794_v46  ;;  %v2272_v57 = vshll.u32 %v2161_v16, 16  ;;  %v2401_v15 = vor.u32 %v2399_v44, %v11649_v34  ;;  %2589 = vst [vmem:[#allocation2 + $0x13c] sm:$0xf] %v2588_v62  ;;  %v2277_v51 = vshrl.u32 %v2162_v58, 16 }
 0x11e   : > { %v10539_v11 = vld [vmem:[#allocation2 + $0x78] ss:$8 sps:$4 sm:$0xff]   ;;  %v1818_v12 = vrot.slane %v1804_v54, %v11231_v41  ;;  %v2271_v19 = vrot.slane %v2269_v60, 7  ;;  %v2280_v6 = vshll.u32 %v2162_v58, 16  ;;  %v326_v29 = vsel %vm11197_vm7, 0, %v325_v1 }
 0x11f   : > { %v1802_v17 = vrot.slane %v1795_v59, %v11231_v41  ;;  %v11664_v25 = vld.sshfl [vmem:[%s11164_s29 + $0x1c] sm:$0x33 pattern:$0x75316420]  ;;  %v2402_v28 = vsel %vm11248_vm14, %v2394_v24, %v2401_v15  ;;  %v2405_v30 = vshrl.u32 %v2177_v3, 16  ;;  %3015 = vmatmul.mubr.bf16.gmra.mrb[20].mxu0 %v10539_v11  ;;  %v11671_v44 = vrot.slane %v2277_v51, 7 }
 0x120   : > { %v1819_v16 = vcombine.low %v1811_v61, %v1818_v12  ;;  %2590 = vst [vmem:[#allocation2 + $0x144] sm:$0xf] %v2402_v28  ;;  %v2274_v14 = vor.u32 %v2272_v57, %v2271_v19  ;;  %v2275_v43 = vrot.slane %v2271_v19, 4  ;;  %327 = vst [vmem:[#allocation2 + $0x150] sm:$0x11] %v326_v29  ;;  %v2408_v46 = vshll.u32 %v2177_v3, 16 }
 0x121   : > { %v1980_v33 = vshrl.u32 %v1802_v17, 16  ;;  %v1983_v36 = vshll.u32 %v1802_v17, 16  ;;  %v2407_v9 = vrot.slane %v2405_v30, 7  ;;  %v2163_v24 = vld [vmem:[%s11172_s13 + $0x30] sm:$0xf]  ;;  %v2216_v39 = vrot.slane %v11406_v40, 4 }
 0x122   : > { %v1826_v42 = vrot.slane %v1819_v16, %v11231_v41  ;;  %v2413_v54 = vshrl.u32 %v2178_v22, 16  ;;  %v305_v49 = vsel %vm11197_vm7, 0, %v304_v32  ;;  %v2164_v58 = vld [vmem:[%s11172_s13 + $0x34] sm:$0xf]  ;;  %v2123_v61 = vld [vmem:[#allocation2 + $0x138] sm:$0xf]  ;;  %v2282_v57 = vor.u32 %v2280_v6, %v11671_v44 }
 0x123   : > { %v1982_v52 = vrot.slane %v1980_v33, 7  ;;  %v2074_v62 = vld [vmem:[#allocation2 + $0x90] sm:$0xf]  ;;  %306 = vst [vmem:[#allocation2 + $0xa8] sm:$0x11] %v305_v49  ;;  %v578_v1 = vcombine.high %v11664_v25, %v11664_v25  ;;  %v2410_v12 = vor.u32 %v2408_v46, %v2407_v9  ;;  %v2416_v15 = vshll.u32 %v2178_v22, 16 }
 0x124   : > { %v1988_v60 = vshrl.u32 %v1826_v42, 16  ;;  %v1991_v59 = vshll.u32 %v1826_v42, 16  ;;  %v2075_v10 = vsel %vm11256_vm15, %v11626_v48, %v2074_v62  ;;  %v2538_v11 = vld [vmem:[#allocation2 + $0x94] sm:$0xf]  ;;  %v2283_v51 = vsel %vm11248_vm14, %v2275_v43, %v2282_v57  ;;  %v328_v16 = vld [vmem:[#allocation2 + $0x168] sm:$0x11] }
 0x125   : > { %v1985_v3 = vor.u32 %v1983_v36, %v1982_v52  ;;  %v1986_v17 = vrot.slane %v1982_v52, 4  ;;  %2076 = vst [vmem:[#allocation2 + $0x90] sm:$0xf] %v2075_v10  ;;  %v2539_v6 = vsel %vm11256_vm15, %v2274_v14, %v2538_v11  ;;  %v331_v28 = vld [vmem:[#allocation2 + $0x180] sm:$0x11]  ;;  %v2411_v48 = vrot.slane %v2407_v9, 4 }
 0x126   : > { %v11684_v19 = vrot.slane %v1988_v60, 7  ;;  %2540 = vst [vmem:[#allocation2 + $0x94] sm:$0xf] %v2539_v6  ;;  %2541 = vst [vmem:[#allocation2 + $0x9c] sm:$0xf] %v2283_v51  ;;  %v11692_v30 = vrot.slane %v2413_v54, 7  ;;  %v585_v9 = vrot.slane %v11664_v25, %v11208_v23 }
 0x127   : > { %v2124_v29 = vsel %vm11256_vm15, %v1985_v3, %v2123_v61  ;;  %v2286_v22 = vshrl.u32 %v2163_v24, 16  ;;  %v2130_v33 = vld [vmem:[#allocation2 + $0x150] sm:$0xf]  ;;  %v2594_v36 = vld [vmem:[#allocation2 + $0x154] sm:$0xf]  ;;  %v2289_v43 = vshll.u32 %v2163_v24, 16 }
 0x128   : > { %v1993_v32 = vor.u32 %v1991_v59, %v11684_v19  ;;  %2125 = vst [vmem:[#allocation2 + $0x138] sm:$0xf] %v2124_v29  ;;  %v2294_v42 = vshrl.u32 %v2164_v58, 16  ;;  %v2131_v14 = vsel %vm11256_vm15, %v1985_v3, %v2130_v33  ;;  %v2418_v46 = vor.u32 %v2416_v15, %v11692_v30 }
 0x129   : > { %v2595_v52 = vsel %vm11256_vm15, %v2410_v12, %v2594_v36  ;;  %2132 = vst [vmem:[#allocation2 + $0x150] sm:$0xf] %v2131_v14  ;;  %v2288_v49 = vrot.slane %v2286_v22, 7  ;;  %v2297_v24 = vshll.u32 %v2164_v58, 16  ;;  %v329_v57 = vsel %vm11197_vm7, 0, %v328_v16 }
 0x12a   : > { %v1994_v54 = vsel %vm11248_vm14, %v1986_v17, %v1993_v32  ;;  %2596 = vst [vmem:[#allocation2 + $0x154] sm:$0xf] %v2595_v52  ;;  %v11704_v60 = vrot.slane %v2294_v42, 7  ;;  %v2419_v59 = vsel %vm11248_vm14, %v2411_v48, %v2418_v46  ;;  %v2081_v61 = vld [vmem:[#allocation2 + $0xa8] sm:$0xf]  ;;  %v332_v25 = vsel %vm11197_vm7, 0, %v331_v28 }
 0x12b   : > { %2126 = vst [vmem:[#allocation2 + $0x140] sm:$0xf] %v1994_v54  ;;  %2133 = vst [vmem:[#allocation2 + $0x158] sm:$0xf] %v1994_v54  ;;  %v2545_v62 = vld [vmem:[#allocation2 + $0xac] sm:$0xf]  ;;  %v592_v3 = vrot.slane %v578_v1, %v11208_v23  ;;  %v2082_v58 = vsel %vm11256_vm15, %v11308_v47, %v2081_v61  ;;  %v2291_v10 = vor.u32 %v2289_v43, %v2288_v49  ;;  %v652_v8 = vunpack.i.h.s16 %v585_v9 }
 0x12c   : > { %2597 = vst [vmem:[#allocation2 + $0x15c] sm:$0xf] %v2419_v59  ;;  %v2292_v11 = vrot.slane %v2288_v49, 4  ;;  %v2299_v12 = vor.u32 %v2297_v24, %v11704_v60  ;;  %330 = vst [vmem:[#allocation2 + $0x168] sm:$0x11] %v329_v57  ;;  %v593_v17 = vcombine.high %v585_v9, %v585_v9  ;;  %v8888_v28 = vpack.i.b16 %v585_v9, %v585_v9 }
 0x12d   : > { %333 = vst [vmem:[#allocation2 + $0x180] sm:$0x11] %v332_v25  ;;  %2083 = vst [vmem:[#allocation2 + $0xa8] sm:$0xf] %v2082_v58  ;;  %v594_v51 = vcombine.high %v592_v3, %v592_v3  ;;  %v2634_v6 = vld [vmem:[#allocation2 + $0x90] sm:$0xff]  ;;  %v11718_v16 = vld [vmem:[#allocation2 + $0x98] sm:$0xff]  ;;  %v2546_v47 = vsel %vm11256_vm15, %v2291_v10, %v2545_v62  ;;  %v654_v1 = vunpack.i.h.s16 %v592_v3  ;;  %v716_v33 = vpack.i.b16 %v652_v8, %v652_v8 }
 0x12e   : > { %v2300_v23 = vsel %vm11248_vm14, %v2292_v11, %v2299_v12  ;;  %v8906_v29 = vcombine.high %v2634_v6, %v11718_v16  ;;  %v8905_v48 = vcombine.low %v2634_v6, %v11718_v16  ;;  %2547 = vst [vmem:[#allocation2 + $0xac] sm:$0xf] %v2546_v47  ;;  %v656_v22 = vunpack.i.h.s16 %v593_v17  ;;  %v10540_v49 = vld [vmem:[#allocation2 + $0x13c] ss:$8 sps:$4 sm:$0xff]  }
 0x12f   : > { %2548 = vst [vmem:[#allocation2 + $0xb4] sm:$0xf] %v2300_v23  ;;  %v658_v32 = vunpack.i.h.s16 %v594_v51  ;;  %v8889_v36 = vpack.i.b16 %v592_v3, %v592_v3  ;;  %v718_v43 = vpack.i.b16 %v654_v1, %v654_v1  ;;  %v8890_v42 = vpack.i.b16 %v593_v17, %v593_v17  ;;  %3078 = vmatprep.mubr.bf16.mxu1 %v10540_v49  ;;  %v2179_v1 = vld [vmem:[%s11172_s13 + $0x70] sm:$0xf] }
 0x130   : > { %3022 = vmatprep.mubr.bf16.mxu0 %v8906_v29  ;;  %v720_v14 = vpack.i.b16 %v656_v22, %v656_v22  ;;  %v8891_v46 = vpack.i.b16 %v594_v51, %v594_v51  ;;  %v950_v54 = vrot.slane %v8888_v28, %v11216_v31  ;;  %v954_v24 = vrot.slane %v716_v33, %v11216_v31 }
 0x131   : > { %v722_v52 = vpack.i.b16 %v658_v32, %v658_v32  ;;  %3023 = vmatmul.mubr.bf16.gmra.mrb[24].mxu0 %v8905_v48  ;;  %v958_v59 = vrot.slane %v8889_v36, %v11216_v31  ;;  %v962_v61 = vrot.slane %v718_v43, %v11216_v31  ;;  %v966_v62 = vrot.slane %v8890_v42, %v11216_v31  ;;  %v2180_v36 = vld [vmem:[%s11172_s13 + $0x74] sm:$0xf] }
 0x132   : > { %v10543_v9 = vld [vmem:[#allocation2 + $0x138] ss:$8 sps:$4 sm:$0xff]   ;;  %v970_v25 = vrot.slane %v720_v14, %v11216_v31  ;;  %v974_v3 = vrot.slane %v8891_v46, %v11216_v31  ;;  %v1372_v10 = vpack.i.b16 %v950_v54, %v950_v54  ;;  %v1379_v11 = vpack.i.b16 %v954_v24, %v954_v24 }
 0x133   : > { %v10549_v57 = vld [vmem:[#allocation2 + $0x154] ss:$8 sps:$4 sm:$0xff]   ;;  %v978_v58 = vrot.slane %v722_v52, %v11216_v31  ;;  %v1386_v12 = vpack.i.b16 %v958_v59, %v958_v59  ;;  %v1393_v17 = vpack.i.b16 %v962_v61, %v962_v61  ;;  %v1400_v51 = vpack.i.b16 %v966_v62, %v966_v62  ;;  %3079 = vmatmul.mubr.bf16.gmra.mrb[20].mxu1 %v10543_v9  ;;  %v10552_v52 = vld [vmem:[#allocation2 + $0x150] ss:$8 sps:$4 sm:$0xff]   ;;  %v4019_v59 = vld [vmem:[#allocation2] sm:$0xee] }
 0x134   : > { %v1377_v8 = vrot.slane %v1372_v10, %v11216_v31  ;;  %v1407_v6 = vpack.i.b16 %v970_v25, %v970_v25  ;;  %v1414_v23 = vpack.i.b16 %v974_v3, %v974_v3  ;;  %3086 = vmatprep.mubr.bf16.mxu1 %v10549_v57  ;;  %v1384_v48 = vrot.slane %v1379_v11, %v11216_v31  ;;  %v11752_v3 = vld [vmem:[#allocation2 + $0x10] sm:$0x11] }
 0x135   : > { %v1421_v47 = vpack.i.b16 %v978_v58, %v978_v58  ;;  %v11736_v28 = vld [vmem:[#allocation2 + $0xa8] sm:$0xff]  ;;  %v1391_v22 = vrot.slane %v1386_v12, %v11216_v31  ;;  %v1398_v32 = vrot.slane %v1393_v17, %v11216_v31  ;;  %v1405_v33 = vrot.slane %v1400_v51, %v11216_v31 }
 0x136   : > { %v11738_v29 = vld [vmem:[#allocation2 + $0xb0] sm:$0xff]  ;;  %v1412_v14 = vrot.slane %v1407_v6, %v11216_v31  ;;  %v1419_v46 = vrot.slane %v1414_v23, %v11216_v31  ;;  %v2422_v24 = vshrl.u32 %v2179_v1, 16  ;;  %v2425_v62 = vshll.u32 %v2179_v1, 16  ;;  %v2601_v51 = vld [vmem:[#allocation2 + $0x16c] sm:$0xf] }
 0x137   : > { %v8908_v43 = vcombine.high %v11736_v28, %v11738_v29  ;;  %v8907_v42 = vcombine.low %v11736_v28, %v11738_v29  ;;  %v1426_v54 = vrot.slane %v1421_v47, %v11216_v31  ;;  %v1827_v49 = vcombine.low %v1377_v8, %v1391_v22 }
 0x138   : > { %v1828_v9 = vcombine.low %v1384_v48, %v1398_v32  ;;  %v1851_v61 = vcombine.low %v1405_v33, %v1419_v46  ;;  %v2430_v57 = vshrl.u32 %v2180_v36, 16  ;;  %v2433_v25 = vshll.u32 %v2180_v36, 16  ;;  %v10738_v33 = vld [vmem:[#allocation2] sm:$0xff] }
 0x139   : > { %3030 = vmatprep.mubr.bf16.mxu0 %v8908_v43  ;;  %v1835_v58 = vrot.slane %v1827_v49, %v11231_v41  ;;  %v1852_v11 = vcombine.low %v1412_v14, %v1426_v54  ;;  %v2424_v12 = vrot.slane %v2422_v24, 7  ;;  %v14298_v1 = vmov 0  ;;  %v339_v24 = vld [vmem:[#allocation2 + $0x28] sm:$0x11] }
 0x13a   : > { %3031 = vmatmul.mubr.bf16.gmra.mrb[28].mxu0 %v8907_v42  ;;  %v1842_v10 = vrot.slane %v1828_v9, %v11231_v41  ;;  %v1859_v31 = vrot.slane %v1851_v61, %v11231_v41  ;;  %v11757_v17 = vrot.slane %v2430_v57, 7  ;;  %v14299_v1 = vsel %vm11760_vm2, 4294967295, %v14298_v1 }
 0x13b   : > { %v1866_v6 = vrot.slane %v1852_v11, %v11231_v41  ;;  %v2427_v23 = vor.u32 %v2425_v62, %v2424_v12  ;;  %v2428_v47 = vrot.slane %v2424_v12, 4  ;;  %14300 = vst [vmem:[#allocation14_spill] sm:$0xff] %v14299_v1  ;;  %3087 = vmatmul.mubr.bf16.gmra.mrb[24].mxu1 %v10552_v52  ;;  %v8989_v32 = vrot.slane %v4019_v59, 9 }
 0x13c   : > { %v1843_v8 = vcombine.low %v1835_v58, %v1842_v10  ;;  %v2435_v22 = vor.u32 %v2433_v25, %v11757_v17  ;;  %v4088_v36 = vrot.slane %v10738_v33, 5  ;;  %v4091_v46 = vrot.slane %v11752_v3, 5  ;;  %v2137_v58 = vld [vmem:[#allocation2 + $0x168] sm:$0xf] }
 0x13d   : > { %v1867_v42 = vcombine.low %v1859_v31, %v1866_v6  ;;  %v2602_v14 = vsel %vm11256_vm15, %v2427_v23, %v2601_v51  ;;  %v2233_v54 = vrot.slane %v11468_v63, 4  ;;  %v1910_v59 = vrot.slane %v11491_v55, 4  ;;  %v10568_v31 = vld [vmem:[#allocation8 + $0x200] sm:$0xff]  }
 0x13e   : > { %v1850_v43 = vrot.slane %v1843_v8, %v11231_v41  ;;  %v2436_v49 = vsel %vm11248_vm14, %v2428_v47, %v2435_v22  ;;  %2603 = vst [vmem:[#allocation2 + $0x16c] sm:$0xf] %v2602_v14  ;;  %v4089_v52 = vsel %vm11760_vm2, %v8989_v32, %v4088_v36  ;;  %v4090_v9 = vrot.slane %v4088_v36, 4  ;;  %v2144_v47 = vld [vmem:[#allocation2 + $0x180] sm:$0xf] }
 0x13f   : > { %v1874_v61 = vrot.slane %v1867_v42, %v11231_v41  ;;  %2604 = vst [vmem:[#allocation2 + $0x174] sm:$0xf] %v2436_v49  ;;  %v3187_v11 = vshrl.u32 %v10738_v33, 16  ;;  %v3190_v12 = vshll.u32 %v10738_v33, 16  ;;  %v3206_v36 = vshll.u32 %v11752_v3, 16  ;;  %v3138_v42 = vld [vmem:[#allocation2 + $0x18] sm:$0xff] }
 0x140   : > { %v1997_v62 = vshrl.u32 %v1850_v43, 16  ;;  %v2000_v57 = vshll.u32 %v1850_v43, 16  ;;  %v4092_v10 = vsel %vm11760_vm2, %v4090_v9, %v4091_v46  ;;  %v11781_v43 = vld [vmem:[#allocation2 + $0x20] sm:$0xff]  ;;  %v340_v33 = vsel %vm11204_vm11, 0, %v339_v24  ;;  %v10571_v9 = vld [vmem:[#allocation8 + $0x248] sm:$0xff]  }
 0x141   : > { %v2005_v8 = vshrl.u32 %v1874_v61, 16  ;;  %v2008_v6 = vshll.u32 %v1874_v61, 16  ;;  %v9005_v23 = vcombine.low %v4089_v52, %v4092_v10  ;;  %v9006_v22 = vcombine.high %v4089_v52, %v4092_v10  ;;  %v342_v46 = vld [vmem:[#allocation2 + $0x40] sm:$0x11]  ;;  %341 = vst [vmem:[#allocation2 + $0x28] sm:$0x11] %v340_v33 }
 0x142   : > { %v1999_v51 = vrot.slane %v1997_v62, 7  ;;  %v3189_v32 = vrot.slane %v3187_v11, 4  ;;  %v3192_v41 = vrot.slane %v3190_v12, 5  ;;  %v10572_v52 = vld [vmem:[#allocation8 + $0x208] sm:$0xff]   ;;  %v2301_v10 = vrot.slane %v11704_v60, 4  ;;  %v3141_v12 = vld [vmem:[#allocation2 + $0x30] sm:$0xff] }
 0x143   : > { %v11783_v48 = vrot.slane %v2005_v8, 7  ;;  %4486 = vmatprep.mubr.bf16.mxu0 %v9006_v22  ;;  %v3208_v11 = vrot.slane %v3206_v36, 5  ;;  %v3214_v22 = vshll.u32 %v3138_v42, 16 }
 0x144   : > { %v2002_v14 = vor.u32 %v2000_v57, %v1999_v51  ;;  %v2003_v49 = vrot.slane %v1999_v51, 4  ;;  %v3193_v61 = vor.u32 %v3192_v41, %v3189_v32  ;;  %4487 = vmatmul.mubr.bf16.vlgmr.msra.gmra.mrb[32].mxu0 %v9005_v23  ;;  %v2549_v51 = vld [vmem:[#allocation2 + $0xbc] sm:$0x1]  ;;  %v3224_v23 = vshrl.u32 %v11781_v43, 16 }
 0x145   : > { %v2010_v62 = vor.u32 %v2008_v6, %v11783_v48  ;;  %9830 = vmatpush3.bf16.msra.mxu0 %v10568_v31  ;;  %v3211_v6 = vshrl.u32 %v3138_v42, 16  ;;  %v11802_v31 = vld [vmem:[#allocation2 + $0x18] sm:$0xee]  ;;  %v343_v32 = vsel %vm11204_vm11, 0, %v342_v46  ;;  %v3216_v42 = vrot.slane %v3214_v22, 5 }
 0x146   : > { %v2138_v3 = vsel %vm11256_vm15, %v2002_v14, %v2137_v58  ;;  %v2145_v57 = vsel %vm11256_vm15, %v2002_v14, %v2144_v47  ;;  %v3194_v24 = vrot.slane %v3193_v61, 4  ;;  %v3220_v58 = vshll.u32 %v11781_v43, 16  ;;  %9831 = vmatprep.subr.bf16.mxu0 %v10571_v9  ;;  %v10575_v47 = vld [vmem:[#allocation8 + $0x250] sm:$0xff]   ;;  %344 = vst [vmem:[#allocation2 + $0x40] sm:$0x11] %v343_v32  ;;  %v11807_v14 = vld [vmem:[#allocation2 + $0x38] sm:$0xff] }
 0x147   : > { %2139 = vst [vmem:[#allocation2 + $0x168] sm:$0xf] %v2138_v3  ;;  %2146 = vst [vmem:[#allocation2 + $0x180] sm:$0xf] %v2145_v57  ;;  %v2011_v8 = vsel %vm11248_vm14, %v2003_v49, %v2010_v62  ;;  %v3213_v36 = vrot.slane %v3211_v6, 4  ;;  %v4095_v9 = vrot.slane %v11781_v43, 5  ;;  %v2550_v4 = vsel %vm11190_vm4, %v2301_v10, %v2549_v51 }
 0x148   : > { %2140 = vst [vmem:[#allocation2 + $0x170] sm:$0xf] %v2011_v8  ;;  %2147 = vst [vmem:[#allocation2 + $0x188] sm:$0xf] %v2011_v8  ;;  %v345_v49 = vld [vmem:[#allocation2 + $0x58] sm:$0x11]  ;;  %v11815_v8 = vsel %vm11798_vm6, %v3194_v24, %v3192_v41  ;;  %v11821_v43 = vsel %vm11798_vm6, %v3194_v24, %v3208_v11 }
 0x149   : > { %v11811_v61 = vrot.slane %v3220_v58, 5  ;;  %v3226_v62 = vrot.slane %v3224_v23, 4  ;;  %9832 = vmatpush3.bf16.msra.mxu0 %v10572_v52  ;;  %v10576_v3 = vld [vmem:[#allocation8 + $0x210] sm:$0xff]   ;;  %v10579_v57 = vld [vmem:[#allocation8 + $0x258] sm:$0xff]   ;;  %v3235_v22 = vshrl.u32 %v3141_v12, 16  ;;  %v3238_v32 = vshll.u32 %v3141_v12, 16 }
 0x14a   : > { %v2043_v46 = vld [vmem:[#allocation2 + $0x28] sm:$0x1]  ;;  %v2507_v6 = vld [vmem:[#allocation2 + $0x2c] sm:$0x1]  ;;  %9833 = vmatprep.subr.bf16.mxu0 %v10575_v47  ;;  %v3217_v58 = vor.u32 %v3216_v42, %v3213_v36  ;;  %v4021_v12 = vld [vmem:[#allocation2 + $0x30] sm:$0xee]  ;;  %v8941_v40 = vcombine.low %v11815_v8, %v11821_v43 }
 0x14b   : > { %v2044_v52 = vsel %vm11190_vm4, %v1893_v5, %v2043_v46  ;;  %v2508_v41 = vsel %vm11190_vm4, %v2199_v53, %v2507_v6  ;;  %2551 = vst [vmem:[#allocation2 + $0xbc] sm:$0x1] %v2550_v4  ;;  %v8990_v10 = vrot.slane %v11802_v31, 9  ;;  %v3237_v24 = vrot.slane %v3235_v22, 4  ;;  %v11833_v51 = vld [vmem:[#allocation2 + $0x50] sm:$0xff]  ;;  %v3144_v23 = vld [vmem:[#allocation2 + $0x48] sm:$0xff] }
 0x14c   : > { %2045 = vst [vmem:[#allocation2 + $0x28] sm:$0x1] %v2044_v52  ;;  %2509 = vst [vmem:[#allocation2 + $0x2c] sm:$0x1] %v2508_v41  ;;  %v3240_v11 = vrot.slane %v3238_v32, 5  ;;  %v4097_v46 = vrot.slane %v4095_v9, 4  ;;  %v8942_v31 = vcombine.high %v11815_v8, %v11821_v43  ;;  %v3227_v22 = vor.u32 %v3226_v62, %v11811_v61 }
 0x14d   : > { %v3244_v37 = vshll.u32 %v11807_v14, 16  ;;  %v3248_v15 = vshrl.u32 %v11807_v14, 16  ;;  %v346_v53 = vsel %vm11204_vm11, 0, %v345_v49  ;;  %9834 = vmatpush3.bf16.msra.mxu0 %v10576_v3  ;;  %v10580_v4 = vld [vmem:[#allocation8 + $0x218] sm:$0xff]   ;;  %v10583_v36 = vld [vmem:[#allocation8 + $0x260] sm:$0xff]   ;;  %v8991_v32 = vrot.slane %v4021_v12, 9 }
 0x14e   : > { %v10558_v42 = vld [vmem:[#allocation2 + $0x16c] ss:$8 sps:$4 sm:$0xff]   ;;  %347 = vst [vmem:[#allocation2 + $0x58] sm:$0x11] %v346_v53  ;;  %9835 = vmatprep.subr.bf16.mxu0 %v10579_v57  ;;  %v3218_v52 = vrot.slane %v3217_v58, 4  ;;  %v4102_v47 = vrot.slane %v11807_v14, 5  ;;  %v3241_v25 = vor.u32 %v3240_v11, %v3237_v24  ;;  %v4096_v14 = vsel %vm11760_vm2, %v8990_v10, %v4095_v9 }
 0x14f   : > { %v10561_v6 = vld [vmem:[#allocation2 + $0x168] ss:$8 sps:$4 sm:$0xff]   ;;  %v2050_v41 = vld [vmem:[#allocation2 + $0x40] sm:$0x1]  ;;  %v2514_v33 = vld [vmem:[#allocation2 + $0x44] sm:$0x1]  ;;  %3094 = vmatprep.mubr.bf16.mxu1 %v10558_v42 }
 0x150   : > { %v348_v49 = vld [vmem:[#allocation2 + $0x70] sm:$0x11]  ;;  %v2051_v3 = vsel %vm11190_vm4, %v1893_v5, %v2050_v41  ;;  %v2515_v62 = vsel %vm11190_vm4, %v2216_v39, %v2514_v33  ;;  %v3246_v12 = vrot.slane %v3244_v37, 5  ;;  %v3250_v57 = vrot.slane %v3248_v15, 4  ;;  %3095 = vmatmul.mubr.bf16.gmra.mrb[28].mxu1 %v10561_v6  ;;  %v11860_v15 = vld [vmem:[#allocation2 + $0x48] sm:$0xee] }
 0x151   : > { %v10584_v58 = vld [vmem:[#allocation8 + $0x220] sm:$0xff]   ;;  %2052 = vst [vmem:[#allocation2 + $0x40] sm:$0x1] %v2051_v3  ;;  %2516 = vst [vmem:[#allocation2 + $0x44] sm:$0x1] %v2515_v62  ;;  %v3259_v24 = vshrl.u32 %v3144_v23, 16  ;;  %9836 = vmatpush3.bf16.msra.mxu0 %v10580_v4  ;;  %3858 = vmatprep.mubr.bf16.mxu1 %v8942_v31  ;;  %v11858_v39 = vsel %vm11760_vm2, %v8991_v32, %v4102_v47 }
 0x152   : > { %v3262_v11 = vshll.u32 %v3144_v23, 16  ;;  %v3268_v21 = vshll.u32 %v11833_v51, 16  ;;  %v3228_v5 = vrot.slane %v3227_v22, 4  ;;  %v3272_v33 = vshrl.u32 %v11833_v51, 16  ;;  %9837 = vmatprep.subr.bf16.mxu0 %v10583_v36  ;;  %v10587_v9 = vld [vmem:[#allocation8 + $0x268] sm:$0xff]   ;;  %v11871_v31 = vld [vmem:[#allocation2 + $0x60] sm:$0xff] }
 0x153   : > { %v3140_v10 = vld [vmem:[#allocation2 + $0x28] sm:$0x11]  ;;  %v11866_v23 = vsel %vm11798_vm6, %v3218_v52, %v11811_v61  ;;  %v3242_v37 = vrot.slane %v3241_v25, 4  ;;  %v3261_v8 = vrot.slane %v3259_v24, 4  ;;  %v4109_v42 = vrot.slane %v11833_v51, 5  ;;  %v10566_v25 = vld [vmem:[#allocation8 + $0x180] sm:$0xff]  }
 0x154   : > { %v3264_v43 = vrot.slane %v3262_v11, 5  ;;  %v4098_v53 = vrot.slane %v3140_v10, 5  ;;  %v3230_v4 = vshll.u32 %v3140_v10, 16  ;;  %v349_v6 = vsel %vm11204_vm11, 0, %v348_v49  ;;  %v10569_v24 = vld [vmem:[#allocation8 + $0x1c8] sm:$0xff]  }
 0x155   : > { %v3251_v36 = vor.u32 %v3250_v57, %v3246_v12  ;;  %v2057_v22 = vld [vmem:[#allocation2 + $0x58] sm:$0x1]  ;;  %v2521_v32 = vld [vmem:[#allocation2 + $0x5c] sm:$0x1]  ;;  %v11873_v3 = vrot.slane %v3268_v21, 5  ;;  %v11875_v61 = vrot.slane %v3272_v33, 4  ;;  %9838 = vmatpush3.bf16.msra.mxu0 %v10584_v58  ;;  %v11894_v63 = vsel %vm11798_vm6, %v3242_v37, %v3246_v12 }
 0x156   : > { %v3265_v41 = vor.u32 %v3264_v43, %v3261_v8  ;;  %350 = vst [vmem:[#allocation2 + $0x70] sm:$0x11] %v349_v6  ;;  %v4099_v52 = vsel %vm11760_vm2, %v4097_v46, %v4098_v53  ;;  %v3232_v62 = vrot.slane %v3230_v4, 5  ;;  %v2058_v49 = vsel %vm11190_vm4, %v1910_v59, %v2057_v22  ;;  %9839 = vmatprep.subr.bf16.mxu0 %v10587_v9  ;;  %v351_v33 = vld [vmem:[#allocation2 + $0x88] sm:$0x11]  ;;  %v10588_v9 = vld [vmem:[#allocation8 + $0x228] sm:$0xff]  }
 0x157   : > { %v2522_v57 = vsel %vm11190_vm4, %v2233_v54, %v2521_v32  ;;  %v9008_v11 = vcombine.high %v4096_v14, %v4099_v52  ;;  %v9007_v21 = vcombine.low %v4096_v14, %v4099_v52  ;;  %v4104_v58 = vrot.slane %v4102_v47, 4  ;;  %2059 = vst [vmem:[#allocation2 + $0x58] sm:$0x1] %v2058_v49  ;;  %v11900_v14 = vld [vmem:[#allocation2 + $0x68] sm:$0xff]  ;;  %v10591_v4 = vld [vmem:[#allocation8 + $0x270] sm:$0xff]   ;;  %v10570_v12 = vld [vmem:[#allocation8 + $0x188] sm:$0xff]  }
 0x158   : > { %2523 = vst [vmem:[#allocation2 + $0x5c] sm:$0x1] %v2522_v57  ;;  %v8992_v46 = vrot.slane %v11860_v15, 9  ;;  %v11890_v10 = vsel %vm11798_vm6, %v3228_v5, %v3232_v62  ;;  %v3143_v8 = vld [vmem:[#allocation2 + $0x40] sm:$0x11]  ;;  %v11898_v54 = vrot.slane %v4109_v42, 4  ;;  %3859 = vmatmul.mubr.bf16.vlgmr.msra.gmra.mrb[32].mxu1 %v8941_v40  ;;  %v3275_v6 = vor.u32 %v11875_v61, %v11873_v3 }
 0x159   : > { %v3283_v47 = vshrl.u32 %v11871_v31, 16  ;;  %4494 = vmatprep.mubr.bf16.mxu0 %v9008_v11  ;;  %v8944_v5 = vcombine.high %v11866_v23, %v11890_v10  ;;  %v4105_v15 = vrot.slane %v3143_v8, 5  ;;  %v3252_v43 = vrot.slane %v3251_v36, 4  ;;  %9718 = vmatpush3.bf16.msra.mxu1 %v10566_v25  ;;  %v11911_v36 = vld [vmem:[#allocation2 + $0x60] sm:$0xee]  ;;  %v3150_v49 = vld [vmem:[#allocation2 + $0x78] sm:$0xff] }
 0x15a   : > { %v3254_v53 = vshll.u32 %v3143_v8, 16  ;;  %4495 = vmatmul.mubr.bf16.gmra.mrb[36].mxu0 %v9007_v21  ;;  %v3266_v37 = vrot.slane %v3265_v41, 4  ;;  %v4116_v22 = vrot.slane %v11900_v14, 5  ;;  %v3286_v32 = vshll.u32 %v11871_v31, 16  ;;  %9719 = vmatprep.subr.bf16.mxu1 %v10569_v24  ;;  %v10573_v41 = vld [vmem:[#allocation8 + $0x1d0] sm:$0xff]  }
 0x15b   : > { %3866 = vmatprep.mubr.bf16.mxu1 %v8944_v5  ;;  %v4106_v40 = vsel %vm11760_vm2, %v4104_v58, %v4105_v15  ;;  %v3292_v25 = vshll.u32 %v11900_v14, 16  ;;  %v3296_v62 = vshrl.u32 %v11900_v14, 16  ;;  %v10592_v57 = vld [vmem:[#allocation8 + $0x230] sm:$0xff]   ;;  %v8943_v61 = vcombine.low %v11866_v23, %v11890_v10  ;;  %9840 = vmatpush3.bf16.msra.mxu0 %v10588_v9  ;;  %v10595_v15 = vld [vmem:[#allocation8 + $0x278] sm:$0xff]  }
 0x15c   : > { %v3256_v52 = vrot.slane %v3254_v53, 5  ;;  %v9010_v31 = vcombine.high %v11858_v39, %v4106_v40  ;;  %v11918_v8 = vrot.slane %v3283_v47, 4  ;;  %v352_v24 = vsel %vm11204_vm11, 0, %v351_v33  ;;  %9841 = vmatprep.subr.bf16.mxu0 %v10591_v4 }
 0x15d   : > { %v2064_v11 = vld [vmem:[#allocation2 + $0x70] sm:$0x1]  ;;  %v2528_v21 = vld [vmem:[#allocation2 + $0x74] sm:$0x1]  ;;  %v14303_v23 = vrot.slane %v11538_v35, 4  ;;  %v3288_v47 = vrot.slane %v3286_v32, 5  ;;  %v9009_v9 = vcombine.low %v11858_v39, %v4106_v40  ;;  %9720 = vmatpush3.bf16.msra.mxu1 %v10570_v12 }
 0x15e   : > { %v11924_v58 = vsel %vm11798_vm6, %v3252_v43, %v3256_v52  ;;  %v2065_v5 = vsel %vm11190_vm4, %v1910_v59, %v2064_v11  ;;  %353 = vst [vmem:[#allocation2 + $0x88] sm:$0x11] %v352_v24  ;;  %4502 = vmatprep.mubr.bf16.mxu0 %v9010_v31  ;;  %v11937_v59 = vrot.slane %v3292_v25, 5  ;;  %v3298_v35 = vrot.slane %v3296_v62, 4  ;;  %9721 = vmatprep.subr.bf16.mxu1 %v10573_v41  ;;  %v10574_v52 = vld [vmem:[#allocation8 + $0x190] sm:$0xff]   ;;  %v10577_v12 = vld [vmem:[#allocation8 + $0x1d8] sm:$0xff]  }
 0x15f   : > { %v2529_v10 = vsel %vm11190_vm4, %v14303_v23, %v2528_v21  ;;  %v8946_v33 = vcombine.high %v11894_v63, %v11924_v58  ;;  %v3146_v55 = vld [vmem:[#allocation2 + $0x58] sm:$0x11]  ;;  %2066 = vst [vmem:[#allocation2 + $0x70] sm:$0x1] %v2065_v5  ;;  %v11943_v43 = vsel %vm11760_vm2, %v8992_v46, %v4109_v42  ;;  %v3276_v4 = vrot.slane %v3275_v6, 4  ;;  %v11945_v31 = vld [vmem:[#allocation2 + $0x80] sm:$0xff]  ;;  %9842 = vmatpush3.bf16.msra.mxu0 %v10592_v57 }
 0x160   : > { %2530 = vst [vmem:[#allocation2 + $0x74] sm:$0x1] %v2529_v10  ;;  %v4112_v53 = vrot.slane %v3146_v55, 5  ;;  %v3278_v32 = vshll.u32 %v3146_v55, 16  ;;  %v354_v39 = vld [vmem:[#allocation2 + $0xa0] sm:$0x11]  ;;  %3867 = vmatmul.mubr.bf16.gmra.mrb[36].mxu1 %v8943_v61  ;;  %v3289_v6 = vor.u32 %v3288_v47, %v11918_v8  ;;  %9843 = vmatprep.subr.bf16.mxu0 %v10595_v15  ;;  %v3299_v57 = vor.u32 %v3298_v35, %v11937_v59 }
 0x161   : > { %v8993_v40 = vrot.slane %v11911_v36, 9  ;;  %v3307_v25 = vshrl.u32 %v3150_v49, 16  ;;  %v3310_v11 = vshll.u32 %v3150_v49, 16  ;;  %v10596_v62 = vld [vmem:[#allocation8 + $0x238] sm:$0xff]   ;;  %v4118_v46 = vrot.slane %v4116_v22, 4  ;;  %3874 = vmatprep.mubr.bf16.mxu1 %v8946_v33  ;;  %v10581_v61 = vld [vmem:[#allocation8 + $0x1e0] sm:$0xff]   ;;  %9722 = vmatpush3.bf16.msra.mxu1 %v10574_v52 }
 0x162   : > { %v4113_v51 = vsel %vm11760_vm2, %v11898_v54, %v4112_v53  ;;  %v3280_v42 = vrot.slane %v3278_v32, 5  ;;  %v10578_v41 = vld [vmem:[#allocation8 + $0x198] sm:$0xff]   ;;  %4503 = vmatmul.mubr.bf16.gmra.mrb[40].mxu0 %v9009_v9  ;;  %v11958_v49 = vsel %vm11798_vm6, %v3266_v37, %v11873_v3  ;;  %v4123_v54 = vrot.slane %v11945_v31, 5  ;;  %v10601_v21 = vld [vmem:[#allocation8 + $0x340] sm:$0xff]   ;;  %v11966_v24 = vld [vmem:[#allocation2 + $0x78] sm:$0xee]  ;;  %9723 = vmatprep.subr.bf16.mxu1 %v10577_v12 }
 0x163   : > { %v9012_v36 = vcombine.high %v11943_v43, %v4113_v51  ;;  %v11968_v5 = vrot.slane %v3307_v25, 4  ;;  %v3312_v23 = vrot.slane %v3310_v11, 5  ;;  %v3316_v10 = vshll.u32 %v11945_v31, 16  ;;  %v3153_v3 = vld [vmem:[#allocation2 + $0x90] sm:$0xff]  ;;  %9844 = vmatpush3.bf16.msra.mxu0 %v10596_v62 }
 0x164   : > { %v11964_v8 = vsel %vm11798_vm6, %v3276_v4, %v3280_v42  ;;  %v8945_v37 = vcombine.low %v11894_v63, %v11924_v58  ;;  %v11977_v47 = vsel %vm11760_vm2, %v8993_v40, %v4116_v22  ;;  %v3320_v9 = vshrl.u32 %v11945_v31, 16  ;;  %v10582_v32 = vld [vmem:[#allocation8 + $0x1a0] sm:$0xff]   ;;  %v10585_v40 = vld [vmem:[#allocation8 + $0x1e8] sm:$0xff]   ;;  %10053 = vmatprep.subr.bf16.mxu0 %v10601_v21 }
 0x165   : > { %4510 = vmatprep.mubr.bf16.mxu0 %v9012_v36  ;;  %v2071_v15 = vld [vmem:[#allocation2 + $0x88] sm:$0x1]  ;;  %v2535_v33 = vld [vmem:[#allocation2 + $0x8c] sm:$0x1]  ;;  %v355_v55 = vsel %vm11204_vm11, 0, %v354_v39  ;;  %v9011_v35 = vcombine.low %v11943_v43, %v4113_v51  ;;  %v3290_v4 = vrot.slane %v3289_v6, 4  ;;  %v8948_v52 = vcombine.high %v11958_v49, %v11964_v8  ;;  %9724 = vmatpush3.bf16.msra.mxu1 %v10578_v41 }
 0x166   : > { %v14304_v63 = vrot.slane %v11621_v38, 4  ;;  %v14305_v22 = vrot.slane %v11596_v45, 4  ;;  %356 = vst [vmem:[#allocation2 + $0xa0] sm:$0x11] %v355_v55  ;;  %v3300_v43 = vrot.slane %v3299_v57, 4  ;;  %v11993_v25 = vrot.slane %v3316_v10, 5  ;;  %9725 = vmatprep.subr.bf16.mxu1 %v10581_v61 }
 0x167   : > { %v3149_v53 = vld [vmem:[#allocation2 + $0x70] sm:$0x11]  ;;  %v3322_v11 = vrot.slane %v3320_v9, 4  ;;  %v11995_v45 = vld [vmem:[#allocation2 + $0x90] sm:$0xee]  ;;  %v3331_v51 = vshrl.u32 %v3153_v3, 16  ;;  %v3313_v57 = vor.u32 %v3312_v23, %v11968_v5 }
 0x168   : > { %v2072_v14 = vsel %vm11190_vm4, %v14304_v63, %v2071_v15  ;;  %v2536_v58 = vsel %vm11190_vm4, %v14305_v22, %v2535_v33  ;;  %v4119_v39 = vrot.slane %v3149_v53, 5  ;;  %v3302_v12 = vshll.u32 %v3149_v53, 16  ;;  %3875 = vmatmul.mubr.bf16.gmra.mrb[40].mxu1 %v8945_v37  ;;  %v10589_v9 = vld [vmem:[#allocation8 + $0x1f0] sm:$0xff]  }
 0x169   : > { %2073 = vst [vmem:[#allocation2 + $0x88] sm:$0x1] %v2072_v14  ;;  %2537 = vst [vmem:[#allocation2 + $0x8c] sm:$0x1] %v2536_v58  ;;  %v3334_v42 = vshll.u32 %v3153_v3, 16  ;;  %v8994_v36 = vrot.slane %v11966_v24, 9  ;;  %3882 = vmatprep.mubr.bf16.mxu1 %v8948_v52  ;;  %v3323_v3 = vor.u32 %v3322_v11, %v11993_v25  ;;  %9726 = vmatpush3.bf16.msra.mxu1 %v10582_v32 }
 0x16a   : > { %v11999_v62 = vsel %vm11760_vm2, %v4118_v46, %v4119_v39  ;;  %v3304_v6 = vrot.slane %v3302_v12, 5  ;;  %v2369_v21 = vrot.slane %v11520_v56, 4  ;;  %v2284_v10 = vrot.slane %v11671_v44, 4  ;;  %4511 = vmatmul.mubr.bf16.gmra.mrb[44].mxu0 %v9011_v35  ;;  %9727 = vmatprep.subr.bf16.mxu1 %v10585_v40  ;;  %v12049_v12 = vld [vmem:[#allocation2 + $0xa8] sm:$0xee] }
 0x16b   : > { %v9014_v15 = vcombine.high %v11977_v47, %v11999_v62  ;;  %v3340_v41 = vshll.u32 %v11718_v16, 16  ;;  %v12011_v46 = vsel %vm11798_vm6, %v3290_v4, %v11937_v59  ;;  %v4125_v61 = vrot.slane %v4123_v54, 4  ;;  %v10586_v59 = vld [vmem:[#allocation8 + $0x1a8] sm:$0xff]  }
 0x16c   : > { %v8995_v24 = vrot.slane %v11995_v45, 9  ;;  %v4130_v44 = vrot.slane %v11718_v16, 5  ;;  %v12021_v23 = vsel %vm11798_vm6, %v3300_v43, %v3304_v6  ;;  %v3333_v37 = vrot.slane %v3331_v51, 4  ;;  %v12053_v51 = vld [vmem:[#allocation2 + $0xb8] sm:$0x11] }
 0x16d   : > { %4518 = vmatprep.mubr.bf16.mxu0 %v9014_v15  ;;  %v3336_v33 = vrot.slane %v3334_v42, 5  ;;  %v8947_v35 = vcombine.low %v11958_v49, %v11964_v8  ;;  %v12032_v53 = vsel %vm11760_vm2, %v8994_v36, %v4123_v54  ;;  %v3314_v4 = vrot.slane %v3313_v57, 4  ;;  %v2078_v63 = vld [vmem:[#allocation2 + $0xa0] sm:$0x1]  ;;  %v2542_v14 = vld [vmem:[#allocation2 + $0xa4] sm:$0x1]  ;;  %9728 = vmatpush3.bf16.msra.mxu1 %v10586_v59 }
 0x16e   : > { %v3344_v22 = vshrl.u32 %v11718_v16, 16  ;;  %v9013_v58 = vcombine.low %v11977_v47, %v11999_v62  ;;  %v14306_v52 = vrot.slane %v11621_v38, 4  ;;  %v2543_v31 = vsel %vm11190_vm4, %v2284_v10, %v2542_v14  ;;  %v10590_v62 = vld [vmem:[#allocation8 + $0x1b0] sm:$0xff]   ;;  %9729 = vmatprep.subr.bf16.mxu1 %v10589_v9  ;;  %v10593_v15 = vld [vmem:[#allocation8 + $0x1f8] sm:$0xff]  }
 0x16f   : > { %v12043_v54 = vrot.slane %v3340_v41, 5  ;;  %v8950_v16 = vcombine.high %v12011_v46, %v12021_v23  ;;  %2544 = vst [vmem:[#allocation2 + $0xa4] sm:$0x1] %v2543_v31  ;;  %v3324_v40 = vrot.slane %v3323_v3, 4  ;;  %v4132_v11 = vrot.slane %v4130_v44, 4 }
 0x170   : > { %v3152_v32 = vld [vmem:[#allocation2 + $0x88] sm:$0x11]  ;;  %v2079_v49 = vsel %vm11190_vm4, %v14306_v52, %v2078_v63  ;;  %v3346_v47 = vrot.slane %v3344_v22, 4  ;;  %v3337_v45 = vor.u32 %v3336_v33, %v3333_v37  ;;  %v3355_v42 = vshrl.u32 %v11736_v28, 16  ;;  %3883 = vmatmul.mubr.bf16.gmra.mrb[44].mxu1 %v8947_v35  ;;  %v3159_v63 = vld [vmem:[#allocation2 + $0xc0] sm:$0xff] }
 0x171   : > { %v4126_v39 = vrot.slane %v3152_v32, 5  ;;  %v3326_v43 = vshll.u32 %v3152_v32, 16  ;;  %2080 = vst [vmem:[#allocation2 + $0xa0] sm:$0x1] %v2079_v49  ;;  %v4137_v57 = vrot.slane %v11738_v29, 5  ;;  %v3358_v10 = vshll.u32 %v11736_v28, 16  ;;  %3890 = vmatprep.mubr.bf16.mxu1 %v8950_v16  ;;  %9730 = vmatpush3.bf16.msra.mxu1 %v10590_v62 }
 0x172   : > { %v12064_v3 = vsel %vm11798_vm6, %v3314_v4, %v11993_v25  ;;  %v3347_v37 = vor.u32 %v3346_v47, %v12043_v54  ;;  %4519 = vmatmul.mubr.bf16.gmra.mrb[48].mxu0 %v9013_v58  ;;  %v12071_v28 = vsel %vm11760_vm2, %v8995_v24, %v4130_v44  ;;  %v8996_v33 = vrot.slane %v12049_v12, 9  ;;  %9731 = vmatprep.subr.bf16.mxu1 %v10593_v15  ;;  %v12083_v16 = vld [vmem:[#allocation2 + $0xc0] sm:$0xee] }
 0x173   : > { %v12017_v5 = vpop.f32.mrb[0].mxu0  ;;  %v4127_v6 = vsel %vm11760_vm2, %v4125_v61, %v4126_v39  ;;  %v3328_v36 = vrot.slane %v3326_v43, 5  ;;  %v8949_v61 = vcombine.low %v12011_v46, %v12021_v23  ;;  %v3357_v59 = vrot.slane %v3355_v42, 4  ;;  %v10594_v46 = vld [vmem:[#allocation8 + $0x1b8] sm:$0xff]   ;;  %v10599_v23 = vld [vmem:[#allocation8 + $0x2c0] sm:$0xff]  }
 0x174   : > { %v12024_v55 = vpop.f32.mrb[1].mxu0  ;;  %v9016_v41 = vcombine.high %v12032_v53, %v4127_v6  ;;  %v4140_v25 = vrot.slane %v12053_v51, 5  ;;  %v3360_v35 = vrot.slane %v3358_v10, 5  ;;  %v3364_v4 = vshll.u32 %v11738_v29, 16  ;;  %v3161_v42 = vld [vmem:[#allocation2 + $0xd0] sm:$0x11] }
 0x175   : > { %v12045_v8 = vpop.f32.mrb[2].mxu0  ;;  %v12076_v9 = vsel %vm11798_vm6, %v3324_v40, %v3328_v36  ;;  %v3338_v14 = vrot.slane %v3337_v45, 4  ;;  %v4139_v24 = vrot.slane %v4137_v57, 4  ;;  %v3368_v44 = vshrl.u32 %v11738_v29, 16  ;;  %v3160_v40 = vld [vmem:[#allocation2 + $0xc8] sm:$0xff]  ;;  %9732 = vmatpush3.bf16.msra.mxu1 %v10594_v46 }
 0x176   : > { %v12051_v38 = vpop.f32.mrb[3].mxu0  ;;  %4526 = vmatprep.mubr.bf16.mxu0 %v9016_v41  ;;  %v3374_v22 = vshll.u32 %v12053_v51, 16  ;;  %v9015_v58 = vcombine.low %v12032_v53, %v4127_v6  ;;  %v3348_v52 = vrot.slane %v3347_v37, 4  ;;  %v3361_v49 = vor.u32 %v3360_v35, %v3357_v59  ;;  %9941 = vmatprep.subr.bf16.mxu1 %v10599_v23  ;;  %v363_v35 = vld [vmem:[#allocation2 + $0xe8] sm:$0x11] }
 0x177   : > { %v3366_v31 = vrot.slane %v3364_v4, 5  ;;  %v8952_v39 = vcombine.high %v12064_v3, %v12076_v9  ;;  %v3370_v12 = vrot.slane %v3368_v44, 4  ;;  %v4144_v51 = vrot.slane %v3160_v40, 5  ;;  %v3162_v44 = vld [vmem:[#allocation2 + $0xd8] sm:$0xff] }
 0x178   : > { %v3155_v32 = vld [vmem:[#allocation2 + $0xa0] sm:$0x11]  ;;  %v3362_v45 = vrot.slane %v3361_v49, 4  ;;  %v3376_v29 = vrot.slane %v3374_v22, 5  ;;  %v3379_v62 = vshrl.u32 %v3159_v63, 16  ;;  %v3382_v10 = vshll.u32 %v3159_v63, 16  ;;  %3891 = vmatmul.mubr.bf16.gmra.mrb[48].mxu1 %v8949_v61 }
 0x179   : > { %v4133_v43 = vrot.slane %v3155_v32, 5  ;;  %v3350_v47 = vshll.u32 %v3155_v32, 16  ;;  %v3371_v36 = vor.u32 %v3370_v12, %v3366_v31  ;;  %v12092_v41 = vsel %vm11760_vm2, %v8996_v33, %v4137_v57  ;;  %3898 = vmatprep.mubr.bf16.mxu1 %v8952_v39  ;;  %v366_v22 = vld [vmem:[#allocation2 + $0x100] sm:$0x11] }
 0x17a   : > { %v12096_v37 = vsel %vm11798_vm6, %v3362_v45, %v3366_v31  ;;  %v8997_v59 = vrot.slane %v12083_v16, 9  ;;  %4527 = vmatmul.mubr.bf16.gmra.mrb[52].mxu0 %v9015_v58  ;;  %v12106_v61 = vsel %vm11760_vm2, %v4139_v24, %v4140_v25  ;;  %v4147_v33 = vrot.slane %v3161_v42, 5  ;;  %v12125_v31 = vld [vmem:[#allocation2 + $0xe0] sm:$0xff]  ;;  %v12134_v45 = vld [vmem:[#allocation2 + $0xd8] sm:$0xee] }
 0x17b   : > { %v4134_v53 = vsel %vm11760_vm2, %v4132_v11, %v4133_v43  ;;  %v3352_v6 = vrot.slane %v3350_v47, 5  ;;  %v12102_v11 = vsel %vm11798_vm6, %v3338_v14, %v12043_v54  ;;  %v3372_v57 = vrot.slane %v3371_v36, 4 }
 0x17c   : > { %v9018_v15 = vcombine.high %v12071_v28, %v4134_v53  ;;  %v3381_v63 = vrot.slane %v3379_v62, 4  ;;  %v3384_v46 = vrot.slane %v3382_v10, 5  ;;  %v3388_v23 = vshll.u32 %v3160_v40, 16 }
 0x17d   : > { %v12110_v4 = vsel %vm11798_vm6, %v3348_v52, %v3352_v6  ;;  %v8951_v54 = vcombine.low %v12064_v3, %v12076_v9  ;;  %v12116_v14 = vsel %vm11798_vm6, %v3372_v57, %v3376_v29  ;;  %v4146_v25 = vrot.slane %v4144_v51, 4 }
 0x17e   : > { %4534 = vmatprep.mubr.bf16.mxu0 %v9018_v15  ;;  %v3392_v24 = vshrl.u32 %v3160_v40, 16  ;;  %v9017_v58 = vcombine.low %v12071_v28, %v4134_v53  ;;  %v8956_v32 = vcombine.high %v12096_v37, %v12116_v14  ;;  %v8955_v52 = vcombine.low %v12096_v37, %v12116_v14 }
 0x17f   : > { %v12123_v49 = vrot.slane %v3388_v23, 5  ;;  %v8954_v3 = vcombine.high %v12102_v11, %v12110_v4  ;;  %v3398_v16 = vshll.u32 %v3161_v42, 16  ;;  %v364_v39 = vsel %vm11204_vm11, 0, %v363_v35  ;;  %v3166_v23 = vld [vmem:[#allocation2 + $0xf8] sm:$0xff] }
 0x180   : > { %v3394_v9 = vrot.slane %v3392_v24, 4  ;;  %v9020_v28 = vcombine.high %v12092_v41, %v12106_v61  ;;  %v3385_v43 = vor.u32 %v3384_v46, %v3381_v63  ;;  %365 = vst [vmem:[#allocation2 + $0xe8] sm:$0x11] %v364_v39  ;;  %v3403_v47 = vshrl.u32 %v3162_v44, 16  ;;  %3899 = vmatmul.mubr.bf16.gmra.mrb[52].mxu1 %v8951_v54  ;;  %v4029_v24 = vld [vmem:[#allocation2 + $0xf0] sm:$0xee] }
 0x181   : > { %v3406_v12 = vshll.u32 %v3162_v44, 16  ;;  %v3412_v29 = vshll.u32 %v12125_v31, 16  ;;  %v367_v62 = vsel %vm11204_vm11, 0, %v366_v22  ;;  %v1978_v42 = vrot.slane %v11552_v50, 4  ;;  %3906 = vmatprep.mubr.bf16.mxu1 %v8954_v3  ;;  %v3165_v44 = vld [vmem:[#allocation2 + $0xf0] sm:$0xff] }
 0x182   : > { %v3395_v40 = vor.u32 %v3394_v9, %v12123_v49  ;;  %v3416_v53 = vshrl.u32 %v12125_v31, 16  ;;  %368 = vst [vmem:[#allocation2 + $0x100] sm:$0x11] %v367_v62  ;;  %v2386_v6 = vrot.slane %v11560_v0, 4  ;;  %4535 = vmatmul.mubr.bf16.gmra.mrb[56].mxu0 %v9017_v58  ;;  %v12144_v36 = vsel %vm11760_vm2, %v8997_v59, %v4144_v51  ;;  %v369_v58 = vld [vmem:[#allocation2 + $0x118] sm:$0x11] }
 0x183   : > { %v12148_v10 = vsel %vm11760_vm2, %v4146_v25, %v4147_v33  ;;  %v3400_v15 = vrot.slane %v3398_v16, 5  ;;  %4542 = vmatprep.mubr.bf16.mxu0 %v9020_v28  ;;  %v3386_v35 = vrot.slane %v3385_v43, 4  ;;  %v8998_v57 = vrot.slane %v12134_v45, 9 }
 0x184   : > { %v3405_v63 = vrot.slane %v3403_v47, 4  ;;  %v3408_v46 = vrot.slane %v3406_v12, 5  ;;  %v3396_v22 = vrot.slane %v3395_v40, 4  ;;  %v3414_v54 = vrot.slane %v3412_v29, 5 }
 0x185   : > { %v8953_v51 = vcombine.low %v12102_v11, %v12110_v4  ;;  %v3418_v59 = vrot.slane %v3416_v53, 4  ;;  %v9019_v33 = vcombine.low %v12092_v41, %v12106_v61  ;;  %v9022_v25 = vcombine.high %v12144_v36, %v12148_v10 }
 0x186   : > { %v12153_v3 = vpop.f32.mrb[0].mxu1  ;;  %v3427_v39 = vshrl.u32 %v3165_v44, 16  ;;  %v3430_v28 = vshll.u32 %v3165_v44, 16  ;;  %v14307_v43 = vrot.slane %v11422_v27, 4  ;;  %v14308_v11 = vrot.slane %v11387_v26, 4 }
 0x187   : > { %v2099_v9 = vld [vmem:[#allocation2 + $0xe8] sm:$0x1]  ;;  %v2563_v16 = vld [vmem:[#allocation2 + $0xec] sm:$0x1]  ;;  %v3409_v12 = vor.u32 %v3408_v46, %v3405_v63  ;;  %v3436_v40 = vshll.u32 %v3166_v23, 16  ;;  %v9446_v41 = vpop.f32.mrb[1].mxu1  ;;  %v12184_v27 = vsel %vm11798_vm6, %v3386_v35, %v12123_v49  ;;  %v9021_v49 = vcombine.low %v12144_v36, %v12148_v10 }
 0x188   : > { %v2100_v47 = vsel %vm11190_vm4, %v14307_v43, %v2099_v9  ;;  %v2564_v4 = vsel %vm11190_vm4, %v14308_v11, %v2563_v16  ;;  %v4151_v61 = vrot.slane %v12125_v31, 5  ;;  %v3440_v62 = vshrl.u32 %v3166_v23, 16  ;;  %3907 = vmatmul.mubr.bf16.gmra.mrb[56].mxu1 %v8953_v51  ;;  %v3168_v16 = vld [vmem:[#allocation2 + $0x108] sm:$0xff]  ;;  %v9448_v31 = vpop.f32.mrb[2].mxu1  ;;  %v372_v51 = vld [vmem:[#allocation2 + $0x130] sm:$0x11] }
 0x189   : > { %2101 = vst [vmem:[#allocation2 + $0xe8] sm:$0x1] %v2100_v47  ;;  %2565 = vst [vmem:[#allocation2 + $0xec] sm:$0x1] %v2564_v4  ;;  %v2106_v45 = vld [vmem:[#allocation2 + $0x100] sm:$0x1]  ;;  %v14309_v53 = vmov %v14307_v43  ;;  %3914 = vmatprep.mubr.bf16.mxu1 %v8956_v32 }
 0x18a   : > { %v2570_v29 = vld [vmem:[#allocation2 + $0x104] sm:$0x1]  ;;  %v2107_v44 = vsel %vm11190_vm4, %v14309_v53, %v2106_v45  ;;  %v14310_v26 = vrot.slane %v11430_v18, 4  ;;  %v8999_v46 = vrot.slane %v4029_v24, 9  ;;  %v370_v9 = vsel %vm11204_vm11, 0, %v369_v58  ;;  %4543 = vmatmul.mubr.bf16.gmra.mrb[60].mxu0 %v9019_v33  ;;  %v9449_v43 = vpop.f32.mrb[3].mxu1 }
 0x18b   : > { %v12188_v18 = vsel %vm11798_vm6, %v3396_v22, %v3400_v15  ;;  %v3419_v24 = vor.u32 %v3418_v59, %v3414_v54  ;;  %2108 = vst [vmem:[#allocation2 + $0x100] sm:$0x1] %v2107_v44  ;;  %v4158_v58 = vrot.slane %v3166_v23, 5  ;;  %371 = vst [vmem:[#allocation2 + $0x118] sm:$0x11] %v370_v9  ;;  %4550 = vmatprep.mubr.bf16.mxu0 %v9022_v25  ;;  %v3410_v47 = vrot.slane %v3409_v12, 4 }
 0x18c   : > { %v2571_v63 = vsel %vm11190_vm4, %v14310_v26, %v2570_v29  ;;  %v3429_v32 = vrot.slane %v3427_v39, 4  ;;  %v3432_v33 = vrot.slane %v3430_v28, 5  ;;  %v12190_v11 = vrot.slane %v3436_v40, 5  ;;  %v12192_v4 = vld [vmem:[#allocation2 + $0x110] sm:$0xff]  ;;  %v4030_v26 = vld [vmem:[#allocation2 + $0x108] sm:$0xee] }
 0x18d   : > { %2572 = vst [vmem:[#allocation2 + $0x104] sm:$0x1] %v2571_v63  ;;  %v12198_v15 = vsel %vm11760_vm2, %v8998_v57, %v4151_v61  ;;  %v3442_v35 = vrot.slane %v3440_v62, 4  ;;  %v3451_v23 = vshrl.u32 %v3168_v16, 16  ;;  %v8958_v22 = vcombine.high %v12184_v27, %v12188_v18 }
 0x18e   : > { %v8957_v59 = vcombine.low %v12184_v27, %v12188_v18  ;;  %v4153_v25 = vrot.slane %v4151_v61, 4  ;;  %v12206_v39 = vsel %vm11760_vm2, %v8999_v46, %v4158_v58  ;;  %v3420_v28 = vrot.slane %v3419_v24, 4 }
 0x18f   : > { %v4160_v12 = vrot.slane %v4158_v58, 4  ;;  %v3454_v36 = vshll.u32 %v3168_v16, 16  ;;  %v373_v10 = vsel %vm11204_vm11, 0, %v372_v51  ;;  %v12212_v40 = vsel %vm11798_vm6, %v3410_v47, %v3414_v54 }
 0x190   : > { %v3164_v57 = vld [vmem:[#allocation2 + $0xe8] sm:$0x11]  ;;  %v3433_v45 = vor.u32 %v3432_v33, %v3429_v32  ;;  %v3460_v29 = vshll.u32 %v12192_v4, 16  ;;  %v3464_v61 = vshrl.u32 %v12192_v4, 16  ;;  %374 = vst [vmem:[#allocation2 + $0x130] sm:$0x11] %v373_v10  ;;  %v3443_v44 = vor.u32 %v3442_v35, %v12190_v11  ;;  %3915 = vmatmul.mubr.bf16.gmra.mrb[60].mxu1 %v8955_v52 }
 0x191   : > { %v4154_v62 = vrot.slane %v3164_v57, 5  ;;  %v3422_v53 = vshll.u32 %v3164_v57, 16  ;;  %v12217_v63 = vrot.slane %v3451_v23, 4  ;;  %v12224_v16 = vadd.f32 %v12024_v55, %v12017_v5  ;;  %3922 = vmatprep.mubr.bf16.mxu1 %v8958_v22  ;;  %v375_v32 = vld [vmem:[#allocation2 + $0x148] sm:$0x11]  ;;  %v3171_v23 = vld [vmem:[#allocation2 + $0x120] sm:$0xff] }
 0x192   : > { %v2113_v54 = vld [vmem:[#allocation2 + $0x118] sm:$0x1]  ;;  %v2577_v9 = vld [vmem:[#allocation2 + $0x11c] sm:$0x1]  ;;  %v12227_v24 = vadd.f32 %v9446_v41, %v12153_v3  ;;  %v12231_v58 = vadd.f32 %v12051_v38, %v12045_v8  ;;  %v12233_v51 = vadd.f32 %v9449_v43, %v9448_v31  ;;  %4551 = vmatmul.mubr.bf16.gmra.mrb[64].mxu0 %v9021_v49  ;;  %v3456_v47 = vrot.slane %v3454_v36, 5  ;;  %v12257_v35 = vld [vmem:[#allocation2 + $0x128] sm:$0xff] }
 0x193   : > { %14311 = vst [vmem:[#allocation15_spill] sm:$0xff] %v12224_v16  ;;  %v4155_v37 = vsel %vm11760_vm2, %v4153_v25, %v4154_v62  ;;  %v3424_v14 = vrot.slane %v3422_v53, 5  ;;  %v2114_v3 = vsel %vm11190_vm4, %v1978_v42, %v2113_v54  ;;  %v2578_v8 = vsel %vm11190_vm4, %v2369_v21, %v2577_v9  ;;  %v378_v54 = vld [vmem:[#allocation2 + $0x160] sm:$0x11] }
 0x194   : > { %v3167_v46 = vld [vmem:[#allocation2 + $0x100] sm:$0x11]  ;;  %14312 = vst [vmem:[#allocation16_spill] sm:$0xff] %v12231_v58  ;;  %14313 = vst [vmem:[#allocation17_spill] sm:$0xff] %v12233_v51  ;;  %v9024_v5 = vcombine.high %v12198_v15, %v4155_v37  ;;  %v9000_v31 = vrot.slane %v4030_v26, 9  ;;  %v4165_v43 = vrot.slane %v12192_v4, 5  ;;  %v9023_v25 = vcombine.low %v12198_v15, %v4155_v37 }
 0x195   : > { %v4161_v52 = vrot.slane %v3167_v46, 5  ;;  %v3446_v55 = vshll.u32 %v3167_v46, 16  ;;  %v12248_v38 = vsel %vm11798_vm6, %v3420_v28, %v3424_v14  ;;  %2115 = vst [vmem:[#allocation2 + $0x118] sm:$0x1] %v2114_v3  ;;  %2579 = vst [vmem:[#allocation2 + $0x11c] sm:$0x1] %v2578_v8  ;;  %v3457_v28 = vor.u32 %v3456_v47, %v12217_v63 }
 0x196   : > { %4558 = vmatprep.mubr.bf16.mxu0 %v9024_v5  ;;  %v3434_v33 = vrot.slane %v3433_v45, 4  ;;  %v3444_v56 = vrot.slane %v3443_v44, 4  ;;  %v12255_v49 = vrot.slane %v3460_v29, 5  ;;  %v3466_v21 = vrot.slane %v3464_v61, 4  ;;  %v12274_v29 = vld [vmem:[#allocation2 + $0x120] sm:$0xee] }
 0x197   : > { %v12252_v41 = vsel %vm11760_vm2, %v4160_v12, %v4161_v52  ;;  %v8960_v22 = vcombine.high %v12212_v40, %v12248_v38  ;;  %v2120_v12 = vld [vmem:[#allocation2 + $0x130] sm:$0x1]  ;;  %v2584_v36 = vld [vmem:[#allocation2 + $0x134] sm:$0x1]  ;;  %v4172_v4 = vrot.slane %v12257_v35, 5  ;;  %v3448_v57 = vrot.slane %v3446_v55, 5 }
 0x198   : > { %v9026_v10 = vcombine.high %v12206_v39, %v12252_v41  ;;  %v2121_v45 = vsel %vm11190_vm4, %v1978_v42, %v2120_v12  ;;  %v2585_v15 = vsel %vm11190_vm4, %v2386_v6, %v2584_v36  ;;  %v12276_v61 = vpop.f32.mrb[4].mxu0  ;;  %v3475_v62 = vshrl.u32 %v3171_v23, 16  ;;  %3923 = vmatmul.mubr.bf16.gmra.mrb[64].mxu1 %v8957_v59  ;;  %v3174_v59 = vld [vmem:[#allocation2 + $0x138] sm:$0xff]  ;;  %v5165_v51 = vld [vmem:[#allocation2 + $0x40] sm:$0x11] }
 0x199   : > { %2122 = vst [vmem:[#allocation2 + $0x130] sm:$0x1] %v2121_v45  ;;  %2586 = vst [vmem:[#allocation2 + $0x134] sm:$0x1] %v2585_v15  ;;  %v3478_v53 = vshll.u32 %v3171_v23, 16  ;;  %v376_v44 = vsel %vm11204_vm11, 0, %v375_v32  ;;  %v12289_v6 = vsel %vm11760_vm2, %v9000_v31, %v4165_v43  ;;  %3930 = vmatprep.mubr.bf16.mxu1 %v8960_v22  ;;  %v12296_v46 = vsel %vm11798_vm6, %v3434_v33, %v12190_v11 }
 0x19a   : > { %v12280_v50 = vpop.f32.mrb[5].mxu0  ;;  %v1995_v42 = vrot.slane %v11684_v19, 4  ;;  %v2403_v0 = vrot.slane %v11649_v34, 4  ;;  %v4167_v26 = vrot.slane %v4165_v43, 4  ;;  %377 = vst [vmem:[#allocation2 + $0x148] sm:$0x11] %v376_v44  ;;  %4559 = vmatmul.mubr.bf16.gmra.mrb[68].mxu0 %v9023_v25  ;;  %v3467_v34 = vor.u32 %v3466_v21, %v12255_v49 }
 0x19b   : > { %v12291_v63 = vpop.f32.mrb[6].mxu0  ;;  %v9001_v27 = vrot.slane %v12274_v29, 9  ;;  %v4174_v18 = vrot.slane %v4172_v4, 4  ;;  %4566 = vmatprep.mubr.bf16.mxu0 %v9026_v10  ;;  %v12306_v37 = vsel %vm11798_vm6, %v3444_v56, %v3448_v57  ;;  %v3458_v52 = vrot.slane %v3457_v28, 4  ;;  %v12312_v43 = vld [vmem:[#allocation2 + $0x140] sm:$0xff] }
 0x19c   : > { %v12302_v9 = vpop.f32.mrb[7].mxu0  ;;  %v3170_v14 = vld [vmem:[#allocation2 + $0x118] sm:$0x11]  ;;  %v3484_v11 = vshll.u32 %v12257_v35, 16  ;;  %v3488_v47 = vshrl.u32 %v12257_v35, 16  ;;  %v3477_v3 = vrot.slane %v3475_v62, 4  ;;  %v8959_v31 = vcombine.low %v12212_v40, %v12248_v38 }
 0x19d   : > { %v4168_v5 = vrot.slane %v3170_v14, 5  ;;  %v3470_v55 = vshll.u32 %v3170_v14, 16  ;;  %v3480_v8 = vrot.slane %v3478_v53, 5  ;;  %v3499_v32 = vshrl.u32 %v3174_v59, 16 }
 0x19e   : > { %v3502_v33 = vshll.u32 %v3174_v59, 16  ;;  %v379_v56 = vsel %vm11204_vm11, 0, %v378_v54  ;;  %v8962_v21 = vcombine.high %v12296_v46, %v12306_v37  ;;  %v9025_v23 = vcombine.low %v12206_v39, %v12252_v41 }
 0x19f   : > { %v12322_v22 = vsel %vm11760_vm2, %v4167_v26, %v4168_v5  ;;  %v3468_v25 = vrot.slane %v3467_v34, 4  ;;  %380 = vst [vmem:[#allocation2 + $0x160] sm:$0x11] %v379_v56  ;;  %v3472_v38 = vrot.slane %v3470_v55, 5  ;;  %v3486_v12 = vrot.slane %v3484_v11, 5  ;;  %v12371_v56 = vld [vmem:[#allocation2 + $0x158] sm:$0xff] }
 0x1a0   : > { %v9028_v40 = vcombine.high %v12289_v6, %v12322_v22  ;;  %v3173_v28 = vld [vmem:[#allocation2 + $0x130] sm:$0x11]  ;;  %v3490_v36 = vrot.slane %v3488_v47, 4  ;;  %v3481_v57 = vor.u32 %v3480_v8, %v3477_v3  ;;  %v3508_v29 = vshll.u32 %v12312_v43, 16  ;;  %3931 = vmatmul.mubr.bf16.gmra.mrb[68].mxu1 %v8959_v31  ;;  %v381_v47 = vld [vmem:[#allocation2 + $0x178] sm:$0x11] }
 0x1a1   : > { %v4175_v10 = vrot.slane %v3173_v28, 5  ;;  %v2127_v45 = vld [vmem:[#allocation2 + $0x148] sm:$0x1]  ;;  %v2591_v15 = vld [vmem:[#allocation2 + $0x14c] sm:$0x1]  ;;  %v3501_v62 = vrot.slane %v3499_v32, 4  ;;  %3938 = vmatprep.mubr.bf16.mxu1 %v8962_v21  ;;  %v12338_v34 = vsel %vm11798_vm6, %v3458_v52, %v12255_v49  ;;  %v12342_v59 = vsel %vm11798_vm6, %v3468_v25, %v3472_v38 }
 0x1a2   : > { %v2128_v39 = vsel %vm11190_vm4, %v1995_v42, %v2127_v45  ;;  %v2592_v41 = vsel %vm11190_vm4, %v2403_v0, %v2591_v15  ;;  %v3504_v53 = vrot.slane %v3502_v33, 5  ;;  %v2420_v44 = vrot.slane %v11692_v30, 4  ;;  %4567 = vmatmul.mubr.bf16.gmra.mrb[72].mxu0 %v9025_v23  ;;  %v4032_v49 = vld [vmem:[#allocation2 + $0x138] sm:$0xee]  ;;  %v3177_v31 = vld [vmem:[#allocation2 + $0x150] sm:$0xff] }
 0x1a3   : > { %2129 = vst [vmem:[#allocation2 + $0x148] sm:$0x1] %v2128_v39  ;;  %2593 = vst [vmem:[#allocation2 + $0x14c] sm:$0x1] %v2592_v41  ;;  %v3512_v26 = vshrl.u32 %v12312_v43, 16  ;;  %4574 = vmatprep.mubr.bf16.mxu0 %v9028_v40  ;;  %v3491_v0 = vor.u32 %v3490_v36, %v3486_v12  ;;  %v3494_v54 = vshll.u32 %v3173_v28, 16  ;;  %v8961_v30 = vcombine.low %v12296_v46, %v12306_v37 }
 0x1a4   : > { %v12350_v14 = vsel %vm11760_vm2, %v9001_v27, %v4172_v4  ;;  %v12354_v11 = vsel %vm11760_vm2, %v4174_v18, %v4175_v10  ;;  %v4179_v52 = vrot.slane %v12312_v43, 5  ;;  %v9027_v5 = vcombine.low %v12289_v6, %v12322_v22 }
 0x1a5   : > { %v3482_v55 = vrot.slane %v3481_v57, 4  ;;  %v3505_v3 = vor.u32 %v3504_v53, %v3501_v62  ;;  %v3510_v46 = vrot.slane %v3508_v29, 5  ;;  %v8964_v4 = vcombine.high %v12338_v34, %v12342_v59  ;;  %v4033_v62 = vld [vmem:[#allocation2 + $0x150] sm:$0xee] }
 0x1a6   : > { %v2134_v37 = vld [vmem:[#allocation2 + $0x160] sm:$0x1]  ;;  %v2598_v35 = vld [vmem:[#allocation2 + $0x164] sm:$0x1]  ;;  %v3514_v27 = vrot.slane %v3512_v26, 4  ;;  %v9030_v6 = vcombine.high %v12350_v14, %v12354_v11  ;;  %v3492_v32 = vrot.slane %v3491_v0, 4 }
 0x1a7   : > { %v2135_v18 = vsel %vm11190_vm4, %v1995_v42, %v2134_v37  ;;  %v2599_v8 = vsel %vm11190_vm4, %v2420_v44, %v2598_v35  ;;  %v3496_v33 = vrot.slane %v3494_v54, 5  ;;  %v382_v19 = vsel %vm11204_vm11, 0, %v381_v47 }
 0x1a8   : > { %v12367_v43 = vpop.f32.mrb[8].mxu0  ;;  %2136 = vst [vmem:[#allocation2 + $0x160] sm:$0x1] %v2135_v18  ;;  %2600 = vst [vmem:[#allocation2 + $0x164] sm:$0x1] %v2599_v8  ;;  %v9002_v42 = vrot.slane %v4032_v49, 9  ;;  %3939 = vmatmul.mubr.bf16.gmra.mrb[72].mxu1 %v8961_v30  ;;  %v12382_v36 = vsel %vm11798_vm6, %v3482_v55, %v3486_v12  ;;  %v3515_v57 = vor.u32 %v3514_v27, %v3510_v46 }
 0x1a9   : > { %v12375_v21 = vpop.f32.mrb[9].mxu0  ;;  %v4181_v23 = vrot.slane %v4179_v52, 4  ;;  %383 = vst [vmem:[#allocation2 + $0x178] sm:$0x11] %v382_v19  ;;  %v2437_v25 = vrot.slane %v11757_v17, 4  ;;  %v3523_v38 = vshrl.u32 %v3177_v31, 16  ;;  %3946 = vmatprep.mubr.bf16.mxu1 %v8964_v4  ;;  %v12391_v17 = vsel %vm11798_vm6, %v3492_v32, %v3496_v33 }
 0x1aa   : > { %v12377_v22 = vpop.f32.mrb[10].mxu0  ;;  %v3176_v40 = vld [vmem:[#allocation2 + $0x148] sm:$0x11]  ;;  %v3526_v28 = vshll.u32 %v3177_v31, 16  ;;  %4575 = vmatmul.mubr.bf16.gmra.mrb[76].mxu0 %v9027_v5  ;;  %v3532_v45 = vshll.u32 %v12371_v56, 16  ;;  %v3506_v39 = vrot.slane %v3505_v3, 4  ;;  %v12399_v26 = vsel %vm11760_vm2, %v9002_v42, %v4179_v52 }
 0x1ab   : > { %v4182_v10 = vrot.slane %v3176_v40, 5  ;;  %v12387_v29 = vpop.f32.mrb[11].mxu0  ;;  %4582 = vmatprep.mubr.bf16.mxu0 %v9030_v6  ;;  %v3518_v41 = vshll.u32 %v3176_v40, 16  ;;  %v3536_v53 = vshrl.u32 %v12371_v56, 16  ;;  %v14270_v44 = vrot.slane %v11783_v48, 4  ;;  %v3180_v3 = vld [vmem:[#allocation2 + $0x168] sm:$0xff] }
 0x1ac   : > { %v12385_v15 = vpop.f32.mrb[4].mxu1  ;;  %v4186_v54 = vrot.slane %v12371_v56, 5  ;;  %v8963_v49 = vcombine.low %v12338_v34, %v12342_v59  ;;  %v9029_v47 = vcombine.low %v12350_v14, %v12354_v11  ;;  %v3525_v5 = vrot.slane %v3523_v38, 4  ;;  %v3181_v8 = vld [vmem:[#allocation2 + $0x170] sm:$0xff]  ;;  %v12430_v42 = vld [vmem:[#allocation2 + $0x18] sm:$0xff] }
 0x1ad   : > { %v12394_v12 = vpop.f32.mrb[5].mxu1  ;;  %v12403_v0 = vsel %vm11760_vm2, %v4181_v23, %v4182_v10  ;;  %v3528_v55 = vrot.slane %v3526_v28, 5  ;;  %v8966_v52 = vcombine.high %v12382_v36, %v12391_v17  ;;  %v3516_v35 = vrot.slane %v3515_v57, 4  ;;  %v12434_v28 = vld [vmem:[#allocation2 + $0x20] sm:$0xff] }
 0x1ae   : > { %v12406_v30 = vpop.f32.mrb[6].mxu1  ;;  %v9003_v27 = vrot.slane %v4033_v62, 9  ;;  %v12416_v18 = vrot.slane %v3532_v45, 5  ;;  %v9032_v34 = vcombine.high %v12399_v26, %v12403_v0  ;;  %v12422_v59 = vsel %vm11798_vm6, %v3506_v39, %v3510_v46 }
 0x1af   : > { %v12412_v37 = vpop.f32.mrb[7].mxu1  ;;  %v3179_v4 = vld [vmem:[#allocation2 + $0x160] sm:$0x11]  ;;  %v3520_v14 = vrot.slane %v3518_v41, 5  ;;  %v3538_v11 = vrot.slane %v3536_v53, 4  ;;  %v4188_v32 = vrot.slane %v4186_v54, 4  ;;  %v8965_v46 = vcombine.low %v12382_v36, %v12391_v17 }
 0x1b0   : > { %v2141_v31 = vld [vmem:[#allocation2 + $0x178] sm:$0x1]  ;;  %v2605_v6 = vld [vmem:[#allocation2 + $0x17c] sm:$0x1]  ;;  %v4189_v33 = vrot.slane %v3179_v4, 5  ;;  %3947 = vmatmul.mubr.bf16.gmra.mrb[76].mxu1 %v8963_v49  ;;  %v3529_v23 = vor.u32 %v3528_v55, %v3525_v5  ;;  %v3547_v40 = vshrl.u32 %v3180_v3, 16  ;;  %v12438_v10 = vsel %vm11760_vm2, %v9003_v27, %v4186_v54 }
 0x1b1   : > { %v2142_v56 = vsel %vm11190_vm4, %v14270_v44, %v2141_v31  ;;  %v2606_v19 = vsel %vm11190_vm4, %v2437_v25, %v2605_v6  ;;  %v3550_v38 = vshll.u32 %v3180_v3, 16  ;;  %3954 = vmatprep.mubr.bf16.mxu1 %v8966_v52  ;;  %v4034_v25 = vld [vmem:[#allocation2 + $0x168] sm:$0xee]  ;;  %v4193_v57 = vrot.slane %v3181_v8, 5 }
 0x1b2   : > { %2143 = vst [vmem:[#allocation2 + $0x178] sm:$0x1] %v2142_v56  ;;  %2607 = vst [vmem:[#allocation2 + $0x17c] sm:$0x1] %v2606_v19  ;;  %4583 = vmatmul.mubr.bf16.gmra.mrb[80].mxu0 %v9029_v47  ;;  %v3556_v45 = vshll.u32 %v3181_v8, 16  ;;  %v3560_v39 = vshrl.u32 %v3181_v8, 16  ;;  %v12444_v36 = vsel %vm11798_vm6, %v3516_v35, %v3520_v14  ;;  %v3539_v17 = vor.u32 %v3538_v11, %v12416_v18 }
 0x1b3   : > { %4590 = vmatprep.mubr.bf16.mxu0 %v9032_v34  ;;  %v3542_v62 = vshll.u32 %v3179_v4, 16  ;;  %v5209_v53 = vshrl.u32 %v12430_v42, 16  ;;  %v12452_v54 = vsel %vm11760_vm2, %v4188_v32, %v4189_v33  ;;  %v5212_v47 = vshll.u32 %v12430_v42, 16  ;;  %v12467_v19 = vld [vmem:[#allocation2 + $0x30] sm:$0xff] }
 0x1b4   : > { %v12440_v41 = vpop.f32.mrb[8].mxu1  ;;  %v5218_v5 = vshll.u32 %v12434_v28, 16  ;;  %v5222_v55 = vshrl.u32 %v12434_v28, 16  ;;  %v3530_v52 = vrot.slane %v3529_v23, 4  ;;  %v9004_v35 = vrot.slane %v4034_v25, 9  ;;  %v12469_v23 = vld [vmem:[#allocation2 + $0x38] sm:$0xff] }
 0x1b5   : > { %v12448_v49 = vpop.f32.mrb[9].mxu1  ;;  %v3549_v27 = vrot.slane %v3547_v40, 4  ;;  %v3552_v4 = vrot.slane %v3550_v38, 5  ;;  %v8968_v34 = vcombine.high %v12422_v59, %v12444_v36  ;;  %v9031_v14 = vcombine.low %v12399_v26, %v12403_v0 }
 0x1b6   : > { %v12457_v3 = vpop.f32.mrb[10].mxu1  ;;  %v3558_v11 = vrot.slane %v3556_v45, 5  ;;  %v3562_v31 = vrot.slane %v3560_v39, 4  ;;  %v9034_v6 = vcombine.high %v12438_v10, %v12452_v54  ;;  %v3540_v32 = vrot.slane %v3539_v17, 4  ;;  %v5162_v39 = vld [vmem:[#allocation2 + $0x28] sm:$0x11] }
 0x1b7   : > { %v12459_v8 = vpop.f32.mrb[11].mxu1  ;;  %v3544_v33 = vrot.slane %v3542_v62, 5  ;;  %v4195_v56 = vrot.slane %v4193_v57, 4  ;;  %v5211_v38 = vrot.slane %v5209_v53, 4  ;;  %v5214_v25 = vrot.slane %v5212_v47, 5 }
 0x1b8   : > { %v5220_v44 = vrot.slane %v5218_v5, 5  ;;  %v5224_v58 = vrot.slane %v5222_v55, 4  ;;  %3955 = vmatmul.mubr.bf16.gmra.mrb[80].mxu1 %v8965_v46  ;;  %v12473_v26 = vsel %vm11760_vm2, %v9004_v35, %v4193_v57  ;;  %v3553_v45 = vor.u32 %v3552_v4, %v3549_v27 }
 0x1b9   : > { %v3182_v40 = vld [vmem:[#allocation2 + $0x178] sm:$0x11]  ;;  %3962 = vmatprep.mubr.bf16.mxu1 %v8968_v34  ;;  %v3535_v17 = vsel %vm11798_vm6, %v3530_v52, %v12416_v18  ;;  %v3563_v62 = vor.u32 %v3562_v31, %v3558_v11  ;;  %v5233_v53 = vshrl.u32 %v12467_v19, 16  ;;  %v5236_v47 = vshll.u32 %v12467_v19, 16 }
 0x1ba   : > { %v4196_v0 = vrot.slane %v3182_v40, 5  ;;  %4591 = vmatmul.mubr.bf16.gmra.mrb[84].mxu0 %v9031_v14  ;;  %v3545_v46 = vsel %vm11798_vm6, %v3540_v32, %v3544_v33  ;;  %v3566_v57 = vshll.u32 %v3182_v40, 16  ;;  %v5242_v5 = vshll.u32 %v12469_v23, 16 }
 0x1bb   : > { %4598 = vmatprep.mubr.bf16.mxu0 %v9034_v6  ;;  %v5246_v55 = vshrl.u32 %v12469_v23, 16  ;;  %v5215_v27 = vor.u32 %v5214_v25, %v5211_v38  ;;  %v5225_v4 = vor.u32 %v5224_v58, %v5220_v44  ;;  %v5228_v18 = vshll.u32 %v5162_v39, 16  ;;  %v12491_v38 = vld [vmem:[#allocation2 + $0x48] sm:$0xff] }
 0x1bc   : > { %v4197_v35 = vsel %vm11760_vm2, %v4195_v56, %v4196_v0  ;;  %v8967_v52 = vcombine.low %v12422_v59, %v12444_v36  ;;  %v9033_v34 = vcombine.low %v12438_v10, %v12452_v54  ;;  %v3554_v14 = vrot.slane %v3553_v45, 4  ;;  %v12497_v54 = vld [vmem:[#allocation2 + $0x50] sm:$0xff] }
 0x1bd   : > { %v8970_v31 = vcombine.high %v3535_v17, %v3545_v46  ;;  %v3564_v6 = vrot.slane %v3563_v62, 4  ;;  %v5235_v32 = vrot.slane %v5233_v53, 4  ;;  %v5238_v33 = vrot.slane %v5236_v47, 5 }
 0x1be   : > { %v9036_v40 = vcombine.high %v12473_v26, %v4197_v35  ;;  %v3568_v16 = vrot.slane %v3566_v57, 5  ;;  %v5244_v1 = vrot.slane %v5242_v5, 5  ;;  %v5248_v56 = vrot.slane %v5246_v55, 4 }
 0x1bf   : > { %v5216_v58 = vrot.slane %v5215_v27, 4  ;;  %v5226_v25 = vrot.slane %v5225_v4, 4  ;;  %v5230_v0 = vrot.slane %v5228_v18, 5  ;;  %v12495_v59 = vsel %vm11798_vm6, %v3554_v14, %v3558_v11 }
 0x1c0   : > { %3963 = vmatmul.mubr.bf16.gmra.mrb[84].mxu1 %v8967_v52  ;;  %v5239_v10 = vor.u32 %v5238_v33, %v5235_v32  ;;  %v5252_v36 = vshll.u32 %v5165_v51, 16  ;;  %v5257_v45 = vshrl.u32 %v12491_v38, 16  ;;  %v3569_v39 = vsel %vm11798_vm6, %v3564_v6, %v3568_v16  ;;  %v12527_v32 = vld [vmem:[#allocation2 + $0x60] sm:$0xff] }
 0x1c1   : > { %3970 = vmatprep.mubr.bf16.mxu1 %v8970_v31  ;;  %v5249_v62 = vor.u32 %v5248_v56, %v5244_v1  ;;  %v5260_v53 = vshll.u32 %v12491_v38, 16  ;;  %v12505_v47 = vadd.f32 %v12280_v50, %v12276_v61  ;;  %v8969_v57 = vcombine.low %v3535_v17, %v3545_v46 }
 0x1c2   : > { %4599 = vmatmul.mubr.bf16.gmra.mrb[88].mxu0 %v9033_v34  ;;  %v5221_v11 = vsel %vm11798_vm6, %v5216_v58, %v5220_v44  ;;  %v5231_v51 = vsel %vm11798_vm6, %v5226_v25, %v5230_v0  ;;  %v12513_v5 = vadd.f32 %v12394_v12, %v12385_v15  ;;  %v5266_v16 = vshll.u32 %v12497_v54, 16 }
 0x1c3   : > { %4606 = vmatprep.mubr.bf16.mxu0 %v9036_v40  ;;  %v5270_v27 = vshrl.u32 %v12497_v54, 16  ;;  %v12519_v61 = vadd.f32 %v12302_v9, %v12291_v63  ;;  %v12523_v50 = vadd.f32 %v12412_v37, %v12406_v30  ;;  %v8972_v17 = vcombine.high %v12495_v59, %v3569_v39  ;;  %v5168_v63 = vld [vmem:[#allocation2 + $0x58] sm:$0x11]  ;;  %v12533_v37 = vld [vmem:[#allocation2 + $0x68] sm:$0xff] }
 0x1c4   : > { %v9035_v46 = vcombine.low %v12473_v26, %v4197_v35  ;;  %v5240_v15 = vrot.slane %v5239_v10, 4  ;;  %v5254_v12 = vrot.slane %v5252_v36, 5  ;;  %v9102_v18 = vcombine.high %v5221_v11, %v5231_v51  ;;  %v10602_v36 = vld [vmem:[#allocation8 + $0x300] sm:$0xff]  }
 0x1c5   : > { %v9415_v55 = vpop.f32.mrb[12].mxu0  ;;  %v5250_v52 = vrot.slane %v5249_v62, 4  ;;  %v5259_v34 = vrot.slane %v5257_v45, 4  ;;  %v5262_v14 = vrot.slane %v5260_v53, 5  ;;  %v5268_v9 = vrot.slane %v5266_v16, 5  ;;  %v12566_v62 = vld [vmem:[#allocation2 + $0x80] sm:$0xff] }
 0x1c6   : > { %v9416_v44 = vpop.f32.mrb[13].mxu0  ;;  %v5272_v6 = vrot.slane %v5270_v27, 4  ;;  %v12531_v30 = vsel %vm11798_vm6, %v5240_v15, %v5244_v1  ;;  %v12537_v26 = vadd.f32 %v12375_v21, %v12367_v43  ;;  %v8971_v35 = vcombine.low %v12495_v59, %v3569_v39  ;;  %v5171_v27 = vld [vmem:[#allocation2 + $0x70] sm:$0x11]  ;;  %v10610_v15 = vld [vmem:[#allocation8 + $0x308] sm:$0xff]  }
 0x1c7   : > { %v9418_v4 = vpop.f32.mrb[14].mxu0  ;;  %v12542_v33 = vsel %vm11798_vm6, %v5250_v52, %v5254_v12  ;;  %v5263_v40 = vor.u32 %v5262_v14, %v5259_v34  ;;  %v12546_v56 = vadd.f32 %v12448_v49, %v12440_v41  ;;  %v5276_v1 = vshll.u32 %v5168_v63, 16  ;;  %v10617_v34 = vld [vmem:[#allocation8 + $0x350] sm:$0xff]  }
 0x1c8   : > { %v9419_v31 = vpop.f32.mrb[15].mxu0  ;;  %3971 = vmatmul.mubr.bf16.gmra.mrb[88].mxu1 %v8969_v57  ;;  %v5281_v58 = vshrl.u32 %v12527_v32, 16  ;;  %v12551_v25 = vadd.f32 %v12387_v29, %v12377_v22  ;;  %v12555_v43 = vadd.f32 %v12459_v8, %v12457_v3  ;;  %v5273_v21 = vor.u32 %v5272_v6, %v5268_v9  ;;  %v12564_v29 = vld [vmem:[#allocation2 + $0x78] sm:$0xff] }
 0x1c9   : > { %3978 = vmatprep.mubr.bf16.mxu1 %v8972_v17  ;;  %v5284_v0 = vshll.u32 %v12527_v32, 16  ;;  %v5290_v59 = vshll.u32 %v12533_v37, 16  ;;  %v5294_v10 = vshrl.u32 %v12533_v37, 16  ;;  %v9101_v41 = vcombine.low %v5221_v11, %v5231_v51  ;;  %v10609_v8 = vld [vmem:[#allocation8 + $0x348] sm:$0xff]  }
 0x1ca   : > { %4607 = vmatmul.mubr.bf16.gmra.mrb[92].mxu0 %v9035_v46  ;;  %v9054_v49 = vcombine.high %v12430_v42, %v12434_v28  ;;  %v9104_v22 = vcombine.high %v12531_v30, %v12542_v33  ;;  %v5264_v45 = vrot.slane %v5263_v40, 4  ;;  %v5278_v3 = vrot.slane %v5276_v1, 5  ;;  %v10600_v40 = vld [vmem:[#allocation8 + $0x280] sm:$0xff]  }
 0x1cb   : > { %5880 = vmatprep.mubr.bf16.mxu0 %v9102_v18  ;;  %v5283_v39 = vrot.slane %v5281_v58, 4  ;;  %v12568_v53 = vadd.f32 %v9416_v44, %v9415_v55  ;;  %v5274_v57 = vrot.slane %v5273_v21, 4  ;;  %v5286_v11 = vrot.slane %v5284_v0, 5  ;;  %v5174_v21 = vld [vmem:[#allocation2 + $0x88] sm:$0x11] }
 0x1cc   : > { %v12570_v51 = vrot.slane %v5290_v59, 5  ;;  %v5296_v16 = vrot.slane %v5294_v10, 4  ;;  %v5305_v17 = vshrl.u32 %v12564_v29, 16  ;;  %v12573_v46 = vadd.f32 %v9419_v31, %v9418_v4 }
 0x1cd   : > { %v5308_v12 = vshll.u32 %v12564_v29, 16  ;;  %v5314_v55 = vshll.u32 %v12566_v62, 16  ;;  %v5318_v44 = vshrl.u32 %v12566_v62, 16  ;;  %v9053_v18 = vcombine.low %v12430_v42, %v12434_v28 }
 0x1ce   : > { %14314 = vst [vmem:[#allocation18_spill] sm:$0xff] %v12573_v46  ;;  %v12582_v52 = vsel %vm11798_vm6, %v5264_v45, %v5268_v9  ;;  %v12586_v14 = vsel %vm11798_vm6, %v5274_v57, %v5278_v3  ;;  %v5287_v31 = vor.u32 %v5286_v11, %v5283_v39  ;;  %v5297_v63 = vor.u32 %v5296_v16, %v12570_v51  ;;  %v10606_v9 = vld [vmem:[#allocation8 + $0x2c8] sm:$0xff]   ;;  %v12599_v45 = vld [vmem:[#allocation2 + $0x90] sm:$0xff]  ;;  %v10625_v11 = vld [vmem:[#allocation8 + $0x358] sm:$0xff]  }
 0x1cf   : > { %v5300_v6 = vshll.u32 %v5171_v27, 16  ;;  %v9056_v42 = vcombine.high %v12467_v19, %v12469_v23  ;;  %v9103_v28 = vcombine.low %v12531_v30, %v12542_v33  ;;  %v5307_v1 = vrot.slane %v5305_v17, 4  ;;  %v10608_v16 = vld [vmem:[#allocation8 + $0x288] sm:$0xff]  }
 0x1d0   : > { %3979 = vmatmul.mubr.bf16.gmra.mrb[92].mxu1 %v8971_v35  ;;  %v5310_v0 = vrot.slane %v5308_v12, 5  ;;  %v12593_v59 = vrot.slane %v5314_v55, 5  ;;  %v5320_v10 = vrot.slane %v5318_v44, 4  ;;  %v5288_v3 = vrot.slane %v5287_v31, 4  ;;  %v12603_v17 = vld [vmem:[#allocation2 + $0x98] sm:$0xff] }
 0x1d1   : > { %4999 = vmatprep.mubr.bf16.mxu1 %v9054_v49  ;;  %v5302_v39 = vrot.slane %v5300_v6, 5  ;;  %v5324_v27 = vshll.u32 %v5174_v21, 16 }
 0x1d2   : > { %5881 = vmatmul.mubr.bf16.vlgmr.msra.gmra.mrb[96].mxu0 %v9101_v41  ;;  %v5311_v55 = vor.u32 %v5310_v0, %v5307_v1  ;;  %v5321_v44 = vor.u32 %v5320_v10, %v12593_v59  ;;  %v9105_v1 = vcombine.low %v12582_v52, %v12586_v14 }
 0x1d3   : > { %10054 = vmatpush3.bf16.msra.mxu0 %v10602_v36  ;;  %5888 = vmatprep.mubr.bf16.mxu0 %v9104_v22  ;;  %v9106_v36 = vcombine.high %v12582_v52, %v12586_v14  ;;  %v10618_v22 = vld [vmem:[#allocation8 + $0x310] sm:$0xff]   ;;  %v12635_v14 = vld [vmem:[#allocation2 + $0xb0] sm:$0xff] }
 0x1d4   : > { %10055 = vmatprep.subr.bf16.mxu0 %v10609_v8  ;;  %v5298_v8 = vrot.slane %v5297_v63, 4  ;;  %v9055_v63 = vcombine.low %v12467_v19, %v12469_v23  ;;  %v10633_v19 = vld [vmem:[#allocation8 + $0x360] sm:$0xff]   ;;  %v9058_v23 = vcombine.high %v12491_v38, %v12497_v54  ;;  %v5312_v21 = vrot.slane %v5311_v55, 4 }
 0x1d5   : > { %v9421_v4 = vpop.f32.mrb[16].mxu0  ;;  %v5322_v0 = vrot.slane %v5321_v44, 4 }
 0x1d6   : > { %v9422_v35 = vpop.f32.mrb[17].mxu0  ;;  %v12642_v44 = vsel %vm11798_vm6, %v5312_v21, %v12593_v59  ;;  %v10642_v59 = vld [vmem:[#allocation8 + $0x328] sm:$0xff]   ;;  %v9060_v21 = vcombine.high %v12527_v32, %v12533_v37 }
 0x1d7   : > { %v9424_v58 = vpop.f32.mrb[18].mxu0  ;;  %10056 = vmatpush3.bf16.msra.mxu0 %v10610_v15  ;;  %v12595_v41 = vadd.f32 %v9422_v35, %v9421_v4  ;;  %v5332_v4 = vshll.u32 %v12599_v45, 16  ;;  %v10626_v35 = vld [vmem:[#allocation8 + $0x318] sm:$0xff]  }
 0x1d8   : > { %v9425_v49 = vpop.f32.mrb[19].mxu0  ;;  %10057 = vmatprep.subr.bf16.mxu0 %v10617_v34  ;;  %5000 = vmatmul.mubr.bf16.vlgmr.msra.gmra.mrb[96].mxu1 %v9053_v18  ;;  %v10614_v18 = vld [vmem:[#allocation8 + $0x2d0] sm:$0xff]   ;;  %v5329_v34 = vshrl.u32 %v12599_v45, 16 }
 0x1d9   : > { %14315 = vst [vmem:[#allocation19_spill] sm:$0xff] %v12595_v41  ;;  %v9463_v30 = vpop.f32.mrb[12].mxu1  ;;  %v12601_v33 = vadd.f32 %v9425_v49, %v9424_v58  ;;  %9942 = vmatpush3.bf16.msra.mxu1 %v10600_v40  ;;  %5007 = vmatprep.mubr.bf16.mxu1 %v9056_v42  ;;  %v12617_v40 = vsel %vm11798_vm6, %v5288_v3, %v12570_v51  ;;  %v5326_v58 = vrot.slane %v5324_v27, 5  ;;  %v10616_v51 = vld [vmem:[#allocation8 + $0x290] sm:$0xff]   ;;  %v5334_v49 = vrot.slane %v5332_v4, 5  ;;  %v10624_v27 = vld [vmem:[#allocation8 + $0x298] sm:$0xff]  }
 0x1da   : > { %v9464_v57 = vpop.f32.mrb[13].mxu1  ;;  %5889 = vmatmul.mubr.bf16.gmra.mrb[100].mxu0 %v9103_v28  ;;  %9943 = vmatprep.subr.bf16.mxu1 %v10606_v9  ;;  %v12621_v42 = vsel %vm11798_vm6, %v5298_v8, %v5302_v39  ;;  %v5338_v28 = vshll.u32 %v12603_v17, 16  ;;  %v5342_v9 = vshrl.u32 %v12603_v17, 16  ;;  %v5331_v10 = vrot.slane %v5329_v34, 4  ;;  %v10634_v8 = vld [vmem:[#allocation8 + $0x320] sm:$0xff]  }
 0x1db   : > { %14316 = vst [vmem:[#allocation20_spill] sm:$0xff] %v12601_v33  ;;  %v12605_v15 = vadd.f32 %v9464_v57, %v9463_v30  ;;  %v9466_v12 = vpop.f32.mrb[14].mxu1  ;;  %5896 = vmatprep.mubr.bf16.mxu0 %v9106_v36  ;;  %10058 = vmatpush3.bf16.msra.mxu0 %v10618_v22  ;;  %v10622_v36 = vld [vmem:[#allocation8 + $0x2d8] sm:$0xff]   ;;  %v9108_v22 = vcombine.high %v12617_v40, %v12621_v42 }
 0x1dc   : > { %v9467_v31 = vpop.f32.mrb[15].mxu1  ;;  %10059 = vmatprep.subr.bf16.mxu0 %v10625_v11  ;;  %v12631_v30 = vld [vmem:[#allocation2 + $0xa8] sm:$0xff]  ;;  %v12633_v39 = vrot.slane %v5338_v28, 5  ;;  %v5344_v52 = vrot.slane %v5342_v9, 4  ;;  %v10641_v11 = vld [vmem:[#allocation8 + $0x368] sm:$0xff]   ;;  %v5335_v34 = vor.u32 %v5334_v49, %v5331_v10  ;;  %v5362_v28 = vshll.u32 %v12635_v14, 16 }
 0x1dd   : > { %v12612_v6 = vadd.f32 %v9467_v31, %v9466_v12  ;;  %9944 = vmatpush3.bf16.msra.mxu1 %v10608_v16  ;;  %v5177_v16 = vld [vmem:[#allocation2 + $0xa0] sm:$0x11]  ;;  %v5353_v4 = vshrl.u32 %v12631_v30, 16  ;;  %v5366_v9 = vshrl.u32 %v12635_v14, 16  ;;  %v9107_v10 = vcombine.low %v12617_v40, %v12621_v42  ;;  %v10657_v40 = vld [vmem:[#allocation8 + $0x378] sm:$0xff]  }
 0x1de   : > { %9945 = vmatprep.subr.bf16.mxu1 %v10614_v18  ;;  %v12646_v18 = vsel %vm11798_vm6, %v5322_v0, %v5326_v58  ;;  %v5348_v58 = vshll.u32 %v5177_v16, 16  ;;  %v10632_v0 = vld [vmem:[#allocation8 + $0x2a0] sm:$0xff]   ;;  %v12667_v42 = vld [vmem:[#allocation2 + $0xc8] sm:$0xff] }
 0x1df   : > { %10060 = vmatpush3.bf16.msra.mxu0 %v10626_v35  ;;  %v5356_v35 = vshll.u32 %v12631_v30, 16  ;;  %v9110_v49 = vcombine.high %v12642_v44, %v12646_v18 }
 0x1e0   : > { %5008 = vmatmul.mubr.bf16.gmra.mrb[100].mxu1 %v9055_v63  ;;  %10061 = vmatprep.subr.bf16.mxu0 %v10633_v19  ;;  %v10630_v63 = vld [vmem:[#allocation8 + $0x2e0] sm:$0xff]   ;;  %v5350_v16 = vrot.slane %v5348_v58, 5  ;;  %v9062_v58 = vcombine.high %v12564_v29, %v12566_v62 }
 0x1e1   : > { %v9469_v3 = vpop.f32.mrb[16].mxu1  ;;  %5015 = vmatprep.mubr.bf16.mxu1 %v9058_v23  ;;  %9946 = vmatpush3.bf16.msra.mxu1 %v10616_v51  ;;  %v9057_v23 = vcombine.low %v12491_v38, %v12497_v54  ;;  %v10649_v51 = vld [vmem:[#allocation8 + $0x370] sm:$0xff]   ;;  %v10638_v38 = vld [vmem:[#allocation8 + $0x2e8] sm:$0xff]   ;;  %v5355_v54 = vrot.slane %v5353_v4, 4 }
 0x1e2   : > { %v9470_v57 = vpop.f32.mrb[17].mxu1  ;;  %5897 = vmatmul.mubr.bf16.gmra.mrb[104].mxu0 %v9105_v1  ;;  %9947 = vmatprep.subr.bf16.mxu1 %v10622_v36  ;;  %v5345_v1 = vor.u32 %v5344_v52, %v12633_v39  ;;  %v5336_v36 = vrot.slane %v5335_v34, 4  ;;  %v5368_v52 = vrot.slane %v5366_v9, 4  ;;  %v9059_v34 = vcombine.low %v12527_v32, %v12533_v37 }
 0x1e3   : > { %v12637_v12 = vadd.f32 %v9470_v57, %v9469_v3  ;;  %v9472_v55 = vpop.f32.mrb[18].mxu1  ;;  %5904 = vmatprep.mubr.bf16.mxu0 %v9108_v22  ;;  %10062 = vmatpush3.bf16.msra.mxu0 %v10634_v8  ;;  %v5180_v22 = vld [vmem:[#allocation2 + $0xb8] sm:$0x11]  ;;  %v5358_v3 = vrot.slane %v5356_v35, 5  ;;  %v12663_v8 = vrot.slane %v5362_v28, 5  ;;  %v10650_v57 = vld [vmem:[#allocation8 + $0x330] sm:$0xff]  }
 0x1e4   : > { %v9473_v31 = vpop.f32.mrb[19].mxu1  ;;  %10063 = vmatprep.subr.bf16.mxu0 %v10641_v11  ;;  %v5346_v11 = vrot.slane %v5345_v1, 4  ;;  %v5372_v4 = vshll.u32 %v5180_v22, 16  ;;  %v5386_v37 = vshll.u32 %v12667_v42, 16  ;;  %v5390_v1 = vshrl.u32 %v12667_v42, 16 }
 0x1e5   : > { %v12652_v19 = vadd.f32 %v9473_v31, %v9472_v55  ;;  %9948 = vmatpush3.bf16.msra.mxu1 %v10624_v27  ;;  %v12665_v27 = vld [vmem:[#allocation2 + $0xc0] sm:$0xff]  ;;  %v10640_v55 = vld [vmem:[#allocation8 + $0x2a8] sm:$0xff]   ;;  %v5359_v35 = vor.u32 %v5358_v3, %v5355_v54  ;;  %v5369_v28 = vor.u32 %v5368_v52, %v12663_v8  ;;  %v5183_v52 = vld [vmem:[#allocation2 + $0xd0] sm:$0x11] }
 0x1e6   : > { %9949 = vmatprep.subr.bf16.mxu1 %v10630_v63  ;;  %v10646_v31 = vld [vmem:[#allocation8 + $0x2f0] sm:$0xff]   ;;  %v12674_v63 = vsel %vm11798_vm6, %v5336_v36, %v12633_v39  ;;  %v5377_v9 = vshrl.u32 %v12665_v27, 16  ;;  %v5380_v32 = vshll.u32 %v12665_v27, 16  ;;  %v10666_v39 = vld [vmem:[#allocation8 + $0x440] sm:$0xff]   ;;  %v10654_v36 = vld [vmem:[#allocation8 + $0x2f8] sm:$0xff]  }
 0x1e7   : > { %10064 = vmatpush3.bf16.msra.mxu0 %v10642_v59  ;;  %v10658_v59 = vld [vmem:[#allocation8 + $0x338] sm:$0xff]   ;;  %v5370_v54 = vrot.slane %v5369_v28, 4  ;;  %v10664_v28 = vld [vmem:[#allocation8 + $0x3c0] sm:$0xff]  }
 0x1e8   : > { %5016 = vmatmul.mubr.bf16.gmra.mrb[104].mxu1 %v9057_v23  ;;  %10065 = vmatprep.subr.bf16.mxu0 %v10649_v51  ;;  %v12680_v23 = vsel %vm11798_vm6, %v5346_v11, %v5350_v16  ;;  %v12687_v51 = vld [vmem:[#allocation2 + $0xd8] sm:$0xff]  ;;  %v5379_v3 = vrot.slane %v5377_v9, 4  ;;  %v5388_v11 = vrot.slane %v5386_v37, 5  ;;  %v5392_v16 = vrot.slane %v5390_v1, 4 }
 0x1e9   : > { %5023 = vmatprep.mubr.bf16.mxu1 %v9060_v21  ;;  %9950 = vmatpush3.bf16.msra.mxu1 %v10632_v0  ;;  %v10648_v21 = vld [vmem:[#allocation8 + $0x2b0] sm:$0xff]   ;;  %v9109_v0 = vcombine.low %v12642_v44, %v12646_v18  ;;  %v9112_v22 = vcombine.high %v12674_v63, %v12680_v23  ;;  %v5404_v18 = vshll.u32 %v12687_v51, 16  ;;  %v9064_v9 = vcombine.high %v12599_v45, %v12603_v17 }
 0x1ea   : > { %5905 = vmatmul.mubr.bf16.gmra.mrb[108].mxu0 %v9107_v10  ;;  %9951 = vmatprep.subr.bf16.mxu1 %v10638_v38  ;;  %v5374_v10 = vrot.slane %v5372_v4, 5  ;;  %v5360_v38 = vrot.slane %v5359_v35, 4 }
 0x1eb   : > { %5912 = vmatprep.mubr.bf16.mxu0 %v9110_v49  ;;  %10066 = vmatpush3.bf16.msra.mxu0 %v10650_v57  ;;  %v12691_v49 = vld [vmem:[#allocation2 + $0xe0] sm:$0xff]  ;;  %v5382_v57 = vrot.slane %v5380_v32, 5  ;;  %v5396_v32 = vshll.u32 %v5183_v52, 16 }
 0x1ec   : > { %10067 = vmatprep.subr.bf16.mxu0 %v10657_v40  ;;  %v5401_v40 = vshrl.u32 %v12687_v51, 16  ;;  %v5414_v4 = vshrl.u32 %v12691_v49, 16 }
 0x1ed   : > { %9952 = vmatpush3.bf16.msra.mxu1 %v10640_v55  ;;  %v5410_v55 = vshll.u32 %v12691_v49, 16 }
 0x1ee   : > { %9953 = vmatprep.subr.bf16.mxu1 %v10646_v31  ;;  %v10656_v31 = vld [vmem:[#allocation8 + $0x2b8] sm:$0xff]   ;;  %v5416_v41 = vrot.slane %v5414_v4, 4  ;;  %v5189_v4 = vld [vmem:[#allocation2 + $0x100] sm:$0x11] }
 0x1ef   : > { %10068 = vmatpush3.bf16.msra.mxu0 %v10658_v59  ;;  %v12706_v59 = vsel %vm11798_vm6, %v5360_v38, %v12663_v8  ;;  %v5412_v33 = vrot.slane %v5410_v55, 5  ;;  %v9111_v8 = vcombine.low %v12674_v63, %v12680_v23  ;;  %v5186_v38 = vld [vmem:[#allocation2 + $0xe8] sm:$0x11] }
 0x1f0   : > { %5024 = vmatmul.mubr.bf16.gmra.mrb[108].mxu1 %v9059_v34  ;;  %10277 = vmatprep.subr.bf16.mxu0 %v10666_v39  ;;  %v9061_v34 = vcombine.low %v12564_v29, %v12566_v62  ;;  %v5375_v39 = vsel %vm11798_vm6, %v5370_v54, %v5374_v10  ;;  %v5383_v29 = vor.u32 %v5382_v57, %v5379_v3  ;;  %v12719_v10 = vld [vmem:[#allocation2 + $0xf8] sm:$0xff]  ;;  %v5420_v55 = vshll.u32 %v5186_v38, 16  ;;  %v384_v38 = vld [vmem:[#allocation2 + $0x190] sm:$0x11] }
 0x1f1   : > { %5031 = vmatprep.mubr.bf16.mxu1 %v9062_v58  ;;  %9954 = vmatpush3.bf16.msra.mxu1 %v10648_v21  ;;  %v5393_v62 = vor.u32 %v5392_v16, %v5388_v11  ;;  %v5403_v21 = vrot.slane %v5401_v40, 4  ;;  %v9114_v52 = vcombine.high %v12706_v59, %v5375_v39  ;;  %v5398_v40 = vrot.slane %v5396_v32, 5 }
 0x1f2   : > { %v9427_v44 = vpop.f32.mrb[20].mxu0  ;;  %5913 = vmatmul.mubr.bf16.gmra.mrb[112].mxu0 %v9109_v0  ;;  %9955 = vmatprep.subr.bf16.mxu1 %v10654_v36  ;;  %v12712_v0 = vld [vmem:[#allocation2 + $0xf0] sm:$0xff]  ;;  %v5384_v57 = vrot.slane %v5383_v29, 4  ;;  %v5434_v63 = vshll.u32 %v12719_v10, 16  ;;  %v5438_v23 = vshrl.u32 %v12719_v10, 16  ;;  %v5422_v29 = vrot.slane %v5420_v55, 5 }
 0x1f3   : > { %v9428_v35 = vpop.f32.mrb[21].mxu0  ;;  %5920 = vmatprep.mubr.bf16.mxu0 %v9112_v22  ;;  %v5406_v22 = vrot.slane %v5404_v18, 5  ;;  %v5425_v54 = vshrl.u32 %v12712_v0, 16  ;;  %v5428_v3 = vshll.u32 %v12712_v0, 16  ;;  %v5394_v16 = vrot.slane %v5393_v62, 4  ;;  %v12737_v62 = vld [vmem:[#allocation2 + $0x108] sm:$0xff] }
 0x1f4   : > { %v12708_v37 = vadd.f32 %v9428_v35, %v9427_v44  ;;  %v9430_v1 = vpop.f32.mrb[22].mxu0  ;;  %v5417_v18 = vor.u32 %v5416_v41, %v5412_v33 }
 0x1f5   : > { %v9431_v58 = vpop.f32.mrb[23].mxu0  ;;  %9956 = vmatpush3.bf16.msra.mxu1 %v10656_v31  ;;  %v5407_v44 = vor.u32 %v5406_v22, %v5403_v21  ;;  %v5427_v31 = vrot.slane %v5425_v54, 4  ;;  %v5430_v35 = vrot.slane %v5428_v3, 5  ;;  %v12733_v41 = vsel %vm11798_vm6, %v5394_v16, %v5398_v40  ;;  %v12742_v21 = vld [vmem:[#allocation2 + $0x110] sm:$0xff]  ;;  %v2181_v3 = vld [vmem:[%s11172_s13 + $0x78] sm:$0xf] }
 0x1f6   : > { %14317 = vst [vmem:[#allocation21_spill] sm:$0xff] %v12708_v37  ;;  %v12714_v36 = vadd.f32 %v9431_v58, %v9430_v1  ;;  %10165 = vmatprep.subr.bf16.mxu1 %v10664_v28  ;;  %v9063_v28 = vcombine.low %v12599_v45, %v12603_v17  ;;  %v5418_v1 = vrot.slane %v5417_v18, 4  ;;  %v9113_v45 = vcombine.low %v12706_v59, %v5375_v39 }
 0x1f7   : > { %v5408_v32 = vrot.slane %v5407_v44, 4  ;;  %v12740_v17 = vrot.slane %v5434_v63, 5  ;;  %v5444_v58 = vshll.u32 %v5189_v4, 16  ;;  %v9068_v54 = vcombine.high %v12665_v27, %v12667_v42 }
 0x1f8   : > { %14318 = vst [vmem:[#allocation22_spill] sm:$0xff] %v12714_v36  ;;  %5032 = vmatmul.mubr.bf16.gmra.mrb[112].mxu1 %v9061_v34  ;;  %v12729_v34 = vsel %vm11798_vm6, %v5384_v57, %v5388_v11  ;;  %v5440_v11 = vrot.slane %v5438_v23, 4  ;;  %v5449_v39 = vshrl.u32 %v12737_v62, 16  ;;  %v2182_v57 = vld [vmem:[%s11172_s13 + $0x7c] sm:$0xf]  ;;  %v12761_v40 = vsel %vm11798_vm6, %v5418_v1, %v5422_v29 }
 0x1f9   : > { %5039 = vmatprep.mubr.bf16.mxu1 %v9064_v9  ;;  %v9066_v9 = vcombine.high %v12631_v30, %v12635_v14  ;;  %v9116_v22 = vcombine.high %v12729_v34, %v12733_v41  ;;  %v9115_v59 = vcombine.low %v12729_v34, %v12733_v41  ;;  %v12757_v16 = vsel %vm11798_vm6, %v5408_v32, %v5412_v33  ;;  %v12777_v29 = vld [vmem:[#allocation2 + $0x128] sm:$0xff] }
 0x1fa   : > { %5921 = vmatmul.mubr.bf16.gmra.mrb[116].mxu0 %v9111_v8  ;;  %v5431_v8 = vor.u32 %v5430_v35, %v5427_v31  ;;  %v5441_v18 = vor.u32 %v5440_v11, %v12740_v17  ;;  %v5446_v55 = vrot.slane %v5444_v58, 5  ;;  %v5462_v63 = vshrl.u32 %v12742_v21, 16  ;;  %v12769_v31 = vld [vmem:[#allocation2 + $0x120] sm:$0xff] }
 0x1fb   : > { %5928 = vmatprep.mubr.bf16.mxu0 %v9114_v52  ;;  %v9065_v52 = vcombine.low %v12631_v30, %v12635_v14  ;;  %v5452_v30 = vshll.u32 %v12737_v62, 16  ;;  %v5458_v14 = vshll.u32 %v12742_v21, 16  ;;  %v385_v23 = vsel %vm11204_vm11, 0, %v384_v38 }
 0x1fc   : > { %v5432_v4 = vrot.slane %v5431_v8, 4  ;;  %386 = vst [vmem:[#allocation2 + $0x190] sm:$0x11] %v385_v23  ;;  %v2439_v35 = vshrl.u32 %v2181_v3, 16  ;;  %v2447_v34 = vshrl.u32 %v2182_v57, 16  ;;  %v9118_v41 = vcombine.high %v12757_v16, %v12761_v40 }
 0x1fd   : > { %v12775_v1 = vrot.slane %v5449_v39, 4  ;;  %v2450_v20 = vshll.u32 %v2182_v57, 16  ;;  %v12779_v58 = vrot.slane %v5452_v30, 5  ;;  %v5442_v36 = vrot.slane %v5441_v18, 4  ;;  %v2608_v39 = vld [vmem:[#allocation2 + $0x184] sm:$0xf] }
 0x1fe   : > { %v2441_v8 = vrot.slane %v2439_v35, 7  ;;  %v2449_v38 = vrot.slane %v2447_v34, 7  ;;  %v5192_v57 = vld [vmem:[#allocation2 + $0x118] sm:$0x11]  ;;  %v5476_v46 = vshll.u32 %v12769_v31, 16  ;;  %v5482_v30 = vshll.u32 %v12777_v29, 16 }
 0x1ff   : > { %v5486_v34 = vshrl.u32 %v12777_v29, 16 }
 0x200   : > { %5040 = vmatmul.mubr.bf16.gmra.mrb[116].mxu1 %v9063_v28  ;;  %v2442_v28 = vshll.u32 %v2181_v3, 16  ;;  %v2454_v18 = vrot.slane %v2449_v38, 4 }
 0x201   : > { %5047 = vmatprep.mubr.bf16.mxu1 %v9066_v9 }
 0x202   : > { %5929 = vmatmul.mubr.bf16.gmra.mrb[120].mxu0 %v9113_v45 }
 0x203   : > { %5936 = vmatprep.mubr.bf16.mxu0 %v9116_v22  ;;  %v12781_v22 = vrot.slane %v5458_v14, 5  ;;  %v2444_v14 = vor.u32 %v2442_v28, %v2441_v8  ;;  %v12804_v28 = vsel %vm11798_vm6, %v5442_v36, %v5446_v55  ;;  %v12814_v36 = vld [vmem:[%s14265_s3] ss:$0 sm:$0xff]  ;;  %v14320_v55 = vrot.slane %v11783_v48, 4 }
 0x204   : > { %v9433_v44 = vpop.f32.mrb[24].mxu0  ;;  %v9117_v48 = vcombine.low %v12757_v16, %v12761_v40 }
 0x205   : > { %v9434_v33 = vpop.f32.mrb[25].mxu0 }
 0x206   : > { %v12773_v9 = vadd.f32 %v9434_v33, %v9433_v44  ;;  %v9436_v32 = vpop.f32.mrb[26].mxu0  ;;  %v9475_v45 = vpop.f32.mrb[20].mxu1  ;;  %v5464_v44 = vrot.slane %v5462_v63, 4  ;;  %v5473_v33 = vshrl.u32 %v12769_v31, 16  ;;  %v9067_v63 = vcombine.low %v12665_v27, %v12667_v42  ;;  %v2148_v42 = vld [vmem:[#allocation2 + $0x190] sm:$0x1] }
 0x207   : > { %v9437_v11 = vpop.f32.mrb[27].mxu0  ;;  %v9476_v3 = vpop.f32.mrb[21].mxu1  ;;  %v5468_v27 = vshll.u32 %v5192_v57, 16 }
 0x208   : > { %14319 = vst [vmem:[#allocation23_spill] sm:$0xff] %v12773_v9  ;;  %v12783_v23 = vadd.f32 %v9437_v11, %v9436_v32  ;;  %v12786_v9 = vadd.f32 %v9476_v3, %v9475_v45  ;;  %v9478_v37 = vpop.f32.mrb[22].mxu1  ;;  %5048 = vmatmul.mubr.bf16.gmra.mrb[120].mxu1 %v9065_v52  ;;  %v2445_v32 = vrot.slane %v2441_v8, 4  ;;  %v2452_v11 = vor.u32 %v2450_v20, %v2449_v38  ;;  %v5195_v8 = vld [vmem:[#allocation2 + $0x130] sm:$0x11] }
 0x209   : > { %v9479_v35 = vpop.f32.mrb[23].mxu1  ;;  %5055 = vmatprep.mubr.bf16.mxu1 %v9068_v54  ;;  %v12798_v3 = vsel %vm11798_vm6, %v5432_v4, %v12740_v17  ;;  %v2609_v52 = vsel %vm11256_vm15, %v2444_v14, %v2608_v39  ;;  %v5455_v54 = vor.u32 %v12779_v58, %v12775_v1  ;;  %v2612_v17 = vld [vmem:[#allocation2 + $0x194] sm:$0x1]  ;;  %v5465_v13 = vor.u32 %v5464_v44, %v12781_v22 }
 0x20a   : > { %v12793_v45 = vadd.f32 %v9479_v35, %v9478_v37  ;;  %5937 = vmatmul.mubr.bf16.gmra.mrb[124].mxu0 %v9115_v59  ;;  %v2453_v37 = vsel %vm11248_vm14, %v2445_v32, %v2452_v11  ;;  %2610 = vst [vmem:[#allocation2 + $0x184] sm:$0xf] %v2609_v52  ;;  %v5475_v59 = vrot.slane %v5473_v33, 4  ;;  %v2149_v1 = vsel %vm11190_vm4, %v14320_v55, %v2148_v42  ;;  %v12828_v35 = vld [vmem:[#allocation2 + $0x138] sm:$0xff] }
 0x20b   : > { %5944 = vmatprep.mubr.bf16.mxu0 %v9118_v41  ;;  %2611 = vst [vmem:[#allocation2 + $0x18c] sm:$0xf] %v2453_v37  ;;  %v2613_v7 = vsel %vm11190_vm4, %v2454_v18, %v2612_v17  ;;  %v5478_v38 = vrot.slane %v5476_v46, 5  ;;  %v5484_v44 = vrot.slane %v5482_v30, 5  ;;  %v5488_v39 = vrot.slane %v5486_v34, 4  ;;  %v12834_v30 = vld [vmem:[#allocation2 + $0x140] sm:$0xff] }
 0x20c   : > { %2150 = vst [vmem:[#allocation2 + $0x190] sm:$0x1] %v2149_v1  ;;  %2614 = vst [vmem:[#allocation2 + $0x194] sm:$0x1] %v2613_v7  ;;  %v9070_v33 = vcombine.high %v12687_v51, %v12691_v49  ;;  %v9120_v32 = vcombine.high %v12798_v3, %v12804_v28  ;;  %v5470_v46 = vrot.slane %v5468_v27, 5  ;;  %v12838_v34 = vadd.f32 %v12227_v24, %v12814_v36  ;;  %v14321_v27 = vld [vmem:[#allocation17_spill] sm:$0xff] }
 0x20d   : > { %v9439_v20 = vpop.f32.mrb[28].mxu0  ;;  %v5456_v40 = vrot.slane %v5455_v54, 4  ;;  %v5466_v52 = vrot.slane %v5465_v13, 4  ;;  %v5479_v37 = vor.u32 %v5478_v38, %v5475_v59  ;;  %v5489_v17 = vor.u32 %v5488_v39, %v5484_v44 }
 0x20e   : > { %v9440_v4 = vpop.f32.mrb[29].mxu0  ;;  %v9481_v57 = vpop.f32.mrb[24].mxu1  ;;  %v12845_v55 = vadd.f32 %v14321_v27, %v12814_v36  ;;  %v5500_v24 = vshll.u32 %v12828_v35, 16  ;;  %v5506_v7 = vshll.u32 %v12834_v30, 16  ;;  %v5510_v54 = vshrl.u32 %v12834_v30, 16 }
 0x20f   : > { %v12822_v58 = vadd.f32 %v9440_v4, %v9439_v20  ;;  %v9442_v41 = vpop.f32.mrb[30].mxu0  ;;  %v9482_v2 = vpop.f32.mrb[25].mxu1  ;;  %v5492_v20 = vshll.u32 %v5195_v8, 16  ;;  %v5497_v4 = vshrl.u32 %v12828_v35, 16  ;;  %v9072_v13 = vcombine.high %v12712_v0, %v12719_v10 }
 0x210   : > { %v9443_v14 = vpop.f32.mrb[31].mxu0  ;;  %v12840_v18 = vadd.f32 %v9482_v2, %v9481_v57  ;;  %v9484_v16 = vpop.f32.mrb[26].mxu1  ;;  %5056 = vmatmul.mubr.bf16.gmra.mrb[124].mxu1 %v9067_v63  ;;  %v9069_v63 = vcombine.low %v12687_v51, %v12691_v49  ;;  %v5461_v59 = vsel %vm11798_vm6, %v5456_v40, %v12781_v22  ;;  %v5480_v8 = vrot.slane %v5479_v37, 4 }
 0x211   : > { %v12832_v11 = vadd.f32 %v9443_v14, %v9442_v41  ;;  %v9485_v42 = vpop.f32.mrb[27].mxu1  ;;  %5063 = vmatprep.mubr.bf16.mxu1 %v9070_v33  ;;  %v5471_v41 = vsel %vm11798_vm6, %v5466_v52, %v5470_v46  ;;  %v5490_v38 = vrot.slane %v5489_v17, 4  ;;  %v5494_v39 = vrot.slane %v5492_v20, 5  ;;  %v5198_v33 = vld [vmem:[#allocation2 + $0x148] sm:$0x11] }
 0x212   : > { %v12847_v1 = vadd.f32 %v9485_v42, %v9484_v16  ;;  %5945 = vmatmul.mubr.bf16.gmra.mrb[128].mxu0 %v9117_v48  ;;  %v5499_v57 = vrot.slane %v5497_v4, 4  ;;  %v5502_v48 = vrot.slane %v5500_v24, 5  ;;  %v5508_v14 = vrot.slane %v5506_v7, 5  ;;  %v12879_v42 = vld [vmem:[#allocation2 + $0x158] sm:$0xff] }
 0x213   : > { %5952 = vmatprep.mubr.bf16.mxu0 %v9120_v32  ;;  %v5512_v2 = vrot.slane %v5510_v54, 4  ;;  %v9119_v51 = vcombine.low %v12798_v3, %v12804_v28  ;;  %v12863_v32 = vld [vmem:[#allocation2 + $0x150] sm:$0xff]  ;;  %v12867_v22 = vadd.f32 %v12513_v5, %v12814_v36  ;;  %v12871_v46 = vadd.f32 %v12523_v50, %v12814_v36 }
 0x214   : > { %v9122_v16 = vcombine.high %v5461_v59, %v5471_v41  ;;  %v12877_v3 = vsel %vm11798_vm6, %v5480_v8, %v5484_v44  ;;  %v5516_v28 = vshll.u32 %v5198_v33, 16  ;;  %v12883_v37 = vsel %vm11798_vm6, %v5490_v38, %v5494_v39 }
 0x215   : > { %v5503_v50 = vor.u32 %v5502_v48, %v5499_v57  ;;  %v5513_v17 = vor.u32 %v5512_v2, %v5508_v14  ;;  %v5521_v4 = vshrl.u32 %v12863_v32, 16  ;;  %v5524_v24 = vshll.u32 %v12863_v32, 16  ;;  %v5201_v48 = vld [vmem:[#allocation2 + $0x160] sm:$0x11] }
 0x216   : > { %v12891_v44 = vadd.f32 %v12546_v56, %v12814_v36  ;;  %v12895_v7 = vadd.f32 %v12555_v43, %v12814_v36  ;;  %v5530_v54 = vshll.u32 %v12879_v42, 16  ;;  %v9074_v8 = vcombine.high %v12737_v62, %v12742_v21 }
 0x217   : > { %v9621_v49 = vpop.f32.mrb[32].mxu0  ;;  %v9121_v38 = vcombine.low %v5461_v59, %v5471_v41  ;;  %v9124_v56 = vcombine.high %v12877_v3, %v12883_v37  ;;  %v5504_v39 = vrot.slane %v5503_v50, 4  ;;  %v5518_v33 = vrot.slane %v5516_v28, 5  ;;  %v12913_v59 = vld [vmem:[#allocation2 + $0x168] sm:$0xff] }
 0x218   : > { %v9622_v40 = vpop.f32.mrb[33].mxu0  ;;  %5064 = vmatmul.mubr.bf16.gmra.mrb[128].mxu1 %v9069_v63  ;;  %v5534_v63 = vshrl.u32 %v12879_v42, 16  ;;  %v12907_v43 = vadd.f32 %v12605_v15, %v12814_v36  ;;  %v5514_v57 = vrot.slane %v5513_v17, 4  ;;  %v5523_v2 = vrot.slane %v5521_v4, 4 }
 0x219   : > { %v12873_v52 = vadd.f32 %v9622_v40, %v9621_v49  ;;  %v9624_v20 = vpop.f32.mrb[34].mxu0  ;;  %5071 = vmatprep.mubr.bf16.mxu1 %v9072_v13  ;;  %v9071_v13 = vcombine.low %v12712_v0, %v12719_v10  ;;  %v12911_v0 = vadd.f32 %v12612_v6, %v12814_v36  ;;  %v5532_v10 = vrot.slane %v5530_v54, 5 }
 0x21a   : > { %v9625_v5 = vpop.f32.mrb[35].mxu0  ;;  %5953 = vmatmul.mubr.bf16.gmra.mrb[132].mxu0 %v9119_v51  ;;  %v5526_v51 = vrot.slane %v5524_v24, 5  ;;  %v5536_v49 = vrot.slane %v5534_v63, 4  ;;  %v12917_v41 = vadd.f32 %v12637_v12, %v12814_v36  ;;  %v12921_v15 = vadd.f32 %v12652_v19, %v12814_v36 }
 0x21b   : > { %v12886_v27 = vadd.f32 %v9625_v5, %v9624_v20  ;;  %5960 = vmatprep.mubr.bf16.mxu0 %v9122_v16  ;;  %14322 = vst [vmem:[#allocation17_spill] sm:$0xff] %v12911_v0  ;;  %v12923_v16 = vld [vmem:[#allocation2 + $0x170] sm:$0xff]  ;;  %v12927_v6 = vsel %vm11798_vm6, %v5504_v39, %v5508_v14  ;;  %v5540_v40 = vshll.u32 %v5201_v48, 16  ;;  %v12931_v20 = vadd.f32 %v12786_v9, %v12814_v36 }
 0x21c   : > { %14323 = vst [vmem:[#allocation24_spill] sm:$0xff] %v12917_v41  ;;  %14324 = vst [vmem:[#allocation25_spill] sm:$0xff] %v12921_v15  ;;  %v12935_v12 = vadd.f32 %v12793_v45, %v12814_v36  ;;  %v12939_v19 = vsel %vm11798_vm6, %v5514_v57, %v5518_v33  ;;  %v5527_v28 = vor.u32 %v5526_v51, %v5523_v2  ;;  %v5545_v5 = vshrl.u32 %v12913_v59, 16 }
 0x21d   : > { %14325 = vst [vmem:[#allocation26_spill] sm:$0xff] %v12931_v20  ;;  %v5548_v14 = vshll.u32 %v12913_v59, 16  ;;  %v5537_v17 = vor.u32 %v5536_v49, %v5532_v10  ;;  %v5554_v9 = vshll.u32 %v12923_v16, 16  ;;  %v5558_v4 = vshrl.u32 %v12923_v16, 16 }
 0x21e   : > { %14326 = vst [vmem:[#allocation27_spill] sm:$0xff] %v12935_v12  ;;  %v9073_v45 = vcombine.low %v12737_v62, %v12742_v21  ;;  %v12949_v54 = vadd.f32 %v12840_v18, %v12814_v36  ;;  %v12953_v63 = vadd.f32 %v12847_v1, %v12814_v36  ;;  %v9126_v39 = vcombine.high %v12927_v6, %v12939_v19  ;;  %v5204_v1 = vld [vmem:[#allocation2 + $0x178] sm:$0x11] }
 0x21f   : > { %v5528_v21 = vrot.slane %v5527_v28, 4  ;;  %v5542_v33 = vrot.slane %v5540_v40, 5  ;;  %v5547_v18 = vrot.slane %v5545_v5, 4  ;;  %v5550_v57 = vrot.slane %v5548_v14, 5  ;;  %v14331_v40 = vld [vmem:[#allocation15_spill] sm:$0xff] }
 0x220   : > { %5072 = vmatmul.mubr.bf16.gmra.mrb[132].mxu1 %v9071_v13  ;;  %14327 = vst [vmem:[#allocation28_spill] sm:$0xff] %v12949_v54  ;;  %14328 = vst [vmem:[#allocation29_spill] sm:$0xff] %v12953_v63  ;;  %v5538_v2 = vrot.slane %v5537_v17, 4  ;;  %v5556_v51 = vrot.slane %v5554_v9, 5  ;;  %v5560_v49 = vrot.slane %v5558_v4, 4  ;;  %v3103_v28 = vadd.f32 %v14331_v40, %v12814_v36 }
 0x221   : > { %5079 = vmatprep.mubr.bf16.mxu1 %v9074_v8  ;;  %v5551_v5 = vor.u32 %v5550_v57, %v5547_v18  ;;  %v5564_v14 = vshll.u32 %v5204_v1, 16  ;;  %v12975_v9 = vsel %vm11798_vm6, %v5528_v21, %v5532_v10  ;;  %v14332_v57 = vld [vmem:[#allocation16_spill] sm:$0xff]  ;;  %v9125_v1 = vcombine.low %v12927_v6, %v12939_v19  ;;  %v12995_v6 = vld [vmem:[#allocation2 + $0x190] sm:$0x11] }
 0x222   : > { %5961 = vmatmul.mubr.bf16.gmra.mrb[136].mxu0 %v9121_v38  ;;  %v9076_v38 = vcombine.high %v12769_v31, %v12777_v29  ;;  %v12979_v4 = vsel %vm11798_vm6, %v5538_v2, %v5542_v33  ;;  %v3104_v33 = vadd.f32 %v14332_v57, %v12814_v36  ;;  %v9078_v2 = vcombine.high %v12828_v35, %v12834_v30 }
 0x223   : > { %v9487_v50 = vpop.f32.mrb[28].mxu1  ;;  %5968 = vmatprep.mubr.bf16.mxu0 %v9124_v56  ;;  %v9123_v56 = vcombine.low %v12877_v3, %v12883_v37  ;;  %v12966_v3 = vld [vmem:[#allocation2 + $0x188] sm:$0xff]  ;;  %v9128_v40 = vcombine.high %v12975_v9, %v12979_v4 }
 0x224   : > { %v9488_v24 = vpop.f32.mrb[29].mxu1  ;;  %v5582_v18 = vshrl.u32 %v12966_v3, 16 }
 0x225   : > { %v9489_v13 = vadd.f32 %v9488_v24, %v9487_v50  ;;  %v9490_v8 = vpop.f32.mrb[30].mxu1  ;;  %v12961_v50 = vld [vmem:[#allocation2 + $0x180] sm:$0xff] }
 0x226   : > { %v9491_v62 = vpop.f32.mrb[31].mxu1  ;;  %v5584_v41 = vrot.slane %v5582_v18, 4 }
 0x227   : > { %v9492_v48 = vadd.f32 %v9491_v62, %v9490_v8  ;;  %v12964_v24 = vadd.f32 %v9489_v13, %v12814_v36  ;;  %v5569_v13 = vshrl.u32 %v12961_v50, 16  ;;  %v5572_v62 = vshll.u32 %v12961_v50, 16 }
 0x228   : > { %5080 = vmatmul.mubr.bf16.gmra.mrb[136].mxu1 %v9073_v45  ;;  %v5561_v45 = vor.u32 %v5560_v49, %v5556_v51 }
 0x229   : > { %14329 = vst [vmem:[#allocation30_spill] sm:$0xff] %v12964_v24  ;;  %5087 = vmatprep.mubr.bf16.mxu1 %v9076_v38  ;;  %v12969_v37 = vadd.f32 %v9492_v48, %v12814_v36  ;;  %v9075_v38 = vcombine.low %v12769_v31, %v12777_v29  ;;  %v5566_v24 = vrot.slane %v5564_v14, 5  ;;  %v5571_v57 = vrot.slane %v5569_v13, 4 }
 0x22a   : > { %5969 = vmatmul.mubr.bf16.gmra.mrb[140].mxu0 %v9123_v56  ;;  %v5562_v54 = vrot.slane %v5561_v45, 4  ;;  %v5574_v20 = vrot.slane %v5572_v62, 5  ;;  %v5588_v62 = vshll.u32 %v12995_v6, 16 }
 0x22b   : > { %14330 = vst [vmem:[#allocation31_spill] sm:$0xff] %v12969_v37  ;;  %v9509_v17 = vpop.f32.mrb[32].mxu1  ;;  %5976 = vmatprep.mubr.bf16.mxu0 %v9126_v39  ;;  %v5578_v39 = vshll.u32 %v12966_v3, 16  ;;  %v5552_v37 = vrot.slane %v5551_v5, 4 }
 0x22c   : > { %v9510_v8 = vpop.f32.mrb[33].mxu1 }
 0x22d   : > { %v9627_v56 = vpop.f32.mrb[36].mxu0  ;;  %v9511_v10 = vadd.f32 %v9510_v8, %v9509_v17  ;;  %v9512_v21 = vpop.f32.mrb[34].mxu1  ;;  %v5580_v15 = vrot.slane %v5578_v39, 5  ;;  %v5557_v14 = vsel %vm11798_vm6, %v5552_v37, %v5556_v51  ;;  %v3105_v39 = vadd.f32 %v12505_v47, %v12814_v36 }
 0x22e   : > { %v9628_v48 = vpop.f32.mrb[37].mxu0  ;;  %v9513_v31 = vpop.f32.mrb[35].mxu1  ;;  %v9080_v51 = vcombine.high %v12863_v32, %v12879_v42 }
 0x22f   : > { %v9629_v29 = vadd.f32 %v9628_v48, %v9627_v56  ;;  %v9630_v49 = vpop.f32.mrb[38].mxu0  ;;  %v3987_v17 = vadd.f32 %v9511_v10, %v3103_v28  ;;  %v9514_v8 = vadd.f32 %v9513_v31, %v9512_v21  ;;  %v9077_v28 = vcombine.low %v12828_v35, %v12834_v30 }
 0x230   : > { %v9631_v63 = vpop.f32.mrb[39].mxu0  ;;  %5088 = vmatmul.mubr.bf16.gmra.mrb[140].mxu1 %v9075_v38  ;;  %v5567_v38 = vsel %vm11798_vm6, %v5562_v54, %v5566_v24  ;;  %v5575_v56 = vor.u32 %v5574_v20, %v5571_v57  ;;  %v9127_v10 = vcombine.low %v12975_v9, %v12979_v4 }
 0x231   : > { %v9632_v12 = vadd.f32 %v9631_v63, %v9630_v49  ;;  %v3988_v0 = vadd.f32 %v9514_v8, %v3104_v33  ;;  %5095 = vmatprep.mubr.bf16.mxu1 %v9078_v2  ;;  %v12998_v19 = vadd.f32 %v12873_v52, %v3987_v17  ;;  %v5585_v52 = vor.u32 %v5584_v41, %v5580_v15 }
 0x232   : > { %5977 = vmatmul.mubr.bf16.gmra.mrb[144].mxu0 %v9125_v1  ;;  %v3106_v41 = vadd.f32 %v12519_v61, %v12814_v36  ;;  %v9130_v21 = vcombine.high %v5557_v14, %v5567_v38  ;;  %v5576_v33 = vrot.slane %v5575_v56, 4  ;;  %v5590_v2 = vrot.slane %v5588_v62, 5 }
 0x233   : > { %v9515_v5 = vpop.f32.mrb[36].mxu1  ;;  %5984 = vmatprep.mubr.bf16.mxu0 %v9128_v40  ;;  %v13005_v63 = vadd.f32 %v12886_v27, %v3988_v0  ;;  %v5586_v48 = vrot.slane %v5585_v52, 4  ;;  %v9079_v61 = vcombine.low %v12863_v32, %v12879_v42  ;;  %v9129_v32 = vcombine.low %v5557_v14, %v5567_v38 }
 0x234   : > { %v9516_v45 = vpop.f32.mrb[37].mxu1  ;;  %v5581_v17 = vsel %vm11798_vm6, %v5576_v33, %v5580_v15  ;;  %v3108_v15 = vadd.f32 %v12551_v25, %v12814_v36  ;;  %v9081_v25 = vcombine.low %v12913_v59, %v12923_v16 }
 0x235   : > { %v9633_v13 = vpop.f32.mrb[40].mxu0  ;;  %v9517_v35 = vadd.f32 %v9516_v45, %v9515_v5  ;;  %v9518_v30 = vpop.f32.mrb[38].mxu1  ;;  %v5591_v8 = vsel %vm11798_vm6, %v5586_v48, %v5590_v2 }
 0x236   : > { %v9634_v18 = vpop.f32.mrb[41].mxu0  ;;  %v9519_v27 = vpop.f32.mrb[39].mxu1 }
 0x237   : > { %v9635_v0 = vadd.f32 %v9634_v18, %v9633_v13  ;;  %v9636_v37 = vpop.f32.mrb[42].mxu0  ;;  %v3989_v54 = vadd.f32 %v9517_v35, %v3105_v39  ;;  %v9520_v20 = vadd.f32 %v9519_v27, %v9518_v30  ;;  %v9132_v39 = vcombine.high %v5581_v17, %v5591_v8  ;;  %v6041_v18 = vld [vmem:[#allocation2 + $0x18] sm:$0xee] }
 0x238   : > { %v9637_v24 = vpop.f32.mrb[43].mxu0  ;;  %5096 = vmatmul.mubr.bf16.gmra.mrb[144].mxu1 %v9077_v28 }
 0x239   : > { %v9638_v47 = vadd.f32 %v9637_v24, %v9636_v37  ;;  %v3990_v1 = vadd.f32 %v9520_v20, %v3106_v41  ;;  %5103 = vmatprep.mubr.bf16.mxu1 %v9080_v51  ;;  %v13018_v31 = vadd.f32 %v9629_v29, %v3989_v54  ;;  %v3107_v29 = vadd.f32 %v12537_v26, %v12814_v36  ;;  %v10739_v51 = vld [vmem:[#allocation2 + $0x20] sm:$0xff] }
 0x23a   : > { %5985 = vmatmul.mubr.bf16.gmra.mrb[148].mxu0 %v9127_v10  ;;  %v6107_v27 = vrot.slane %v10739_v51, 5  ;;  %v3109_v54 = vadd.f32 %v12568_v53, %v12814_v36  ;;  %v9084_v24 = vcombine.high %v12961_v50, %v12966_v3 }
 0x23b   : > { %v9521_v49 = vpop.f32.mrb[40].mxu1  ;;  %5992 = vmatprep.mubr.bf16.mxu0 %v9130_v21  ;;  %v13020_v9 = vadd.f32 %v9632_v12, %v3990_v1  ;;  %v9082_v12 = vcombine.high %v12913_v59, %v12923_v16  ;;  %v9149_v21 = vrot.slane %v6041_v18, 9  ;;  %v14333_v59 = vld [vmem:[#allocation18_spill] sm:$0xff] }
 0x23c   : > { %v9522_v4 = vpop.f32.mrb[41].mxu1  ;;  %v6109_v1 = vrot.slane %v6107_v27, 4  ;;  %v3110_v16 = vadd.f32 %v14333_v59, %v12814_v36 }
 0x23d   : > { %v9639_v40 = vpop.f32.mrb[44].mxu0  ;;  %v9523_v57 = vadd.f32 %v9522_v4, %v9521_v49  ;;  %v9524_v5 = vpop.f32.mrb[42].mxu1  ;;  %v10740_v49 = vld [vmem:[#allocation2 + $0x28] sm:$0x11] }
 0x23e   : > { %v9640_v28 = vpop.f32.mrb[45].mxu0  ;;  %v9525_v45 = vpop.f32.mrb[43].mxu1  ;;  %v6110_v4 = vrot.slane %v10740_v49, 5 }
 0x23f   : > { %v9641_v13 = vadd.f32 %v9640_v28, %v9639_v40  ;;  %v9642_v56 = vpop.f32.mrb[46].mxu0  ;;  %v3991_v42 = vadd.f32 %v9523_v57, %v3107_v29  ;;  %v9526_v52 = vadd.f32 %v9525_v45, %v9524_v5  ;;  %v10663_v29 = vld [vmem:[#allocation2 + $0x34] ss:$8 sps:$4 sm:$0xff]  }
 0x240   : > { %v9643_v62 = vpop.f32.mrb[47].mxu0  ;;  %5104 = vmatmul.mubr.bf16.gmra.mrb[148].mxu1 %v9079_v61  ;;  %v6042_v45 = vld [vmem:[#allocation2 + $0x30] sm:$0xee] }
 0x241   : > { %v9644_v35 = vadd.f32 %v9643_v62, %v9642_v56  ;;  %v3992_v26 = vadd.f32 %v9526_v52, %v3108_v15  ;;  %5111 = vmatprep.mubr.bf16.mxu1 %v9082_v12  ;;  %v13034_v30 = vadd.f32 %v9635_v0, %v3991_v42  ;;  %v10741_v56 = vld [vmem:[#allocation2 + $0x38] sm:$0xff] }
 0x242   : > { %5993 = vmatmul.mubr.bf16.gmra.mrb[152].mxu0 %v9129_v32  ;;  %v6114_v32 = vrot.slane %v10741_v56, 5 }
 0x243   : > { %v9527_v37 = vpop.f32.mrb[44].mxu1  ;;  %6000 = vmatprep.mubr.bf16.mxu0 %v9132_v39  ;;  %v13036_v14 = vadd.f32 %v9638_v47, %v3992_v26  ;;  %v9131_v47 = vcombine.low %v5581_v17, %v5591_v8  ;;  %v13050_v17 = vsel %vm11760_vm2, %v9149_v21, %v6107_v27  ;;  %v13054_v8 = vsel %vm11760_vm2, %v6109_v1, %v6110_v4  ;;  %v14335_v39 = vld [vmem:[#allocation19_spill] sm:$0xff]  ;;  %v10668_v1 = vld [vmem:[#allocation2 + $0x4c] ss:$8 sps:$4 sm:$0xff]  }
 0x244   : > { %v9528_v38 = vpop.f32.mrb[45].mxu1  ;;  %v3111_v26 = vadd.f32 %v14335_v39, %v12814_v36  ;;  %v10676_v4 = vld [vmem:[#allocation8 + $0x448] sm:$0xff]   ;;  %v14337_v39 = vld [vmem:[#allocation21_spill] sm:$0xff] }
 0x245   : > { %v9645_v10 = vpop.f32.mrb[48].mxu0  ;;  %v9529_v41 = vadd.f32 %v9528_v38, %v9527_v37  ;;  %v9530_v20 = vpop.f32.mrb[46].mxu1  ;;  %v9166_v37 = vcombine.high %v13050_v17, %v13054_v8  ;;  %v9150_v38 = vrot.slane %v6042_v45, 9  ;;  %v10743_v45 = vld [vmem:[#allocation2 + $0x50] sm:$0xff] }
 0x246   : > { %v9646_v0 = vpop.f32.mrb[49].mxu0  ;;  %v9531_v33 = vpop.f32.mrb[47].mxu1  ;;  %v6121_v56 = vrot.slane %v10743_v45, 5  ;;  %v10687_v45 = vld [vmem:[#allocation8 + $0x410] sm:$0xff]  }
 0x247   : > { %v9647_v48 = vadd.f32 %v9646_v0, %v9645_v10  ;;  %v9648_v2 = vpop.f32.mrb[50].mxu0  ;;  %v3993_v61 = vadd.f32 %v9529_v41, %v3109_v54  ;;  %v9532_v40 = vadd.f32 %v9531_v33, %v9530_v20  ;;  %v10661_v54 = vld [vmem:[#allocation2 + $0x30] ss:$8 sps:$4 sm:$0xff]   ;;  %v6116_v41 = vrot.slane %v6114_v32, 4  ;;  %v10742_v20 = vld [vmem:[#allocation2 + $0x40] sm:$0x11] }
 0x248   : > { %v9649_v53 = vpop.f32.mrb[51].mxu0  ;;  %5112 = vmatmul.mubr.bf16.gmra.mrb[152].mxu1 %v9081_v25  ;;  %v6117_v0 = vrot.slane %v10742_v20, 5  ;;  %v13072_v59 = vsel %vm11760_vm2, %v9150_v38, %v6114_v32  ;;  %v10677_v32 = vld [vmem:[#allocation8 + $0x408] sm:$0xff]  }
 0x249   : > { %v9650_v57 = vadd.f32 %v9649_v53, %v9648_v2  ;;  %v3994_v5 = vadd.f32 %v9532_v40, %v3110_v16  ;;  %5119 = vmatprep.mubr.bf16.mxu1 %v9084_v24  ;;  %v13046_v28 = vadd.f32 %v9641_v13, %v3993_v61  ;;  %v9083_v13 = vcombine.low %v12961_v50, %v12966_v3  ;;  %v14336_v24 = vld [vmem:[#allocation20_spill] sm:$0xff]  ;;  %v6043_v16 = vld [vmem:[#allocation2 + $0x48] sm:$0xee] }
 0x24a   : > { %6001 = vmatmul.mubr.bf16.gmra.mrb[156].mxu0 %v9131_v47  ;;  %v3112_v21 = vadd.f32 %v14336_v24, %v12814_v36  ;;  %v10667_v47 = vld [vmem:[#allocation8 + $0x400] sm:$0xff]   ;;  %v6056_v53 = vld [vmem:[#allocation2 + $0x180] sm:$0xee] }
 0x24b   : > { %v9533_v42 = vpop.f32.mrb[48].mxu1  ;;  %7019 = vmatprep.mubr.bf16.mxu0 %v10663_v29  ;;  %v13056_v15 = vadd.f32 %v9644_v35, %v3994_v5  ;;  %v6212_v29 = vrot.slane %v12966_v3, 5  ;;  %v13079_v5 = vsel %vm11760_vm2, %v6116_v41, %v6117_v0  ;;  %v3113_v3 = vadd.f32 %v14337_v39, %v12814_v36  ;;  %v10744_v41 = vld [vmem:[#allocation2 + $0x58] sm:$0x11]  ;;  %v10670_v24 = vld [vmem:[#allocation2 + $0x48] ss:$8 sps:$4 sm:$0xff]  }
 0x24c   : > { %v9534_v52 = vpop.f32.mrb[49].mxu1  ;;  %v6124_v20 = vrot.slane %v10744_v41, 5 }
 0x24d   : > { %v9651_v62 = vpop.f32.mrb[52].mxu0  ;;  %v9535_v18 = vadd.f32 %v9534_v52, %v9533_v42  ;;  %v9536_v51 = vpop.f32.mrb[50].mxu1  ;;  %v9164_v42 = vrot.slane %v6056_v53, 9  ;;  %v6215_v52 = vrot.slane %v12995_v6, 5 }
 0x24e   : > { %v9652_v27 = vpop.f32.mrb[53].mxu0  ;;  %v9537_v25 = vpop.f32.mrb[51].mxu1 }
 0x24f   : > { %v13064_v10 = vadd.f32 %v9652_v27, %v9651_v62  ;;  %v9654_v35 = vpop.f32.mrb[54].mxu0  ;;  %v3995_v50 = vadd.f32 %v9535_v18, %v3111_v26  ;;  %v9538_v33 = vadd.f32 %v9537_v25, %v9536_v51  ;;  %v9165_v18 = vcombine.low %v13050_v17, %v13054_v8 }
 0x250   : > { %v9655_v2 = vpop.f32.mrb[55].mxu0  ;;  %5120 = vmatmul.mubr.bf16.gmra.mrb[156].mxu1 %v9083_v13  ;;  %v9151_v27 = vrot.slane %v6043_v16, 9  ;;  %v13090_v6 = vsel %vm11760_vm2, %v9164_v42, %v6212_v29 }
 0x251   : > { %v13068_v49 = vadd.f32 %v9655_v2, %v9654_v35  ;;  %v3996_v61 = vadd.f32 %v9538_v33, %v3112_v21  ;;  %6505 = vmatprep.mubr.bf16.mxu1 %v9166_v37  ;;  %v13074_v40 = vadd.f32 %v9647_v48, %v3995_v50  ;;  %v6214_v48 = vrot.slane %v6212_v29, 4  ;;  %v10686_v37 = vld [vmem:[#allocation8 + $0x450] sm:$0xff]   ;;  %v10674_v33 = vld [vmem:[#allocation8 + $0x3c8] sm:$0xff]  }
 0x252   : > { %7020 = vmatmul.mubr.bf16.vlgmr.msra.gmra.mrb[160].mxu0 %v10661_v54  ;;  %v9168_v54 = vcombine.high %v13072_v59, %v13079_v5  ;;  %v6123_v21 = vrot.slane %v6121_v56, 4  ;;  %v10671_v29 = vld [vmem:[#allocation2 + $0x64] ss:$8 sps:$4 sm:$0xff]  }
 0x253   : > { %v9539_v13 = vpop.f32.mrb[52].mxu1  ;;  %10278 = vmatpush3.bf16.msra.mxu0 %v10667_v47  ;;  %7027 = vmatprep.mubr.bf16.mxu0 %v10668_v1  ;;  %v13082_v62 = vadd.f32 %v9650_v57, %v3996_v61  ;;  %v10665_v57 = vld [vmem:[#allocation8 + $0x380] sm:$0xff]   ;;  %v13096_v17 = vsel %vm11760_vm2, %v6214_v48, %v6215_v52  ;;  %v10696_v52 = vld [vmem:[#allocation8 + $0x458] sm:$0xff]   ;;  %v10675_v48 = vld [vmem:[#allocation8 + $0x388] sm:$0xff]  }
 0x254   : > { %v9540_v26 = vpop.f32.mrb[53].mxu1  ;;  %10279 = vmatprep.subr.bf16.mxu0 %v10676_v4  ;;  %v14338_v4 = vld [vmem:[#allocation22_spill] sm:$0xff] }
 0x255   : > { %v9657_v51 = vpop.f32.mrb[56].mxu0  ;;  %v9541_v38 = vadd.f32 %v9540_v26, %v9539_v13  ;;  %v9542_v25 = vpop.f32.mrb[54].mxu1  ;;  %v3114_v61 = vadd.f32 %v14338_v4, %v12814_v36  ;;  %v10745_v26 = vld [vmem:[#allocation2 + $0x68] sm:$0xff]  ;;  %v14359_v47 = vld [vmem:[#allocation30_spill] sm:$0xff] }
 0x256   : > { %v9658_v35 = vpop.f32.mrb[57].mxu0  ;;  %v9543_v8 = vpop.f32.mrb[55].mxu1 }
 0x257   : > { %v13098_v0 = vadd.f32 %v9658_v35, %v9657_v51  ;;  %v9660_v50 = vpop.f32.mrb[58].mxu0  ;;  %v3997_v1 = vadd.f32 %v9541_v38, %v3113_v3  ;;  %v9544_v16 = vadd.f32 %v9543_v8, %v9542_v25  ;;  %10280 = vmatpush3.bf16.msra.mxu0 %v10677_v32  ;;  %v13113_v3 = vsel %vm11760_vm2, %v9151_v27, %v6121_v56  ;;  %v10684_v51 = vld [vmem:[#allocation8 + $0x3d0] sm:$0xff]   ;;  %v10697_v25 = vld [vmem:[#allocation8 + $0x418] sm:$0xff]   ;;  %v10706_v35 = vld [vmem:[#allocation8 + $0x460] sm:$0xff]  }
 0x258   : > { %v9661_v53 = vpop.f32.mrb[59].mxu0  ;;  %6506 = vmatmul.mubr.bf16.vlgmr.msra.gmra.mrb[160].mxu1 %v9165_v18  ;;  %10281 = vmatprep.subr.bf16.mxu0 %v10686_v37  ;;  %v13117_v32 = vsel %vm11760_vm2, %v6123_v21, %v6124_v20  ;;  %v6128_v18 = vrot.slane %v10745_v26, 5  ;;  %v6044_v38 = vld [vmem:[#allocation2 + $0x60] sm:$0xee]  ;;  %v9167_v56 = vcombine.low %v13072_v59, %v13079_v5 }
 0x259   : > { %v13106_v42 = vadd.f32 %v9661_v53, %v9660_v50  ;;  %v3998_v13 = vadd.f32 %v9544_v16, %v3114_v61  ;;  %10166 = vmatpush3.bf16.msra.mxu1 %v10665_v57  ;;  %6513 = vmatprep.mubr.bf16.mxu1 %v9168_v54  ;;  %v13109_v39 = vadd.f32 %v13064_v10, %v3997_v1  ;;  %v14339_v54 = vld [vmem:[#allocation23_spill] sm:$0xff]  ;;  %v10673_v21 = vld [vmem:[#allocation2 + $0x60] ss:$8 sps:$4 sm:$0xff]   ;;  %v9152_v59 = vrot.slane %v6044_v38, 9  ;;  %v10746_v61 = vld [vmem:[#allocation2 + $0x70] sm:$0x11] }
 0x25a   : > { %7028 = vmatmul.mubr.bf16.gmra.mrb[164].mxu0 %v10670_v24  ;;  %10167 = vmatprep.subr.bf16.mxu1 %v10674_v33  ;;  %v3115_v41 = vadd.f32 %v14339_v54, %v12814_v36  ;;  %v9170_v24 = vcombine.high %v13113_v3, %v13117_v32  ;;  %v6130_v5 = vrot.slane %v6128_v18, 4  ;;  %v6131_v16 = vrot.slane %v10746_v61, 5  ;;  %v10694_v53 = vld [vmem:[#allocation8 + $0x3d8] sm:$0xff]   ;;  %v10678_v26 = vld [vmem:[#allocation2 + $0x7c] ss:$8 sps:$4 sm:$0xff]  }
 0x25b   : > { %v9545_v37 = vpop.f32.mrb[56].mxu1  ;;  %7035 = vmatprep.mubr.bf16.mxu0 %v10671_v29  ;;  %10282 = vmatpush3.bf16.msra.mxu0 %v10687_v45  ;;  %v13120_v10 = vadd.f32 %v13068_v49, %v3998_v13  ;;  %v10685_v49 = vld [vmem:[#allocation8 + $0x390] sm:$0xff]   ;;  %v3116_v45 = vadd.f32 %v12783_v23, %v12814_v36  ;;  %v13139_v23 = vsel %vm11760_vm2, %v9152_v59, %v6128_v18 }
 0x25c   : > { %v9546_v57 = vpop.f32.mrb[57].mxu1  ;;  %10283 = vmatprep.subr.bf16.mxu0 %v10696_v52  ;;  %v9169_v18 = vcombine.low %v13113_v3, %v13117_v32  ;;  %v10680_v61 = vld [vmem:[#allocation2 + $0x78] ss:$8 sps:$4 sm:$0xff]  }
 0x25d   : > { %v9663_v27 = vpop.f32.mrb[60].mxu0  ;;  %v9547_v20 = vadd.f32 %v9546_v57, %v9545_v37  ;;  %v9548_v8 = vpop.f32.mrb[58].mxu1  ;;  %10168 = vmatpush3.bf16.msra.mxu1 %v10675_v48  ;;  %v10707_v48 = vld [vmem:[#allocation8 + $0x420] sm:$0xff]   ;;  %v10716_v57 = vld [vmem:[#allocation8 + $0x468] sm:$0xff]  }
 0x25e   : > { %v9664_v50 = vpop.f32.mrb[61].mxu0  ;;  %v9549_v33 = vpop.f32.mrb[59].mxu1  ;;  %10169 = vmatprep.subr.bf16.mxu1 %v10684_v51 }
 0x25f   : > { %v13128_v1 = vadd.f32 %v9664_v50, %v9663_v27  ;;  %v9666_v4 = vpop.f32.mrb[62].mxu0  ;;  %v3999_v29 = vadd.f32 %v9547_v20, %v3115_v41  ;;  %v9550_v52 = vadd.f32 %v9549_v33, %v9548_v8  ;;  %10284 = vmatpush3.bf16.msra.mxu0 %v10697_v25  ;;  %v10695_v27 = vld [vmem:[#allocation8 + $0x398] sm:$0xff]   ;;  %v13143_v25 = vsel %vm11760_vm2, %v6130_v5, %v6131_v16  ;;  %v6045_v20 = vld [vmem:[#allocation2 + $0x78] sm:$0xee] }
 0x260   : > { %v9667_v13 = vpop.f32.mrb[63].mxu0  ;;  %6514 = vmatmul.mubr.bf16.gmra.mrb[164].mxu1 %v9167_v56  ;;  %10285 = vmatprep.subr.bf16.mxu0 %v10706_v35  ;;  %v10747_v56 = vld [vmem:[#allocation2 + $0x80] sm:$0xff]  ;;  %v10704_v35 = vld [vmem:[#allocation8 + $0x3e0] sm:$0xff]   ;;  %v10717_v8 = vld [vmem:[#allocation8 + $0x428] sm:$0xff]   ;;  %v9172_v5 = vcombine.high %v13139_v23, %v13143_v25  ;;  %v9153_v3 = vrot.slane %v6045_v20, 9 }
 0x261   : > { %v13132_v37 = vadd.f32 %v9667_v13, %v9666_v4  ;;  %v4000_v38 = vadd.f32 %v9550_v52, %v3116_v45  ;;  %6521 = vmatprep.mubr.bf16.mxu1 %v9170_v24  ;;  %10170 = vmatpush3.bf16.msra.mxu1 %v10685_v49  ;;  %v13135_v51 = vadd.f32 %v13098_v0, %v3999_v29  ;;  %v6135_v54 = vrot.slane %v10747_v56, 5  ;;  %v10748_v45 = vld [vmem:[#allocation2 + $0x88] sm:$0x11]  ;;  %v10714_v13 = vld [vmem:[#allocation8 + $0x3e8] sm:$0xff]  }
 0x262   : > { %7036 = vmatmul.mubr.bf16.gmra.mrb[168].mxu0 %v10673_v21  ;;  %10171 = vmatprep.subr.bf16.mxu1 %v10694_v53  ;;  %v10726_v21 = vld [vmem:[#allocation8 + $0x470] sm:$0xff]   ;;  %v3117_v49 = vadd.f32 %v12822_v58, %v12814_v36  ;;  %v6138_v52 = vrot.slane %v10748_v45, 5  ;;  %v10715_v20 = vld [vmem:[#allocation8 + $0x3a8] sm:$0xff]  }
 0x263   : > { %v9551_v41 = vpop.f32.mrb[60].mxu1  ;;  %7043 = vmatprep.mubr.bf16.mxu0 %v10678_v26  ;;  %10286 = vmatpush3.bf16.msra.mxu0 %v10707_v48  ;;  %v13146_v0 = vadd.f32 %v13106_v42, %v4000_v38  ;;  %v10705_v42 = vld [vmem:[#allocation8 + $0x3a0] sm:$0xff]   ;;  %v6137_v32 = vrot.slane %v6135_v54, 4  ;;  %v3118_v26 = vadd.f32 %v12832_v11, %v12814_v36  ;;  %v13163_v36 = vsel %vm11760_vm2, %v9153_v3, %v6135_v54  ;;  %v10725_v3 = vld [vmem:[#allocation8 + $0x3b0] sm:$0xff]  }
 0x264   : > { %v9552_v50 = vpop.f32.mrb[61].mxu1  ;;  %10287 = vmatprep.subr.bf16.mxu0 %v10716_v57  ;;  %v10681_v38 = vld [vmem:[#allocation2 + $0x94] ss:$8 sps:$4 sm:$0xff]   ;;  %v9171_v54 = vcombine.low %v13139_v23, %v13143_v25  ;;  %v10734_v23 = vld [vmem:[#allocation8 + $0x3f8] sm:$0xff]  }
 0x265   : > { %v9669_v24 = vpop.f32.mrb[64].mxu0  ;;  %v9553_v33 = vadd.f32 %v9552_v50, %v9551_v41  ;;  %v9554_v4 = vpop.f32.mrb[62].mxu1  ;;  %10172 = vmatpush3.bf16.msra.mxu1 %v10695_v27  ;;  %v10727_v27 = vld [vmem:[#allocation8 + $0x430] sm:$0xff]   ;;  %v10736_v41 = vld [vmem:[#allocation8 + $0x478] sm:$0xff]   ;;  %v13167_v11 = vsel %vm11760_vm2, %v6137_v32, %v6138_v52 }
 0x266   : > { %v9670_v59 = vpop.f32.mrb[65].mxu0  ;;  %v9555_v16 = vpop.f32.mrb[63].mxu1  ;;  %10173 = vmatprep.subr.bf16.mxu1 %v10704_v35 }
 0x267   : > { %v13154_v53 = vadd.f32 %v9670_v59, %v9669_v24  ;;  %v9672_v29 = vpop.f32.mrb[66].mxu0  ;;  %v4001_v58 = vadd.f32 %v9553_v33, %v3117_v49  ;;  %v9556_v48 = vadd.f32 %v9555_v16, %v9554_v4  ;;  %10288 = vmatpush3.bf16.msra.mxu0 %v10717_v8  ;;  %v10749_v8 = vld [vmem:[#allocation2 + $0x98] sm:$0xff]  ;;  %v10724_v24 = vld [vmem:[#allocation8 + $0x3f0] sm:$0xff]   ;;  %v6046_v49 = vld [vmem:[#allocation2 + $0x90] sm:$0xee]  ;;  %v9174_v16 = vcombine.high %v13163_v36, %v13167_v11 }
 0x268   : > { %v9673_v57 = vpop.f32.mrb[67].mxu0  ;;  %6522 = vmatmul.mubr.bf16.gmra.mrb[168].mxu1 %v9169_v18  ;;  %10289 = vmatprep.subr.bf16.mxu0 %v10726_v21  ;;  %v6142_v18 = vrot.slane %v10749_v8, 5  ;;  %v10737_v33 = vld [vmem:[#allocation8 + $0x438] sm:$0xff]  }
 0x269   : > { %v9674_v56 = vadd.f32 %v9673_v57, %v9672_v29  ;;  %v4002_v50 = vadd.f32 %v9556_v48, %v3118_v26  ;;  %6529 = vmatprep.mubr.bf16.mxu1 %v9172_v5  ;;  %10174 = vmatpush3.bf16.msra.mxu1 %v10705_v42  ;;  %v13159_v35 = vadd.f32 %v13128_v1, %v4001_v58  ;;  %v10683_v29 = vld [vmem:[#allocation2 + $0x90] ss:$8 sps:$4 sm:$0xff]   ;;  %v10750_v58 = vld [vmem:[#allocation2 + $0xa0] sm:$0x11] }
 0x26a   : > { %7044 = vmatmul.mubr.bf16.gmra.mrb[172].mxu0 %v10680_v61  ;;  %10175 = vmatprep.subr.bf16.mxu1 %v10714_v13  ;;  %v6144_v13 = vrot.slane %v6142_v18, 4  ;;  %v6145_v26 = vrot.slane %v10750_v58, 5 }
 0x26b   : > { %v9557_v21 = vpop.f32.mrb[64].mxu1  ;;  %7051 = vmatprep.mubr.bf16.mxu0 %v10681_v38  ;;  %10290 = vmatpush3.bf16.msra.mxu0 %v10727_v27  ;;  %v13170_v1 = vadd.f32 %v13132_v37, %v4002_v50  ;;  %v9154_v37 = vrot.slane %v6046_v49, 9  ;;  %v10688_v38 = vld [vmem:[#allocation2 + $0xac] ss:$8 sps:$4 sm:$0xff]  }
 0x26c   : > { %v9558_v4 = vpop.f32.mrb[65].mxu1  ;;  %10291 = vmatprep.subr.bf16.mxu0 %v10736_v41  ;;  %v10735_v50 = vld [vmem:[#allocation8 + $0x3b8] sm:$0xff]   ;;  %v6146_v8 = vsel %vm11760_vm2, %v6144_v13, %v6145_v26 }
 0x26d   : > { %v9675_v59 = vpop.f32.mrb[68].mxu0  ;;  %v9559_v5 = vadd.f32 %v9558_v4, %v9557_v21  ;;  %v9560_v61 = vpop.f32.mrb[66].mxu1  ;;  %10176 = vmatpush3.bf16.msra.mxu1 %v10715_v20  ;;  %v13180_v20 = vsel %vm11760_vm2, %v9154_v37, %v6142_v18  ;;  %v10752_v37 = vld [vmem:[#allocation2 + $0xb8] sm:$0x11] }
 0x26e   : > { %v9676_v42 = vpop.f32.mrb[69].mxu0  ;;  %v9561_v32 = vpop.f32.mrb[67].mxu1  ;;  %10177 = vmatprep.subr.bf16.mxu1 %v10724_v24 }
 0x26f   : > { %v9677_v45 = vadd.f32 %v9676_v42, %v9675_v59  ;;  %v9678_v52 = vpop.f32.mrb[70].mxu0  ;;  %v4003_v25 = vadd.f32 %v9559_v5, %v12838_v34  ;;  %v9562_v48 = vadd.f32 %v9561_v32, %v9560_v61  ;;  %10292 = vmatpush3.bf16.msra.mxu0 %v10737_v33  ;;  %v10751_v34 = vld [vmem:[#allocation2 + $0xb0] sm:$0xff]  ;;  %v9176_v42 = vcombine.high %v13180_v20, %v6146_v8 }
 0x270   : > { %v9679_v57 = vpop.f32.mrb[71].mxu0  ;;  %6530 = vmatmul.mubr.bf16.gmra.mrb[172].mxu1 %v9171_v54  ;;  %v6149_v24 = vrot.slane %v10751_v34, 5  ;;  %v9173_v54 = vcombine.low %v13163_v36, %v13167_v11  ;;  %v10691_v36 = vld [vmem:[#allocation2 + $0xc4] ss:$8 sps:$4 sm:$0xff]  }
 0x271   : > { %v9680_v27 = vadd.f32 %v9679_v57, %v9678_v52  ;;  %v4004_v41 = vadd.f32 %v9562_v48, %v12845_v55  ;;  %6537 = vmatprep.mubr.bf16.mxu1 %v9174_v16  ;;  %10178 = vmatpush3.bf16.msra.mxu1 %v10725_v3  ;;  %v13185_v21 = vadd.f32 %v13154_v53, %v4003_v25  ;;  %v6047_v55 = vld [vmem:[#allocation2 + $0xa8] sm:$0xee] }
 0x272   : > { %7052 = vmatmul.mubr.bf16.gmra.mrb[176].mxu0 %v10683_v29  ;;  %10179 = vmatprep.subr.bf16.mxu1 %v10734_v23  ;;  %v10690_v16 = vld [vmem:[#allocation2 + $0xa8] ss:$8 sps:$4 sm:$0xff]   ;;  %v9155_v32 = vrot.slane %v6047_v55, 9  ;;  %v6151_v52 = vrot.slane %v6149_v24, 4 }
 0x273   : > { %v9563_v49 = vpop.f32.mrb[68].mxu1  ;;  %7059 = vmatprep.mubr.bf16.mxu0 %v10688_v38  ;;  %v13187_v33 = vadd.f32 %v9674_v56, %v4004_v41  ;;  %v6152_v56 = vrot.slane %v10752_v37, 5  ;;  %v10753_v57 = vld [vmem:[#allocation2 + $0xc8] sm:$0xff]  ;;  %v10698_v37 = vld [vmem:[#allocation2 + $0xdc] ss:$8 sps:$4 sm:$0xff]  }
 0x274   : > { %v9564_v4 = vpop.f32.mrb[69].mxu1  ;;  %v6150_v25 = vsel %vm11760_vm2, %v9155_v32, %v6149_v24  ;;  %v6156_v38 = vrot.slane %v10753_v57, 5 }
 0x275   : > { %v9681_v18 = vpop.f32.mrb[72].mxu0  ;;  %v9565_v59 = vadd.f32 %v9564_v4, %v9563_v49  ;;  %v9566_v5 = vpop.f32.mrb[70].mxu1  ;;  %10180 = vmatpush3.bf16.msra.mxu1 %v10735_v50  ;;  %v6153_v48 = vsel %vm11760_vm2, %v6151_v52, %v6152_v56  ;;  %v6048_v50 = vld [vmem:[#allocation2 + $0xc0] sm:$0xee] }
 0x276   : > { %v9682_v61 = vpop.f32.mrb[73].mxu0  ;;  %v9567_v29 = vpop.f32.mrb[71].mxu1  ;;  %v9178_v24 = vcombine.high %v6150_v25, %v6153_v48 }
 0x277   : > { %v9683_v53 = vadd.f32 %v9682_v61, %v9681_v18  ;;  %v9684_v3 = vpop.f32.mrb[74].mxu0  ;;  %v4005_v13 = vadd.f32 %v9565_v59, %v12867_v22  ;;  %v9568_v58 = vadd.f32 %v9567_v29, %v9566_v5  ;;  %v10693_v59 = vld [vmem:[#allocation2 + $0xc0] ss:$8 sps:$4 sm:$0xff]   ;;  %v10754_v29 = vld [vmem:[#allocation2 + $0xd0] sm:$0x11] }
 0x278   : > { %v9685_v26 = vpop.f32.mrb[75].mxu0  ;;  %6538 = vmatmul.mubr.bf16.gmra.mrb[176].mxu1 %v9173_v54 }
 0x279   : > { %v9686_v11 = vadd.f32 %v9685_v26, %v9684_v3  ;;  %v4006_v23 = vadd.f32 %v9568_v58, %v12871_v46  ;;  %6545 = vmatprep.mubr.bf16.mxu1 %v9176_v42  ;;  %v13198_v41 = vadd.f32 %v9677_v45, %v4005_v13  ;;  %v9175_v46 = vcombine.low %v13180_v20, %v6146_v8  ;;  %v10755_v58 = vld [vmem:[#allocation2 + $0xe0] sm:$0xff] }
 0x27a   : > { %7060 = vmatmul.mubr.bf16.gmra.mrb[180].mxu0 %v10690_v16  ;;  %v9156_v16 = vrot.slane %v6048_v50, 9  ;;  %v6158_v45 = vrot.slane %v6156_v38, 4  ;;  %v6159_v3 = vrot.slane %v10754_v29, 5  ;;  %v6163_v26 = vrot.slane %v10755_v58, 5  ;;  %v10701_v29 = vld [vmem:[#allocation2 + $0xf4] ss:$8 sps:$4 sm:$0xff]  }
 0x27b   : > { %14340 = vst [vmem:[#allocation15_spill] sm:$0xff] %v13198_v41  ;;  %v9569_v22 = vpop.f32.mrb[72].mxu1  ;;  %7067 = vmatprep.mubr.bf16.mxu0 %v10691_v36  ;;  %v13200_v34 = vadd.f32 %v9680_v27, %v4006_v23  ;;  %v9177_v50 = vcombine.low %v6150_v25, %v6153_v48  ;;  %v14344_v48 = vld [vmem:[#allocation17_spill] sm:$0xff] }
 0x27c   : > { %v9570_v49 = vpop.f32.mrb[73].mxu1  ;;  %v6157_v56 = vsel %vm11760_vm2, %v9156_v16, %v6156_v38  ;;  %v6160_v13 = vsel %vm11760_vm2, %v6158_v45, %v6159_v3  ;;  %v10700_v38 = vld [vmem:[#allocation2 + $0xd8] ss:$8 sps:$4 sm:$0xff]  }
 0x27d   : > { %14341 = vst [vmem:[#allocation16_spill] sm:$0xff] %v13200_v34  ;;  %v9687_v55 = vpop.f32.mrb[76].mxu0  ;;  %v9571_v4 = vadd.f32 %v9570_v49, %v9569_v22  ;;  %v9572_v54 = vpop.f32.mrb[74].mxu1  ;;  %v13394_v34 = vld [vmem:[#allocation2 + $0x70] sm:$0x11] }
 0x27e   : > { %v9688_v18 = vpop.f32.mrb[77].mxu0  ;;  %v9573_v5 = vpop.f32.mrb[75].mxu1 }
 0x27f   : > { %v9689_v61 = vadd.f32 %v9688_v18, %v9687_v55  ;;  %v9690_v42 = vpop.f32.mrb[78].mxu0  ;;  %v4007_v32 = vadd.f32 %v9571_v4, %v12891_v44  ;;  %v9574_v27 = vadd.f32 %v9573_v5, %v9572_v54  ;;  %v6049_v44 = vld [vmem:[#allocation2 + $0xd8] sm:$0xee]  ;;  %v9180_v4 = vcombine.high %v6157_v56, %v6160_v13 }
 0x280   : > { %v9691_v52 = vpop.f32.mrb[79].mxu0  ;;  %6546 = vmatmul.mubr.bf16.gmra.mrb[180].mxu1 %v9175_v46  ;;  %v6165_v5 = vrot.slane %v6163_v26, 4 }
 0x281   : > { %v9692_v20 = vadd.f32 %v9691_v52, %v9690_v42  ;;  %v4008_v8 = vadd.f32 %v9574_v27, %v12895_v7  ;;  %6553 = vmatprep.mubr.bf16.mxu1 %v9178_v24  ;;  %v13209_v23 = vadd.f32 %v9683_v53, %v4007_v32  ;;  %v10756_v42 = vld [vmem:[#allocation2 + $0xe8] sm:$0x11]  ;;  %v10757_v52 = vld [vmem:[#allocation2 + $0xf8] sm:$0xff] }
 0x282   : > { %7068 = vmatmul.mubr.bf16.gmra.mrb[184].mxu0 %v10693_v59  ;;  %v9157_v59 = vrot.slane %v6049_v44, 9  ;;  %v6166_v16 = vrot.slane %v10756_v42, 5  ;;  %v9179_v44 = vcombine.low %v6157_v56, %v6160_v13  ;;  %v10708_v56 = vld [vmem:[#allocation2 + $0x10c] ss:$8 sps:$4 sm:$0xff]  }
 0x283   : > { %v9575_v36 = vpop.f32.mrb[76].mxu1  ;;  %7075 = vmatprep.mubr.bf16.mxu0 %v10698_v37  ;;  %14342 = vst [vmem:[#allocation18_spill] sm:$0xff] %v13209_v23  ;;  %v13211_v57 = vadd.f32 %v9686_v11, %v4008_v8  ;;  %v6170_v37 = vrot.slane %v10757_v52, 5  ;;  %v14348_v13 = vld [vmem:[#allocation25_spill] sm:$0xff] }
 0x284   : > { %v9576_v22 = vpop.f32.mrb[77].mxu1  ;;  %v6164_v32 = vsel %vm11760_vm2, %v9157_v59, %v6163_v26  ;;  %v6167_v27 = vsel %vm11760_vm2, %v6165_v5, %v6166_v16  ;;  %v10703_v26 = vld [vmem:[#allocation2 + $0xf0] ss:$8 sps:$4 sm:$0xff]   ;;  %v10758_v5 = vld [vmem:[#allocation2 + $0x100] sm:$0x11] }
 0x285   : > { %14343 = vst [vmem:[#allocation14_spill] sm:$0xff] %v13211_v57  ;;  %v9693_v7 = vpop.f32.mrb[80].mxu0  ;;  %v9577_v49 = vadd.f32 %v9576_v22, %v9575_v36  ;;  %v9578_v46 = vpop.f32.mrb[78].mxu1  ;;  %v6172_v59 = vrot.slane %v6170_v37, 4  ;;  %v6173_v42 = vrot.slane %v10758_v5, 5  ;;  %v14347_v16 = vld [vmem:[#allocation24_spill] sm:$0xff] }
 0x286   : > { %v9694_v55 = vpop.f32.mrb[81].mxu0  ;;  %v9579_v54 = vpop.f32.mrb[79].mxu1 }
 0x287   : > { %v9695_v18 = vadd.f32 %v9694_v55, %v9693_v7  ;;  %v9696_v24 = vpop.f32.mrb[82].mxu0  ;;  %v4009_v53 = vadd.f32 %v9577_v49, %v12907_v43  ;;  %v9580_v45 = vadd.f32 %v9579_v54, %v9578_v46  ;;  %v6050_v43 = vld [vmem:[#allocation2 + $0xf0] sm:$0xee]  ;;  %v9182_v55 = vcombine.high %v6164_v32, %v6167_v27 }
 0x288   : > { %v9697_v11 = vpop.f32.mrb[83].mxu0  ;;  %6554 = vmatmul.mubr.bf16.gmra.mrb[184].mxu1 %v9177_v50  ;;  %v6174_v52 = vsel %vm11760_vm2, %v6172_v59, %v6173_v42 }
 0x289   : > { %v9698_v25 = vadd.f32 %v9697_v11, %v9696_v24  ;;  %v4010_v3 = vadd.f32 %v9580_v45, %v14344_v48  ;;  %6561 = vmatprep.mubr.bf16.mxu1 %v9180_v4  ;;  %v13219_v58 = vadd.f32 %v9689_v61, %v4009_v53  ;;  %v9158_v24 = vrot.slane %v6050_v43, 9 }
 0x28a   : > { %7076 = vmatmul.mubr.bf16.gmra.mrb[188].mxu0 %v10700_v38 }
 0x28b   : > { %v9581_v8 = vpop.f32.mrb[80].mxu1  ;;  %7083 = vmatprep.mubr.bf16.mxu0 %v10701_v29  ;;  %14345 = vst [vmem:[#allocation19_spill] sm:$0xff] %v13219_v58  ;;  %v13221_v50 = vadd.f32 %v9692_v20, %v4010_v3  ;;  %v10759_v29 = vld [vmem:[#allocation2 + $0x110] sm:$0xff]  ;;  %v6171_v3 = vsel %vm11760_vm2, %v9158_v24, %v6170_v37 }
 0x28c   : > { %v9582_v36 = vpop.f32.mrb[81].mxu1  ;;  %v6177_v48 = vrot.slane %v10759_v29, 5  ;;  %v9184_v5 = vcombine.high %v6171_v3, %v6174_v52 }
 0x28d   : > { %v9699_v22 = vpop.f32.mrb[84].mxu0  ;;  %14346 = vst [vmem:[#allocation20_spill] sm:$0xff] %v13221_v50  ;;  %v9583_v7 = vadd.f32 %v9582_v36, %v9581_v8  ;;  %v9584_v49 = vpop.f32.mrb[82].mxu1  ;;  %v6051_v8 = vld [vmem:[#allocation2 + $0x108] sm:$0xee] }
 0x28e   : > { %v9700_v46 = vpop.f32.mrb[85].mxu0  ;;  %v9585_v4 = vpop.f32.mrb[83].mxu1  ;;  %v9159_v37 = vrot.slane %v6051_v8, 9  ;;  %v6179_v24 = vrot.slane %v6177_v48, 4  ;;  %v10761_v8 = vld [vmem:[#allocation2 + $0x128] sm:$0xff] }
 0x28f   : > { %v9701_v38 = vadd.f32 %v9700_v46, %v9699_v22  ;;  %v9702_v54 = vpop.f32.mrb[86].mxu0  ;;  %v4011_v61 = vadd.f32 %v9583_v7, %v14347_v16  ;;  %v9586_v53 = vadd.f32 %v9585_v4, %v9584_v49  ;;  %v10760_v49 = vld [vmem:[#allocation2 + $0x118] sm:$0x11] }
 0x290   : > { %v9703_v45 = vpop.f32.mrb[87].mxu0  ;;  %6562 = vmatmul.mubr.bf16.gmra.mrb[188].mxu1 %v9179_v44  ;;  %v9181_v44 = vcombine.low %v6164_v32, %v6167_v27  ;;  %v6180_v46 = vrot.slane %v10760_v49, 5  ;;  %v10711_v27 = vld [vmem:[#allocation2 + $0x124] ss:$8 sps:$4 sm:$0xff]  }
 0x291   : > { %v9704_v20 = vadd.f32 %v9703_v45, %v9702_v54  ;;  %v4012_v11 = vadd.f32 %v9586_v53, %v14348_v13  ;;  %6569 = vmatprep.mubr.bf16.mxu1 %v9182_v55  ;;  %v13229_v36 = vadd.f32 %v9695_v18, %v4011_v61  ;;  %v10710_v53 = vld [vmem:[#allocation2 + $0x108] ss:$8 sps:$4 sm:$0xff]  }
 0x292   : > { %7084 = vmatmul.mubr.bf16.gmra.mrb[192].mxu0 %v10703_v26  ;;  %v14351_v18 = vld [vmem:[#allocation26_spill] sm:$0xff]  ;;  %v13243_v29 = vsel %vm11760_vm2, %v6179_v24, %v6180_v46 }
 0x293   : > { %v9587_v43 = vpop.f32.mrb[84].mxu1  ;;  %7091 = vmatprep.mubr.bf16.mxu0 %v10708_v56  ;;  %14349 = vst [vmem:[#allocation21_spill] sm:$0xff] %v13229_v36  ;;  %v13231_v55 = vadd.f32 %v9698_v25, %v4012_v11  ;;  %v14352_v25 = vld [vmem:[#allocation27_spill] sm:$0xff]  ;;  %v13239_v11 = vsel %vm11760_vm2, %v9159_v37, %v6177_v48 }
 0x294   : > { %v9588_v22 = vpop.f32.mrb[85].mxu1  ;;  %v9186_v48 = vcombine.high %v13239_v11, %v13243_v29 }
 0x295   : > { %v9705_v7 = vpop.f32.mrb[88].mxu0  ;;  %14350 = vst [vmem:[#allocation22_spill] sm:$0xff] %v13231_v55  ;;  %v9589_v4 = vadd.f32 %v9588_v22, %v9587_v43  ;;  %v9590_v26 = vpop.f32.mrb[86].mxu1  ;;  %v6184_v43 = vrot.slane %v10761_v8, 5  ;;  %v6052_v22 = vld [vmem:[#allocation2 + $0x120] sm:$0xee] }
 0x296   : > { %v9706_v54 = vpop.f32.mrb[89].mxu0  ;;  %v9591_v16 = vpop.f32.mrb[87].mxu1  ;;  %v9160_v24 = vrot.slane %v6052_v22, 9 }
 0x297   : > { %v13233_v59 = vadd.f32 %v9706_v54, %v9705_v7  ;;  %v9708_v42 = vpop.f32.mrb[90].mxu0  ;;  %v4013_v61 = vadd.f32 %v9589_v4, %v14351_v18  ;;  %v9592_v45 = vadd.f32 %v9591_v16, %v9590_v26  ;;  %v9183_v26 = vcombine.low %v6171_v3, %v6174_v52  ;;  %v10718_v52 = vld [vmem:[#allocation2 + $0x13c] ss:$8 sps:$4 sm:$0xff]  }
 0x298   : > { %v9709_v32 = vpop.f32.mrb[91].mxu0  ;;  %6570 = vmatmul.mubr.bf16.gmra.mrb[192].mxu1 %v9181_v44  ;;  %v6186_v16 = vrot.slane %v6184_v43, 4  ;;  %v13259_v22 = vsel %vm11760_vm2, %v9160_v24, %v6184_v43  ;;  %v10764_v43 = vld [vmem:[#allocation2 + $0x148] sm:$0x11] }
 0x299   : > { %v9710_v56 = vadd.f32 %v9709_v32, %v9708_v42  ;;  %v4014_v13 = vadd.f32 %v9592_v45, %v14352_v25  ;;  %6577 = vmatprep.mubr.bf16.mxu1 %v9184_v5  ;;  %v13245_v49 = vadd.f32 %v9701_v38, %v4013_v61  ;;  %v10762_v42 = vld [vmem:[#allocation2 + $0x130] sm:$0x11]  ;;  %v10713_v61 = vld [vmem:[#allocation2 + $0x120] ss:$8 sps:$4 sm:$0xff]   ;;  %v6194_v24 = vrot.slane %v10764_v43, 5 }
 0x29a   : > { %7092 = vmatmul.mubr.bf16.gmra.mrb[196].mxu0 %v10710_v53  ;;  %v6187_v53 = vrot.slane %v10762_v42, 5 }
 0x29b   : > { %v9593_v7 = vpop.f32.mrb[88].mxu1  ;;  %7099 = vmatprep.mubr.bf16.mxu0 %v10711_v27  ;;  %14353 = vst [vmem:[#allocation23_spill] sm:$0xff] %v13245_v49  ;;  %v13247_v44 = vadd.f32 %v9704_v20, %v4014_v13  ;;  %v14355_v20 = vld [vmem:[#allocation28_spill] sm:$0xff]  ;;  %v14356_v13 = vld [vmem:[#allocation29_spill] sm:$0xff] }
 0x29c   : > { %v9594_v4 = vpop.f32.mrb[89].mxu1 }
 0x29d   : > { %14354 = vst [vmem:[#allocation17_spill] sm:$0xff] %v13247_v44  ;;  %v9711_v54 = vpop.f32.mrb[92].mxu0  ;;  %v9595_v5 = vadd.f32 %v9594_v4, %v9593_v7  ;;  %v9596_v37 = vpop.f32.mrb[90].mxu1  ;;  %v13263_v7 = vsel %vm11760_vm2, %v6186_v16, %v6187_v53  ;;  %v10763_v4 = vld [vmem:[#allocation2 + $0x140] sm:$0xff]  ;;  %v6054_v44 = vld [vmem:[#allocation2 + $0x150] sm:$0xee] }
 0x29e   : > { %v9712_v46 = vpop.f32.mrb[93].mxu0  ;;  %v9597_v18 = vpop.f32.mrb[91].mxu1 }
 0x29f   : > { %v13251_v45 = vadd.f32 %v9712_v46, %v9711_v54  ;;  %v9714_v38 = vpop.f32.mrb[94].mxu0  ;;  %v4015_v32 = vadd.f32 %v9595_v5, %v14355_v20  ;;  %v9598_v27 = vadd.f32 %v9597_v18, %v9596_v37  ;;  %v6191_v54 = vrot.slane %v10763_v4, 5  ;;  %v6053_v5 = vld [vmem:[#allocation2 + $0x138] sm:$0xee] }
 0x2a0   : > { %v9715_v3 = vpop.f32.mrb[95].mxu0  ;;  %6578 = vmatmul.mubr.bf16.gmra.mrb[196].mxu1 %v9183_v26  ;;  %v9185_v46 = vcombine.low %v13239_v11, %v13243_v29  ;;  %v9161_v53 = vrot.slane %v6053_v5, 9  ;;  %v10765_v11 = vld [vmem:[#allocation2 + $0x158] sm:$0xff] }
 0x2a1   : > { %v13254_v25 = vadd.f32 %v9715_v3, %v9714_v38  ;;  %v4016_v8 = vadd.f32 %v9598_v27, %v14356_v13  ;;  %6585 = vmatprep.mubr.bf16.mxu1 %v9186_v48  ;;  %v9188_v48 = vcombine.high %v13259_v22, %v13263_v7  ;;  %v6193_v20 = vrot.slane %v6191_v54, 4  ;;  %v10720_v13 = vld [vmem:[#allocation2 + $0x138] ss:$8 sps:$4 sm:$0xff]  }
 0x2a2   : > { %7100 = vmatmul.mubr.bf16.gmra.mrb[200].mxu0 %v10713_v61  ;;  %v13270_v61 = vadd.f32 %v13233_v59, %v4015_v32  ;;  %v6198_v29 = vrot.slane %v10765_v11, 5  ;;  %v14360_v59 = vld [vmem:[#allocation31_spill] sm:$0xff] }
 0x2a3   : > { %v9599_v37 = vpop.f32.mrb[92].mxu1  ;;  %7107 = vmatprep.mubr.bf16.mxu0 %v10718_v52  ;;  %v13274_v4 = vadd.f32 %v9710_v56, %v4016_v8  ;;  %v13286_v56 = vsel %vm11760_vm2, %v6193_v20, %v6194_v24  ;;  %v13288_v8 = vld [vmem:[#allocation2 + $0x38] sm:$0xff] }
 0x2a4   : > { %v9600_v26 = vpop.f32.mrb[93].mxu1  ;;  %14357 = vst [vmem:[#allocation24_spill] sm:$0xff] %v13270_v61  ;;  %v7238_v11 = vshll.u32 %v13288_v8, 16 }
 0x2a5   : > { %v9845_v42 = vpop.f32.mrb[96].mxu0  ;;  %v9601_v18 = vadd.f32 %v9600_v26, %v9599_v37  ;;  %v9602_v38 = vpop.f32.mrb[94].mxu1  ;;  %14358 = vst [vmem:[#allocation25_spill] sm:$0xff] %v13274_v4  ;;  %v10721_v26 = vld [vmem:[#allocation2 + $0x154] ss:$8 sps:$4 sm:$0xff]  }
 0x2a6   : > { %v9846_v16 = vpop.f32.mrb[97].mxu0  ;;  %v9603_v27 = vpop.f32.mrb[95].mxu1  ;;  %v13313_v58 = vrot.slane %v7238_v11, 5 }
 0x2a7   : > { %v13272_v3 = vadd.f32 %v9846_v16, %v9845_v42  ;;  %v9848_v52 = vpop.f32.mrb[98].mxu0  ;;  %v4017_v2 = vadd.f32 %v9601_v18, %v14359_v47  ;;  %v9604_v43 = vadd.f32 %v9603_v27, %v9602_v38  ;;  %v13282_v42 = vsel %vm11760_vm2, %v9161_v53, %v6191_v54  ;;  %v7180_v47 = vld [vmem:[#allocation2 + $0x30] sm:$0xff] }
 0x2a8   : > { %v9849_v37 = vpop.f32.mrb[99].mxu0  ;;  %6586 = vmatmul.mubr.bf16.gmra.mrb[200].mxu1 %v9185_v46  ;;  %v9162_v18 = vrot.slane %v6054_v44, 9  ;;  %v6200_v38 = vrot.slane %v6198_v29, 4  ;;  %v10766_v46 = vld [vmem:[#allocation2 + $0x160] sm:$0x11]  ;;  %v9190_v54 = vcombine.high %v13282_v42, %v13286_v56  ;;  %v10767_v53 = vld [vmem:[#allocation2 + $0x170] sm:$0xff] }
 0x2a9   : > { %v13277_v5 = vadd.f32 %v9849_v37, %v9848_v52  ;;  %v4018_v32 = vadd.f32 %v9604_v43, %v14360_v59  ;;  %6593 = vmatprep.mubr.bf16.mxu1 %v9188_v48  ;;  %v6201_v16 = vrot.slane %v10766_v46, 5  ;;  %v9187_v48 = vcombine.low %v13259_v22, %v13263_v7  ;;  %v6055_v37 = vld [vmem:[#allocation2 + $0x168] sm:$0xee] }
 0x2aa   : > { %7108 = vmatmul.mubr.bf16.gmra.mrb[204].mxu0 %v10720_v13  ;;  %v6205_v24 = vrot.slane %v10767_v53, 5  ;;  %v7229_v20 = vshrl.u32 %v7180_v47, 16  ;;  %v7232_v59 = vshll.u32 %v7180_v47, 16  ;;  %v7242_v46 = vshrl.u32 %v13288_v8, 16 }
 0x2ab   : > { %v9733_v27 = vpop.f32.mrb[96].mxu1  ;;  %7115 = vmatprep.mubr.bf16.mxu0 %v10721_v26  ;;  %v13297_v4 = vadd.f32 %v13251_v45, %v4017_v2  ;;  %v10723_v26 = vld [vmem:[#allocation2 + $0x150] ss:$8 sps:$4 sm:$0xff]   ;;  %v13301_v61 = vsel %vm11760_vm2, %v9162_v18, %v6198_v29  ;;  %v13305_v53 = vsel %vm11760_vm2, %v6200_v38, %v6201_v16  ;;  %v10728_v45 = vld [vmem:[#allocation2 + $0x16c] ss:$8 sps:$4 sm:$0xff]   ;;  %v9163_v29 = vrot.slane %v6055_v37, 9 }
 0x2ac   : > { %v9734_v52 = vpop.f32.mrb[97].mxu1  ;;  %v6207_v18 = vrot.slane %v6205_v24, 4  ;;  %v7231_v50 = vrot.slane %v7229_v20, 4  ;;  %v13318_v16 = vld [vmem:[#allocation2 + $0x40] sm:$0x11]  ;;  %v7183_v20 = vld [vmem:[#allocation2 + $0x48] sm:$0xff]  ;;  %v14365_v41 = vcombine.low %v13301_v61, %v13305_v53 }
 0x2ad   : > { %v9735_v43 = vadd.f32 %v9734_v52, %v9733_v27  ;;  %v9736_v13 = vpop.f32.mrb[98].mxu1  ;;  %v9851_v44 = vpop.f32.mrb[100].mxu0  ;;  %14361 = vst [vmem:[#allocation26_spill] sm:$0xff] %v13297_v4  ;;  %v13308_v27 = vadd.f32 %v13254_v25, %v4018_v32  ;;  %v10768_v4 = vld [vmem:[#allocation2 + $0x178] sm:$0x11]  ;;  %v7244_v32 = vrot.slane %v7242_v46, 4 }
 0x2ae   : > { %v9737_v22 = vpop.f32.mrb[99].mxu1  ;;  %v9852_v7 = vpop.f32.mrb[101].mxu0  ;;  %v6208_v55 = vrot.slane %v10768_v4, 5  ;;  %v9189_v4 = vcombine.low %v13282_v42, %v13286_v56  ;;  %v8127_v42 = vrot.slane %v13288_v8, 5 }
 0x2af   : > { %14362 = vst [vmem:[#allocation27_spill] sm:$0xff] %v13308_v27  ;;  %v5128_v47 = vadd.f32 %v9735_v43, %v12998_v19  ;;  %v9738_v52 = vadd.f32 %v9737_v22, %v9736_v13  ;;  %v13311_v49 = vadd.f32 %v9852_v7, %v9851_v44  ;;  %v9854_v2 = vpop.f32.mrb[102].mxu0  ;;  %v7234_v19 = vrot.slane %v7232_v59, 5  ;;  %v8061_v13 = vld [vmem:[#allocation2 + $0x30] sm:$0xee] }
 0x2b0   : > { %6594 = vmatmul.mubr.bf16.gmra.mrb[204].mxu1 %v9187_v48  ;;  %v9855_v36 = vpop.f32.mrb[103].mxu0  ;;  %v9192_v48 = vcombine.high %v13301_v61, %v13305_v53  ;;  %v7245_v46 = vor.u32 %v7244_v32, %v13313_v58  ;;  %v7248_v22 = vshll.u32 %v13318_v16, 16  ;;  %v13337_v7 = vld [vmem:[#allocation2 + $0x50] sm:$0xff]  ;;  %v10731_v32 = vld [vmem:[#allocation2 + $0x184] ss:$8 sps:$4 sm:$0xff]   ;;  %v8130_v27 = vrot.slane %v13318_v16, 5 }
 0x2b1   : > { %v5129_v38 = vadd.f32 %v9738_v52, %v13005_v63  ;;  %v13316_v25 = vadd.f32 %v9855_v36, %v9854_v2  ;;  %6601 = vmatprep.mubr.bf16.mxu1 %v9190_v54  ;;  %v13328_v36 = vsel %vm11760_vm2, %v9163_v29, %v6205_v24  ;;  %v13332_v54 = vsel %vm11760_vm2, %v6207_v18, %v6208_v55  ;;  %v10730_v52 = vld [vmem:[#allocation2 + $0x168] ss:$8 sps:$4 sm:$0xff]  }
 0x2b2   : > { %7116 = vmatmul.mubr.bf16.gmra.mrb[208].mxu0 %v10723_v26  ;;  %v7235_v59 = vor.u32 %v7234_v19, %v7231_v50  ;;  %v7253_v2 = vshrl.u32 %v7183_v20, 16  ;;  %v13340_v55 = vadd.f32 %v13272_v3, %v5128_v47  ;;  %v8129_v63 = vrot.slane %v8127_v42, 4 }
 0x2b3   : > { %v9739_v43 = vpop.f32.mrb[100].mxu1  ;;  %7123 = vmatprep.mubr.bf16.mxu0 %v10728_v45  ;;  %v7256_v45 = vshll.u32 %v7183_v20, 16  ;;  %v13343_v8 = vadd.f32 %v13277_v5, %v5129_v38  ;;  %v7262_v20 = vshll.u32 %v13337_v7, 16  ;;  %v7266_v3 = vshrl.u32 %v13337_v7, 16 }
 0x2b4   : > { %v9740_v11 = vpop.f32.mrb[101].mxu1  ;;  %14363 = vst [vmem:[#allocation28_spill] sm:$0xff] %v13340_v55  ;;  %v7250_v38 = vrot.slane %v7248_v22, 5  ;;  %v7255_v16 = vrot.slane %v7253_v2, 4 }
 0x2b5   : > { %v9741_v56 = vadd.f32 %v9740_v11, %v9739_v43  ;;  %v9742_v44 = vpop.f32.mrb[102].mxu1  ;;  %v9857_v37 = vpop.f32.mrb[104].mxu0  ;;  %14364 = vst [vmem:[#allocation29_spill] sm:$0xff] %v13343_v8  ;;  %v9309_v43 = vrot.slane %v8061_v13, 9  ;;  %v7246_v13 = vrot.slane %v7245_v46, 4 }
 0x2b6   : > { %v9743_v26 = vpop.f32.mrb[103].mxu1  ;;  %v9858_v24 = vpop.f32.mrb[105].mxu0  ;;  %v8063_v8 = vld [vmem:[#allocation2 + $0x60] sm:$0xee] }
 0x2b7   : > { %v5130_v29 = vadd.f32 %v9741_v56, %v13018_v31  ;;  %v9744_v50 = vadd.f32 %v9743_v26, %v9742_v44  ;;  %v13346_v18 = vadd.f32 %v9858_v24, %v9857_v37  ;;  %v9860_v19 = vpop.f32.mrb[106].mxu0  ;;  %v7236_v31 = vrot.slane %v7235_v59, 4  ;;  %v13354_v56 = vld [vmem:[#allocation2 + $0x48] sm:$0xee]  ;;  %v13363_v59 = vld [vmem:[#allocation2] sm:$0xff] }
 0x2b8   : > { %6602 = vmatmul.mubr.bf16.gmra.mrb[208].mxu1 %v9189_v4  ;;  %v9861_v11 = vpop.f32.mrb[107].mxu0  ;;  %v13356_v4 = vld [vmem:[#allocation2 + $0x58] sm:$0x11]  ;;  %v8134_v44 = vrot.slane %v13337_v7, 5  ;;  %v7258_v37 = vrot.slane %v7256_v45, 5  ;;  %v9244_v22 = vcombine.high %v13363_v59, %v13363_v59  ;;  %v9310_v2 = vrot.slane %v13354_v56, 9 }
 0x2b9   : > { %v5131_v5 = vadd.f32 %v9744_v50, %v13020_v9  ;;  %v13352_v47 = vadd.f32 %v9861_v11, %v9860_v19  ;;  %6609 = vmatprep.mubr.bf16.mxu1 %v9192_v48  ;;  %v9194_v9 = vcombine.high %v13328_v36, %v13332_v54  ;;  %v10733_v7 = vld [vmem:[#allocation2 + $0x180] ss:$8 sps:$4 sm:$0xff]   ;;  %v13374_v45 = vrot.slane %v7262_v20, 5 }
 0x2ba   : > { %7124 = vmatmul.mubr.bf16.gmra.mrb[212].mxu0 %v10730_v52  ;;  %v13371_v52 = vsel %vm11760_vm2, %v9309_v43, %v8127_v42  ;;  %v7268_v50 = vrot.slane %v7266_v3, 4  ;;  %v13378_v48 = vsel %vm11760_vm2, %v8129_v63, %v8130_v27  ;;  %v13383_v46 = vsel %vm11798_vm6, %v7236_v31, %v13313_v58  ;;  %v7187_v43 = vld [vmem:[#allocation2 + $0x68] sm:$0xff]  ;;  %v7186_v27 = vld [vmem:[#allocation2 + $0x60] sm:$0xff] }
 0x2bb   : > { %v9745_v26 = vpop.f32.mrb[104].mxu1  ;;  %7131 = vmatprep.mubr.bf16.mxu0 %v10731_v32  ;;  %v8137_v42 = vrot.slane %v13356_v4, 5  ;;  %v13388_v3 = vsel %vm11798_vm6, %v7246_v13, %v7250_v38  ;;  %v8141_v55 = vrot.slane %v7187_v43, 5  ;;  %v7272_v31 = vshll.u32 %v13356_v4, 16 }
 0x2bc   : > { %v9746_v24 = vpop.f32.mrb[105].mxu1  ;;  %v7269_v13 = vor.u32 %v7268_v50, %v13374_v45  ;;  %v7277_v4 = vshrl.u32 %v7186_v27, 16  ;;  %v7286_v53 = vshll.u32 %v7187_v43, 16  ;;  %v7290_v50 = vshrl.u32 %v7187_v43, 16 }
 0x2bd   : > { %v9747_v19 = vadd.f32 %v9746_v24, %v9745_v26  ;;  %v9748_v32 = vpop.f32.mrb[106].mxu1  ;;  %v9863_v11 = vpop.f32.mrb[108].mxu0  ;;  %v8136_v26 = vrot.slane %v8134_v44, 4  ;;  %v7259_v24 = vor.u32 %v7258_v37, %v7255_v16  ;;  %v9311_v16 = vrot.slane %v8063_v8, 9 }
 0x2be   : > { %v9749_v56 = vpop.f32.mrb[107].mxu1  ;;  %v9864_v20 = vpop.f32.mrb[109].mxu0  ;;  %v13401_v37 = vadd.f32 %v13311_v49, %v5130_v29  ;;  %v8143_v61 = vrot.slane %v8141_v55, 4  ;;  %v7189_v29 = vld [vmem:[#allocation2 + $0x78] sm:$0xff] }
 0x2bf   : > { %v5132_v63 = vadd.f32 %v9747_v19, %v13034_v30  ;;  %v9750_v57 = vadd.f32 %v9749_v56, %v9748_v32  ;;  %v13391_v23 = vadd.f32 %v9864_v20, %v9863_v11  ;;  %v9866_v58 = vpop.f32.mrb[110].mxu0  ;;  %v13404_v30 = vadd.f32 %v13316_v25, %v5131_v5 }
 0x2c0   : > { %6610 = vmatmul.mubr.bf16.gmra.mrb[212].mxu1 %v14365_v41  ;;  %v9867_v38 = vpop.f32.mrb[111].mxu0  ;;  %v7280_v11 = vshll.u32 %v7186_v27, 16  ;;  %v8144_v41 = vrot.slane %v13394_v34, 5  ;;  %v9326_v25 = vcombine.high %v13371_v52, %v13378_v48  ;;  %v13426_v43 = vsel %vm11760_vm2, %v9311_v16, %v8141_v55 }
 0x2c1   : > { %14366 = vst [vmem:[#allocation30_spill] sm:$0xff] %v13404_v30  ;;  %v5133_v19 = vadd.f32 %v9750_v57, %v13036_v14  ;;  %v13407_v32 = vadd.f32 %v9867_v38, %v9866_v58  ;;  %6617 = vmatprep.mubr.bf16.mxu1 %v9194_v9  ;;  %v13418_v57 = vsel %vm11760_vm2, %v9310_v2, %v8134_v44  ;;  %v7270_v58 = vrot.slane %v7269_v13, 4  ;;  %v13428_v44 = vld [vmem:[#allocation2 + $0x80] sm:$0xff]  ;;  %v8065_v30 = vld [vmem:[#allocation2 + $0x90] sm:$0xee] }
 0x2c2   : > { %7132 = vmatmul.mubr.bf16.gmra.mrb[216].mxu0 %v10733_v7  ;;  %v13422_v9 = vsel %vm11760_vm2, %v8136_v26, %v8137_v42  ;;  %v7274_v7 = vrot.slane %v7272_v31, 5  ;;  %v7279_v38 = vrot.slane %v7277_v4, 4  ;;  %v7282_v14 = vrot.slane %v7280_v11, 5 }
 0x2c3   : > { %v9751_v8 = vpop.f32.mrb[108].mxu1  ;;  %7139 = vmatprep.mubr.bf16.mxu0 %v9244_v22  ;;  %v7260_v22 = vrot.slane %v7259_v24, 4  ;;  %v13432_v42 = vsel %vm11760_vm2, %v8143_v61, %v8144_v41  ;;  %v13434_v26 = vrot.slane %v7286_v53, 5  ;;  %v7292_v24 = vrot.slane %v7290_v50, 4 }
 0x2c4   : > { %v9752_v5 = vpop.f32.mrb[109].mxu1  ;;  %v7301_v31 = vshrl.u32 %v7189_v29, 16  ;;  %v7304_v4 = vshll.u32 %v7189_v29, 16  ;;  %v14367_v11 = vcombine.low %v13328_v36, %v13332_v54  ;;  %v7310_v61 = vshll.u32 %v13428_v44, 16 }
 0x2c5   : > { %v9753_v56 = vadd.f32 %v9752_v5, %v9751_v8  ;;  %v9754_v20 = vpop.f32.mrb[110].mxu1  ;;  %v9869_v27 = vpop.f32.mrb[112].mxu0  ;;  %v7314_v41 = vshrl.u32 %v13428_v44, 16  ;;  %v13447_v53 = vadd.f32 %v13346_v18, %v5132_v63  ;;  %v14370_v29 = vcombine.high %v13090_v6, %v13096_v17 }
 0x2c6   : > { %v9755_v2 = vpop.f32.mrb[111].mxu1  ;;  %v9870_v49 = vpop.f32.mrb[113].mxu0  ;;  %v7283_v36 = vor.u32 %v7282_v14, %v7279_v38  ;;  %v7296_v54 = vshll.u32 %v13394_v34, 16  ;;  %v13465_v18 = vsel %vm11798_vm6, %v7260_v22, %v13374_v45  ;;  %v8148_v63 = vrot.slane %v13428_v44, 5  ;;  %v7191_v22 = vld [vmem:[#allocation2 + $0x88] sm:$0x11] }
 0x2c7   : > { %v13437_v55 = vadd.f32 %v9753_v56, %v13046_v28  ;;  %v9756_v16 = vadd.f32 %v9755_v2, %v9754_v20  ;;  %v13439_v8 = vadd.f32 %v9870_v49, %v9869_v27  ;;  %v9872_v13 = vpop.f32.mrb[114].mxu0  ;;  %14368 = vst [vmem:[#allocation31_spill] sm:$0xff] %v13447_v53  ;;  %v13450_v28 = vadd.f32 %v13352_v47, %v5133_v19  ;;  %v7192_v53 = vld [vmem:[#allocation2 + $0x90] sm:$0xff] }
 0x2c8   : > { %6618 = vmatmul.mubr.bf16.gmra.mrb[216].mxu1 %v14367_v11  ;;  %v9873_v5 = vpop.f32.mrb[115].mxu0  ;;  %v14371_v56 = vcombine.low %v13363_v59, %v13363_v59  ;;  %v7293_v47 = vor.u32 %v7292_v24, %v13434_v26  ;;  %v9262_v34 = vcombine.high %v13383_v46, %v13388_v3  ;;  %v9328_v59 = vcombine.high %v13418_v57, %v13422_v9 }
 0x2c9   : > { %14369 = vst [vmem:[#allocation32_spill] sm:$0xff] %v13450_v28  ;;  %v5135_v50 = vadd.f32 %v9756_v16, %v13056_v15  ;;  %v13453_v49 = vadd.f32 %v9873_v5, %v9872_v13  ;;  %6625 = vmatprep.mubr.bf16.mxu1 %v14370_v29  ;;  %v13469_v15 = vsel %vm11798_vm6, %v7270_v58, %v7274_v7  ;;  %v8064_v7 = vld [vmem:[#allocation2 + $0x78] sm:$0xee]  ;;  %v7303_v27 = vrot.slane %v7301_v31, 4 }
 0x2ca   : > { %7140 = vmatmul.mubr.bf16.gmra.mrb[220].mxu0 %v14371_v56  ;;  %v7306_v58 = vrot.slane %v7304_v4, 5  ;;  %v13481_v38 = vrot.slane %v7310_v61, 5  ;;  %v7284_v13 = vrot.slane %v7283_v36, 4  ;;  %v7298_v11 = vrot.slane %v7296_v54, 5 }
 0x2cb   : > { %v9757_v19 = vpop.f32.mrb[112].mxu1  ;;  %8525 = vmatprep.mubr.bf16.mxu0 %v9326_v25  ;;  %v7316_v25 = vrot.slane %v7314_v41, 4  ;;  %v7294_v56 = vrot.slane %v7293_v47, 4  ;;  %v9312_v14 = vrot.slane %v8064_v7, 9  ;;  %v8150_v45 = vrot.slane %v8148_v63, 4 }
 0x2cc   : > { %v9758_v20 = vpop.f32.mrb[113].mxu1  ;;  %v8151_v28 = vrot.slane %v7191_v22, 5  ;;  %v14372_v16 = vcombine.low %v13090_v6, %v13096_v17  ;;  %v9263_v54 = vcombine.low %v13465_v18, %v13469_v15  ;;  %v7307_v47 = vor.u32 %v7306_v58, %v7303_v27 }
 0x2cd   : > { %v9759_v44 = vadd.f32 %v9758_v20, %v9757_v19  ;;  %v9760_v2 = vpop.f32.mrb[114].mxu1  ;;  %v9875_v24 = vpop.f32.mrb[116].mxu0  ;;  %v7320_v19 = vshll.u32 %v7191_v22, 16  ;;  %v7193_v20 = vld [vmem:[#allocation2 + $0x98] sm:$0xff]  ;;  %v7317_v7 = vor.u32 %v7316_v25, %v13481_v38  ;;  %v13497_v22 = vld [vmem:[#allocation2 + $0xa0] sm:$0x11]  ;;  %v13501_v6 = vadd.f32 %v13391_v23, %v13437_v55 }
 0x2ce   : > { %v9761_v5 = vpop.f32.mrb[115].mxu1  ;;  %v9876_v29 = vpop.f32.mrb[117].mxu0  ;;  %v13504_v17 = vadd.f32 %v13407_v32, %v5135_v50  ;;  %v14373_v27 = vcombine.low %v13371_v52, %v13378_v48  ;;  %v7325_v58 = vshrl.u32 %v7192_v53, 16  ;;  %v7328_v25 = vshll.u32 %v7192_v53, 16 }
 0x2cf   : > { %v5136_v31 = vadd.f32 %v9759_v44, %v13074_v40  ;;  %v9762_v4 = vadd.f32 %v9761_v5, %v9760_v2  ;;  %v13486_v61 = vadd.f32 %v9876_v29, %v9875_v24  ;;  %v9878_v41 = vpop.f32.mrb[118].mxu0  ;;  %v8155_v40 = vrot.slane %v7193_v20, 5 }
 0x2d0   : > { %6626 = vmatmul.mubr.bf16.gmra.mrb[220].mxu1 %v14372_v16  ;;  %v9879_v36 = vpop.f32.mrb[119].mxu0  ;;  %v13520_v32 = vsel %vm11798_vm6, %v7294_v56, %v7298_v11  ;;  %v13524_v48 = vsel %vm11760_vm2, %v8150_v45, %v8151_v28  ;;  %v7322_v52 = vrot.slane %v7320_v19, 5  ;;  %v9313_v55 = vrot.slane %v8065_v30, 9  ;;  %v14414_v12 = vld [vmem:[#allocation32_spill] sm:$0xff] }
 0x2d1   : > { %v5137_v44 = vadd.f32 %v9762_v4, %v13082_v62  ;;  %v13495_v2 = vadd.f32 %v9879_v36, %v9878_v41  ;;  %7900 = vmatprep.mubr.bf16.mxu1 %v9262_v34  ;;  %v13512_v62 = vsel %vm11798_vm6, %v7284_v13, %v13434_v26  ;;  %v13516_v34 = vsel %vm11760_vm2, %v9312_v14, %v8148_v63 }
 0x2d2   : > { %8526 = vmatmul.mubr.bf16.vlgmr.msra.gmra.mrb[224].mxu0 %v14373_v27  ;;  %v7308_v50 = vrot.slane %v7307_v47, 4  ;;  %v7318_v24 = vrot.slane %v7317_v7, 4  ;;  %v8157_v16 = vrot.slane %v8155_v40, 4  ;;  %v8158_v63 = vrot.slane %v13497_v22, 5 }
 0x2d3   : > { %v9763_v23 = vpop.f32.mrb[116].mxu1  ;;  %8533 = vmatprep.mubr.bf16.mxu0 %v9328_v59  ;;  %v9329_v59 = vcombine.low %v13426_v43, %v13432_v42  ;;  %v7334_v11 = vshll.u32 %v7193_v20, 16  ;;  %v7338_v5 = vshrl.u32 %v7193_v20, 16  ;;  %v9266_v28 = vcombine.high %v13512_v62, %v13520_v32  ;;  %v7195_v20 = vld [vmem:[#allocation2 + $0xa8] sm:$0xff] }
 0x2d4   : > { %v9764_v26 = vpop.f32.mrb[117].mxu1  ;;  %v9332_v30 = vcombine.high %v13516_v34, %v13524_v48  ;;  %v7327_v45 = vrot.slane %v7325_v58, 4  ;;  %v7330_v4 = vrot.slane %v7328_v25, 5  ;;  %v13538_v7 = vsel %vm11760_vm2, %v9313_v55, %v8155_v40 }
 0x2d5   : > { %v9765_v14 = vadd.f32 %v9764_v26, %v9763_v23  ;;  %v9766_v53 = vpop.f32.mrb[118].mxu1  ;;  %v9881_v13 = vpop.f32.mrb[120].mxu0  ;;  %v14374_v27 = vcombine.low %v13383_v46, %v13388_v3  ;;  %v13546_v58 = vsel %vm11798_vm6, %v7308_v50, %v13481_v38  ;;  %v13554_v25 = vsel %vm11760_vm2, %v8157_v16, %v8158_v63  ;;  %v7196_v50 = vld [vmem:[#allocation2 + $0xb0] sm:$0xff] }
 0x2d6   : > { %v9767_v29 = vpop.f32.mrb[119].mxu1  ;;  %v9882_v56 = vpop.f32.mrb[121].mxu0  ;;  %v13557_v40 = vadd.f32 %v13439_v8, %v5136_v31  ;;  %v14375_v55 = vcombine.high %v13465_v18, %v13469_v15  ;;  %v7336_v38 = vrot.slane %v7334_v11, 5  ;;  %v7340_v26 = vrot.slane %v7338_v5, 4  ;;  %v8066_v11 = vld [vmem:[#allocation2 + $0xa8] sm:$0xee] }
 0x2d7   : > { %v5138_v41 = vadd.f32 %v9765_v14, %v13109_v39  ;;  %v9768_v19 = vadd.f32 %v9767_v29, %v9766_v53  ;;  %v13534_v36 = vadd.f32 %v9882_v56, %v9881_v13  ;;  %v9884_v47 = vpop.f32.mrb[122].mxu0  ;;  %v13550_v39 = vsel %vm11798_vm6, %v7318_v24, %v7322_v52 }
 0x2d8   : > { %7901 = vmatmul.mubr.bf16.vlgmr.msra.gmra.mrb[224].mxu1 %v14374_v27  ;;  %v9885_v23 = vpop.f32.mrb[123].mxu0  ;;  %v14376_v52 = vcombine.low %v13418_v57, %v13422_v9  ;;  %v7331_v24 = vor.u32 %v7330_v4, %v7327_v45  ;;  %v7349_v16 = vshrl.u32 %v7195_v20, 16  ;;  %v7352_v63 = vshll.u32 %v7195_v20, 16  ;;  %v7197_v20 = vld [vmem:[#allocation2 + $0xb8] sm:$0x11] }
 0x2d9   : > { %v5139_v46 = vadd.f32 %v9768_v19, %v13120_v10  ;;  %v13560_v3 = vadd.f32 %v9885_v23, %v9884_v47  ;;  %7908 = vmatprep.mubr.bf16.mxu1 %v14375_v55  ;;  %v13569_v8 = vadd.f32 %v13453_v49, %v5137_v44  ;;  %v14377_v31 = vcombine.high %v13426_v43, %v13432_v42  ;;  %v13622_v42 = vld [vmem:[#allocation2 + $0xd0] sm:$0x11] }
 0x2da   : > { %8534 = vmatmul.mubr.bf16.gmra.mrb[228].mxu0 %v14376_v52  ;;  %v7344_v9 = vshll.u32 %v13497_v22, 16  ;;  %v7358_v5 = vshll.u32 %v7196_v50, 16  ;;  %v7362_v29 = vshrl.u32 %v7196_v50, 16  ;;  %v7341_v47 = vor.u32 %v7340_v26, %v7336_v38 }
 0x2db   : > { %v9769_v10 = vpop.f32.mrb[120].mxu1  ;;  %8541 = vmatprep.mubr.bf16.mxu0 %v14377_v31  ;;  %v8162_v27 = vrot.slane %v7196_v50, 5  ;;  %v7332_v55 = vrot.slane %v7331_v24, 4  ;;  %v7351_v52 = vrot.slane %v7349_v16, 4  ;;  %v7354_v31 = vrot.slane %v7352_v63, 5  ;;  %v7199_v63 = vld [vmem:[#allocation2 + $0xc8] sm:$0xff] }
 0x2dc   : > { %v9770_v13 = vpop.f32.mrb[121].mxu1  ;;  %v13588_v57 = vadd.f32 %v13486_v61, %v5138_v41  ;;  %v9314_v49 = vrot.slane %v8066_v11, 9  ;;  %v7346_v50 = vrot.slane %v7344_v9, 5  ;;  %v8165_v19 = vrot.slane %v7197_v20, 5  ;;  %v7198_v11 = vld [vmem:[#allocation2 + $0xc0] sm:$0xff] }
 0x2dd   : > { %v9771_v56 = vadd.f32 %v9770_v13, %v9769_v10  ;;  %v9772_v45 = vpop.f32.mrb[122].mxu1  ;;  %v9887_v4 = vpop.f32.mrb[124].mxu0  ;;  %v13594_v14 = vrot.slane %v7358_v5, 5  ;;  %v7364_v24 = vrot.slane %v7362_v29, 4  ;;  %v8164_v41 = vrot.slane %v8162_v27, 4 }
 0x2de   : > { %v9773_v22 = vpop.f32.mrb[123].mxu1  ;;  %v9888_v23 = vpop.f32.mrb[125].mxu0  ;;  %v7355_v18 = vor.u32 %v7354_v31, %v7351_v52  ;;  %v7368_v15 = vshll.u32 %v7197_v20, 16  ;;  %v13620_v43 = vsel %vm11760_vm2, %v9314_v49, %v8162_v27  ;;  %v7382_v5 = vshll.u32 %v7199_v63, 16 }
 0x2df   : > { %v5140_v44 = vadd.f32 %v9771_v56, %v13135_v51  ;;  %v9774_v53 = vadd.f32 %v9773_v22, %v9772_v45  ;;  %v9889_v10 = vadd.f32 %v9888_v23, %v9887_v4  ;;  %v9890_v13 = vpop.f32.mrb[126].mxu0  ;;  %v7342_v51 = vrot.slane %v7341_v47, 4 }
 0x2e0   : > { %7909 = vmatmul.mubr.bf16.gmra.mrb[228].mxu1 %v9263_v54  ;;  %v9891_v26 = vpop.f32.mrb[127].mxu0  ;;  %v13606_v54 = vadd.f32 %v13495_v2, %v5139_v46  ;;  %v8067_v2 = vld [vmem:[#allocation2 + $0xc0] sm:$0xee]  ;;  %v7365_v9 = vor.u32 %v7364_v24, %v13594_v14  ;;  %v13634_v45 = vsel %vm11760_vm2, %v8164_v41, %v8165_v19  ;;  %v7386_v4 = vshrl.u32 %v7199_v63, 16 }
 0x2e1   : > { %v5141_v16 = vadd.f32 %v9774_v53, %v13146_v0  ;;  %v13597_v61 = vadd.f32 %v9891_v26, %v9890_v13  ;;  %7916 = vmatprep.mubr.bf16.mxu1 %v9266_v28  ;;  %v13609_v0 = vadd.f32 %v13534_v36, %v5140_v44  ;;  %v13616_v28 = vsel %vm11798_vm6, %v7332_v55, %v7336_v38 }
 0x2e2   : > { %8542 = vmatmul.mubr.bf16.gmra.mrb[232].mxu0 %v9329_v59  ;;  %v8169_v59 = vrot.slane %v7199_v63, 5  ;;  %v7373_v44 = vshrl.u32 %v7198_v11, 16  ;;  %v13630_v49 = vsel %vm11798_vm6, %v7342_v51, %v7346_v50  ;;  %v7356_v20 = vrot.slane %v7355_v18, 4 }
 0x2e3   : > { %v9775_v53 = vpop.f32.mrb[124].mxu1  ;;  %8549 = vmatprep.mubr.bf16.mxu0 %v9332_v30  ;;  %v13625_v36 = vadd.f32 %v13560_v3, %v5141_v16  ;;  %v7376_v30 = vshll.u32 %v7198_v11, 16  ;;  %v7370_v27 = vrot.slane %v7368_v15, 5  ;;  %v9315_v22 = vrot.slane %v8067_v2, 9  ;;  %v7201_v15 = vld [vmem:[#allocation2 + $0xd8] sm:$0xff] }
 0x2e4   : > { %v9776_v46 = vpop.f32.mrb[125].mxu1  ;;  %v8172_v23 = vrot.slane %v13622_v42, 5  ;;  %v8171_v26 = vrot.slane %v8169_v59, 4  ;;  %v14378_v50 = vcombine.low %v13512_v62, %v13520_v32  ;;  %v7366_v24 = vrot.slane %v7365_v9, 4 }
 0x2e5   : > { %v9777_v29 = vadd.f32 %v9776_v46, %v9775_v53  ;;  %v9778_v38 = vpop.f32.mrb[126].mxu1  ;;  %v9893_v56 = vpop.f32.mrb[128].mxu0  ;;  %v7375_v16 = vrot.slane %v7373_v44, 4  ;;  %v7378_v51 = vrot.slane %v7376_v30, 5  ;;  %v13643_v41 = vrot.slane %v7382_v5, 5  ;;  %v7202_v30 = vld [vmem:[#allocation2 + $0xe0] sm:$0xff] }
 0x2e6   : > { %v9779_v3 = vpop.f32.mrb[127].mxu1  ;;  %v9894_v47 = vpop.f32.mrb[129].mxu0  ;;  %v7388_v18 = vrot.slane %v7386_v4, 4  ;;  %v14380_v62 = vcombine.low %v13516_v34, %v13524_v48  ;;  %v9270_v32 = vcombine.high %v13616_v28, %v13630_v49  ;;  %v9336_v2 = vcombine.high %v13620_v43, %v13634_v45  ;;  %v8068_v5 = vld [vmem:[#allocation2 + $0xd8] sm:$0xee] }
 0x2e7   : > { %v5142_v55 = vadd.f32 %v9777_v29, %v13159_v35  ;;  %v9780_v52 = vadd.f32 %v9779_v3, %v9778_v38  ;;  %v13638_v31 = vadd.f32 %v9894_v47, %v9893_v56  ;;  %v9896_v13 = vpop.f32.mrb[130].mxu0  ;;  %v14379_v35 = vcombine.high %v13546_v58, %v13550_v39  ;;  %v13680_v56 = vld [vmem:[#allocation2 + $0xe8] sm:$0x11] }
 0x2e8   : > { %7917 = vmatmul.mubr.bf16.gmra.mrb[232].mxu1 %v14378_v50  ;;  %v9897_v19 = vpop.f32.mrb[131].mxu0  ;;  %v7392_v46 = vshll.u32 %v13622_v42, 16  ;;  %v13669_v34 = vsel %vm11798_vm6, %v7356_v20, %v13594_v14  ;;  %v9335_v48 = vcombine.low %v13620_v43, %v13634_v45  ;;  %v13675_v44 = vsel %vm11760_vm2, %v9315_v22, %v8169_v59 }
 0x2e9   : > { %v5143_v63 = vadd.f32 %v9780_v52, %v13170_v1  ;;  %v13646_v11 = vadd.f32 %v9897_v19, %v9896_v13  ;;  %7924 = vmatprep.mubr.bf16.mxu1 %v14379_v35  ;;  %v13651_v53 = vadd.f32 %v9889_v10, %v5142_v55  ;;  %v9269_v1 = vcombine.low %v13616_v28, %v13630_v49 }
 0x2ea   : > { %8550 = vmatmul.mubr.bf16.gmra.mrb[236].mxu0 %v14380_v62  ;;  %v14381_v10 = vcombine.high %v13538_v7, %v13554_v25  ;;  %v7379_v38 = vor.u32 %v7378_v51, %v7375_v16  ;;  %v8176_v4 = vrot.slane %v7202_v30, 5  ;;  %v7397_v3 = vshrl.u32 %v7201_v15, 16 }
 0x2eb   : > { %v9781_v9 = vpop.f32.mrb[128].mxu1  ;;  %v13678_v42 = vadd.f32 %v13597_v61, %v5143_v63  ;;  %v7400_v14 = vshll.u32 %v7201_v15, 16  ;;  %v13684_v52 = vsel %vm11798_vm6, %v7366_v24, %v7370_v27  ;;  %v13688_v59 = vsel %vm11760_vm2, %v8171_v26, %v8172_v23  ;;  %v7204_v24 = vld [vmem:[#allocation2 + $0xf0] sm:$0xff] }
 0x2ec   : > { %8557 = vmatprep.mubr.bf16.mxu0 %v14381_v10  ;;  %v9782_v29 = vpop.f32.mrb[129].mxu1  ;;  %v7389_v61 = vor.u32 %v7388_v18, %v13643_v41  ;;  %v7394_v50 = vrot.slane %v7392_v46, 5  ;;  %v9316_v19 = vrot.slane %v8068_v5, 9  ;;  %v7406_v16 = vshll.u32 %v7202_v30, 16 }
 0x2ed   : > { %v9783_v47 = vadd.f32 %v9782_v29, %v9781_v9  ;;  %v9784_v20 = vpop.f32.mrb[130].mxu1  ;;  %v9899_v55 = vpop.f32.mrb[132].mxu0  ;;  %v7410_v51 = vshrl.u32 %v7202_v30, 16  ;;  %v8179_v27 = vrot.slane %v13680_v56, 5  ;;  %v14382_v23 = vcombine.low %v13546_v58, %v13550_v39  ;;  %v13697_v29 = vld [vmem:[#allocation2 + $0xf8] sm:$0xff] }
 0x2ee   : > { %v9785_v22 = vpop.f32.mrb[131].mxu1  ;;  %v9900_v13 = vpop.f32.mrb[133].mxu0  ;;  %v7380_v18 = vrot.slane %v7379_v38, 4  ;;  %v8178_v9 = vrot.slane %v8176_v4, 4  ;;  %v7399_v10 = vrot.slane %v7397_v3, 4  ;;  %v7402_v46 = vrot.slane %v7400_v14, 5 }
 0x2ef   : > { %v5144_v63 = vadd.f32 %v9783_v47, %v13185_v21  ;;  %v9786_v35 = vadd.f32 %v9785_v22, %v9784_v20  ;;  %v9901_v15 = vadd.f32 %v9900_v13, %v9899_v55  ;;  %v9902_v62 = vpop.f32.mrb[134].mxu0  ;;  %v7390_v21 = vrot.slane %v7389_v61, 4  ;;  %v8069_v61 = vld [vmem:[#allocation2 + $0xf0] sm:$0xee] }
 0x2f0   : > { %7925 = vmatmul.mubr.bf16.gmra.mrb[236].mxu1 %v14382_v23  ;;  %v9903_v26 = vpop.f32.mrb[135].mxu0  ;;  %v14383_v20 = vcombine.low %v13538_v7, %v13554_v25  ;;  %v13705_v58 = vrot.slane %v7406_v16, 5  ;;  %v7412_v39 = vrot.slane %v7410_v51, 4  ;;  %v7421_v38 = vshrl.u32 %v7204_v24, 16 }
 0x2f1   : > { %v5145_v5 = vadd.f32 %v9786_v35, %v13187_v33  ;;  %v9904_v30 = vadd.f32 %v9903_v26, %v9902_v62  ;;  %7932 = vmatprep.mubr.bf16.mxu1 %v9270_v32  ;;  %v13700_v47 = vadd.f32 %v13638_v31, %v5144_v63  ;;  %v7424_v3 = vshll.u32 %v7204_v24, 16 }
 0x2f2   : > { %8558 = vmatmul.mubr.bf16.gmra.mrb[240].mxu0 %v14383_v20  ;;  %v9272_v33 = vcombine.high %v13669_v34, %v13684_v52  ;;  %v9338_v32 = vcombine.high %v13675_v44, %v13688_v59  ;;  %v13713_v31 = vsel %vm11760_vm2, %v9316_v19, %v8176_v4  ;;  %v13721_v55 = vsel %vm11798_vm6, %v7380_v18, %v13643_v41  ;;  %v7206_v19 = vld [vmem:[#allocation2 + $0x100] sm:$0x11] }
 0x2f3   : > { %v9787_v14 = vpop.f32.mrb[132].mxu1  ;;  %8565 = vmatprep.mubr.bf16.mxu0 %v9336_v2  ;;  %v13716_v7 = vadd.f32 %v13646_v11, %v5145_v5  ;;  %v7403_v2 = vor.u32 %v7402_v46, %v7399_v10  ;;  %v7430_v22 = vshll.u32 %v13697_v29, 16  ;;  %v7434_v13 = vshrl.u32 %v13697_v29, 16  ;;  %v14384_v10 = vld [vmem:[#allocation15_spill] sm:$0xff] }
 0x2f4   : > { %v9788_v25 = vpop.f32.mrb[133].mxu1  ;;  %v13727_v4 = vsel %vm11760_vm2, %v8178_v9, %v8179_v27  ;;  %v7416_v11 = vshll.u32 %v13680_v56, 16  ;;  %v8183_v35 = vrot.slane %v13697_v29, 5  ;;  %v13733_v24 = vsel %vm11798_vm6, %v7390_v21, %v7394_v50  ;;  %v14385_v21 = vld [vmem:[#allocation16_spill] sm:$0xff] }
 0x2f5   : > { %v9789_v16 = vadd.f32 %v9788_v25, %v9787_v14  ;;  %v9790_v51 = vpop.f32.mrb[134].mxu1  ;;  %v9905_v63 = vpop.f32.mrb[136].mxu0  ;;  %v7413_v23 = vor.u32 %v7412_v39, %v13705_v58  ;;  %v7423_v26 = vrot.slane %v7421_v38, 4  ;;  %v7426_v18 = vrot.slane %v7424_v3, 5 }
 0x2f6   : > { %v9791_v41 = vpop.f32.mrb[135].mxu1  ;;  %v9906_v62 = vpop.f32.mrb[137].mxu0  ;;  %v9317_v20 = vrot.slane %v8069_v61, 9  ;;  %v7404_v29 = vrot.slane %v7403_v2, 4  ;;  %v8186_v14 = vrot.slane %v7206_v19, 5  ;;  %v13740_v25 = vrot.slane %v7430_v22, 5 }
 0x2f7   : > { %v5146_v46 = vadd.f32 %v9789_v16, %v14384_v10  ;;  %v9792_v5 = vadd.f32 %v9791_v41, %v9790_v51  ;;  %v9907_v27 = vadd.f32 %v9906_v62, %v9905_v63  ;;  %v9908_v9 = vpop.f32.mrb[138].mxu0  ;;  %v7436_v50 = vrot.slane %v7434_v13, 4  ;;  %v14387_v10 = vld [vmem:[#allocation18_spill] sm:$0xff] }
 0x2f8   : > { %7933 = vmatmul.mubr.bf16.gmra.mrb[240].mxu1 %v9269_v1  ;;  %v9909_v56 = vpop.f32.mrb[139].mxu0  ;;  %v8185_v3 = vrot.slane %v8183_v35, 4  ;;  %v7414_v28 = vrot.slane %v7413_v23, 4  ;;  %v7418_v49 = vrot.slane %v7416_v11, 5  ;;  %v7427_v1 = vor.u32 %v7426_v18, %v7423_v26  ;;  %v7208_v11 = vld [vmem:[#allocation2 + $0x110] sm:$0xff] }
 0x2f9   : > { %v5147_v39 = vadd.f32 %v9792_v5, %v14385_v21  ;;  %v13743_v38 = vadd.f32 %v9909_v56, %v9908_v9  ;;  %7940 = vmatprep.mubr.bf16.mxu1 %v9272_v33  ;;  %v13745_v16 = vadd.f32 %v9901_v15, %v5146_v46  ;;  %v7440_v2 = vshll.u32 %v7206_v19, 16  ;;  %v8070_v33 = vld [vmem:[#allocation2 + $0x108] sm:$0xee] }
 0x2fa   : > { %8566 = vmatmul.mubr.bf16.gmra.mrb[244].mxu0 %v9335_v48  ;;  %v9271_v22 = vcombine.low %v13669_v34, %v13684_v52  ;;  %v9337_v13 = vcombine.low %v13675_v44, %v13688_v59  ;;  %v9274_v43 = vcombine.high %v13721_v55, %v13733_v24  ;;  %v9340_v45 = vcombine.high %v13713_v31, %v13727_v4  ;;  %v7207_v19 = vld [vmem:[#allocation2 + $0x108] sm:$0xff] }
 0x2fb   : > { %v9793_v61 = vpop.f32.mrb[136].mxu1  ;;  %8573 = vmatprep.mubr.bf16.mxu0 %v9338_v32  ;;  %v13754_v51 = vadd.f32 %v9904_v30, %v5147_v39  ;;  %v7437_v63 = vor.u32 %v7436_v50, %v13740_v25  ;;  %v13766_v44 = vsel %vm11798_vm6, %v7404_v29, %v13705_v58  ;;  %v13770_v59 = vsel %vm11760_vm2, %v9317_v20, %v8183_v35  ;;  %v13781_v20 = vld [vmem:[#allocation2 + $0x118] sm:$0x11] }
 0x2fc   : > { %v9794_v15 = vpop.f32.mrb[137].mxu1  ;;  %v13774_v30 = vsel %vm11760_vm2, %v8185_v3, %v8186_v14  ;;  %v13778_v23 = vsel %vm11798_vm6, %v7414_v28, %v7418_v49  ;;  %v7428_v26 = vrot.slane %v7427_v1, 4  ;;  %v7442_v18 = vrot.slane %v7440_v2, 5  ;;  %v14388_v3 = vld [vmem:[#allocation14_spill] sm:$0xff] }
 0x2fd   : > { %14386 = vst [vmem:[#allocation15_spill] sm:$0xff] %v13754_v51  ;;  %v9795_v34 = vadd.f32 %v9794_v15, %v9793_v61  ;;  %v9796_v52 = vpop.f32.mrb[138].mxu1  ;;  %v9911_v32 = vpop.f32.mrb[140].mxu0  ;;  %v9318_v58 = vrot.slane %v8070_v33, 9  ;;  %v8190_v56 = vrot.slane %v7208_v11, 5  ;;  %v7438_v14 = vrot.slane %v7437_v63, 4 }
 0x2fe   : > { %v9797_v41 = vpop.f32.mrb[139].mxu1  ;;  %v9912_v62 = vpop.f32.mrb[141].mxu0  ;;  %v7445_v50 = vshrl.u32 %v7207_v19, 16  ;;  %v7448_v21 = vshll.u32 %v7207_v19, 16  ;;  %v7454_v39 = vshll.u32 %v7208_v11, 16  ;;  %v7458_v1 = vshrl.u32 %v7208_v11, 16 }
 0x2ff   : > { %v5148_v46 = vadd.f32 %v9795_v34, %v14387_v10  ;;  %v9798_v5 = vadd.f32 %v9797_v41, %v9796_v52  ;;  %v9913_v35 = vadd.f32 %v9912_v62, %v9911_v32  ;;  %v9914_v9 = vpop.f32.mrb[142].mxu0  ;;  %v9273_v61 = vcombine.low %v13721_v55, %v13733_v24  ;;  %v7211_v34 = vld [vmem:[#allocation2 + $0x128] sm:$0xff]  ;;  %v7210_v52 = vld [vmem:[#allocation2 + $0x120] sm:$0xff] }
 0x300   : > { %7941 = vmatmul.mubr.bf16.gmra.mrb[244].mxu1 %v9271_v22  ;;  %v9915_v29 = vpop.f32.mrb[143].mxu0  ;;  %v9276_v22 = vcombine.high %v13766_v44, %v13778_v23  ;;  %v9342_v15 = vcombine.high %v13770_v59, %v13774_v30  ;;  %v13805_v32 = vsel %vm11798_vm6, %v7428_v26, %v13740_v25  ;;  %v7447_v11 = vrot.slane %v7445_v50, 4 }
 0x301   : > { %v5149_v28 = vadd.f32 %v9798_v5, %v14388_v3  ;;  %v13784_v49 = vadd.f32 %v9915_v29, %v9914_v9  ;;  %7948 = vmatprep.mubr.bf16.mxu1 %v9274_v43  ;;  %v13786_v2 = vadd.f32 %v9907_v27, %v5148_v46  ;;  %v8192_v27 = vrot.slane %v8190_v56, 4  ;;  %v8071_v9 = vld [vmem:[#allocation2 + $0x120] sm:$0xee] }
 0x302   : > { %8574 = vmatmul.mubr.bf16.gmra.mrb[248].mxu0 %v9337_v13  ;;  %v8193_v13 = vrot.slane %v13781_v20, 5  ;;  %v7450_v19 = vrot.slane %v7448_v21, 5  ;;  %v13813_v46 = vsel %vm11798_vm6, %v7438_v14, %v7442_v18  ;;  %v7460_v5 = vrot.slane %v7458_v1, 4 }
 0x303   : > { %14389 = vst [vmem:[#allocation16_spill] sm:$0xff] %v13786_v2  ;;  %v9799_v63 = vpop.f32.mrb[140].mxu1  ;;  %8581 = vmatprep.mubr.bf16.mxu0 %v9340_v45  ;;  %v13800_v55 = vadd.f32 %v13743_v38, %v5149_v28  ;;  %v13809_v45 = vsel %vm11760_vm2, %v9318_v58, %v8190_v56  ;;  %v13815_v38 = vrot.slane %v7454_v39, 5  ;;  %v7469_v26 = vshrl.u32 %v7210_v52, 16  ;;  %v14391_v56 = vld [vmem:[#allocation19_spill] sm:$0xff] }
 0x304   : > { %v9800_v24 = vpop.f32.mrb[141].mxu1  ;;  %v7472_v3 = vshll.u32 %v7210_v52, 16  ;;  %v7478_v28 = vshll.u32 %v7211_v34, 16  ;;  %v7482_v58 = vshrl.u32 %v7211_v34, 16  ;;  %v13822_v18 = vsel %vm11760_vm2, %v8192_v27, %v8193_v13  ;;  %v14392_v52 = vld [vmem:[#allocation20_spill] sm:$0xff] }
 0x305   : > { %14390 = vst [vmem:[#allocation18_spill] sm:$0xff] %v13800_v55  ;;  %v9801_v41 = vadd.f32 %v9800_v24, %v9799_v63  ;;  %v9802_v62 = vpop.f32.mrb[142].mxu1  ;;  %v9917_v10 = vpop.f32.mrb[144].mxu0  ;;  %v7451_v39 = vor.u32 %v7450_v19, %v7447_v11  ;;  %v7464_v1 = vshll.u32 %v13781_v20, 16  ;;  %v9319_v33 = vrot.slane %v8071_v9, 9 }
 0x306   : > { %v9803_v29 = vpop.f32.mrb[143].mxu1  ;;  %v9918_v25 = vpop.f32.mrb[145].mxu0  ;;  %v8197_v43 = vrot.slane %v7211_v34, 5  ;;  %v14394_v27 = vcombine.low %v13713_v31, %v13727_v4  ;;  %v7474_v13 = vrot.slane %v7472_v3, 5  ;;  %v13834_v11 = vrot.slane %v7478_v28, 5 }
 0x307   : > { %v5150_v50 = vadd.f32 %v9801_v41, %v14391_v56  ;;  %v9804_v21 = vadd.f32 %v9803_v29, %v9802_v62  ;;  %v13818_v63 = vadd.f32 %v9918_v25, %v9917_v10  ;;  %v9920_v24 = vpop.f32.mrb[146].mxu0  ;;  %v7461_v41 = vor.u32 %v7460_v5, %v13815_v38  ;;  %v7213_v62 = vld [vmem:[#allocation2 + $0x138] sm:$0xff]  ;;  %v7212_v5 = vld [vmem:[#allocation2 + $0x130] sm:$0x11]  ;;  %v13851_v19 = vld [vmem:[#allocation2 + $0x148] sm:$0x11] }
 0x308   : > { %7949 = vmatmul.mubr.bf16.gmra.mrb[248].mxu1 %v9273_v61  ;;  %v9921_v14 = vpop.f32.mrb[147].mxu0  ;;  %v7471_v61 = vrot.slane %v7469_v26, 4  ;;  %v7484_v20 = vrot.slane %v7482_v58, 4  ;;  %v7452_v9 = vrot.slane %v7451_v39, 4  ;;  %v7466_v29 = vrot.slane %v7464_v1, 5  ;;  %v14396_v1 = vld [vmem:[#allocation21_spill] sm:$0xff] }
 0x309   : > { %v5151_v48 = vadd.f32 %v9804_v21, %v14392_v52  ;;  %v13826_v55 = vadd.f32 %v9921_v14, %v9920_v24  ;;  %7956 = vmatprep.mubr.bf16.mxu1 %v9276_v22  ;;  %v13829_v10 = vadd.f32 %v9913_v35, %v5150_v50  ;;  %v9278_v22 = vcombine.high %v13805_v32, %v13813_v46  ;;  %v7214_v21 = vld [vmem:[#allocation2 + $0x140] sm:$0xff] }
 0x30a   : > { %8582 = vmatmul.mubr.bf16.gmra.mrb[252].mxu0 %v14394_v27  ;;  %v9344_v35 = vcombine.high %v13809_v45, %v13822_v18  ;;  %v7493_v25 = vshrl.u32 %v7213_v62, 16  ;;  %v7496_v26 = vshll.u32 %v7213_v62, 16  ;;  %v7462_v58 = vrot.slane %v7461_v41, 4  ;;  %v8072_v41 = vld [vmem:[#allocation2 + $0x138] sm:$0xee] }
 0x30b   : > { %14393 = vst [vmem:[#allocation14_spill] sm:$0xff] %v13829_v10  ;;  %v9805_v34 = vpop.f32.mrb[144].mxu1  ;;  %8589 = vmatprep.mubr.bf16.mxu0 %v9342_v15  ;;  %v13843_v31 = vadd.f32 %v13784_v49, %v5151_v48  ;;  %v13847_v56 = vsel %vm11760_vm2, %v9319_v33, %v8197_v43  ;;  %v8199_v50 = vrot.slane %v8197_v43, 4  ;;  %v8200_v52 = vrot.slane %v7212_v5, 5 }
 0x30c   : > { %v9806_v4 = vpop.f32.mrb[145].mxu1  ;;  %v7475_v48 = vor.u32 %v7474_v13, %v7471_v61  ;;  %v7485_v49 = vor.u32 %v7484_v20, %v13834_v11  ;;  %v7488_v39 = vshll.u32 %v7212_v5, 16  ;;  %v14397_v33 = vcombine.low %v13766_v44, %v13778_v23  ;;  %v14398_v20 = vld [vmem:[#allocation22_spill] sm:$0xff] }
 0x30d   : > { %14395 = vst [vmem:[#allocation19_spill] sm:$0xff] %v13843_v31  ;;  %v9807_v3 = vadd.f32 %v9806_v4, %v9805_v34  ;;  %v9808_v15 = vpop.f32.mrb[146].mxu1  ;;  %v9923_v28 = vpop.f32.mrb[148].mxu0  ;;  %v8204_v31 = vrot.slane %v7214_v21, 5  ;;  %v7495_v10 = vrot.slane %v7493_v25, 4  ;;  %v7498_v2 = vrot.slane %v7496_v26, 5 }
 0x30e   : > { %v9809_v24 = vpop.f32.mrb[147].mxu1  ;;  %v9924_v14 = vpop.f32.mrb[149].mxu0  ;;  %v7502_v61 = vshll.u32 %v7214_v21, 16  ;;  %v7506_v13 = vshrl.u32 %v7214_v21, 16  ;;  %v14399_v44 = vcombine.low %v13770_v59, %v13774_v30  ;;  %v13870_v23 = vsel %vm11798_vm6, %v7462_v58, %v7466_v29 }
 0x30f   : > { %v5152_v27 = vadd.f32 %v9807_v3, %v14396_v1  ;;  %v9810_v62 = vadd.f32 %v9809_v24, %v9808_v15  ;;  %v9925_v34 = vadd.f32 %v9924_v14, %v9923_v28  ;;  %v9926_v4 = vpop.f32.mrb[150].mxu0  ;;  %v13860_v3 = vsel %vm11798_vm6, %v7452_v9, %v13815_v38 }
 0x310   : > { %7957 = vmatmul.mubr.bf16.gmra.mrb[252].mxu1 %v14397_v33  ;;  %v9927_v43 = vpop.f32.mrb[151].mxu0  ;;  %v13874_v25 = vsel %vm11760_vm2, %v8199_v50, %v8200_v52  ;;  %v9320_v26 = vrot.slane %v8072_v41, 9  ;;  %v7486_v38 = vrot.slane %v7485_v49, 4  ;;  %v7490_v9 = vrot.slane %v7488_v39, 5  ;;  %v14400_v39 = vld [vmem:[#allocation23_spill] sm:$0xff]  ;;  %v7216_v33 = vld [vmem:[#allocation2 + $0x150] sm:$0xff] }
 0x311   : > { %v5153_v5 = vadd.f32 %v9810_v62, %v14398_v20  ;;  %v9928_v51 = vadd.f32 %v9927_v43, %v9926_v4  ;;  %7964 = vmatprep.mubr.bf16.mxu1 %v9278_v22  ;;  %v13863_v15 = vadd.f32 %v13818_v63, %v5152_v27  ;;  %v7476_v22 = vrot.slane %v7475_v48, 4 }
 0x312   : > { %8590 = vmatmul.mubr.bf16.gmra.mrb[0].mxu0 %v14399_v44  ;;  %v8207_v63 = vrot.slane %v13851_v19, 5  ;;  %v8206_v30 = vrot.slane %v8204_v31, 4  ;;  %v7499_v24 = vor.u32 %v7498_v2, %v7495_v10  ;;  %v7504_v29 = vrot.slane %v7502_v61, 5  ;;  %v14402_v44 = vld [vmem:[#allocation17_spill] sm:$0xff] }
 0x313   : > { %v9811_v28 = vpop.f32.mrb[148].mxu1  ;;  %8597 = vmatprep.mubr.bf16.mxu0 %v9344_v35  ;;  %v13878_v21 = vadd.f32 %v13826_v55, %v5153_v5  ;;  %v7508_v58 = vrot.slane %v7506_v13, 4  ;;  %v9280_v52 = vcombine.high %v13860_v3, %v13870_v23  ;;  %v9343_v49 = vcombine.low %v13809_v45, %v13822_v18  ;;  %v7217_v18 = vld [vmem:[#allocation2 + $0x158] sm:$0xff]  ;;  %v8073_v5 = vld [vmem:[#allocation2 + $0x150] sm:$0xee] }
 0x314   : > { %v9812_v59 = vpop.f32.mrb[149].mxu1  ;;  %v9346_v55 = vcombine.high %v13847_v56, %v13874_v25  ;;  %v13889_v2 = vsel %vm11798_vm6, %v7476_v22, %v13834_v11  ;;  %v13893_v10 = vsel %vm11760_vm2, %v9320_v26, %v8204_v31  ;;  %v13900_v45 = vsel %vm11798_vm6, %v7486_v38, %v7490_v9 }
 0x315   : > { %v9813_v14 = vadd.f32 %v9812_v59, %v9811_v28  ;;  %v9814_v1 = vpop.f32.mrb[150].mxu1  ;;  %v9929_v50 = vpop.f32.mrb[152].mxu0  ;;  %v14401_v11 = vcombine.low %v13805_v32, %v13813_v46  ;;  %v13907_v31 = vsel %vm11760_vm2, %v8206_v30, %v8207_v63  ;;  %v7500_v61 = vrot.slane %v7499_v24, 4  ;;  %v13915_v32 = vld [vmem:[#allocation2 + $0x160] sm:$0x11] }
 0x316   : > { %v9815_v48 = vpop.f32.mrb[151].mxu1  ;;  %v9930_v35 = vpop.f32.mrb[153].mxu0  ;;  %v7509_v13 = vor.u32 %v7508_v58, %v7504_v29  ;;  %v7512_v20 = vshll.u32 %v13851_v19, 16  ;;  %v8211_v28 = vrot.slane %v7217_v18, 5  ;;  %v7517_v46 = vshrl.u32 %v7216_v33, 16 }
 0x317   : > { %v5154_v27 = vadd.f32 %v9813_v14, %v14400_v39  ;;  %v9816_v62 = vadd.f32 %v9815_v48, %v9814_v1  ;;  %v13896_v4 = vadd.f32 %v9930_v35, %v9929_v50  ;;  %v9932_v41 = vpop.f32.mrb[154].mxu0  ;;  %v7520_v9 = vshll.u32 %v7216_v33, 16 }
 0x318   : > { %7965 = vmatmul.mubr.bf16.gmra.mrb[0].mxu1 %v14401_v11  ;;  %v9933_v43 = vpop.f32.mrb[155].mxu0  ;;  %v7526_v63 = vshll.u32 %v7217_v18, 16  ;;  %v7530_v59 = vshrl.u32 %v7217_v18, 16  ;;  %v9279_v19 = vcombine.low %v13860_v3, %v13870_v23  ;;  %v9345_v24 = vcombine.low %v13847_v56, %v13874_v25  ;;  %v13931_v3 = vld [vmem:[#allocation2 + $0x170] sm:$0xff] }
 0x319   : > { %v5155_v22 = vadd.f32 %v9816_v62, %v14402_v44  ;;  %v13911_v26 = vadd.f32 %v9933_v43, %v9932_v41  ;;  %7972 = vmatprep.mubr.bf16.mxu1 %v9280_v52  ;;  %v13913_v38 = vadd.f32 %v9925_v34, %v5154_v27  ;;  %v9321_v58 = vrot.slane %v8073_v5, 9 }
 0x31a   : > { %8598 = vmatmul.mubr.bf16.gmra.mrb[4].mxu0 %v9343_v49  ;;  %v9282_v1 = vcombine.high %v13889_v2, %v13900_v45  ;;  %v9348_v50 = vcombine.high %v13893_v10, %v13907_v31  ;;  %v13929_v52 = vsel %vm11798_vm6, %v7500_v61, %v7504_v29  ;;  %v7514_v48 = vrot.slane %v7512_v20, 5  ;;  %v14404_v29 = vld [vmem:[#allocation24_spill] sm:$0xff] }
 0x31b   : > { %v9817_v30 = vpop.f32.mrb[152].mxu1  ;;  %8605 = vmatprep.mubr.bf16.mxu0 %v9346_v55  ;;  %v13921_v14 = vadd.f32 %v9928_v51, %v5155_v22  ;;  %v7510_v35 = vrot.slane %v7509_v13, 4  ;;  %v8213_v51 = vrot.slane %v8211_v28, 4  ;;  %v8214_v49 = vrot.slane %v13915_v32, 5  ;;  %v7219_v55 = vld [vmem:[#allocation2 + $0x168] sm:$0xff] }
 0x31c   : > { %v9818_v34 = vpop.f32.mrb[153].mxu1  ;;  %v7519_v62 = vrot.slane %v7517_v46, 4  ;;  %v7522_v41 = vrot.slane %v7520_v9, 5  ;;  %v13934_v18 = vrot.slane %v7526_v63, 5  ;;  %v7532_v33 = vrot.slane %v7530_v59, 4  ;;  %v14405_v9 = vld [vmem:[#allocation25_spill] sm:$0xff] }
 0x31d   : > { %14403 = vst [vmem:[#allocation20_spill] sm:$0xff] %v13921_v14  ;;  %v9819_v23 = vadd.f32 %v9818_v34, %v9817_v30  ;;  %v9820_v56 = vpop.f32.mrb[154].mxu1  ;;  %v9935_v25 = vpop.f32.mrb[156].mxu0  ;;  %v13939_v5 = vsel %vm11760_vm2, %v9321_v58, %v8211_v28  ;;  %v7541_v44 = vshrl.u32 %v7219_v55, 16  ;;  %v7544_v22 = vshll.u32 %v7219_v55, 16 }
 0x31e   : > { %v9821_v39 = vpop.f32.mrb[155].mxu1  ;;  %v9936_v27 = vpop.f32.mrb[157].mxu0  ;;  %v7550_v30 = vshll.u32 %v13931_v3, 16  ;;  %v7554_v46 = vshrl.u32 %v13931_v3, 16  ;;  %v7536_v34 = vshll.u32 %v13915_v32, 16  ;;  %v13952_v28 = vsel %vm11798_vm6, %v7510_v35, %v7514_v48 }
 0x31f   : > { %v5156_v11 = vadd.f32 %v9819_v23, %v14404_v29  ;;  %v9822_v43 = vadd.f32 %v9821_v39, %v9820_v56  ;;  %v9937_v61 = vadd.f32 %v9936_v27, %v9935_v25  ;;  %v9938_v20 = vpop.f32.mrb[158].mxu0  ;;  %v7523_v58 = vor.u32 %v7522_v41, %v7519_v62  ;;  %v7221_v32 = vld [vmem:[#allocation2 + $0x178] sm:$0x11] }
 0x320   : > { %7973 = vmatmul.mubr.bf16.gmra.mrb[4].mxu1 %v9279_v19  ;;  %v9939_v13 = vpop.f32.mrb[159].mxu0  ;;  %v13956_v19 = vsel %vm11760_vm2, %v8213_v51, %v8214_v49  ;;  %v7533_v56 = vor.u32 %v7532_v33, %v13934_v18  ;;  %v8218_v48 = vrot.slane %v13931_v3, 5  ;;  %v7543_v49 = vrot.slane %v7541_v44, 4 }
 0x321   : > { %v5157_v63 = vadd.f32 %v9822_v43, %v14405_v9  ;;  %v13944_v59 = vadd.f32 %v9939_v13, %v9938_v20  ;;  %7980 = vmatprep.mubr.bf16.mxu1 %v9282_v1  ;;  %v13948_v23 = vadd.f32 %v13896_v4, %v5156_v11  ;;  %v9281_v1 = vcombine.low %v13889_v2, %v13900_v45  ;;  %v14408_v20 = vld [vmem:[#allocation26_spill] sm:$0xff]  ;;  %v13974_v9 = vld [vmem:[#allocation2 + $0x188] sm:$0xff] }
 0x322   : > { %8606 = vmatmul.mubr.bf16.gmra.mrb[8].mxu0 %v9345_v24  ;;  %v9347_v4 = vcombine.low %v13893_v10, %v13907_v31  ;;  %v8074_v24 = vld [vmem:[#allocation2 + $0x168] sm:$0xee]  ;;  %v7546_v55 = vrot.slane %v7544_v22, 5  ;;  %v13967_v39 = vrot.slane %v7550_v30, 5  ;;  %v7556_v27 = vrot.slane %v7554_v46, 4 }
 0x323   : > { %14406 = vst [vmem:[#allocation21_spill] sm:$0xff] %v13948_v23  ;;  %v9823_v25 = vpop.f32.mrb[156].mxu1  ;;  %8613 = vmatprep.mubr.bf16.mxu0 %v9348_v50  ;;  %v13965_v35 = vadd.f32 %v13911_v26, %v5157_v63  ;;  %v9284_v10 = vcombine.high %v13929_v52, %v13952_v28  ;;  %v9350_v45 = vcombine.high %v13939_v5, %v13956_v19  ;;  %v7538_v31 = vrot.slane %v7536_v34, 5  ;;  %v7222_v50 = vld [vmem:[#allocation2 + $0x180] sm:$0xff]  ;;  %v14409_v23 = vld [vmem:[#allocation27_spill] sm:$0xff] }
 0x324   : > { %v9824_v51 = vpop.f32.mrb[157].mxu1  ;;  %v7524_v33 = vrot.slane %v7523_v58, 4  ;;  %v7534_v29 = vrot.slane %v7533_v56, 4  ;;  %v9322_v11 = vrot.slane %v8074_v24, 9  ;;  %v8221_v43 = vrot.slane %v7221_v32, 5 }
 0x325   : > { %14407 = vst [vmem:[#allocation22_spill] sm:$0xff] %v13965_v35  ;;  %v9825_v62 = vadd.f32 %v9824_v51, %v9823_v25  ;;  %v9826_v41 = vpop.f32.mrb[158].mxu1  ;;  %v10069_v2 = vpop.f32.mrb[160].mxu0  ;;  %v8220_v46 = vrot.slane %v8218_v48, 4  ;;  %v7547_v25 = vor.u32 %v7546_v55, %v7543_v49  ;;  %v7557_v34 = vor.u32 %v7556_v27, %v13967_v39 }
 0x326   : > { %v9827_v3 = vpop.f32.mrb[159].mxu1  ;;  %v10070_v26 = vpop.f32.mrb[161].mxu0  ;;  %v7560_v51 = vshll.u32 %v7221_v32, 16  ;;  %v7565_v35 = vshrl.u32 %v7222_v50, 16  ;;  %v7568_v24 = vshll.u32 %v7222_v50, 16  ;;  %v7574_v32 = vshll.u32 %v13974_v9, 16 }
 0x327   : > { %v5158_v13 = vadd.f32 %v9825_v62, %v14408_v20  ;;  %v9828_v44 = vadd.f32 %v9827_v3, %v9826_v41  ;;  %v10071_v22 = vadd.f32 %v10070_v26, %v10069_v2  ;;  %v10072_v30 = vpop.f32.mrb[162].mxu0  ;;  %v13983_v62 = vsel %vm11798_vm6, %v7524_v33, %v13934_v18  ;;  %v7224_v3 = vld [vmem:[#allocation2 + $0x190] sm:$0x11] }
 0x328   : > { %7981 = vmatmul.mubr.bf16.gmra.mrb[8].mxu1 %v9281_v1  ;;  %v10073_v63 = vpop.f32.mrb[163].mxu0  ;;  %v13987_v1 = vsel %vm11798_vm6, %v7534_v29, %v7538_v31  ;;  %v7578_v49 = vshrl.u32 %v13974_v9, 16  ;;  %v9283_v55 = vcombine.low %v13929_v52, %v13952_v28  ;;  %v13999_v18 = vsel %vm11760_vm2, %v8220_v46, %v8221_v43 }
 0x329   : > { %v5159_v58 = vadd.f32 %v9828_v44, %v14409_v23  ;;  %v10074_v56 = vadd.f32 %v10073_v63, %v10072_v30  ;;  %7988 = vmatprep.mubr.bf16.mxu1 %v9284_v10  ;;  %v13978_v14 = vadd.f32 %v9937_v61, %v5158_v13  ;;  %v13995_v61 = vsel %vm11760_vm2, %v9322_v11, %v8218_v48  ;;  %v14410_v44 = vld [vmem:[#allocation28_spill] sm:$0xff] }
 0x32a   : > { %8614 = vmatmul.mubr.bf16.gmra.mrb[12].mxu0 %v9347_v4  ;;  %v8075_v4 = vld [vmem:[#allocation2 + $0x180] sm:$0xee]  ;;  %v7548_v2 = vrot.slane %v7547_v25, 4  ;;  %v7558_v10 = vrot.slane %v7557_v34, 4  ;;  %v7562_v31 = vrot.slane %v7560_v51, 5  ;;  %v8225_v50 = vrot.slane %v13974_v9, 5 }
 0x32b   : > { %v9957_v23 = vpop.f32.mrb[160].mxu1  ;;  %8621 = vmatprep.mubr.bf16.mxu0 %v9350_v45  ;;  %v14002_v27 = vadd.f32 %v13944_v59, %v5159_v58  ;;  %v9286_v48 = vcombine.high %v13983_v62, %v13987_v1  ;;  %v7567_v26 = vrot.slane %v7565_v35, 4  ;;  %v7570_v33 = vrot.slane %v7568_v24, 5  ;;  %v14411_v58 = vld [vmem:[#allocation29_spill] sm:$0xff] }
 0x32c   : > { %v9958_v41 = vpop.f32.mrb[161].mxu1  ;;  %v9349_v59 = vcombine.low %v13939_v5, %v13956_v19  ;;  %v9352_v43 = vcombine.high %v13995_v61, %v13999_v18  ;;  %v7576_v20 = vrot.slane %v7574_v32, 5  ;;  %v7580_v13 = vrot.slane %v7578_v49, 4 }
 0x32d   : > { %v9959_v52 = vadd.f32 %v9958_v41, %v9957_v23  ;;  %v9960_v28 = vpop.f32.mrb[162].mxu1  ;;  %v10075_v45 = vpop.f32.mrb[164].mxu0  ;;  %v9323_v25 = vrot.slane %v8075_v4, 9  ;;  %v14015_v35 = vsel %vm11798_vm6, %v7548_v2, %v13967_v39  ;;  %v14019_v5 = vsel %vm11798_vm6, %v7558_v10, %v7562_v31  ;;  %v10770_v41 = vld [vmem:[#allocation2] sm:$0xff] }
 0x32e   : > { %v9961_v29 = vpop.f32.mrb[163].mxu1  ;;  %v10076_v11 = vpop.f32.mrb[165].mxu0  ;;  %v8227_v19 = vrot.slane %v8225_v50, 4  ;;  %v8228_v51 = vrot.slane %v7224_v3, 5  ;;  %v7571_v49 = vor.u32 %v7570_v33, %v7567_v26  ;;  %v7584_v4 = vshll.u32 %v7224_v3, 16 }
 0x32f   : > { %v6634_v30 = vadd.f32 %v9959_v52, %v14410_v44  ;;  %v9962_v46 = vadd.f32 %v9961_v29, %v9960_v28  ;;  %v10077_v9 = vadd.f32 %v10076_v11, %v10075_v45  ;;  %v10078_v63 = vpop.f32.mrb[166].mxu0  ;;  %v7589_v52 = vshrl.u32 %v10770_v41, 16 }
 0x330   : > { %7989 = vmatmul.mubr.bf16.gmra.mrb[12].mxu1 %v9283_v55  ;;  %v10079_v34 = vpop.f32.mrb[167].mxu0  ;;  %v7581_v55 = vor.u32 %v7580_v13, %v7576_v20  ;;  %v7592_v39 = vshll.u32 %v10770_v41, 16  ;;  %v9285_v31 = vcombine.low %v13983_v62, %v13987_v1  ;;  %v14030_v45 = vsel %vm11760_vm2, %v9323_v25, %v8225_v50  ;;  %v8076_v62 = vld [vmem:[#allocation2 + $0x198] sm:$0xee] }
 0x331   : > { %v6635_v24 = vadd.f32 %v9962_v46, %v14411_v58  ;;  %v10080_v32 = vadd.f32 %v10079_v34, %v10078_v63  ;;  %7996 = vmatprep.mubr.bf16.mxu1 %v9286_v48  ;;  %v14022_v23 = vadd.f32 %v10071_v22, %v6634_v30  ;;  %v8229_v22 = vsel %vm11760_vm2, %v8227_v19, %v8228_v51  ;;  %v7227_v48 = vld [vmem:[#allocation2 + $0x1a8] sm:$0x11] }
 0x332   : > { %8622 = vmatmul.mubr.bf16.gmra.mrb[16].mxu0 %v9349_v59  ;;  %v8232_v3 = vrot.slane %v10770_v41, 5  ;;  %v9288_v11 = vcombine.high %v14015_v35, %v14019_v5  ;;  %v7572_v59 = vrot.slane %v7571_v49, 4  ;;  %v7582_v50 = vrot.slane %v7581_v55, 4 }
 0x333   : > { %v9963_v2 = vpop.f32.mrb[164].mxu1  ;;  %8629 = vmatprep.mubr.bf16.mxu0 %v9352_v43  ;;  %v14024_v28 = vadd.f32 %v10074_v56, %v6635_v24  ;;  %v9351_v56 = vcombine.low %v13995_v61, %v13999_v18  ;;  %v7586_v13 = vrot.slane %v7584_v4, 5  ;;  %v7591_v44 = vrot.slane %v7589_v52, 4  ;;  %v14412_v24 = vld [vmem:[#allocation30_spill] sm:$0xff] }
 0x334   : > { %v9964_v10 = vpop.f32.mrb[165].mxu1  ;;  %v7594_v30 = vrot.slane %v7592_v39, 5  ;;  %v9354_v19 = vcombine.high %v14030_v45, %v8229_v22  ;;  %v9324_v18 = vrot.slane %v8076_v62, 9  ;;  %v8234_v51 = vrot.slane %v8232_v3, 4 }
 0x335   : > { %v9965_v26 = vadd.f32 %v9964_v10, %v9963_v2  ;;  %v9966_v33 = vpop.f32.mrb[166].mxu1  ;;  %v10081_v29 = vpop.f32.mrb[168].mxu0  ;;  %v8235_v58 = vrot.slane %v7227_v48, 5  ;;  %v7577_v55 = vsel %vm11798_vm6, %v7572_v59, %v7576_v20  ;;  %v7608_v39 = vshll.u32 %v7227_v48, 16 }
 0x336   : > { %v9967_v1 = vpop.f32.mrb[167].mxu1  ;;  %v10082_v43 = vpop.f32.mrb[169].mxu0  ;;  %v7595_v52 = vor.u32 %v7594_v30, %v7591_v44  ;;  %v9353_v62 = vcombine.low %v14030_v45, %v8229_v22 }
 0x337   : > { %v6636_v46 = vadd.f32 %v9965_v26, %v13401_v37  ;;  %v9968_v63 = vadd.f32 %v9967_v1, %v9966_v33  ;;  %v10083_v25 = vadd.f32 %v10082_v43, %v10081_v29  ;;  %v10084_v34 = vpop.f32.mrb[170].mxu0  ;;  %v7587_v37 = vsel %vm11798_vm6, %v7582_v50, %v7586_v13  ;;  %v14413_v43 = vld [vmem:[#allocation31_spill] sm:$0xff] }
 0x338   : > { %7997 = vmatmul.mubr.bf16.gmra.mrb[16].mxu1 %v9285_v31  ;;  %v10085_v61 = vpop.f32.mrb[171].mxu0  ;;  %v9287_v26 = vcombine.low %v14015_v35, %v14019_v5  ;;  %v8233_v33 = vsel %vm11760_vm2, %v9324_v18, %v8232_v3  ;;  %v8236_v20 = vsel %vm11760_vm2, %v8234_v51, %v8235_v58  ;;  %v7610_v1 = vrot.slane %v7608_v39, 5 }
 0x339   : > { %v6637_v49 = vadd.f32 %v9968_v63, %v14412_v24  ;;  %v10086_v41 = vadd.f32 %v10085_v61, %v10084_v34  ;;  %8004 = vmatprep.mubr.bf16.mxu1 %v9288_v11  ;;  %v14043_v4 = vadd.f32 %v10077_v9, %v6636_v46  ;;  %v9290_v11 = vcombine.high %v7577_v55, %v7587_v37 }
 0x33a   : > { %8630 = vmatmul.mubr.bf16.gmra.mrb[20].mxu0 %v9351_v56  ;;  %v9356_v44 = vcombine.high %v8233_v33, %v8236_v20  ;;  %v9289_v51 = vcombine.low %v7577_v55, %v7587_v37 }
 0x33b   : > { %v9969_v2 = vpop.f32.mrb[168].mxu1  ;;  %8637 = vmatprep.mubr.bf16.mxu0 %v9354_v19  ;;  %v14047_v10 = vadd.f32 %v10080_v32, %v6637_v49  ;;  %v7596_v32 = vrot.slane %v7595_v52, 4 }
 0x33c   : > { %v9970_v31 = vpop.f32.mrb[169].mxu1 }
 0x33d   : > { %v9971_v9 = vadd.f32 %v9970_v31, %v9969_v2  ;;  %v9972_v29 = vpop.f32.mrb[170].mxu1  ;;  %v10087_v56 = vpop.f32.mrb[172].mxu0  ;;  %v7601_v45 = vsel %vm11798_vm6, %v7596_v32, %v7594_v30  ;;  %v7611_v22 = vsel %vm11798_vm6, %v7596_v32, %v7610_v1  ;;  %v9355_v2 = vcombine.low %v8233_v33, %v8236_v20 }
 0x33e   : > { %v9973_v59 = vpop.f32.mrb[171].mxu1  ;;  %v10088_v48 = vpop.f32.mrb[173].mxu0  ;;  %v9292_v52 = vcombine.high %v7601_v45, %v7611_v22 }
 0x33f   : > { %v6638_v50 = vadd.f32 %v9971_v9, %v14413_v43  ;;  %v9974_v13 = vadd.f32 %v9973_v59, %v9972_v29  ;;  %v10089_v35 = vadd.f32 %v10088_v48, %v10087_v56  ;;  %v10090_v5 = vpop.f32.mrb[174].mxu0  ;;  %v9291_v59 = vcombine.low %v7601_v45, %v7611_v22 }
 0x340   : > { %8005 = vmatmul.mubr.bf16.gmra.mrb[20].mxu1 %v9287_v26  ;;  %v10091_v3 = vpop.f32.mrb[175].mxu0 }
 0x341   : > { %v6639_v46 = vadd.f32 %v9974_v13, %v14414_v12  ;;  %v10092_v63 = vadd.f32 %v10091_v3, %v10090_v5  ;;  %8012 = vmatprep.mubr.bf16.mxu1 %v9290_v11  ;;  %v14058_v34 = vadd.f32 %v10083_v25, %v6638_v50 }
 0x342   : > { %8638 = vmatmul.mubr.bf16.gmra.mrb[24].mxu0 %v9353_v62 }
 0x343   : > { %v9975_v19 = vpop.f32.mrb[172].mxu1  ;;  %8645 = vmatprep.mubr.bf16.mxu0 %v9356_v44  ;;  %v14064_v61 = vadd.f32 %v10086_v41, %v6639_v46 }
 0x344   : > { %v9976_v18 = vpop.f32.mrb[173].mxu1 }
 0x345   : > { %v9977_v58 = vadd.f32 %v9976_v18, %v9975_v19  ;;  %v9978_v24 = vpop.f32.mrb[174].mxu1  ;;  %v10093_v49 = vpop.f32.mrb[176].mxu0 }
 0x346   : > { %v9979_v39 = vpop.f32.mrb[175].mxu1  ;;  %v10094_v25 = vpop.f32.mrb[177].mxu0 }
 0x347   : > { %v6640_v31 = vadd.f32 %v9977_v58, %v13501_v6  ;;  %v9980_v26 = vadd.f32 %v9979_v39, %v9978_v24  ;;  %v10095_v30 = vadd.f32 %v10094_v25, %v10093_v49  ;;  %v10096_v9 = vpop.f32.mrb[178].mxu0 }
 0x348   : > { %8013 = vmatmul.mubr.bf16.gmra.mrb[24].mxu1 %v9289_v51  ;;  %v10097_v60 = vpop.f32.mrb[179].mxu0 }
 0x349   : > { %v6641_v29 = vadd.f32 %v9980_v26, %v13504_v17  ;;  %v10098_v41 = vadd.f32 %v10097_v60, %v10096_v9  ;;  %8020 = vmatprep.mubr.bf16.mxu1 %v9292_v52  ;;  %v14068_v56 = vadd.f32 %v10089_v35, %v6640_v31 }
 0x34a   : > { %8646 = vmatmul.mubr.bf16.gmra.mrb[28].mxu0 %v9355_v2 }
 0x34b   : > { %v9981_v55 = vpop.f32.mrb[176].mxu1  ;;  %v14070_v37 = vadd.f32 %v10092_v63, %v6641_v29 }
 0x34c   : > { %v9982_v11 = vpop.f32.mrb[177].mxu1 }
 0x34d   : > { %v9983_v33 = vadd.f32 %v9982_v11, %v9981_v55  ;;  %v9984_v20 = vpop.f32.mrb[178].mxu1  ;;  %v10099_v6 = vpop.f32.mrb[180].mxu0 }
 0x34e   : > { %v9985_v48 = vpop.f32.mrb[179].mxu1  ;;  %v10100_v62 = vpop.f32.mrb[181].mxu0 }
 0x34f   : > { %v6642_v32 = vadd.f32 %v9983_v33, %v13557_v40  ;;  %v9986_v1 = vadd.f32 %v9985_v48, %v9984_v20  ;;  %v10101_v43 = vadd.f32 %v10100_v62, %v10099_v6  ;;  %v10102_v17 = vpop.f32.mrb[182].mxu0 }
 0x350   : > { %8021 = vmatmul.mubr.bf16.gmra.mrb[28].mxu1 %v9291_v59  ;;  %v10103_v50 = vpop.f32.mrb[183].mxu0 }
 0x351   : > { %v6643_v13 = vadd.f32 %v9986_v1, %v13569_v8  ;;  %v10104_v35 = vadd.f32 %v10103_v50, %v10102_v17  ;;  %v14074_v5 = vadd.f32 %v10095_v30, %v6642_v32 }
 0x353   : > { %v9987_v44 = vpop.f32.mrb[180].mxu1  ;;  %v14076_v3 = vadd.f32 %v10098_v41, %v6643_v13 }
 0x354   : > { %v9988_v12 = vpop.f32.mrb[181].mxu1 }
 0x355   : > { %v9989_v46 = vadd.f32 %v9988_v12, %v9987_v44  ;;  %v9990_v63 = vpop.f32.mrb[182].mxu1  ;;  %v10105_v45 = vpop.f32.mrb[184].mxu0 }
 0x356   : > { %v9991_v22 = vpop.f32.mrb[183].mxu1  ;;  %v10106_v19 = vpop.f32.mrb[185].mxu0 }
 0x357   : > { %v6644_v40 = vadd.f32 %v9989_v46, %v13588_v57  ;;  %v9992_v18 = vadd.f32 %v9991_v22, %v9990_v63  ;;  %v10107_v51 = vadd.f32 %v10106_v19, %v10105_v45  ;;  %v10108_v58 = vpop.f32.mrb[186].mxu0 }
 0x358   : > { %v10109_v24 = vpop.f32.mrb[187].mxu0 }
 0x359   : > { %v6645_v8 = vadd.f32 %v9992_v18, %v13606_v54  ;;  %v10110_v49 = vadd.f32 %v10109_v24, %v10108_v58  ;;  %v14080_v52 = vadd.f32 %v10101_v43, %v6644_v40 }
 0x35b   : > { %v9993_v39 = vpop.f32.mrb[184].mxu1  ;;  %v14082_v25 = vadd.f32 %v10104_v35, %v6645_v8 }
 0x35c   : > { %v9994_v2 = vpop.f32.mrb[185].mxu1 }
 0x35d   : > { %v9995_v31 = vadd.f32 %v9994_v2, %v9993_v39  ;;  %v9996_v26 = vpop.f32.mrb[186].mxu1  ;;  %v10111_v30 = vpop.f32.mrb[188].mxu0 }
 0x35e   : > { %v9997_v9 = vpop.f32.mrb[187].mxu1  ;;  %v10112_v60 = vpop.f32.mrb[189].mxu0 }
 0x35f   : > { %v6646_v57 = vadd.f32 %v9995_v31, %v13609_v0  ;;  %v9998_v29 = vadd.f32 %v9997_v9, %v9996_v26  ;;  %v10113_v41 = vadd.f32 %v10112_v60, %v10111_v30  ;;  %v10114_v55 = vpop.f32.mrb[190].mxu0 }
 0x360   : > { %v10115_v11 = vpop.f32.mrb[191].mxu0 }
 0x361   : > { %v6647_v54 = vadd.f32 %v9998_v29, %v13625_v36  ;;  %v10116_v59 = vadd.f32 %v10115_v11, %v10114_v55  ;;  %v14086_v33 = vadd.f32 %v10107_v51, %v6646_v57 }
 0x363   : > { %v9999_v20 = vpop.f32.mrb[188].mxu1  ;;  %v14088_v6 = vadd.f32 %v10110_v49, %v6647_v54 }
 0x364   : > { %v10000_v48 = vpop.f32.mrb[189].mxu1 }
 0x365   : > { %v10001_v62 = vadd.f32 %v10000_v48, %v9999_v20  ;;  %v10002_v32 = vpop.f32.mrb[190].mxu1  ;;  %v10117_v1 = vpop.f32.mrb[192].mxu0  ;;  %v14415_v48 = vld [vmem:[#allocation15_spill] sm:$0xff] }
 0x366   : > { %v10003_v43 = vpop.f32.mrb[191].mxu1  ;;  %v10118_v17 = vpop.f32.mrb[193].mxu0 }
 0x367   : > { %v6648_v0 = vadd.f32 %v10001_v62, %v13651_v53  ;;  %v10004_v50 = vadd.f32 %v10003_v43, %v10002_v32  ;;  %v10119_v13 = vadd.f32 %v10118_v17, %v10117_v1  ;;  %v10120_v35 = vpop.f32.mrb[194].mxu0 }
 0x368   : > { %v10121_v44 = vpop.f32.mrb[195].mxu0 }
 0x369   : > { %v6649_v36 = vadd.f32 %v10004_v50, %v13678_v42  ;;  %v10122_v12 = vadd.f32 %v10121_v44, %v10120_v35  ;;  %v14092_v46 = vadd.f32 %v10113_v41, %v6648_v0 }
 0x36b   : > { %v10005_v63 = vpop.f32.mrb[192].mxu1  ;;  %v14094_v45 = vadd.f32 %v10116_v59, %v6649_v36  ;;  %v14416_v36 = vld [vmem:[#allocation16_spill] sm:$0xff] }
 0x36c   : > { %v10006_v22 = vpop.f32.mrb[193].mxu1 }
 0x36d   : > { %v10007_v19 = vadd.f32 %v10006_v22, %v10005_v63  ;;  %v10008_v40 = vpop.f32.mrb[194].mxu1  ;;  %v10123_v18 = vpop.f32.mrb[196].mxu0 }
 0x36e   : > { %v10009_v51 = vpop.f32.mrb[195].mxu1  ;;  %v10124_v58 = vpop.f32.mrb[197].mxu0 }
 0x36f   : > { %v6650_v53 = vadd.f32 %v10007_v19, %v13700_v47  ;;  %v10010_v24 = vadd.f32 %v10009_v51, %v10008_v40  ;;  %v10125_v8 = vadd.f32 %v10124_v58, %v10123_v18  ;;  %v10126_v49 = vpop.f32.mrb[198].mxu0  ;;  %v14417_v40 = vld [vmem:[#allocation18_spill] sm:$0xff] }
 0x370   : > { %v10127_v39 = vpop.f32.mrb[199].mxu0 }
 0x371   : > { %v6651_v42 = vadd.f32 %v10010_v24, %v13716_v7  ;;  %v10128_v2 = vadd.f32 %v10127_v39, %v10126_v49  ;;  %v14098_v31 = vadd.f32 %v10119_v13, %v6650_v53 }
 0x373   : > { %v10011_v26 = vpop.f32.mrb[196].mxu1  ;;  %v14100_v30 = vadd.f32 %v10122_v12, %v6651_v42 }
 0x374   : > { %v10012_v9 = vpop.f32.mrb[197].mxu1 }
 0x375   : > { %v10013_v60 = vadd.f32 %v10012_v9, %v10011_v26  ;;  %v10014_v57 = vpop.f32.mrb[198].mxu1  ;;  %v10129_v29 = vpop.f32.mrb[200].mxu0  ;;  %v14418_v9 = vld [vmem:[#allocation14_spill] sm:$0xff] }
 0x376   : > { %v10015_v41 = vpop.f32.mrb[199].mxu1  ;;  %v10130_v55 = vpop.f32.mrb[201].mxu0 }
 0x377   : > { %v6652_v47 = vadd.f32 %v10013_v60, %v13745_v16  ;;  %v10016_v11 = vadd.f32 %v10015_v41, %v10014_v57  ;;  %v10131_v54 = vadd.f32 %v10130_v55, %v10129_v29  ;;  %v10132_v59 = vpop.f32.mrb[202].mxu0 }
 0x378   : > { %v10133_v20 = vpop.f32.mrb[203].mxu0 }
 0x379   : > { %v6653_v7 = vadd.f32 %v10016_v11, %v14415_v48  ;;  %v10134_v62 = vadd.f32 %v10133_v20, %v10132_v59  ;;  %v14104_v32 = vadd.f32 %v10125_v8, %v6652_v47  ;;  %v14419_v47 = vld [vmem:[#allocation19_spill] sm:$0xff] }
 0x37b   : > { %v10017_v1 = vpop.f32.mrb[200].mxu1  ;;  %v14106_v43 = vadd.f32 %v10128_v2, %v6653_v7 }
 0x37c   : > { %v10018_v17 = vpop.f32.mrb[201].mxu1 }
 0x37d   : > { %v10019_v0 = vadd.f32 %v10018_v17, %v10017_v1  ;;  %v10020_v50 = vpop.f32.mrb[202].mxu1  ;;  %v10135_v13 = vpop.f32.mrb[204].mxu0 }
 0x37e   : > { %v10021_v35 = vpop.f32.mrb[203].mxu1  ;;  %v10136_v44 = vpop.f32.mrb[205].mxu0 }
 0x37f   : > { %v6654_v16 = vadd.f32 %v10019_v0, %v14416_v36  ;;  %v10022_v12 = vadd.f32 %v10021_v35, %v10020_v50  ;;  %v10137_v63 = vadd.f32 %v10136_v44, %v10135_v13  ;;  %v10138_v22 = vpop.f32.mrb[206].mxu0 }
 0x380   : > { %v10139_v19 = vpop.f32.mrb[207].mxu0 }
 0x381   : > { %v6655_v18 = vadd.f32 %v10022_v12, %v14417_v40  ;;  %v10140_v51 = vadd.f32 %v10139_v19, %v10138_v22  ;;  %v14110_v58 = vadd.f32 %v10131_v54, %v6654_v16 }
 0x383   : > { %v10023_v53 = vpop.f32.mrb[204].mxu1  ;;  %v14112_v24 = vadd.f32 %v10134_v62, %v6655_v18 }
 0x384   : > { %v10024_v8 = vpop.f32.mrb[205].mxu1 }
 0x385   : > { %v10025_v49 = vadd.f32 %v10024_v8, %v10023_v53  ;;  %v10026_v39 = vpop.f32.mrb[206].mxu1  ;;  %v10141_v42 = vpop.f32.mrb[208].mxu0 }
 0x386   : > { %v10027_v2 = vpop.f32.mrb[207].mxu1  ;;  %v10142_v26 = vpop.f32.mrb[209].mxu0 }
 0x387   : > { %v6656_v60 = vadd.f32 %v10025_v49, %v14418_v9  ;;  %v10028_v57 = vadd.f32 %v10027_v2, %v10026_v39  ;;  %v10143_v29 = vadd.f32 %v10142_v26, %v10141_v42  ;;  %v10144_v41 = vpop.f32.mrb[210].mxu0 }
 0x388   : > { %v10145_v55 = vpop.f32.mrb[211].mxu0 }
 0x389   : > { %v6657_v11 = vadd.f32 %v10028_v57, %v14419_v47  ;;  %v10146_v59 = vadd.f32 %v10145_v55, %v10144_v41  ;;  %v14116_v54 = vadd.f32 %v10137_v63, %v6656_v60  ;;  %v14420_v60 = vld [vmem:[#allocation20_spill] sm:$0xff] }
 0x38b   : > { %v10029_v20 = vpop.f32.mrb[208].mxu1  ;;  %v14118_v48 = vadd.f32 %v10140_v51, %v6657_v11 }
 0x38c   : > { %v10030_v7 = vpop.f32.mrb[209].mxu1 }
 0x38d   : > { %v10031_v62 = vadd.f32 %v10030_v7, %v10029_v20  ;;  %v10032_v1 = vpop.f32.mrb[210].mxu1  ;;  %v10147_v17 = vpop.f32.mrb[212].mxu0 }
 0x38e   : > { %v10033_v0 = vpop.f32.mrb[211].mxu1  ;;  %v10148_v50 = vpop.f32.mrb[213].mxu0 }
 0x38f   : > { %v6658_v13 = vadd.f32 %v10031_v62, %v13863_v15  ;;  %v10034_v35 = vadd.f32 %v10033_v0, %v10032_v1  ;;  %v10149_v44 = vadd.f32 %v10148_v50, %v10147_v17  ;;  %v10150_v36 = vpop.f32.mrb[214].mxu0  ;;  %v14421_v1 = vld [vmem:[#allocation21_spill] sm:$0xff] }
 0x390   : > { %v10151_v16 = vpop.f32.mrb[215].mxu0 }
 0x391   : > { %v6659_v12 = vadd.f32 %v10034_v35, %v13878_v21  ;;  %v10152_v22 = vadd.f32 %v10151_v16, %v10150_v36  ;;  %v14122_v63 = vadd.f32 %v10143_v29, %v6658_v13  ;;  %v14422_v35 = vld [vmem:[#allocation22_spill] sm:$0xff] }
 0x393   : > { %v10035_v19 = vpop.f32.mrb[212].mxu1  ;;  %v14124_v40 = vadd.f32 %v10146_v59, %v6659_v12 }
 0x394   : > { %v10036_v18 = vpop.f32.mrb[213].mxu1 }
 0x395   : > { %v10037_v51 = vadd.f32 %v10036_v18, %v10035_v19  ;;  %v10038_v53 = vpop.f32.mrb[214].mxu1  ;;  %v10153_v8 = vpop.f32.mrb[216].mxu0 }
 0x396   : > { %v10039_v49 = vpop.f32.mrb[215].mxu1  ;;  %v10154_v39 = vpop.f32.mrb[217].mxu0 }
 0x397   : > { %v6660_v15 = vadd.f32 %v10037_v51, %v13913_v38  ;;  %v10040_v42 = vadd.f32 %v10039_v49, %v10038_v53  ;;  %v10155_v2 = vadd.f32 %v10154_v39, %v10153_v8  ;;  %v10156_v26 = vpop.f32.mrb[218].mxu0 }
 0x398   : > { %v10157_v9 = vpop.f32.mrb[219].mxu0 }
 0x399   : > { %v6661_v21 = vadd.f32 %v10040_v42, %v14420_v60  ;;  %v10158_v57 = vadd.f32 %v10157_v9, %v10156_v26  ;;  %v14128_v29 = vadd.f32 %v10149_v44, %v6660_v15 }
 0x39b   : > { %v10041_v41 = vpop.f32.mrb[216].mxu1  ;;  %v14130_v55 = vadd.f32 %v10152_v22, %v6661_v21 }
 0x39c   : > { %v10042_v47 = vpop.f32.mrb[217].mxu1 }
 0x39d   : > { %v10043_v11 = vadd.f32 %v10042_v47, %v10041_v41  ;;  %v10044_v59 = vpop.f32.mrb[218].mxu1  ;;  %v10159_v20 = vpop.f32.mrb[220].mxu0 }
 0x39e   : > { %v10045_v7 = vpop.f32.mrb[219].mxu1  ;;  %v10160_v62 = vpop.f32.mrb[221].mxu0 }
 0x39f   : > { %v6662_v38 = vadd.f32 %v10043_v11, %v14421_v1  ;;  %v10046_v17 = vadd.f32 %v10045_v7, %v10044_v59  ;;  %v10161_v0 = vadd.f32 %v10160_v62, %v10159_v20  ;;  %v10162_v50 = vpop.f32.mrb[222].mxu0 }
 0x3a0   : > { %v10163_v13 = vpop.f32.mrb[223].mxu0 }
 0x3a1   : > { %v6663_v36 = vadd.f32 %v10046_v17, %v14422_v35  ;;  %v10164_v16 = vadd.f32 %v10163_v13, %v10162_v50  ;;  %v14134_v44 = vadd.f32 %v10155_v2, %v6662_v38 }
 0x3a3   : > { %v10047_v12 = vpop.f32.mrb[220].mxu1  ;;  %v14136_v22 = vadd.f32 %v10158_v57, %v6663_v36 }
 0x3a4   : > { %v10048_v19 = vpop.f32.mrb[221].mxu1 }
 0x3a5   : > { %v10049_v18 = vadd.f32 %v10048_v19, %v10047_v12  ;;  %v10050_v51 = vpop.f32.mrb[222].mxu1  ;;  %v10293_v53 = vpop.f32.mrb[224].mxu0 }
 0x3a6   : > { %v10051_v8 = vpop.f32.mrb[223].mxu1  ;;  %v10294_v49 = vpop.f32.mrb[225].mxu0 }
 0x3a7   : > { %v6664_v39 = vadd.f32 %v10049_v18, %v13978_v14  ;;  %v10052_v15 = vadd.f32 %v10051_v8, %v10050_v51  ;;  %v10295_v42 = vadd.f32 %v10294_v49, %v10293_v53  ;;  %v10296_v26 = vpop.f32.mrb[226].mxu0 }
 0x3a8   : > { %v10297_v9 = vpop.f32.mrb[227].mxu0 }
 0x3a9   : > { %v6665_v60 = vadd.f32 %v10052_v15, %v14002_v27  ;;  %v10298_v2 = vadd.f32 %v10297_v9, %v10296_v26  ;;  %v14140_v21 = vadd.f32 %v10161_v0, %v6664_v39 }
 0x3ab   : > { %v10181_v57 = vpop.f32.mrb[224].mxu1  ;;  %v14142_v41 = vadd.f32 %v10164_v16, %v6665_v60 }
 0x3ac   : > { %v10182_v47 = vpop.f32.mrb[225].mxu1 }
 0x3ad   : > { %v10183_v11 = vadd.f32 %v10182_v47, %v10181_v57  ;;  %v10184_v59 = vpop.f32.mrb[226].mxu1  ;;  %v10299_v20 = vpop.f32.mrb[228].mxu0 }
 0x3ae   : > { %v10185_v7 = vpop.f32.mrb[227].mxu1  ;;  %v10300_v62 = vpop.f32.mrb[229].mxu0 }
 0x3af   : > { %v8029_v14 = vadd.f32 %v10183_v11, %v14022_v23  ;;  %v10186_v1 = vadd.f32 %v10185_v7, %v10184_v59  ;;  %v10301_v38 = vadd.f32 %v10300_v62, %v10299_v20  ;;  %v10302_v17 = vpop.f32.mrb[230].mxu0 }
 0x3b0   : > { %v10303_v50 = vpop.f32.mrb[231].mxu0 }
 0x3b1   : > { %v8654_v27 = vadd.f32 %v10295_v42, %v8029_v14  ;;  %v8030_v0 = vadd.f32 %v10186_v1, %v14024_v28  ;;  %v10304_v13 = vadd.f32 %v10303_v50, %v10302_v17 }
 0x3b3   : > { %8686 = vst [vmem:[%s14147_s25] sm:$0xff] %v8654_v27  ;;  %v8655_v35 = vadd.f32 %v10298_v2, %v8030_v0  ;;  %v10187_v36 = vpop.f32.mrb[228].mxu1 }
 0x3b4   : > { %v10188_v16 = vpop.f32.mrb[229].mxu1 }
 0x3b5   : > { %8687 = vst [vmem:[%s14147_s25 + $0x8] sm:$0xff] %v8655_v35  ;;  %v10189_v12 = vadd.f32 %v10188_v16, %v10187_v36  ;;  %v10190_v23 = vpop.f32.mrb[230].mxu1  ;;  %v10305_v19 = vpop.f32.mrb[232].mxu0 }
 0x3b6   : > { %v10191_v18 = vpop.f32.mrb[231].mxu1  ;;  %v10306_v51 = vpop.f32.mrb[233].mxu0 }
 0x3b7   : > { %v8031_v53 = vadd.f32 %v10189_v12, %v14043_v4  ;;  %v10192_v28 = vadd.f32 %v10191_v18, %v10190_v23  ;;  %v10307_v8 = vadd.f32 %v10306_v51, %v10305_v19  ;;  %v10308_v49 = vpop.f32.mrb[234].mxu0 }
 0x3b8   : > { %v10309_v39 = vpop.f32.mrb[235].mxu0 }
 0x3b9   : > { %v8656_v15 = vadd.f32 %v10301_v38, %v8031_v53  ;;  %v8032_v42 = vadd.f32 %v10192_v28, %v14047_v10  ;;  %v10310_v26 = vadd.f32 %v10309_v39, %v10308_v49 }
 0x3bb   : > { %8688 = vst [vmem:[%s14147_s25 + $0x10] sm:$0xff] %v8656_v15  ;;  %v8657_v9 = vadd.f32 %v10304_v13, %v8032_v42  ;;  %v10193_v60 = vpop.f32.mrb[232].mxu1 }
 0x3bc   : > { %v10194_v2 = vpop.f32.mrb[233].mxu1 }
 0x3bd   : > { %8689 = vst [vmem:[%s14147_s25 + $0x18] sm:$0xff] %v8657_v9  ;;  %v10195_v57 = vadd.f32 %v10194_v2, %v10193_v60  ;;  %v10196_v47 = vpop.f32.mrb[234].mxu1  ;;  %v10311_v11 = vpop.f32.mrb[236].mxu0 }
 0x3be   : > { %v10197_v59 = vpop.f32.mrb[235].mxu1  ;;  %v10312_v4 = vpop.f32.mrb[237].mxu0 }
 0x3bf   : > { %v8033_v20 = vadd.f32 %v10195_v57, %v14058_v34  ;;  %v10198_v7 = vadd.f32 %v10197_v59, %v10196_v47  ;;  %v10313_v62 = vadd.f32 %v10312_v4, %v10311_v11  ;;  %v10314_v14 = vpop.f32.mrb[238].mxu0 }
 0x3c0   : > { %v10315_v1 = vpop.f32.mrb[239].mxu0 }
 0x3c1   : > { %v8658_v10 = vadd.f32 %v10307_v8, %v8033_v20  ;;  %v8034_v38 = vadd.f32 %v10198_v7, %v14064_v61  ;;  %v10316_v17 = vadd.f32 %v10315_v1, %v10314_v14 }
 0x3c3   : > { %8690 = vst [vmem:[%s14147_s25 + $0x20] sm:$0xff] %v8658_v10  ;;  %v8659_v50 = vadd.f32 %v10310_v26, %v8034_v38  ;;  %v10199_v27 = vpop.f32.mrb[236].mxu1 }
 0x3c4   : > { %v10200_v0 = vpop.f32.mrb[237].mxu1 }
 0x3c5   : > { %8691 = vst [vmem:[%s14147_s25 + $0x28] sm:$0xff] %v8659_v50  ;;  %v10201_v13 = vadd.f32 %v10200_v0, %v10199_v27  ;;  %v10202_v35 = vpop.f32.mrb[238].mxu1  ;;  %v10317_v36 = vpop.f32.mrb[240].mxu0 }
 0x3c6   : > { %v10203_v16 = vpop.f32.mrb[239].mxu1  ;;  %v10318_v34 = vpop.f32.mrb[241].mxu0 }
 0x3c7   : > { %v8035_v12 = vadd.f32 %v10201_v13, %v14068_v56  ;;  %v10204_v23 = vadd.f32 %v10203_v16, %v10202_v35  ;;  %v10319_v19 = vadd.f32 %v10318_v34, %v10317_v36  ;;  %v10320_v18 = vpop.f32.mrb[242].mxu0 }
 0x3c8   : > { %v10321_v51 = vpop.f32.mrb[243].mxu0 }
 0x3c9   : > { %v8660_v61 = vadd.f32 %v10313_v62, %v8035_v12  ;;  %v8036_v53 = vadd.f32 %v10204_v23, %v14070_v37  ;;  %v10322_v28 = vadd.f32 %v10321_v51, %v10320_v18 }
 0x3cb   : > { %8692 = vst [vmem:[%s14147_s25 + $0x30] sm:$0xff] %v8660_v61  ;;  %v8661_v8 = vadd.f32 %v10316_v17, %v8036_v53  ;;  %v10205_v49 = vpop.f32.mrb[240].mxu1 }
 0x3cc   : > { %v10206_v39 = vpop.f32.mrb[241].mxu1 }
 0x3cd   : > { %8693 = vst [vmem:[%s14147_s25 + $0x38] sm:$0xff] %v8661_v8  ;;  %v10207_v15 = vadd.f32 %v10206_v39, %v10205_v49  ;;  %v10208_v42 = vpop.f32.mrb[242].mxu1  ;;  %v10323_v26 = vpop.f32.mrb[244].mxu0 }
 0x3ce   : > { %v10209_v9 = vpop.f32.mrb[243].mxu1  ;;  %v10324_v56 = vpop.f32.mrb[245].mxu0 }
 0x3cf   : > { %v8037_v60 = vadd.f32 %v10207_v15, %v14074_v5  ;;  %v10210_v2 = vadd.f32 %v10209_v9, %v10208_v42  ;;  %v10325_v57 = vadd.f32 %v10324_v56, %v10323_v26  ;;  %v10326_v47 = vpop.f32.mrb[246].mxu0 }
 0x3d0   : > { %v10327_v11 = vpop.f32.mrb[247].mxu0 }
 0x3d1   : > { %v8662_v37 = vadd.f32 %v10319_v19, %v8037_v60  ;;  %v8038_v59 = vadd.f32 %v10210_v2, %v14076_v3  ;;  %v10328_v4 = vadd.f32 %v10327_v11, %v10326_v47 }
 0x3d3   : > { %8694 = vst [vmem:[%s14147_s25 + $0x40] sm:$0xff] %v8662_v37  ;;  %v8663_v20 = vadd.f32 %v10322_v28, %v8038_v59  ;;  %v10211_v7 = vpop.f32.mrb[244].mxu1 }
 0x3d4   : > { %v10212_v62 = vpop.f32.mrb[245].mxu1 }
 0x3d5   : > { %8695 = vst [vmem:[%s14147_s25 + $0x48] sm:$0xff] %v8663_v20  ;;  %v10213_v14 = vadd.f32 %v10212_v62, %v10211_v7  ;;  %v10214_v1 = vpop.f32.mrb[246].mxu1  ;;  %v10329_v10 = vpop.f32.mrb[248].mxu0 }
 0x3d6   : > { %v10215_v38 = vpop.f32.mrb[247].mxu1  ;;  %v10330_v5 = vpop.f32.mrb[249].mxu0 }
 0x3d7   : > { %v8039_v17 = vadd.f32 %v10213_v14, %v14080_v52  ;;  %v10216_v50 = vadd.f32 %v10215_v38, %v10214_v1  ;;  %v10331_v27 = vadd.f32 %v10330_v5, %v10329_v10  ;;  %v10332_v0 = vpop.f32.mrb[250].mxu0 }
 0x3d8   : > { %v10333_v13 = vpop.f32.mrb[251].mxu0 }
 0x3d9   : > { %v8664_v3 = vadd.f32 %v10325_v57, %v8039_v17  ;;  %v8040_v35 = vadd.f32 %v10216_v50, %v14082_v25  ;;  %v10334_v36 = vadd.f32 %v10333_v13, %v10332_v0 }
 0x3db   : > { %8696 = vst [vmem:[%s14147_s25 + $0x50] sm:$0xff] %v8664_v3  ;;  %v8665_v16 = vadd.f32 %v10328_v4, %v8040_v35  ;;  %v10217_v34 = vpop.f32.mrb[248].mxu1 }
 0x3dc   : > { %v10218_v12 = vpop.f32.mrb[249].mxu1 }
 0x3dd   : > { %8697 = vst [vmem:[%s14147_s25 + $0x58] sm:$0xff] %v8665_v16  ;;  %v10219_v23 = vadd.f32 %v10218_v12, %v10217_v34  ;;  %v10220_v19 = vpop.f32.mrb[250].mxu1  ;;  %v10335_v18 = vpop.f32.mrb[252].mxu0 }
 0x3de   : > { %v10221_v51 = vpop.f32.mrb[251].mxu1  ;;  %v10336_v52 = vpop.f32.mrb[253].mxu0 }
 0x3df   : > { %v8041_v61 = vadd.f32 %v10219_v23, %v14086_v33  ;;  %v10222_v53 = vadd.f32 %v10221_v51, %v10220_v19  ;;  %v10337_v28 = vadd.f32 %v10336_v52, %v10335_v18  ;;  %v10338_v8 = vpop.f32.mrb[254].mxu0 }
 0x3e0   : > { %v10339_v49 = vpop.f32.mrb[255].mxu0 }
 0x3e1   : > { %v8666_v25 = vadd.f32 %v10331_v27, %v8041_v61  ;;  %v8042_v39 = vadd.f32 %v10222_v53, %v14088_v6  ;;  %v10340_v15 = vadd.f32 %v10339_v49, %v10338_v8 }
 0x3e3   : > { %8698 = vst [vmem:[%s14147_s25 + $0x60] sm:$0xff] %v8666_v25  ;;  %v8667_v42 = vadd.f32 %v10334_v36, %v8042_v39  ;;  %v10223_v26 = vpop.f32.mrb[252].mxu1 }
 0x3e4   : > { %v10224_v9 = vpop.f32.mrb[253].mxu1 }
 0x3e5   : > { %8699 = vst [vmem:[%s14147_s25 + $0x68] sm:$0xff] %v8667_v42  ;;  %v10225_v56 = vadd.f32 %v10224_v9, %v10223_v26  ;;  %v10226_v60 = vpop.f32.mrb[254].mxu1  ;;  %v10341_v2 = vpop.f32.mrb[0].mxu0 }
 0x3e6   : > { %v10227_v57 = vpop.f32.mrb[255].mxu1  ;;  %v10342_v33 = vpop.f32.mrb[1].mxu0 }
 0x3e7   : > { %v8043_v47 = vadd.f32 %v10225_v56, %v14092_v46  ;;  %v10228_v11 = vadd.f32 %v10227_v57, %v10226_v60  ;;  %v10343_v37 = vadd.f32 %v10342_v33, %v10341_v2  ;;  %v10344_v59 = vpop.f32.mrb[2].mxu0 }
 0x3e8   : > { %v10345_v4 = vpop.f32.mrb[3].mxu0 }
 0x3e9   : > { %v8668_v6 = vadd.f32 %v10337_v28, %v8043_v47  ;;  %v8044_v20 = vadd.f32 %v10228_v11, %v14094_v45  ;;  %v10346_v7 = vadd.f32 %v10345_v4, %v10344_v59 }
 0x3eb   : > { %8700 = vst [vmem:[%s14147_s25 + $0x70] sm:$0xff] %v8668_v6  ;;  %v8669_v62 = vadd.f32 %v10340_v15, %v8044_v20  ;;  %v10229_v14 = vpop.f32.mrb[0].mxu1 }
 0x3ec   : > { %v10230_v1 = vpop.f32.mrb[1].mxu1 }
 0x3ed   : > { %8701 = vst [vmem:[%s14147_s25 + $0x78] sm:$0xff] %v8669_v62  ;;  %v10231_v10 = vadd.f32 %v10230_v1, %v10229_v14  ;;  %v10232_v38 = vpop.f32.mrb[2].mxu1  ;;  %v10347_v5 = vpop.f32.mrb[4].mxu0 }
 0x3ee   : > { %v10233_v17 = vpop.f32.mrb[3].mxu1  ;;  %v10348_v46 = vpop.f32.mrb[5].mxu0 }
 0x3ef   : > { %v8045_v50 = vadd.f32 %v10231_v10, %v14098_v31  ;;  %v10234_v27 = vadd.f32 %v10233_v17, %v10232_v38  ;;  %v10349_v0 = vadd.f32 %v10348_v46, %v10347_v5  ;;  %v10350_v13 = vpop.f32.mrb[6].mxu0 }
 0x3f0   : > { %v10351_v3 = vpop.f32.mrb[7].mxu0 }
 0x3f1   : > { %v8670_v45 = vadd.f32 %v10343_v37, %v8045_v50  ;;  %v8046_v35 = vadd.f32 %v10234_v27, %v14100_v30  ;;  %v10352_v36 = vadd.f32 %v10351_v3, %v10350_v13 }
 0x3f3   : > { %8702 = vst [vmem:[%s14147_s25 + $0x80] sm:$0xff] %v8670_v45  ;;  %v8671_v16 = vadd.f32 %v10346_v7, %v8046_v35  ;;  %v10235_v34 = vpop.f32.mrb[4].mxu1 }
 0x3f4   : > { %v10236_v12 = vpop.f32.mrb[5].mxu1 }
 0x3f5   : > { %8703 = vst [vmem:[%s14147_s25 + $0x88] sm:$0xff] %v8671_v16  ;;  %v10237_v23 = vadd.f32 %v10236_v12, %v10235_v34  ;;  %v10238_v19 = vpop.f32.mrb[6].mxu1  ;;  %v10353_v18 = vpop.f32.mrb[8].mxu0 }
 0x3f6   : > { %v10239_v51 = vpop.f32.mrb[7].mxu1  ;;  %v10354_v31 = vpop.f32.mrb[9].mxu0 }
 0x3f7   : > { %v8047_v52 = vadd.f32 %v10237_v23, %v14104_v32  ;;  %v10240_v61 = vadd.f32 %v10239_v51, %v10238_v19  ;;  %v10355_v53 = vadd.f32 %v10354_v31, %v10353_v18  ;;  %v10356_v28 = vpop.f32.mrb[10].mxu0 }
 0x3f8   : > { %v10357_v8 = vpop.f32.mrb[11].mxu0 }
 0x3f9   : > { %v8672_v30 = vadd.f32 %v10349_v0, %v8047_v52  ;;  %v8048_v49 = vadd.f32 %v10240_v61, %v14106_v43  ;;  %v10358_v25 = vadd.f32 %v10357_v8, %v10356_v28 }
 0x3fb   : > { %8704 = vst [vmem:[%s14147_s25 + $0x90] sm:$0xff] %v8672_v30  ;;  %v8673_v39 = vadd.f32 %v10352_v36, %v8048_v49  ;;  %v10241_v15 = vpop.f32.mrb[8].mxu1 }
 0x3fc   : > { %v10242_v42 = vpop.f32.mrb[9].mxu1 }
 0x3fd   : > { %8705 = vst [vmem:[%s14147_s25 + $0x98] sm:$0xff] %v8673_v39  ;;  %v10243_v26 = vadd.f32 %v10242_v42, %v10241_v15  ;;  %v10244_v9 = vpop.f32.mrb[10].mxu1  ;;  %v10359_v56 = vpop.f32.mrb[12].mxu0 }
 0x3fe   : > { %v10245_v60 = vpop.f32.mrb[11].mxu1  ;;  %v10360_v32 = vpop.f32.mrb[13].mxu0 }
 0x3ff   : > { %v8049_v2 = vadd.f32 %v10243_v26, %v14110_v58  ;;  %v10246_v57 = vadd.f32 %v10245_v60, %v10244_v9  ;;  %v10361_v33 = vadd.f32 %v10360_v32, %v10359_v56  ;;  %v10362_v47 = vpop.f32.mrb[14].mxu0 }
 0x400   : > { %v10363_v11 = vpop.f32.mrb[15].mxu0 }
 0x401   : > { %v8674_v43 = vadd.f32 %v10355_v53, %v8049_v2  ;;  %v8050_v37 = vadd.f32 %v10246_v57, %v14112_v24  ;;  %v10364_v59 = vadd.f32 %v10363_v11, %v10362_v47 }
 0x403   : > { %8706 = vst [vmem:[%s14147_s25 + $0xa0] sm:$0xff] %v8674_v43  ;;  %v8675_v4 = vadd.f32 %v10358_v25, %v8050_v37  ;;  %v10247_v6 = vpop.f32.mrb[12].mxu1 }
 0x404   : > { %v10248_v20 = vpop.f32.mrb[13].mxu1 }
 0x405   : > { %8707 = vst [vmem:[%s14147_s25 + $0xa8] sm:$0xff] %v8675_v4  ;;  %v10249_v7 = vadd.f32 %v10248_v20, %v10247_v6  ;;  %v10250_v62 = vpop.f32.mrb[14].mxu1  ;;  %v10365_v14 = vpop.f32.mrb[16].mxu0 }
 0x406   : > { %v10251_v1 = vpop.f32.mrb[15].mxu1  ;;  %v10366_v58 = vpop.f32.mrb[17].mxu0 }
 0x407   : > { %v8051_v10 = vadd.f32 %v10249_v7, %v14116_v54  ;;  %v10252_v38 = vadd.f32 %v10251_v1, %v10250_v62  ;;  %v10367_v5 = vadd.f32 %v10366_v58, %v10365_v14  ;;  %v10368_v17 = vpop.f32.mrb[18].mxu0 }
 0x408   : > { %v10369_v46 = vpop.f32.mrb[19].mxu0 }
 0x409   : > { %v8676_v24 = vadd.f32 %v10361_v33, %v8051_v10  ;;  %v8052_v50 = vadd.f32 %v10252_v38, %v14118_v48  ;;  %v10370_v27 = vadd.f32 %v10369_v46, %v10368_v17 }
 0x40b   : > { %8708 = vst [vmem:[%s14147_s25 + $0xb0] sm:$0xff] %v8676_v24  ;;  %v8677_v0 = vadd.f32 %v10364_v59, %v8052_v50  ;;  %v10253_v13 = vpop.f32.mrb[16].mxu1 }
 0x40c   : > { %v10254_v3 = vpop.f32.mrb[17].mxu1 }
 0x40d   : > { %8709 = vst [vmem:[%s14147_s25 + $0xb8] sm:$0xff] %v8677_v0  ;;  %v10255_v45 = vadd.f32 %v10254_v3, %v10253_v13  ;;  %v10256_v35 = vpop.f32.mrb[18].mxu1  ;;  %v10371_v36 = vpop.f32.mrb[20].mxu0 }
 0x40e   : > { %v10257_v16 = vpop.f32.mrb[19].mxu1  ;;  %v10372_v54 = vpop.f32.mrb[21].mxu0 }
 0x40f   : > { %v8053_v34 = vadd.f32 %v10255_v45, %v14122_v63  ;;  %v10258_v12 = vadd.f32 %v10257_v16, %v10256_v35  ;;  %v10373_v23 = vadd.f32 %v10372_v54, %v10371_v36  ;;  %v10374_v19 = vpop.f32.mrb[22].mxu0 }
 0x410   : > { %v10375_v18 = vpop.f32.mrb[23].mxu0 }
 0x411   : > { %v8678_v48 = vadd.f32 %v10367_v5, %v8053_v34  ;;  %v8054_v51 = vadd.f32 %v10258_v12, %v14124_v40  ;;  %v10376_v31 = vadd.f32 %v10375_v18, %v10374_v19 }
 0x413   : > { %8710 = vst [vmem:[%s14147_s25 + $0xc0] sm:$0xff] %v8678_v48  ;;  %v8679_v52 = vadd.f32 %v10370_v27, %v8054_v51  ;;  %v10259_v61 = vpop.f32.mrb[20].mxu1 }
 0x414   : > { %v10260_v53 = vpop.f32.mrb[21].mxu1 }
 0x415   : > { %8711 = vst [vmem:[%s14147_s25 + $0xc8] sm:$0xff] %v8679_v52  ;;  %v10261_v28 = vadd.f32 %v10260_v53, %v10259_v61  ;;  %v10262_v8 = vpop.f32.mrb[22].mxu1  ;;  %v10377_v30 = vpop.f32.mrb[24].mxu0 }
 0x416   : > { %v10263_v49 = vpop.f32.mrb[23].mxu1  ;;  %v10378_v63 = vpop.f32.mrb[25].mxu0 }
 0x417   : > { %v8055_v25 = vadd.f32 %v10261_v28, %v14128_v29  ;;  %v10264_v39 = vadd.f32 %v10263_v49, %v10262_v8  ;;  %v10379_v15 = vadd.f32 %v10378_v63, %v10377_v30  ;;  %v10380_v42 = vpop.f32.mrb[26].mxu0 }
 0x418   : > { %v10381_v26 = vpop.f32.mrb[27].mxu0 }
 0x419   : > { %v8680_v40 = vadd.f32 %v10373_v23, %v8055_v25  ;;  %v8056_v9 = vadd.f32 %v10264_v39, %v14130_v55  ;;  %v10382_v56 = vadd.f32 %v10381_v26, %v10380_v42 }
 0x41b   : > { %8712 = vst [vmem:[%s14147_s25 + $0xd0] sm:$0xff] %v8680_v40  ;;  %v8681_v60 = vadd.f32 %v10376_v31, %v8056_v9  ;;  %v10265_v32 = vpop.f32.mrb[24].mxu1 }
 0x41c   : > { %v10266_v2 = vpop.f32.mrb[25].mxu1 }
 0x41d   : > { %8713 = vst [vmem:[%s14147_s25 + $0xd8] sm:$0xff] %v8681_v60  ;;  %v10267_v57 = vadd.f32 %v10266_v2, %v10265_v32  ;;  %v10268_v33 = vpop.f32.mrb[26].mxu1  ;;  %v10383_v47 = vpop.f32.mrb[28].mxu0 }
 0x41e   : > { %v10269_v11 = vpop.f32.mrb[27].mxu1  ;;  %v10384_v29 = vpop.f32.mrb[29].mxu0 }
 0x41f   : > { %v8057_v43 = vadd.f32 %v10267_v57, %v14134_v44  ;;  %v10270_v37 = vadd.f32 %v10269_v11, %v10268_v33  ;;  %v10385_v59 = vadd.f32 %v10384_v29, %v10383_v47  ;;  %v10386_v4 = vpop.f32.mrb[30].mxu0 }
 0x420   : > { %v10387_v55 = vpop.f32.mrb[31].mxu0 }
 0x421   : > { %v8682_v6 = vadd.f32 %v10379_v15, %v8057_v43  ;;  %v8058_v20 = vadd.f32 %v10270_v37, %v14136_v22  ;;  %v10388_v7 = vadd.f32 %v10387_v55, %v10386_v4 }
 0x423   : > { %8714 = vst [vmem:[%s14147_s25 + $0xe0] sm:$0xff] %v8682_v6  ;;  %v8683_v62 = vadd.f32 %v10382_v56, %v8058_v20  ;;  %v10271_v14 = vpop.f32.mrb[28].mxu1 }
 0x424   : > { %v10272_v1 = vpop.f32.mrb[29].mxu1 }
 0x425   : > { %8715 = vst [vmem:[%s14147_s25 + $0xe8] sm:$0xff] %v8683_v62  ;;  %v10273_v58 = vadd.f32 %v10272_v1, %v10271_v14  ;;  %v10274_v44 = vpop.f32.mrb[30].mxu1 }
 0x426   : > { %v10275_v10 = vpop.f32.mrb[31].mxu1 }
 0x427   : > { %v8059_v38 = vadd.f32 %v10273_v58, %v14140_v21  ;;  %v10276_v5 = vadd.f32 %v10275_v10, %v10274_v44 }
 0x429   : > { %v8684_v17 = vadd.f32 %v10385_v59, %v8059_v38  ;;  %v8060_v22 = vadd.f32 %v10276_v5, %v14142_v41 }
 0x42b   : > { %8716 = vst [vmem:[%s14147_s25 + $0xf0] sm:$0xff] %v8684_v17  ;;  %v8685_v46 = vadd.f32 %v10388_v7, %v8060_v22 }
 0x42d   : > { %8717 = vst [vmem:[%s14147_s25 + $0xf8] sm:$0xff] %v8685_v46 }
 0x42e   : > { %10872 = shalt.err (!%p10869_p6)
}
 0x42f   : > { %s10873_s29 = scalar_lea.hbm %s14214_s14, 4096  ;;  %s10877_s12 = scalar_lea.hbm %s14266_s4, 8192 }
 0x430   : > { %p10874_p8 = scmp.ne.s32.totalorder %s14214_s14, %s10873_s29  ;;  %p10878_p4 = scmp.lt.u32.totalorder %s14214_s14, %s14266_s4 }
 0x431   : > { %p10879_p11 = scmp.lt.u32.totalorder %s10877_s12, %s10873_s29  ;;  %p10881_p3 = scmp.lt.u32.totalorder %s10873_s29, %s14214_s14 }
 0x432   : > { %p10875_p10 = pnand %p10874_p8, %p11065_p12 }
 0x433   : > { %p10880_p13 = por %p10879_p11, %p10878_p4 }
 0x434   : > { %p10876_p0 = pneg %p10875_p10 }
 0x435   : > { %p10882_p7 = por %p10881_p3, %p10880_p13 }
 0x437   : > { %p10883_p9 = pnand %p10882_p7, %p10876_p0 }
 0x439   : > { %10886 = shalt.err (!%p10883_p9)
}
 0x43a   : > { %s10944_s9 = smov 128   ;;  %s10945_s20 = smov 8  }
 0x43b   : > { %10413 = dma.vmem_to_hbm [thread:$0]  (%p11065_p12), %s14216_s11, 4096, %s14214_s14, %s8719_s7, %s10944_s9, %s10944_s9, %s10945_s20  }
 0x43c PF: > { %s8747_s25 = sand.u32 1, %s10921_s15   ;;  %p14423_p1 = scmp.ne.s32.totalorder %s14276_s22, 0 }
 0x43d   : > { %p14424_p5 = scmp.ge.s32.totalorder %s10933_s18, 2  ;;  %s8748_s8 = scalar_lea.sflag [#allocation5], %s8747_s25 }
 0x43f   : > { %p10427_p2 = pnand %p14424_p5, %p14423_p1 }
 0x441   : > { %10916 = dma.done.wait (!%p10427_p2), %s8748_s8, 4096  }
 0x442   : > { %10918 = vsyncadd (!%p10427_p2), %s8748_s8, 4294963200  ;;  %p20_p6 = scmp.ge.s32.totalorder %s11027_s27, 4   ;;  %s14425_s15 = smov %s10925_s16 }
 0x443   : > { %s14426_s16 = smov %s10929_s17  ;;  %s14427_s17 = smov %s11061_s24 }
 0x444   : > { %s14428_s18 = smov %s11027_s27  ;;  %22 = sbr.rel (!%p20_p6) target bundleno = 10 (0xa), region = 101 }
 0x44b   :  { %8753 = vsyncpa [#allocation4], 1 }
 0x44c   :  { %8755 = vsyncpa [#allocation4 + $0x1], 1 }
 0x44d   :  { %8756 = vsyncpa [#allocation7], 1 }
 0x44e   :  { %8758 = vsyncpa [#allocation7 + $0x1], 1 }
 0x44f   :  { %8759 = vsyncpa [#allocation5], 1 }
 0x450   :  { %8761 = vsyncpa [#allocation5 + $0x1], 1 }

</bundles_post_ra>
